<compile_context>
chip_gen: v6e
topology: v6e:2x2x1
jax: 0.10.0
libtpu: 0.0.40
codegen_flags: <defaults>
</compile_context>

<pallas_src>
import jax
import jax.numpy as jnp
from jax import lax
from jax.experimental import pallas as pl
from jax.experimental.pallas import tpu as pltpu

HIDDEN = 128  # torch.nn.LSTM(hidden_size=128)


def lstm_emo_kernel(gx0_ref, whh0_ref, whh1_ref, wih1_ref, b1_ref,
                    wfc_ref, bfc_ref, out_ref, st_ref):
    """One (batch block, time chunk) grid step of the 2-layer LSTM + FC head.

    gx0_ref : (Tc, bb, 4H)      precomputed x @ w_ih0 + b0, time-major
    whh0_ref: (H, 4H)           layer-0 recurrent weight (matmul dtype)
    whh1_ref: (H, 4H)           layer-1 recurrent weight (matmul dtype)
    wih1_ref: (H, 4H)           layer-1 input weight (matmul dtype)
    b1_ref  : (1, 4H)  f32      folded layer-1 bias
    wfc_ref : (H, Cp)  f32      lane-dense (zero-padded) FC weight
    bfc_ref : (1, Cp)  f32
    out_ref : (bb, Cp) f32
    st_ref  : (bb, 4H) f32      [h1 | h2 | c1 | c2], persists across time chunks
    """
    H = HIDDEN
    Tc = gx0_ref.shape[0]
    bb = out_ref.shape[0]
    k = pl.program_id(1)

    # Zero state at the first time chunk of each batch block (PyTorch default
    # h0/c0 == 0 when omitted).
    @pl.when(k == 0)
    def _():
        st_ref[...] = jnp.zeros_like(st_ref)

    # Recurrence state lives in vregs (fori_loop carries), not VMEM scratch.
    h1 = st_ref[:, 0 * H:1 * H]
    h2 = st_ref[:, 1 * H:2 * H]
    c1 = st_ref[:, 2 * H:3 * H]
    c2 = st_ref[:, 3 * H:4 * H]

    w_hh0 = whh0_ref[...]
    w_hh1 = whh1_ref[...]
    w_ih1 = wih1_ref[...]
    mm = w_hh0.dtype  # MXU operand dtype (f32 or bf16); accumulation is f32.
    if mm == jnp.float32:
        cast = lambda v: v          # no per-step casts on the f32 (v5e) path
    else:
        cast = lambda v: v.astype(mm)

    # Hoist the (1,4H)->(bb,4H) bias broadcast out of the time loop
    # (JAX does not CSE broadcast_in_dim).
    b1b = jnp.broadcast_to(b1_ref[...], (bb, 4 * H))

    def gates_to_hc(gates, c_old):
        # PyTorch gate order (i, f, g, o); elementwise math kept in f32.
        i = jax.nn.sigmoid(gates[:, 0:H])
        f = jax.nn.sigmoid(gates[:, H:2 * H])
        g = jnp.tanh(gates[:, 2 * H:3 * H])
        o = jax.nn.sigmoid(gates[:, 3 * H:4 * H])
        c_new = f * c_old + i * g
        h_new = o * jnp.tanh(c_new)
        return h_new, c_new

    def body(t, carry):
        h1, h2, c1, c2 = carry
        # Both recurrent matmuls depend only on step t-1 state, so the
        # h2-path matmul overlaps with layer-0 gate (EUP) work; with the
        # unrolled loop, step t+1's rec1 also overlaps step t's layer-1 gates.
        rec1 = jnp.dot(cast(h1), w_hh0, preferred_element_type=jnp.float32)
        rec2 = jnp.dot(cast(h2), w_hh1, preferred_element_type=jnp.float32)

        # layer 0: input projection hoisted into gx0 (wrapper-side matmul)
        g0 = gx0_ref[t].astype(jnp.float32) + rec1
        h1n, c1n = gates_to_hc(g0, c1)

        # layer 1: only the h1_t-dependent matmul sits after the layer-0 gates
        g1 = jnp.dot(cast(h1n), w_ih1,
                     preferred_element_type=jnp.float32) + rec2 + b1b
        h2n, c2n = gates_to_hc(g1, c2)
        return h1n, h2n, c1n, c2n

    # Unroll so adjacent-step MXU / EUP / VPU work can overlap.
    unroll = True if Tc <= 32 else 8
    h1, h2, c1, c2 = lax.fori_loop(0, Tc, body, (h1, h2, c1, c2),
                                   unroll=unroll)

    # Persist state across time-chunk grid steps (lane-aligned slice stores).
    st_ref[:, 0 * H:1 * H] = h1
    st_ref[:, 1 * H:2 * H] = h2
    st_ref[:, 2 * H:3 * H] = c1
    st_ref[:, 3 * H:4 * H] = c2

    # dropout(0.5) is identity in eval mode; fc on the last layer's final h.
    @pl.when(k == pl.num_programs(1) - 1)
    def _():
        out_ref[...] = (jnp.dot(h2, wfc_ref[...],
                                preferred_element_type=jnp.float32)
                        + bfc_ref[...])


def _largest_divisor(n, cap, multiple_of=1):
    """Largest divisor of n that is <= cap and a multiple of `multiple_of`."""
    best = None
    for d in range(1, min(n, cap) + 1):
        if n % d == 0 and d % multiple_of == 0:
            best = d
    return n if best is None else best


def lstm_emo_forward(x, params, *, matmul_dtype=jnp.float32,
                     gx0_dtype=jnp.float32, batch_block=None, time_block=None):
    """x: (batch, seq, input_size) f32 -> (batch, num_classes) f32.

    matmul_dtype: MXU operand dtype for the recurrent weights (keep f32 on v5e
      and for small batch; bf16 pays off on v6e/v7x with batch blocks >= 128).
    gx0_dtype: storage dtype of the hoisted input projection (bf16 halves its
      HBM/VMEM footprint; recommended on v7x).
    batch_block: per-grid-step batch rows (multiple of 8). On v7x pick it so
      that padded_batch / batch_block >= 2 to use both TensorCores.
    time_block: timesteps per grid step (must divide seq). Default: largest
      chunk that fits the VMEM budget.
    """
    B, T, D = x.shape
    H = HIDDEN
    C = params["w_fc"].shape[1]
    Cp = 128 * pl.cdiv(C, 128)  # lane-dense head (unmasked full-lane store)

    # --- pad batch to a multiple of 8: full f32 sublanes / MXU-M occupancy ---
    Bp = 8 * pl.cdiv(B, 8)
    if Bp != B:
        x = jnp.pad(x, ((0, Bp - B), (0, 0), (0, 0)))

    # Hoisted layer-0 input projection: ONE big matmul over all timesteps,
    # emitted time-major so the kernel indexes gx0[t] on the leading dim.
    gx0 = (jnp.einsum('btd,dg->tbg', x, params["w_ih0"]) + params["b0"]
           ).astype(gx0_dtype)

    # Recurrent / layer-1 weights in the MXU operand dtype (f32 accumulate).
    w_hh0 = params["w_hh0"].astype(matmul_dtype)
    w_hh1 = params["w_hh1"].astype(matmul_dtype)
    w_ih1 = params["w_ih1"].astype(matmul_dtype)

    # Pad FC head to a full 128-lane slab; slice back after the kernel.
    w_fc = jnp.zeros((H, Cp), jnp.float32).at[:, :C].set(params["w_fc"])
    b_fc = jnp.zeros((1, Cp), jnp.float32).at[:, :C].set(params["b_fc"])

    # --- batch block: fill sublanes / MXU M; "parallel" axis for megacore ---
    if batch_block is None:
        bb = Bp if Bp <= 256 else _largest_divisor(Bp, 256, 8)
    else:
        bb = batch_block
    assert Bp % bb == 0 and (bb == Bp or bb % 8 == 0), "invalid batch_block"
    nb = Bp // bb

    # --- VMEM budgeting (per-chip) and time chunking ----------------------
    try:
        vmem_cap = int(pltpu.get_tpu_info().vmem_capacity_bytes)
    except Exception:
        vmem_cap = 64 << 20  # conservative fallback (v7x per-TC VMEM)
    vmem_budget = (vmem_cap * 3) // 4  # leave headroom for internal scratch

    gx0_isz = jnp.dtype(gx0_dtype).itemsize
    mm_isz = jnp.dtype(matmul_dtype).itemsize
    w_bytes = 3 * H * 4 * H * mm_isz + 4 * H * 4 + (H + 1) * Cp * 4
    out_bytes = bb * Cp * 4
    st_bytes = bb * 4 * H * 4
    per_t_bytes = bb * 4 * H * gx0_isz
    fixed = 2 * (w_bytes + out_bytes) + st_bytes + (1 << 20)
    gx0_budget = max(vmem_budget - fixed, per_t_bytes) // 2  # double-buffered

    if time_block is None:
        Tc = _largest_divisor(T, max(1, gx0_budget // per_t_bytes), 1)
    else:
        Tc = time_block
    assert T % Tc == 0, "time_block must divide seq length"
    nt = T // Tc

    vmem_est = fixed + 2 * Tc * per_t_bytes
    vmem_limit = min(max(vmem_est, 16 << 20), vmem_budget)
    if vmem_limit < vmem_est:          # never clamp below the actual estimate
        vmem_limit = vmem_est
    vmem_limit = int(vmem_limit)

    # Advisory cost estimate.
    flops = T * Bp * (3 * 2 * H * 4 * H) + 2 * Bp * H * Cp
    transcendentals = 10 * T * Bp * H
    bytes_accessed = T * Bp * 4 * H * gx0_isz + w_bytes + Bp * Cp * 4

    out_p = pl.pallas_call(
        lstm_emo_kernel,
        out_shape=jax.ShapeDtypeStruct((Bp, Cp), jnp.float32),
        grid=(nb, nt),
        in_specs=[
            pl.BlockSpec((Tc, bb, 4 * H), lambda i, k: (k, i, 0)),   # gx0
            pl.BlockSpec((H, 4 * H), lambda i, k: (0, 0)),           # w_hh0
            pl.BlockSpec((H, 4 * H), lambda i, k: (0, 0)),           # w_hh1
            pl.BlockSpec((H, 4 * H), lambda i, k: (0, 0)),           # w_ih1
            pl.BlockSpec((1, 4 * H), lambda i, k: (0, 0)),           # b1
            pl.BlockSpec((H, Cp), lambda i, k: (0, 0)),              # w_fc
            pl.BlockSpec((1, Cp), lambda i, k: (0, 0)),              # b_fc
        ],
        out_specs=pl.BlockSpec((bb, Cp), lambda i, k: (i, 0)),
        scratch_shapes=[
            pltpu.VMEM((bb, 4 * H), jnp.float32),  # [h1|h2|c1|c2] across chunks
        ],
        compiler_params=pltpu.CompilerParams(
            dimension_semantics=("parallel", "arbitrary"),
            vmem_limit_bytes=vmem_limit),
        cost_estimate=pl.CostEstimate(
            flops=int(flops), transcendentals=int(transcendentals),
            bytes_accessed=int(bytes_accessed)),
    )(gx0, w_hh0, w_hh1, w_ih1, params["b1"], w_fc, b_fc)

    return out_p[:B, :C]


def init_params(key, input_size, num_classes):
    """Deterministic synthetic params, PyTorch-style U(-1/sqrt(H), 1/sqrt(H)).

    NOTE: when converting real PyTorch weights, matrices must be transposed to
    the x @ W layout and b0/b1 must be the sum b_ih + b_hh per layer.
    """
    k = 1.0 / jnp.sqrt(jnp.float32(HIDDEN))
    keys = jax.random.split(key, 8)

    def u(kk, shape):
        return jax.random.uniform(kk, shape, jnp.float32, -k, k)

    return {
        "w_ih0": u(keys[0], (input_size, 4 * HIDDEN)),
        "w_hh0": u(keys[1], (HIDDEN, 4 * HIDDEN)),
        "b0":    u(keys[2], (1, 4 * HIDDEN)),
        "w_ih1": u(keys[3], (HIDDEN, 4 * HIDDEN)),
        "w_hh1": u(keys[4], (HIDDEN, 4 * HIDDEN)),
        "b1":    u(keys[5], (1, 4 * HIDDEN)),
        "w_fc":  u(keys[6], (HIDDEN, num_classes)),
        "b_fc":  u(keys[7], (1, num_classes)),
    }


def lstm_emo_reference(x, params):
    """Pure-JAX reference (same math) for correctness checking."""
    H = HIDDEN
    B, T, D = x.shape

    def cell(xt, h, c, wih, whh, b):
        g = xt @ wih + h @ whh + b
        i = jax.nn.sigmoid(g[:, 0:H])
        f = jax.nn.sigmoid(g[:, H:2 * H])
        gg = jnp.tanh(g[:, 2 * H:3 * H])
        o = jax.nn.sigmoid(g[:, 3 * H:4 * H])
        c = f * c + i * gg
        h = o * jnp.tanh(c)
        return h, c

    h1 = jnp.zeros((B, H), jnp.float32)
    c1 = jnp.zeros((B, H), jnp.float32)
    h2 = jnp.zeros((B, H), jnp.float32)
    c2 = jnp.zeros((B, H), jnp.float32)
    for t in range(T):
        xt = x[:, t, :]
        h1, c1 = cell(xt, h1, c1, params["w_ih0"], params["w_hh0"], params["b0"])
        h2, c2 = cell(h1, h2, c2, params["w_ih1"], params["w_hh1"], params["b1"])
    return h2 @ params["w_fc"] + params["b_fc"]


if __name__ == "__main__":
    B, T, D, C = 2, 8, 32, 4   # batch, seq, input_size, num_classes

    key = jax.random.PRNGKey(0)
    kx, kp = jax.random.split(key)
    x = jax.random.normal(kx, (B, T, D), jnp.float32)
    params = init_params(kp, D, C)

    fwd = jax.jit(lstm_emo_forward,
                  static_argnames=("matmul_dtype", "gx0_dtype",
                                   "batch_block", "time_block"))

    ref = lstm_emo_reference(x, params)

    # f32 path (single time chunk): tight check against the pure-JAX reference.
    out = jax.block_until_ready(fwd(x, params))
    assert out.shape == (B, C)
    assert jnp.allclose(out, ref, atol=2e-5, rtol=2e-5), "f32 mismatch vs reference"

    # Time-chunked path (grid=(nb, nt>1)): state carried across chunks in VMEM.
    out_tc = jax.block_until_ready(fwd(x, params, time_block=4))
    assert jnp.allclose(out_tc, ref, atol=2e-5, rtol=2e-5), "chunked mismatch vs reference"

    # bf16 MXU-operand + bf16 gx0 (v6e/v7x fast path): looser tolerance since
    # the recurrence compounds bf16 rounding over T.
    out_bf16 = jax.block_until_ready(
        fwd(x, params, matmul_dtype=jnp.bfloat16, gx0_dtype=jnp.bfloat16))
    assert out_bf16.shape == (B, C)
    assert jnp.allclose(out_bf16, ref, atol=3e-2, rtol=3e-2), "bf16 mismatch vs reference"

    print("KERNEL_OK")
</pallas_src>

<mosaic_0001>
module attributes {stable_mosaic.version = 11 : i64} {
  func.func @lstm_emo_kernel(%arg0: i32, %arg1: i32, %arg2: memref<8x8x512xf32, #tpu.memory_space<vmem>>, %arg3: memref<128x512xf32, #tpu.memory_space<vmem>>, %arg4: memref<128x512xf32, #tpu.memory_space<vmem>>, %arg5: memref<128x512xf32, #tpu.memory_space<vmem>>, %arg6: memref<1x512xf32, #tpu.memory_space<vmem>>, %arg7: memref<128x128xf32, #tpu.memory_space<vmem>>, %arg8: memref<1x128xf32, #tpu.memory_space<vmem>>, %arg9: memref<8x128xf32, #tpu.memory_space<vmem>>, %arg10: memref<8x512xf32, #tpu.memory_space<vmem>>) attributes {dimension_semantics = [#tpu.dimension_semantics<parallel>, #tpu.dimension_semantics<arbitrary>], iteration_bounds = array<i64: 1, 1>, scalar_prefetch = 0 : i64, scratch_operands = 1 : i64, tpu.core_type = #tpu.core_type<tc>, window_params = [{transform_indices = @transform_0, window_bounds = array<i64: 8, 8, 512>}, {pipeline_mode = #tpu.pipeline_mode<synchronous>, transform_indices = @transform_1, window_bounds = array<i64: 128, 512>}, {pipeline_mode = #tpu.pipeline_mode<synchronous>, transform_indices = @transform_2, window_bounds = array<i64: 128, 512>}, {pipeline_mode = #tpu.pipeline_mode<synchronous>, transform_indices = @transform_3, window_bounds = array<i64: 128, 512>}, {pipeline_mode = #tpu.pipeline_mode<synchronous>, transform_indices = @transform_4, window_bounds = array<i64: 1, 512>}, {pipeline_mode = #tpu.pipeline_mode<synchronous>, transform_indices = @transform_5, window_bounds = array<i64: 128, 128>}, {pipeline_mode = #tpu.pipeline_mode<synchronous>, transform_indices = @transform_6, window_bounds = array<i64: 1, 128>}, {transform_indices = @transform_7, window_bounds = array<i64: 8, 128>}]} {
    %c0_i32 = arith.constant 0 : i32
    %0 = arith.cmpi eq, %arg1, %c0_i32 : i32
    %1 = arith.extui %0 : i1 to i32
    %c0_i32_0 = arith.constant 0 : i32
    %2 = arith.cmpi ne, %1, %c0_i32_0 : i32
    scf.if %2 {
      %cst_111 = arith.constant 0.000000e+00 : f32
      %492 = vector.broadcast %cst_111 : f32 to vector<8x512xf32>
      %c0_112 = arith.constant 0 : index
      %c0_113 = arith.constant 0 : index
      %493 = vector.load %arg10[%c0_112, %c0_113] : memref<8x512xf32, #tpu.memory_space<vmem>>, vector<8x512xf32>
      tpu.vector_store %arg10[%c0_112, %c0_113], %492 {strides = array<i32>} : memref<8x512xf32, #tpu.memory_space<vmem>>, vector<8x512xf32>,
    } else {
    }
    %c0 = arith.constant 0 : index
    %c0_1 = arith.constant 0 : index
    %3 = vector.load %arg10[%c0, %c0_1] : memref<8x512xf32, #tpu.memory_space<vmem>>, vector<8x128xf32>
    %c0_2 = arith.constant 0 : index
    %c128 = arith.constant 128 : index
    %4 = vector.load %arg10[%c0_2, %c128] : memref<8x512xf32, #tpu.memory_space<vmem>>, vector<8x128xf32>
    %c0_3 = arith.constant 0 : index
    %c256 = arith.constant 256 : index
    %5 = vector.load %arg10[%c0_3, %c256] : memref<8x512xf32, #tpu.memory_space<vmem>>, vector<8x128xf32>
    %c0_4 = arith.constant 0 : index
    %c384 = arith.constant 384 : index
    %6 = vector.load %arg10[%c0_4, %c384] : memref<8x512xf32, #tpu.memory_space<vmem>>, vector<8x128xf32>
    %c0_5 = arith.constant 0 : index
    %c0_6 = arith.constant 0 : index
    %7 = vector.load %arg3[%c0_5, %c0_6] : memref<128x512xf32, #tpu.memory_space<vmem>>, vector<128x512xf32>
    %c0_7 = arith.constant 0 : index
    %c0_8 = arith.constant 0 : index
    %8 = vector.load %arg4[%c0_7, %c0_8] : memref<128x512xf32, #tpu.memory_space<vmem>>, vector<128x512xf32>
    %c0_9 = arith.constant 0 : index
    %c0_10 = arith.constant 0 : index
    %9 = vector.load %arg5[%c0_9, %c0_10] : memref<128x512xf32, #tpu.memory_space<vmem>>, vector<128x512xf32>
    %c0_11 = arith.constant 0 : index
    %c0_12 = arith.constant 0 : index
    %10 = vector.load %arg6[%c0_11, %c0_12] : memref<1x512xf32, #tpu.memory_space<vmem>>, vector<1x512xf32>
    %11 = vector.shape_cast %10 : vector<1x512xf32> to vector<1x512xf32>
    %12 = vector.broadcast %11 : vector<1x512xf32> to vector<8x512xf32>
    %c0_i32_13 = arith.constant 0 : i32
    %cst = arith.constant dense<0.000000e+00> : vector<8x512xf32>
    %13 = tpu.matmul %3, %7, %cst {dimension_numbers = #tpu.dot_dimension_numbers<[1], [0], [0], [1], [0, 0, 1, 1], [], []>} : vector<8x128xf32>, vector<128x512xf32>, vector<8x512xf32> -> vector<8x512xf32>
    %cst_14 = arith.constant dense<0.000000e+00> : vector<8x512xf32>
    %14 = tpu.matmul %4, %8, %cst_14 {dimension_numbers = #tpu.dot_dimension_numbers<[1], [0], [0], [1], [0, 0, 1, 1], [], []>} : vector<8x128xf32>, vector<128x512xf32>, vector<8x512xf32> -> vector<8x512xf32>
    %15 = arith.index_cast %c0_i32_13 : i32 to index
    %c0_15 = arith.constant 0 : index
    %c0_16 = arith.constant 0 : index
    %16 = vector.load %arg2[%15, %c0_15, %c0_16] : memref<8x8x512xf32, #tpu.memory_space<vmem>>, vector<1x8x512xf32>
    %17 = vector.shape_cast %16 : vector<1x8x512xf32> to vector<8x512xf32>
    %18 = arith.addf %17, %13 : vector<8x512xf32>
    %19 = vector.extract_strided_slice %18 {offsets = [0, 0], sizes = [8, 128], strides = [1, 1]} : vector<8x512xf32> to vector<8x128xf32>
    %20 = arith.negf %19 : vector<8x128xf32>
    %21 = math.exp %20 : vector<8x128xf32>
    %cst_17 = arith.constant 1.000000e+00 : f32
    %22 = vector.broadcast %cst_17 : f32 to vector<8x128xf32>
    %23 = arith.addf %22, %21 : vector<8x128xf32>
    %24 = arith.divf %22, %23 : vector<8x128xf32>
    %25 = vector.extract_strided_slice %18 {offsets = [0, 128], sizes = [8, 128], strides = [1, 1]} : vector<8x512xf32> to vector<8x128xf32>
    %26 = arith.negf %25 : vector<8x128xf32>
    %27 = math.exp %26 : vector<8x128xf32>
    %cst_18 = arith.constant 1.000000e+00 : f32
    %28 = vector.broadcast %cst_18 : f32 to vector<8x128xf32>
    %29 = arith.addf %28, %27 : vector<8x128xf32>
    %30 = arith.divf %28, %29 : vector<8x128xf32>
    %31 = vector.extract_strided_slice %18 {offsets = [0, 256], sizes = [8, 128], strides = [1, 1]} : vector<8x512xf32> to vector<8x128xf32>
    %32 = math.tanh %31 : vector<8x128xf32>
    %33 = vector.extract_strided_slice %18 {offsets = [0, 384], sizes = [8, 128], strides = [1, 1]} : vector<8x512xf32> to vector<8x128xf32>
    %34 = arith.negf %33 : vector<8x128xf32>
    %35 = math.exp %34 : vector<8x128xf32>
    %cst_19 = arith.constant 1.000000e+00 : f32
    %36 = vector.broadcast %cst_19 : f32 to vector<8x128xf32>
    %37 = arith.addf %36, %35 : vector<8x128xf32>
    %38 = arith.divf %36, %37 : vector<8x128xf32>
    %39 = arith.mulf %30, %5 : vector<8x128xf32>
    %40 = arith.mulf %24, %32 : vector<8x128xf32>
    %41 = arith.addf %39, %40 : vector<8x128xf32>
    %42 = math.tanh %41 : vector<8x128xf32>
    %43 = arith.mulf %38, %42 : vector<8x128xf32>
    %cst_20 = arith.constant dense<0.000000e+00> : vector<8x512xf32>
    %44 = tpu.matmul %43, %9, %cst_20 {dimension_numbers = #tpu.dot_dimension_numbers<[1], [0], [0], [1], [0, 0, 1, 1], [], []>} : vector<8x128xf32>, vector<128x512xf32>, vector<8x512xf32> -> vector<8x512xf32>
    %45 = arith.addf %44, %14 : vector<8x512xf32>
    %46 = arith.addf %45, %12 : vector<8x512xf32>
    %47 = vector.extract_strided_slice %46 {offsets = [0, 0], sizes = [8, 128], strides = [1, 1]} : vector<8x512xf32> to vector<8x128xf32>
    %48 = arith.negf %47 : vector<8x128xf32>
    %49 = math.exp %48 : vector<8x128xf32>
    %cst_21 = arith.constant 1.000000e+00 : f32
    %50 = vector.broadcast %cst_21 : f32 to vector<8x128xf32>
    %51 = arith.addf %50, %49 : vector<8x128xf32>
    %52 = arith.divf %50, %51 : vector<8x128xf32>
    %53 = vector.extract_strided_slice %46 {offsets = [0, 128], sizes = [8, 128], strides = [1, 1]} : vector<8x512xf32> to vector<8x128xf32>
    %54 = arith.negf %53 : vector<8x128xf32>
    %55 = math.exp %54 : vector<8x128xf32>
    %cst_22 = arith.constant 1.000000e+00 : f32
    %56 = vector.broadcast %cst_22 : f32 to vector<8x128xf32>
    %57 = arith.addf %56, %55 : vector<8x128xf32>
    %58 = arith.divf %56, %57 : vector<8x128xf32>
    %59 = vector.extract_strided_slice %46 {offsets = [0, 256], sizes = [8, 128], strides = [1, 1]} : vector<8x512xf32> to vector<8x128xf32>
    %60 = math.tanh %59 : vector<8x128xf32>
    %61 = vector.extract_strided_slice %46 {offsets = [0, 384], sizes = [8, 128], strides = [1, 1]} : vector<8x512xf32> to vector<8x128xf32>
    %62 = arith.negf %61 : vector<8x128xf32>
    %63 = math.exp %62 : vector<8x128xf32>
    %cst_23 = arith.constant 1.000000e+00 : f32
    %64 = vector.broadcast %cst_23 : f32 to vector<8x128xf32>
    %65 = arith.addf %64, %63 : vector<8x128xf32>
    %66 = arith.divf %64, %65 : vector<8x128xf32>
    %67 = arith.mulf %58, %6 : vector<8x128xf32>
    %68 = arith.mulf %52, %60 : vector<8x128xf32>
    %69 = arith.addf %67, %68 : vector<8x128xf32>
    %70 = math.tanh %69 : vector<8x128xf32>
    %71 = arith.mulf %66, %70 : vector<8x128xf32>
    %c1_i32 = arith.constant 1 : i32
    %cst_24 = arith.constant dense<0.000000e+00> : vector<8x512xf32>
    %72 = tpu.matmul %43, %7, %cst_24 {dimension_numbers = #tpu.dot_dimension_numbers<[1], [0], [0], [1], [0, 0, 1, 1], [], []>} : vector<8x128xf32>, vector<128x512xf32>, vector<8x512xf32> -> vector<8x512xf32>
    %cst_25 = arith.constant dense<0.000000e+00> : vector<8x512xf32>
    %73 = tpu.matmul %71, %8, %cst_25 {dimension_numbers = #tpu.dot_dimension_numbers<[1], [0], [0], [1], [0, 0, 1, 1], [], []>} : vector<8x128xf32>, vector<128x512xf32>, vector<8x512xf32> -> vector<8x512xf32>
    %74 = arith.index_cast %c1_i32 : i32 to index
    %c0_26 = arith.constant 0 : index
    %c0_27 = arith.constant 0 : index
    %75 = vector.load %arg2[%74, %c0_26, %c0_27] : memref<8x8x512xf32, #tpu.memory_space<vmem>>, vector<1x8x512xf32>
    %76 = vector.shape_cast %75 : vector<1x8x512xf32> to vector<8x512xf32>
    %77 = arith.addf %76, %72 : vector<8x512xf32>
    %78 = vector.extract_strided_slice %77 {offsets = [0, 0], sizes = [8, 128], strides = [1, 1]} : vector<8x512xf32> to vector<8x128xf32>
    %79 = arith.negf %78 : vector<8x128xf32>
    %80 = math.exp %79 : vector<8x128xf32>
    %cst_28 = arith.constant 1.000000e+00 : f32
    %81 = vector.broadcast %cst_28 : f32 to vector<8x128xf32>
    %82 = arith.addf %81, %80 : vector<8x128xf32>
    %83 = arith.divf %81, %82 : vector<8x128xf32>
    %84 = vector.extract_strided_slice %77 {offsets = [0, 128], sizes = [8, 128], strides = [1, 1]} : vector<8x512xf32> to vector<8x128xf32>
    %85 = arith.negf %84 : vector<8x128xf32>
    %86 = math.exp %85 : vector<8x128xf32>
    %cst_29 = arith.constant 1.000000e+00 : f32
    %87 = vector.broadcast %cst_29 : f32 to vector<8x128xf32>
    %88 = arith.addf %87, %86 : vector<8x128xf32>
    %89 = arith.divf %87, %88 : vector<8x128xf32>
    %90 = vector.extract_strided_slice %77 {offsets = [0, 256], sizes = [8, 128], strides = [1, 1]} : vector<8x512xf32> to vector<8x128xf32>
    %91 = math.tanh %90 : vector<8x128xf32>
    %92 = vector.extract_strided_slice %77 {offsets = [0, 384], sizes = [8, 128], strides = [1, 1]} : vector<8x512xf32> to vector<8x128xf32>
    %93 = arith.negf %92 : vector<8x128xf32>
    %94 = math.exp %93 : vector<8x128xf32>
    %cst_30 = arith.constant 1.000000e+00 : f32
    %95 = vector.broadcast %cst_30 : f32 to vector<8x128xf32>
    %96 = arith.addf %95, %94 : vector<8x128xf32>
    %97 = arith.divf %95, %96 : vector<8x128xf32>
    %98 = arith.mulf %89, %41 : vector<8x128xf32>
    %99 = arith.mulf %83, %91 : vector<8x128xf32>
    %100 = arith.addf %98, %99 : vector<8x128xf32>
    %101 = math.tanh %100 : vector<8x128xf32>
    %102 = arith.mulf %97, %101 : vector<8x128xf32>
    %cst_31 = arith.constant dense<0.000000e+00> : vector<8x512xf32>
    %103 = tpu.matmul %102, %9, %cst_31 {dimension_numbers = #tpu.dot_dimension_numbers<[1], [0], [0], [1], [0, 0, 1, 1], [], []>} : vector<8x128xf32>, vector<128x512xf32>, vector<8x512xf32> -> vector<8x512xf32>
    %104 = arith.addf %103, %73 : vector<8x512xf32>
    %105 = arith.addf %104, %12 : vector<8x512xf32>
    %106 = vector.extract_strided_slice %105 {offsets = [0, 0], sizes = [8, 128], strides = [1, 1]} : vector<8x512xf32> to vector<8x128xf32>
    %107 = arith.negf %106 : vector<8x128xf32>
    %108 = math.exp %107 : vector<8x128xf32>
    %cst_32 = arith.constant 1.000000e+00 : f32
    %109 = vector.broadcast %cst_32 : f32 to vector<8x128xf32>
    %110 = arith.addf %109, %108 : vector<8x128xf32>
    %111 = arith.divf %109, %110 : vector<8x128xf32>
    %112 = vector.extract_strided_slice %105 {offsets = [0, 128], sizes = [8, 128], strides = [1, 1]} : vector<8x512xf32> to vector<8x128xf32>
    %113 = arith.negf %112 : vector<8x128xf32>
    %114 = math.exp %113 : vector<8x128xf32>
    %cst_33 = arith.constant 1.000000e+00 : f32
    %115 = vector.broadcast %cst_33 : f32 to vector<8x128xf32>
    %116 = arith.addf %115, %114 : vector<8x128xf32>
    %117 = arith.divf %115, %116 : vector<8x128xf32>
    %118 = vector.extract_strided_slice %105 {offsets = [0, 256], sizes = [8, 128], strides = [1, 1]} : vector<8x512xf32> to vector<8x128xf32>
    %119 = math.tanh %118 : vector<8x128xf32>
    %120 = vector.extract_strided_slice %105 {offsets = [0, 384], sizes = [8, 128], strides = [1, 1]} : vector<8x512xf32> to vector<8x128xf32>
    %121 = arith.negf %120 : vector<8x128xf32>
    %122 = math.exp %121 : vector<8x128xf32>
    %cst_34 = arith.constant 1.000000e+00 : f32
    %123 = vector.broadcast %cst_34 : f32 to vector<8x128xf32>
    %124 = arith.addf %123, %122 : vector<8x128xf32>
    %125 = arith.divf %123, %124 : vector<8x128xf32>
    %126 = arith.mulf %117, %69 : vector<8x128xf32>
    %127 = arith.mulf %111, %119 : vector<8x128xf32>
    %128 = arith.addf %126, %127 : vector<8x128xf32>
    %129 = math.tanh %128 : vector<8x128xf32>
    %130 = arith.mulf %125, %129 : vector<8x128xf32>
    %c2_i32 = arith.constant 2 : i32
    %cst_35 = arith.constant dense<0.000000e+00> : vector<8x512xf32>
    %131 = tpu.matmul %102, %7, %cst_35 {dimension_numbers = #tpu.dot_dimension_numbers<[1], [0], [0], [1], [0, 0, 1, 1], [], []>} : vector<8x128xf32>, vector<128x512xf32>, vector<8x512xf32> -> vector<8x512xf32>
    %cst_36 = arith.constant dense<0.000000e+00> : vector<8x512xf32>
    %132 = tpu.matmul %130, %8, %cst_36 {dimension_numbers = #tpu.dot_dimension_numbers<[1], [0], [0], [1], [0, 0, 1, 1], [], []>} : vector<8x128xf32>, vector<128x512xf32>, vector<8x512xf32> -> vector<8x512xf32>
    %133 = arith.index_cast %c2_i32 : i32 to index
    %c0_37 = arith.constant 0 : index
    %c0_38 = arith.constant 0 : index
    %134 = vector.load %arg2[%133, %c0_37, %c0_38] : memref<8x8x512xf32, #tpu.memory_space<vmem>>, vector<1x8x512xf32>
    %135 = vector.shape_cast %134 : vector<1x8x512xf32> to vector<8x512xf32>
    %136 = arith.addf %135, %131 : vector<8x512xf32>
    %137 = vector.extract_strided_slice %136 {offsets = [0, 0], sizes = [8, 128], strides = [1, 1]} : vector<8x512xf32> to vector<8x128xf32>
    %138 = arith.negf %137 : vector<8x128xf32>
    %139 = math.exp %138 : vector<8x128xf32>
    %cst_39 = arith.constant 1.000000e+00 : f32
    %140 = vector.broadcast %cst_39 : f32 to vector<8x128xf32>
    %141 = arith.addf %140, %139 : vector<8x128xf32>
    %142 = arith.divf %140, %141 : vector<8x128xf32>
    %143 = vector.extract_strided_slice %136 {offsets = [0, 128], sizes = [8, 128], strides = [1, 1]} : vector<8x512xf32> to vector<8x128xf32>
    %144 = arith.negf %143 : vector<8x128xf32>
    %145 = math.exp %144 : vector<8x128xf32>
    %cst_40 = arith.constant 1.000000e+00 : f32
    %146 = vector.broadcast %cst_40 : f32 to vector<8x128xf32>
    %147 = arith.addf %146, %145 : vector<8x128xf32>
    %148 = arith.divf %146, %147 : vector<8x128xf32>
    %149 = vector.extract_strided_slice %136 {offsets = [0, 256], sizes = [8, 128], strides = [1, 1]} : vector<8x512xf32> to vector<8x128xf32>
    %150 = math.tanh %149 : vector<8x128xf32>
    %151 = vector.extract_strided_slice %136 {offsets = [0, 384], sizes = [8, 128], strides = [1, 1]} : vector<8x512xf32> to vector<8x128xf32>
    %152 = arith.negf %151 : vector<8x128xf32>
    %153 = math.exp %152 : vector<8x128xf32>
    %cst_41 = arith.constant 1.000000e+00 : f32
    %154 = vector.broadcast %cst_41 : f32 to vector<8x128xf32>
    %155 = arith.addf %154, %153 : vector<8x128xf32>
    %156 = arith.divf %154, %155 : vector<8x128xf32>
    %157 = arith.mulf %148, %100 : vector<8x128xf32>
    %158 = arith.mulf %142, %150 : vector<8x128xf32>
    %159 = arith.addf %157, %158 : vector<8x128xf32>
    %160 = math.tanh %159 : vector<8x128xf32>
    %161 = arith.mulf %156, %160 : vector<8x128xf32>
    %cst_42 = arith.constant dense<0.000000e+00> : vector<8x512xf32>
    %162 = tpu.matmul %161, %9, %cst_42 {dimension_numbers = #tpu.dot_dimension_numbers<[1], [0], [0], [1], [0, 0, 1, 1], [], []>} : vector<8x128xf32>, vector<128x512xf32>, vector<8x512xf32> -> vector<8x512xf32>
    %163 = arith.addf %162, %132 : vector<8x512xf32>
    %164 = arith.addf %163, %12 : vector<8x512xf32>
    %165 = vector.extract_strided_slice %164 {offsets = [0, 0], sizes = [8, 128], strides = [1, 1]} : vector<8x512xf32> to vector<8x128xf32>
    %166 = arith.negf %165 : vector<8x128xf32>
    %167 = math.exp %166 : vector<8x128xf32>
    %cst_43 = arith.constant 1.000000e+00 : f32
    %168 = vector.broadcast %cst_43 : f32 to vector<8x128xf32>
    %169 = arith.addf %168, %167 : vector<8x128xf32>
    %170 = arith.divf %168, %169 : vector<8x128xf32>
    %171 = vector.extract_strided_slice %164 {offsets = [0, 128], sizes = [8, 128], strides = [1, 1]} : vector<8x512xf32> to vector<8x128xf32>
    %172 = arith.negf %171 : vector<8x128xf32>
    %173 = math.exp %172 : vector<8x128xf32>
    %cst_44 = arith.constant 1.000000e+00 : f32
    %174 = vector.broadcast %cst_44 : f32 to vector<8x128xf32>
    %175 = arith.addf %174, %173 : vector<8x128xf32>
    %176 = arith.divf %174, %175 : vector<8x128xf32>
    %177 = vector.extract_strided_slice %164 {offsets = [0, 256], sizes = [8, 128], strides = [1, 1]} : vector<8x512xf32> to vector<8x128xf32>
    %178 = math.tanh %177 : vector<8x128xf32>
    %179 = vector.extract_strided_slice %164 {offsets = [0, 384], sizes = [8, 128], strides = [1, 1]} : vector<8x512xf32> to vector<8x128xf32>
    %180 = arith.negf %179 : vector<8x128xf32>
    %181 = math.exp %180 : vector<8x128xf32>
    %cst_45 = arith.constant 1.000000e+00 : f32
    %182 = vector.broadcast %cst_45 : f32 to vector<8x128xf32>
    %183 = arith.addf %182, %181 : vector<8x128xf32>
    %184 = arith.divf %182, %183 : vector<8x128xf32>
    %185 = arith.mulf %176, %128 : vector<8x128xf32>
    %186 = arith.mulf %170, %178 : vector<8x128xf32>
    %187 = arith.addf %185, %186 : vector<8x128xf32>
    %188 = math.tanh %187 : vector<8x128xf32>
    %189 = arith.mulf %184, %188 : vector<8x128xf32>
    %c3_i32 = arith.constant 3 : i32
    %cst_46 = arith.constant dense<0.000000e+00> : vector<8x512xf32>
    %190 = tpu.matmul %161, %7, %cst_46 {dimension_numbers = #tpu.dot_dimension_numbers<[1], [0], [0], [1], [0, 0, 1, 1], [], []>} : vector<8x128xf32>, vector<128x512xf32>, vector<8x512xf32> -> vector<8x512xf32>
    %cst_47 = arith.constant dense<0.000000e+00> : vector<8x512xf32>
    %191 = tpu.matmul %189, %8, %cst_47 {dimension_numbers = #tpu.dot_dimension_numbers<[1], [0], [0], [1], [0, 0, 1, 1], [], []>} : vector<8x128xf32>, vector<128x512xf32>, vector<8x512xf32> -> vector<8x512xf32>
    %192 = arith.index_cast %c3_i32 : i32 to index
    %c0_48 = arith.constant 0 : index
    %c0_49 = arith.constant 0 : index
    %193 = vector.load %arg2[%192, %c0_48, %c0_49] : memref<8x8x512xf32, #tpu.memory_space<vmem>>, vector<1x8x512xf32>
    %194 = vector.shape_cast %193 : vector<1x8x512xf32> to vector<8x512xf32>
    %195 = arith.addf %194, %190 : vector<8x512xf32>
    %196 = vector.extract_strided_slice %195 {offsets = [0, 0], sizes = [8, 128], strides = [1, 1]} : vector<8x512xf32> to vector<8x128xf32>
    %197 = arith.negf %196 : vector<8x128xf32>
    %198 = math.exp %197 : vector<8x128xf32>
    %cst_50 = arith.constant 1.000000e+00 : f32
    %199 = vector.broadcast %cst_50 : f32 to vector<8x128xf32>
    %200 = arith.addf %199, %198 : vector<8x128xf32>
    %201 = arith.divf %199, %200 : vector<8x128xf32>
    %202 = vector.extract_strided_slice %195 {offsets = [0, 128], sizes = [8, 128], strides = [1, 1]} : vector<8x512xf32> to vector<8x128xf32>
    %203 = arith.negf %202 : vector<8x128xf32>
    %204 = math.exp %203 : vector<8x128xf32>
    %cst_51 = arith.constant 1.000000e+00 : f32
    %205 = vector.broadcast %cst_51 : f32 to vector<8x128xf32>
    %206 = arith.addf %205, %204 : vector<8x128xf32>
    %207 = arith.divf %205, %206 : vector<8x128xf32>
    %208 = vector.extract_strided_slice %195 {offsets = [0, 256], sizes = [8, 128], strides = [1, 1]} : vector<8x512xf32> to vector<8x128xf32>
    %209 = math.tanh %208 : vector<8x128xf32>
    %210 = vector.extract_strided_slice %195 {offsets = [0, 384], sizes = [8, 128], strides = [1, 1]} : vector<8x512xf32> to vector<8x128xf32>
    %211 = arith.negf %210 : vector<8x128xf32>
    %212 = math.exp %211 : vector<8x128xf32>
    %cst_52 = arith.constant 1.000000e+00 : f32
    %213 = vector.broadcast %cst_52 : f32 to vector<8x128xf32>
    %214 = arith.addf %213, %212 : vector<8x128xf32>
    %215 = arith.divf %213, %214 : vector<8x128xf32>
    %216 = arith.mulf %207, %159 : vector<8x128xf32>
    %217 = arith.mulf %201, %209 : vector<8x128xf32>
    %218 = arith.addf %216, %217 : vector<8x128xf32>
    %219 = math.tanh %218 : vector<8x128xf32>
    %220 = arith.mulf %215, %219 : vector<8x128xf32>
    %cst_53 = arith.constant dense<0.000000e+00> : vector<8x512xf32>
    %221 = tpu.matmul %220, %9, %cst_53 {dimension_numbers = #tpu.dot_dimension_numbers<[1], [0], [0], [1], [0, 0, 1, 1], [], []>} : vector<8x128xf32>, vector<128x512xf32>, vector<8x512xf32> -> vector<8x512xf32>
    %222 = arith.addf %221, %191 : vector<8x512xf32>
    %223 = arith.addf %222, %12 : vector<8x512xf32>
    %224 = vector.extract_strided_slice %223 {offsets = [0, 0], sizes = [8, 128], strides = [1, 1]} : vector<8x512xf32> to vector<8x128xf32>
    %225 = arith.negf %224 : vector<8x128xf32>
    %226 = math.exp %225 : vector<8x128xf32>
    %cst_54 = arith.constant 1.000000e+00 : f32
    %227 = vector.broadcast %cst_54 : f32 to vector<8x128xf32>
    %228 = arith.addf %227, %226 : vector<8x128xf32>
    %229 = arith.divf %227, %228 : vector<8x128xf32>
    %230 = vector.extract_strided_slice %223 {offsets = [0, 128], sizes = [8, 128], strides = [1, 1]} : vector<8x512xf32> to vector<8x128xf32>
    %231 = arith.negf %230 : vector<8x128xf32>
    %232 = math.exp %231 : vector<8x128xf32>
    %cst_55 = arith.constant 1.000000e+00 : f32
    %233 = vector.broadcast %cst_55 : f32 to vector<8x128xf32>
    %234 = arith.addf %233, %232 : vector<8x128xf32>
    %235 = arith.divf %233, %234 : vector<8x128xf32>
    %236 = vector.extract_strided_slice %223 {offsets = [0, 256], sizes = [8, 128], strides = [1, 1]} : vector<8x512xf32> to vector<8x128xf32>
    %237 = math.tanh %236 : vector<8x128xf32>
    %238 = vector.extract_strided_slice %223 {offsets = [0, 384], sizes = [8, 128], strides = [1, 1]} : vector<8x512xf32> to vector<8x128xf32>
    %239 = arith.negf %238 : vector<8x128xf32>
    %240 = math.exp %239 : vector<8x128xf32>
    %cst_56 = arith.constant 1.000000e+00 : f32
    %241 = vector.broadcast %cst_56 : f32 to vector<8x128xf32>
    %242 = arith.addf %241, %240 : vector<8x128xf32>
    %243 = arith.divf %241, %242 : vector<8x128xf32>
    %244 = arith.mulf %235, %187 : vector<8x128xf32>
    %245 = arith.mulf %229, %237 : vector<8x128xf32>
    %246 = arith.addf %244, %245 : vector<8x128xf32>
    %247 = math.tanh %246 : vector<8x128xf32>
    %248 = arith.mulf %243, %247 : vector<8x128xf32>
    %c4_i32 = arith.constant 4 : i32
    %cst_57 = arith.constant dense<0.000000e+00> : vector<8x512xf32>
    %249 = tpu.matmul %220, %7, %cst_57 {dimension_numbers = #tpu.dot_dimension_numbers<[1], [0], [0], [1], [0, 0, 1, 1], [], []>} : vector<8x128xf32>, vector<128x512xf32>, vector<8x512xf32> -> vector<8x512xf32>
    %cst_58 = arith.constant dense<0.000000e+00> : vector<8x512xf32>
    %250 = tpu.matmul %248, %8, %cst_58 {dimension_numbers = #tpu.dot_dimension_numbers<[1], [0], [0], [1], [0, 0, 1, 1], [], []>} : vector<8x128xf32>, vector<128x512xf32>, vector<8x512xf32> -> vector<8x512xf32>
    %251 = arith.index_cast %c4_i32 : i32 to index
    %c0_59 = arith.constant 0 : index
    %c0_60 = arith.constant 0 : index
    %252 = vector.load %arg2[%251, %c0_59, %c0_60] : memref<8x8x512xf32, #tpu.memory_space<vmem>>, vector<1x8x512xf32>
    %253 = vector.shape_cast %252 : vector<1x8x512xf32> to vector<8x512xf32>
    %254 = arith.addf %253, %249 : vector<8x512xf32>
    %255 = vector.extract_strided_slice %254 {offsets = [0, 0], sizes = [8, 128], strides = [1, 1]} : vector<8x512xf32> to vector<8x128xf32>
    %256 = arith.negf %255 : vector<8x128xf32>
    %257 = math.exp %256 : vector<8x128xf32>
    %cst_61 = arith.constant 1.000000e+00 : f32
    %258 = vector.broadcast %cst_61 : f32 to vector<8x128xf32>
    %259 = arith.addf %258, %257 : vector<8x128xf32>
    %260 = arith.divf %258, %259 : vector<8x128xf32>
    %261 = vector.extract_strided_slice %254 {offsets = [0, 128], sizes = [8, 128], strides = [1, 1]} : vector<8x512xf32> to vector<8x128xf32>
    %262 = arith.negf %261 : vector<8x128xf32>
    %263 = math.exp %262 : vector<8x128xf32>
    %cst_62 = arith.constant 1.000000e+00 : f32
    %264 = vector.broadcast %cst_62 : f32 to vector<8x128xf32>
    %265 = arith.addf %264, %263 : vector<8x128xf32>
    %266 = arith.divf %264, %265 : vector<8x128xf32>
    %267 = vector.extract_strided_slice %254 {offsets = [0, 256], sizes = [8, 128], strides = [1, 1]} : vector<8x512xf32> to vector<8x128xf32>
    %268 = math.tanh %267 : vector<8x128xf32>
    %269 = vector.extract_strided_slice %254 {offsets = [0, 384], sizes = [8, 128], strides = [1, 1]} : vector<8x512xf32> to vector<8x128xf32>
    %270 = arith.negf %269 : vector<8x128xf32>
    %271 = math.exp %270 : vector<8x128xf32>
    %cst_63 = arith.constant 1.000000e+00 : f32
    %272 = vector.broadcast %cst_63 : f32 to vector<8x128xf32>
    %273 = arith.addf %272, %271 : vector<8x128xf32>
    %274 = arith.divf %272, %273 : vector<8x128xf32>
    %275 = arith.mulf %266, %218 : vector<8x128xf32>
    %276 = arith.mulf %260, %268 : vector<8x128xf32>
    %277 = arith.addf %275, %276 : vector<8x128xf32>
    %278 = math.tanh %277 : vector<8x128xf32>
    %279 = arith.mulf %274, %278 : vector<8x128xf32>
    %cst_64 = arith.constant dense<0.000000e+00> : vector<8x512xf32>
    %280 = tpu.matmul %279, %9, %cst_64 {dimension_numbers = #tpu.dot_dimension_numbers<[1], [0], [0], [1], [0, 0, 1, 1], [], []>} : vector<8x128xf32>, vector<128x512xf32>, vector<8x512xf32> -> vector<8x512xf32>
    %281 = arith.addf %280, %250 : vector<8x512xf32>
    %282 = arith.addf %281, %12 : vector<8x512xf32>
    %283 = vector.extract_strided_slice %282 {offsets = [0, 0], sizes = [8, 128], strides = [1, 1]} : vector<8x512xf32> to vector<8x128xf32>
    %284 = arith.negf %283 : vector<8x128xf32>
    %285 = math.exp %284 : vector<8x128xf32>
    %cst_65 = arith.constant 1.000000e+00 : f32
    %286 = vector.broadcast %cst_65 : f32 to vector<8x128xf32>
    %287 = arith.addf %286, %285 : vector<8x128xf32>
    %288 = arith.divf %286, %287 : vector<8x128xf32>
    %289 = vector.extract_strided_slice %282 {offsets = [0, 128], sizes = [8, 128], strides = [1, 1]} : vector<8x512xf32> to vector<8x128xf32>
    %290 = arith.negf %289 : vector<8x128xf32>
    %291 = math.exp %290 : vector<8x128xf32>
    %cst_66 = arith.constant 1.000000e+00 : f32
    %292 = vector.broadcast %cst_66 : f32 to vector<8x128xf32>
    %293 = arith.addf %292, %291 : vector<8x128xf32>
    %294 = arith.divf %292, %293 : vector<8x128xf32>
    %295 = vector.extract_strided_slice %282 {offsets = [0, 256], sizes = [8, 128], strides = [1, 1]} : vector<8x512xf32> to vector<8x128xf32>
    %296 = math.tanh %295 : vector<8x128xf32>
    %297 = vector.extract_strided_slice %282 {offsets = [0, 384], sizes = [8, 128], strides = [1, 1]} : vector<8x512xf32> to vector<8x128xf32>
    %298 = arith.negf %297 : vector<8x128xf32>
    %299 = math.exp %298 : vector<8x128xf32>
    %cst_67 = arith.constant 1.000000e+00 : f32
    %300 = vector.broadcast %cst_67 : f32 to vector<8x128xf32>
    %301 = arith.addf %300, %299 : vector<8x128xf32>
    %302 = arith.divf %300, %301 : vector<8x128xf32>
    %303 = arith.mulf %294, %246 : vector<8x128xf32>
    %304 = arith.mulf %288, %296 : vector<8x128xf32>
    %305 = arith.addf %303, %304 : vector<8x128xf32>
    %306 = math.tanh %305 : vector<8x128xf32>
    %307 = arith.mulf %302, %306 : vector<8x128xf32>
    %c5_i32 = arith.constant 5 : i32
    %cst_68 = arith.constant dense<0.000000e+00> : vector<8x512xf32>
    %308 = tpu.matmul %279, %7, %cst_68 {dimension_numbers = #tpu.dot_dimension_numbers<[1], [0], [0], [1], [0, 0, 1, 1], [], []>} : vector<8x128xf32>, vector<128x512xf32>, vector<8x512xf32> -> vector<8x512xf32>
    %cst_69 = arith.constant dense<0.000000e+00> : vector<8x512xf32>
    %309 = tpu.matmul %307, %8, %cst_69 {dimension_numbers = #tpu.dot_dimension_numbers<[1], [0], [0], [1], [0, 0, 1, 1], [], []>} : vector<8x128xf32>, vector<128x512xf32>, vector<8x512xf32> -> vector<8x512xf32>
    %310 = arith.index_cast %c5_i32 : i32 to index
    %c0_70 = arith.constant 0 : index
    %c0_71 = arith.constant 0 : index
    %311 = vector.load %arg2[%310, %c0_70, %c0_71] : memref<8x8x512xf32, #tpu.memory_space<vmem>>, vector<1x8x512xf32>
    %312 = vector.shape_cast %311 : vector<1x8x512xf32> to vector<8x512xf32>
    %313 = arith.addf %312, %308 : vector<8x512xf32>
    %314 = vector.extract_strided_slice %313 {offsets = [0, 0], sizes = [8, 128], strides = [1, 1]} : vector<8x512xf32> to vector<8x128xf32>
    %315 = arith.negf %314 : vector<8x128xf32>
    %316 = math.exp %315 : vector<8x128xf32>
    %cst_72 = arith.constant 1.000000e+00 : f32
    %317 = vector.broadcast %cst_72 : f32 to vector<8x128xf32>
    %318 = arith.addf %317, %316 : vector<8x128xf32>
    %319 = arith.divf %317, %318 : vector<8x128xf32>
    %320 = vector.extract_strided_slice %313 {offsets = [0, 128], sizes = [8, 128], strides = [1, 1]} : vector<8x512xf32> to vector<8x128xf32>
    %321 = arith.negf %320 : vector<8x128xf32>
    %322 = math.exp %321 : vector<8x128xf32>
    %cst_73 = arith.constant 1.000000e+00 : f32
    %323 = vector.broadcast %cst_73 : f32 to vector<8x128xf32>
    %324 = arith.addf %323, %322 : vector<8x128xf32>
    %325 = arith.divf %323, %324 : vector<8x128xf32>
    %326 = vector.extract_strided_slice %313 {offsets = [0, 256], sizes = [8, 128], strides = [1, 1]} : vector<8x512xf32> to vector<8x128xf32>
    %327 = math.tanh %326 : vector<8x128xf32>
    %328 = vector.extract_strided_slice %313 {offsets = [0, 384], sizes = [8, 128], strides = [1, 1]} : vector<8x512xf32> to vector<8x128xf32>
    %329 = arith.negf %328 : vector<8x128xf32>
    %330 = math.exp %329 : vector<8x128xf32>
    %cst_74 = arith.constant 1.000000e+00 : f32
    %331 = vector.broadcast %cst_74 : f32 to vector<8x128xf32>
    %332 = arith.addf %331, %330 : vector<8x128xf32>
    %333 = arith.divf %331, %332 : vector<8x128xf32>
    %334 = arith.mulf %325, %277 : vector<8x128xf32>
    %335 = arith.mulf %319, %327 : vector<8x128xf32>
    %336 = arith.addf %334, %335 : vector<8x128xf32>
    %337 = math.tanh %336 : vector<8x128xf32>
    %338 = arith.mulf %333, %337 : vector<8x128xf32>
    %cst_75 = arith.constant dense<0.000000e+00> : vector<8x512xf32>
    %339 = tpu.matmul %338, %9, %cst_75 {dimension_numbers = #tpu.dot_dimension_numbers<[1], [0], [0], [1], [0, 0, 1, 1], [], []>} : vector<8x128xf32>, vector<128x512xf32>, vector<8x512xf32> -> vector<8x512xf32>
    %340 = arith.addf %339, %309 : vector<8x512xf32>
    %341 = arith.addf %340, %12 : vector<8x512xf32>
    %342 = vector.extract_strided_slice %341 {offsets = [0, 0], sizes = [8, 128], strides = [1, 1]} : vector<8x512xf32> to vector<8x128xf32>
    %343 = arith.negf %342 : vector<8x128xf32>
    %344 = math.exp %343 : vector<8x128xf32>
    %cst_76 = arith.constant 1.000000e+00 : f32
    %345 = vector.broadcast %cst_76 : f32 to vector<8x128xf32>
    %346 = arith.addf %345, %344 : vector<8x128xf32>
    %347 = arith.divf %345, %346 : vector<8x128xf32>
    %348 = vector.extract_strided_slice %341 {offsets = [0, 128], sizes = [8, 128], strides = [1, 1]} : vector<8x512xf32> to vector<8x128xf32>
    %349 = arith.negf %348 : vector<8x128xf32>
    %350 = math.exp %349 : vector<8x128xf32>
    %cst_77 = arith.constant 1.000000e+00 : f32
    %351 = vector.broadcast %cst_77 : f32 to vector<8x128xf32>
    %352 = arith.addf %351, %350 : vector<8x128xf32>
    %353 = arith.divf %351, %352 : vector<8x128xf32>
    %354 = vector.extract_strided_slice %341 {offsets = [0, 256], sizes = [8, 128], strides = [1, 1]} : vector<8x512xf32> to vector<8x128xf32>
    %355 = math.tanh %354 : vector<8x128xf32>
    %356 = vector.extract_strided_slice %341 {offsets = [0, 384], sizes = [8, 128], strides = [1, 1]} : vector<8x512xf32> to vector<8x128xf32>
    %357 = arith.negf %356 : vector<8x128xf32>
    %358 = math.exp %357 : vector<8x128xf32>
    %cst_78 = arith.constant 1.000000e+00 : f32
    %359 = vector.broadcast %cst_78 : f32 to vector<8x128xf32>
    %360 = arith.addf %359, %358 : vector<8x128xf32>
    %361 = arith.divf %359, %360 : vector<8x128xf32>
    %362 = arith.mulf %353, %305 : vector<8x128xf32>
    %363 = arith.mulf %347, %355 : vector<8x128xf32>
    %364 = arith.addf %362, %363 : vector<8x128xf32>
    %365 = math.tanh %364 : vector<8x128xf32>
    %366 = arith.mulf %361, %365 : vector<8x128xf32>
    %c6_i32 = arith.constant 6 : i32
    %cst_79 = arith.constant dense<0.000000e+00> : vector<8x512xf32>
    %367 = tpu.matmul %338, %7, %cst_79 {dimension_numbers = #tpu.dot_dimension_numbers<[1], [0], [0], [1], [0, 0, 1, 1], [], []>} : vector<8x128xf32>, vector<128x512xf32>, vector<8x512xf32> -> vector<8x512xf32>
    %cst_80 = arith.constant dense<0.000000e+00> : vector<8x512xf32>
    %368 = tpu.matmul %366, %8, %cst_80 {dimension_numbers = #tpu.dot_dimension_numbers<[1], [0], [0], [1], [0, 0, 1, 1], [], []>} : vector<8x128xf32>, vector<128x512xf32>, vector<8x512xf32> -> vector<8x512xf32>
    %369 = arith.index_cast %c6_i32 : i32 to index
    %c0_81 = arith.constant 0 : index
    %c0_82 = arith.constant 0 : index
    %370 = vector.load %arg2[%369, %c0_81, %c0_82] : memref<8x8x512xf32, #tpu.memory_space<vmem>>, vector<1x8x512xf32>
    %371 = vector.shape_cast %370 : vector<1x8x512xf32> to vector<8x512xf32>
    %372 = arith.addf %371, %367 : vector<8x512xf32>
    %373 = vector.extract_strided_slice %372 {offsets = [0, 0], sizes = [8, 128], strides = [1, 1]} : vector<8x512xf32> to vector<8x128xf32>
    %374 = arith.negf %373 : vector<8x128xf32>
    %375 = math.exp %374 : vector<8x128xf32>
    %cst_83 = arith.constant 1.000000e+00 : f32
    %376 = vector.broadcast %cst_83 : f32 to vector<8x128xf32>
    %377 = arith.addf %376, %375 : vector<8x128xf32>
    %378 = arith.divf %376, %377 : vector<8x128xf32>
    %379 = vector.extract_strided_slice %372 {offsets = [0, 128], sizes = [8, 128], strides = [1, 1]} : vector<8x512xf32> to vector<8x128xf32>
    %380 = arith.negf %379 : vector<8x128xf32>
    %381 = math.exp %380 : vector<8x128xf32>
    %cst_84 = arith.constant 1.000000e+00 : f32
    %382 = vector.broadcast %cst_84 : f32 to vector<8x128xf32>
    %383 = arith.addf %382, %381 : vector<8x128xf32>
    %384 = arith.divf %382, %383 : vector<8x128xf32>
    %385 = vector.extract_strided_slice %372 {offsets = [0, 256], sizes = [8, 128], strides = [1, 1]} : vector<8x512xf32> to vector<8x128xf32>
    %386 = math.tanh %385 : vector<8x128xf32>
    %387 = vector.extract_strided_slice %372 {offsets = [0, 384], sizes = [8, 128], strides = [1, 1]} : vector<8x512xf32> to vector<8x128xf32>
    %388 = arith.negf %387 : vector<8x128xf32>
    %389 = math.exp %388 : vector<8x128xf32>
    %cst_85 = arith.constant 1.000000e+00 : f32
    %390 = vector.broadcast %cst_85 : f32 to vector<8x128xf32>
    %391 = arith.addf %390, %389 : vector<8x128xf32>
    %392 = arith.divf %390, %391 : vector<8x128xf32>
    %393 = arith.mulf %384, %336 : vector<8x128xf32>
    %394 = arith.mulf %378, %386 : vector<8x128xf32>
    %395 = arith.addf %393, %394 : vector<8x128xf32>
    %396 = math.tanh %395 : vector<8x128xf32>
    %397 = arith.mulf %392, %396 : vector<8x128xf32>
    %cst_86 = arith.constant dense<0.000000e+00> : vector<8x512xf32>
    %398 = tpu.matmul %397, %9, %cst_86 {dimension_numbers = #tpu.dot_dimension_numbers<[1], [0], [0], [1], [0, 0, 1, 1], [], []>} : vector<8x128xf32>, vector<128x512xf32>, vector<8x512xf32> -> vector<8x512xf32>
    %399 = arith.addf %398, %368 : vector<8x512xf32>
    %400 = arith.addf %399, %12 : vector<8x512xf32>
    %401 = vector.extract_strided_slice %400 {offsets = [0, 0], sizes = [8, 128], strides = [1, 1]} : vector<8x512xf32> to vector<8x128xf32>
    %402 = arith.negf %401 : vector<8x128xf32>
    %403 = math.exp %402 : vector<8x128xf32>
    %cst_87 = arith.constant 1.000000e+00 : f32
    %404 = vector.broadcast %cst_87 : f32 to vector<8x128xf32>
    %405 = arith.addf %404, %403 : vector<8x128xf32>
    %406 = arith.divf %404, %405 : vector<8x128xf32>
    %407 = vector.extract_strided_slice %400 {offsets = [0, 128], sizes = [8, 128], strides = [1, 1]} : vector<8x512xf32> to vector<8x128xf32>
    %408 = arith.negf %407 : vector<8x128xf32>
    %409 = math.exp %408 : vector<8x128xf32>
    %cst_88 = arith.constant 1.000000e+00 : f32
    %410 = vector.broadcast %cst_88 : f32 to vector<8x128xf32>
    %411 = arith.addf %410, %409 : vector<8x128xf32>
    %412 = arith.divf %410, %411 : vector<8x128xf32>
    %413 = vector.extract_strided_slice %400 {offsets = [0, 256], sizes = [8, 128], strides = [1, 1]} : vector<8x512xf32> to vector<8x128xf32>
    %414 = math.tanh %413 : vector<8x128xf32>
    %415 = vector.extract_strided_slice %400 {offsets = [0, 384], sizes = [8, 128], strides = [1, 1]} : vector<8x512xf32> to vector<8x128xf32>
    %416 = arith.negf %415 : vector<8x128xf32>
    %417 = math.exp %416 : vector<8x128xf32>
    %cst_89 = arith.constant 1.000000e+00 : f32
    %418 = vector.broadcast %cst_89 : f32 to vector<8x128xf32>
    %419 = arith.addf %418, %417 : vector<8x128xf32>
    %420 = arith.divf %418, %419 : vector<8x128xf32>
    %421 = arith.mulf %412, %364 : vector<8x128xf32>
    %422 = arith.mulf %406, %414 : vector<8x128xf32>
    %423 = arith.addf %421, %422 : vector<8x128xf32>
    %424 = math.tanh %423 : vector<8x128xf32>
    %425 = arith.mulf %420, %424 : vector<8x128xf32>
    %c7_i32 = arith.constant 7 : i32
    %cst_90 = arith.constant dense<0.000000e+00> : vector<8x512xf32>
    %426 = tpu.matmul %397, %7, %cst_90 {dimension_numbers = #tpu.dot_dimension_numbers<[1], [0], [0], [1], [0, 0, 1, 1], [], []>} : vector<8x128xf32>, vector<128x512xf32>, vector<8x512xf32> -> vector<8x512xf32>
    %cst_91 = arith.constant dense<0.000000e+00> : vector<8x512xf32>
    %427 = tpu.matmul %425, %8, %cst_91 {dimension_numbers = #tpu.dot_dimension_numbers<[1], [0], [0], [1], [0, 0, 1, 1], [], []>} : vector<8x128xf32>, vector<128x512xf32>, vector<8x512xf32> -> vector<8x512xf32>
    %428 = arith.index_cast %c7_i32 : i32 to index
    %c0_92 = arith.constant 0 : index
    %c0_93 = arith.constant 0 : index
    %429 = vector.load %arg2[%428, %c0_92, %c0_93] : memref<8x8x512xf32, #tpu.memory_space<vmem>>, vector<1x8x512xf32>
    %430 = vector.shape_cast %429 : vector<1x8x512xf32> to vector<8x512xf32>
    %431 = arith.addf %430, %426 : vector<8x512xf32>
    %432 = vector.extract_strided_slice %431 {offsets = [0, 0], sizes = [8, 128], strides = [1, 1]} : vector<8x512xf32> to vector<8x128xf32>
    %433 = arith.negf %432 : vector<8x128xf32>
    %434 = math.exp %433 : vector<8x128xf32>
    %cst_94 = arith.constant 1.000000e+00 : f32
    %435 = vector.broadcast %cst_94 : f32 to vector<8x128xf32>
    %436 = arith.addf %435, %434 : vector<8x128xf32>
    %437 = arith.divf %435, %436 : vector<8x128xf32>
    %438 = vector.extract_strided_slice %431 {offsets = [0, 128], sizes = [8, 128], strides = [1, 1]} : vector<8x512xf32> to vector<8x128xf32>
    %439 = arith.negf %438 : vector<8x128xf32>
    %440 = math.exp %439 : vector<8x128xf32>
    %cst_95 = arith.constant 1.000000e+00 : f32
    %441 = vector.broadcast %cst_95 : f32 to vector<8x128xf32>
    %442 = arith.addf %441, %440 : vector<8x128xf32>
    %443 = arith.divf %441, %442 : vector<8x128xf32>
    %444 = vector.extract_strided_slice %431 {offsets = [0, 256], sizes = [8, 128], strides = [1, 1]} : vector<8x512xf32> to vector<8x128xf32>
    %445 = math.tanh %444 : vector<8x128xf32>
    %446 = vector.extract_strided_slice %431 {offsets = [0, 384], sizes = [8, 128], strides = [1, 1]} : vector<8x512xf32> to vector<8x128xf32>
    %447 = arith.negf %446 : vector<8x128xf32>
    %448 = math.exp %447 : vector<8x128xf32>
    %cst_96 = arith.constant 1.000000e+00 : f32
    %449 = vector.broadcast %cst_96 : f32 to vector<8x128xf32>
    %450 = arith.addf %449, %448 : vector<8x128xf32>
    %451 = arith.divf %449, %450 : vector<8x128xf32>
    %452 = arith.mulf %443, %395 : vector<8x128xf32>
    %453 = arith.mulf %437, %445 : vector<8x128xf32>
    %454 = arith.addf %452, %453 : vector<8x128xf32>
    %455 = math.tanh %454 : vector<8x128xf32>
    %456 = arith.mulf %451, %455 : vector<8x128xf32>
    %cst_97 = arith.constant dense<0.000000e+00> : vector<8x512xf32>
    %457 = tpu.matmul %456, %9, %cst_97 {dimension_numbers = #tpu.dot_dimension_numbers<[1], [0], [0], [1], [0, 0, 1, 1], [], []>} : vector<8x128xf32>, vector<128x512xf32>, vector<8x512xf32> -> vector<8x512xf32>
    %458 = arith.addf %457, %427 : vector<8x512xf32>
    %459 = arith.addf %458, %12 : vector<8x512xf32>
    %460 = vector.extract_strided_slice %459 {offsets = [0, 0], sizes = [8, 128], strides = [1, 1]} : vector<8x512xf32> to vector<8x128xf32>
    %461 = arith.negf %460 : vector<8x128xf32>
    %462 = math.exp %461 : vector<8x128xf32>
    %cst_98 = arith.constant 1.000000e+00 : f32
    %463 = vector.broadcast %cst_98 : f32 to vector<8x128xf32>
    %464 = arith.addf %463, %462 : vector<8x128xf32>
    %465 = arith.divf %463, %464 : vector<8x128xf32>
    %466 = vector.extract_strided_slice %459 {offsets = [0, 128], sizes = [8, 128], strides = [1, 1]} : vector<8x512xf32> to vector<8x128xf32>
    %467 = arith.negf %466 : vector<8x128xf32>
    %468 = math.exp %467 : vector<8x128xf32>
    %cst_99 = arith.constant 1.000000e+00 : f32
    %469 = vector.broadcast %cst_99 : f32 to vector<8x128xf32>
    %470 = arith.addf %469, %468 : vector<8x128xf32>
    %471 = arith.divf %469, %470 : vector<8x128xf32>
    %472 = vector.extract_strided_slice %459 {offsets = [0, 256], sizes = [8, 128], strides = [1, 1]} : vector<8x512xf32> to vector<8x128xf32>
    %473 = math.tanh %472 : vector<8x128xf32>
    %474 = vector.extract_strided_slice %459 {offsets = [0, 384], sizes = [8, 128], strides = [1, 1]} : vector<8x512xf32> to vector<8x128xf32>
    %475 = arith.negf %474 : vector<8x128xf32>
    %476 = math.exp %475 : vector<8x128xf32>
    %cst_100 = arith.constant 1.000000e+00 : f32
    %477 = vector.broadcast %cst_100 : f32 to vector<8x128xf32>
    %478 = arith.addf %477, %476 : vector<8x128xf32>
    %479 = arith.divf %477, %478 : vector<8x128xf32>
    %480 = arith.mulf %471, %423 : vector<8x128xf32>
    %481 = arith.mulf %465, %473 : vector<8x128xf32>
    %482 = arith.addf %480, %481 : vector<8x128xf32>
    %483 = math.tanh %482 : vector<8x128xf32>
    %484 = arith.mulf %479, %483 : vector<8x128xf32>
    %c8_i32 = arith.constant 8 : i32
    %c0_101 = arith.constant 0 : index
    %c0_102 = arith.constant 0 : index
    %485 = vector.load %arg10[%c0_101, %c0_102] : memref<8x512xf32, #tpu.memory_space<vmem>>, vector<8x128xf32>
    tpu.vector_store %arg10[%c0_101, %c0_102], %456 {strides = array<i32>} : memref<8x512xf32, #tpu.memory_space<vmem>>, vector<8x128xf32>,
    %c0_103 = arith.constant 0 : index
    %c128_104 = arith.constant 128 : index
    %486 = vector.load %arg10[%c0_103, %c128_104] : memref<8x512xf32, #tpu.memory_space<vmem>>, vector<8x128xf32>
    tpu.vector_store %arg10[%c0_103, %c128_104], %484 {strides = array<i32>} : memref<8x512xf32, #tpu.memory_space<vmem>>, vector<8x128xf32>,
    %c0_105 = arith.constant 0 : index
    %c256_106 = arith.constant 256 : index
    %487 = vector.load %arg10[%c0_105, %c256_106] : memref<8x512xf32, #tpu.memory_space<vmem>>, vector<8x128xf32>
    tpu.vector_store %arg10[%c0_105, %c256_106], %454 {strides = array<i32>} : memref<8x512xf32, #tpu.memory_space<vmem>>, vector<8x128xf32>,
    %c0_107 = arith.constant 0 : index
    %c384_108 = arith.constant 384 : index
    %488 = vector.load %arg10[%c0_107, %c384_108] : memref<8x512xf32, #tpu.memory_space<vmem>>, vector<8x128xf32>
    tpu.vector_store %arg10[%c0_107, %c384_108], %482 {strides = array<i32>} : memref<8x512xf32, #tpu.memory_space<vmem>>, vector<8x128xf32>,
    %c0_i32_109 = arith.constant 0 : i32
    %489 = arith.cmpi eq, %arg1, %c0_i32_109 : i32
    %490 = arith.extui %489 : i1 to i32
    %c0_i32_110 = arith.constant 0 : i32
    %491 = arith.cmpi ne, %490, %c0_i32_110 : i32
    scf.if %491 {
      %c0_111 = arith.constant 0 : index
      %c0_112 = arith.constant 0 : index
      %492 = vector.load %arg7[%c0_111, %c0_112] : memref<128x128xf32, #tpu.memory_space<vmem>>, vector<128x128xf32>
      %cst_113 = arith.constant dense<0.000000e+00> : vector<8x128xf32>
      %493 = tpu.matmul %484, %492, %cst_113 {dimension_numbers = #tpu.dot_dimension_numbers<[1], [0], [0], [1], [0, 0, 1, 1], [], []>} : vector<8x128xf32>, vector<128x128xf32>, vector<8x128xf32> -> vector<8x128xf32>
      %c0_114 = arith.constant 0 : index
      %c0_115 = arith.constant 0 : index
      %494 = vector.load %arg8[%c0_114, %c0_115] : memref<1x128xf32, #tpu.memory_space<vmem>>, vector<1x128xf32>
      %495 = vector.broadcast %494 : vector<1x128xf32> to vector<8x128xf32>
      %496 = arith.addf %493, %495 : vector<8x128xf32>
      %c0_116 = arith.constant 0 : index
      %c0_117 = arith.constant 0 : index
      %497 = vector.load %arg9[%c0_116, %c0_117] : memref<8x128xf32, #tpu.memory_space<vmem>>, vector<8x128xf32>
      tpu.vector_store %arg9[%c0_116, %c0_117], %496 {strides = array<i32>} : memref<8x128xf32, #tpu.memory_space<vmem>>, vector<8x128xf32>,
    } else {
    }
    return
  }
  func.func @transform_0(%arg0: i32, %arg1: i32) -> (i32, i32, i32) {
    %c0_i32 = arith.constant 0 : i32
    %c0_i32_0 = arith.constant 0 : i32
    return %arg1, %arg0, %c0_i32 : i32, i32, i32
  }
  func.func @transform_1(%arg0: i32, %arg1: i32) -> (i32, i32) {
    %c0_i32 = arith.constant 0 : i32
    %c0_i32_0 = arith.constant 0 : i32
    %c0_i32_1 = arith.constant 0 : i32
    return %c0_i32, %c0_i32_0 : i32, i32
  }
  func.func @transform_2(%arg0: i32, %arg1: i32) -> (i32, i32) {
    %c0_i32 = arith.constant 0 : i32
    %c0_i32_0 = arith.constant 0 : i32
    %c0_i32_1 = arith.constant 0 : i32
    return %c0_i32, %c0_i32_0 : i32, i32
  }
  func.func @transform_3(%arg0: i32, %arg1: i32) -> (i32, i32) {
    %c0_i32 = arith.constant 0 : i32
    %c0_i32_0 = arith.constant 0 : i32
    %c0_i32_1 = arith.constant 0 : i32
    return %c0_i32, %c0_i32_0 : i32, i32
  }
  func.func @transform_4(%arg0: i32, %arg1: i32) -> (i32, i32) {
    %c0_i32 = arith.constant 0 : i32
    %c0_i32_0 = arith.constant 0 : i32
    %c0_i32_1 = arith.constant 0 : i32
    return %c0_i32, %c0_i32_0 : i32, i32
  }
  func.func @transform_5(%arg0: i32, %arg1: i32) -> (i32, i32) {
    %c0_i32 = arith.constant 0 : i32
    %c0_i32_0 = arith.constant 0 : i32
    %c0_i32_1 = arith.constant 0 : i32
    return %c0_i32, %c0_i32_0 : i32, i32
  }
  func.func @transform_6(%arg0: i32, %arg1: i32) -> (i32, i32) {
    %c0_i32 = arith.constant 0 : i32
    %c0_i32_0 = arith.constant 0 : i32
    %c0_i32_1 = arith.constant 0 : i32
    return %c0_i32, %c0_i32_0 : i32, i32
  }
  func.func @transform_7(%arg0: i32, %arg1: i32) -> (i32, i32) {
    %c0_i32 = arith.constant 0 : i32
    %c0_i32_0 = arith.constant 0 : i32
    return %arg0, %c0_i32 : i32, i32
  }
}

</mosaic_0001>

<bundles_post_ra>
// kernel: lstm_emo_forward.1
= control target key start
LH: loop header
LB: loop body
LE: loop exit
PB: predicated region body
PF: predicated region fallthrough
CT: control target
= control target key end

     0   :  { %12 = vsyncpa [#allocation4], 0  ;;  %s5255_s24 = smov [#allocation3]   ;;  %s10271_s0 = inlined_call_operand.vmem [shape: f32[8,8,512], index: 0, kind: input, shape index: {}]   ;;  %s10272_s1 = inlined_call_operand.vmem [shape: f32[128,512], index: 1, kind: input, shape index: {}]   ;;  %s10273_s2 = inlined_call_operand.vmem [shape: f32[128,512], index: 2, kind: input, shape index: {}]   ;;  %s10274_s3 = inlined_call_operand.hbm [shape: f32[128,512], index: 3, kind: input, shape index: {}]   ;;  %s10275_s4 = inlined_call_operand.vmem [shape: f32[1,512], index: 4, kind: input, shape index: {}]   ;;  %s10276_s5 = inlined_call_operand.vmem [shape: f32[128,128], index: 5, kind: input, shape index: {}]   ;;  %s10277_s6 = inlined_call_operand.vmem [shape: f32[1,128], index: 6, kind: input, shape index: {}]   ;;  %s10278_s7 = inlined_call_operand.vmem [shape: f32[8,128], index: 7, kind: output, shape index: {}]  }
   0x1   :  { %s24_s25 = sshll.u32 %s5255_s24, 4  ;;  %s25_s25 = int_to_ptr.vmem [resolvable:$true] %s24_s25 }
   0x2   :  { %s5241_s26 = scalar_lea.vmem %s25_s25, 8192  ;;  %p5246_p1 = scmp.lt.s32.totalorder %s25_s25, %s25_s25 }
   0x3   :  { %p5242_p0 = scmp.ne.s32.totalorder %s25_s25, %s5241_s26  ;;  %p5247_p2 = scmp.lt.s32.totalorder %s5241_s26, %s5241_s26 }
   0x5   :  { %p5248_p3 = por %p5247_p2, %p5246_p1 }
   0x7   :  { %p5249_p4 = pnand %p5248_p3, %p5242_p0 }
   0x9   :  { %5252 = shalt.err (!%p5249_p4)
}
   0xa   :  { %s5256_s27 = smov 512   ;;  %s5257_s28 = smov 32  }
   0xb   :  { %30 = dma.hbm_to_vmem [thread:$0]  %s10274_s3, 8192, %s25_s25, [#allocation4], %s5256_s27, %s5256_s27, %s5257_s28  }
   0xc   :  { %5253 = dma.done.wait [#allocation4], 8192  }
   0xd   :  { %5254 = vsyncadd [#allocation4], 4294959104  ;;  %v10279_v0 = vmov 0.0   ;;  %v5308_v1 = vld [vmem:[%s10272_s1 + $0x1e8] sm:$0xff]  ;;  %v5313_v2 = vld [vmem:[%s10272_s1 + $0x1e0] sm:$0xff]  ;;  %vm5259_vm0 = vmmov 0  }
   0xe   :  { %330 = vmatprep.mubr.f32.mxu0 %v10279_v0  ;;  %401 = vmatprep.mubr.f32.mxu1 %v10279_v0  ;;  %v5318_v3 = vld [vmem:[%s10272_s1 + $0x1c8] sm:$0xff]  ;;  %v5324_v4 = vld [vmem:[%s10272_s1 + $0x1c0] sm:$0xff]  ;;  %v5353_v9 = vld [vmem:[%s10272_s1 + $0x1f8] sm:$0xff] }
   0xf   :  { %266 = vmatprep.subr.mxu0 %v5308_v1  ;;  %v5330_v5 = vld [vmem:[%s10272_s1 + $0x1a8] sm:$0xff]  ;;  %v5336_v6 = vld [vmem:[%s10272_s1 + $0x1a0] sm:$0xff]  ;;  %337 = vmatprep.subr.mxu1 %v5353_v9  ;;  %v5365_v11 = vld [vmem:[%s10272_s1 + $0x1f0] sm:$0xff] }
  0x10   :  { %267 = vmatpush1.msra.mxu0 %v5313_v2  ;;  %v5342_v7 = vld [vmem:[%s10272_s1 + $0x188] sm:$0xff]  ;;  %v5348_v8 = vld [vmem:[%s10272_s1 + $0x180] sm:$0xff]  ;;  %338 = vmatpush1.msra.mxu1 %v5365_v11  ;;  %v5377_v13 = vld [vmem:[%s10272_s1 + $0x1d8] sm:$0xff] }
  0x11   :  { %268 = vmatprep.subr.mxu0 %v5318_v3  ;;  %v5359_v10 = vld [vmem:[%s10272_s1 + $0x168] sm:$0xff]  ;;  %v5371_v12 = vld [vmem:[%s10272_s1 + $0x160] sm:$0xff]  ;;  %v5382_v14 = vld [vmem:[%s10272_s1 + $0x1d0] sm:$0xff]  ;;  %339 = vmatprep.subr.mxu1 %v5377_v13 }
  0x12   :  { %269 = vmatpush1.msra.mxu0 %v5324_v4  ;;  %v5388_v15 = vld [vmem:[%s10272_s1 + $0x148] sm:$0xff]  ;;  %v5394_v16 = vld [vmem:[%s10272_s1 + $0x1b8] sm:$0xff]  ;;  %v5400_v17 = vld [vmem:[%s10272_s1 + $0x140] sm:$0xff]  ;;  %340 = vmatpush1.msra.mxu1 %v5382_v14 }
  0x13   :  { %270 = vmatprep.subr.mxu0 %v5330_v5  ;;  %v5406_v18 = vld [vmem:[%s10272_s1 + $0x1b0] sm:$0xff]  ;;  %v5411_v19 = vld [vmem:[%s10272_s1 + $0x198] sm:$0xff]  ;;  %v5417_v20 = vld [vmem:[%s10272_s1 + $0x128] sm:$0xff]  ;;  %341 = vmatprep.subr.mxu1 %v5394_v16 }
  0x14   :  { %271 = vmatpush1.msra.mxu0 %v5336_v6  ;;  %v5423_v21 = vld [vmem:[%s10272_s1 + $0x190] sm:$0xff]  ;;  %v5429_v22 = vld [vmem:[%s10272_s1 + $0x120] sm:$0xff]  ;;  %342 = vmatpush1.msra.mxu1 %v5406_v18  ;;  %v5435_v23 = vld [vmem:[%s10272_s1 + $0x178] sm:$0xff] }
  0x15   :  { %272 = vmatprep.subr.mxu0 %v5342_v7  ;;  %v5441_v24 = vld [vmem:[%s10272_s1 + $0x108] sm:$0xff]  ;;  %343 = vmatprep.subr.mxu1 %v5411_v19  ;;  %v5447_v25 = vld [vmem:[%s10272_s1 + $0x170] sm:$0xff]  ;;  %v5453_v26 = vld [vmem:[%s10272_s1 + $0x100] sm:$0xff] }
  0x16   :  { %273 = vmatpush1.msra.mxu0 %v5348_v8  ;;  %344 = vmatpush1.msra.mxu1 %v5423_v21  ;;  %v5459_v27 = vld [vmem:[%s10272_s1 + $0x158] sm:$0xff]  ;;  %v5465_v28 = vld [vmem:[%s10272_s1 + $0xe8] sm:$0xff]  ;;  %v5471_v29 = vld [vmem:[%s10272_s1 + $0x150] sm:$0xff] }
  0x17   :  { %274 = vmatprep.subr.mxu0 %v5359_v10  ;;  %345 = vmatprep.subr.mxu1 %v5435_v23  ;;  %v5477_v30 = vld [vmem:[%s10272_s1 + $0xe0] sm:$0xff]  ;;  %v5483_v31 = vld [vmem:[%s10272_s1 + $0x138] sm:$0xff]  ;;  %v5489_v32 = vld [vmem:[%s10272_s1 + $0xc8] sm:$0xff] }
  0x18   :  { %275 = vmatpush1.msra.mxu0 %v5371_v12  ;;  %346 = vmatpush1.msra.mxu1 %v5447_v25  ;;  %v5495_v33 = vld [vmem:[%s10272_s1 + $0x130] sm:$0xff]  ;;  %v5501_v34 = vld [vmem:[%s10272_s1 + $0xc0] sm:$0xff]  ;;  %v5507_v35 = vld [vmem:[%s10272_s1 + $0x118] sm:$0xff] }
  0x19   :  { %276 = vmatprep.subr.mxu0 %v5388_v15  ;;  %347 = vmatprep.subr.mxu1 %v5459_v27  ;;  %v5513_v36 = vld [vmem:[%s10272_s1 + $0xa8] sm:$0xff]  ;;  %v5519_v37 = vld [vmem:[%s10272_s1 + $0x110] sm:$0xff]  ;;  %v5525_v38 = vld [vmem:[%s10272_s1 + $0xa0] sm:$0xff] }
  0x1a   :  { %277 = vmatpush1.msra.mxu0 %v5400_v17  ;;  %348 = vmatpush1.msra.mxu1 %v5471_v29  ;;  %v5531_v39 = vld [vmem:[%s10272_s1 + $0xf8] sm:$0xff]  ;;  %v5537_v40 = vld [vmem:[%s10272_s1 + $0x88] sm:$0xff]  ;;  %v5543_v41 = vld [vmem:[%s10272_s1 + $0xf0] sm:$0xff] }
  0x1b   :  { %278 = vmatprep.subr.mxu0 %v5417_v20  ;;  %349 = vmatprep.subr.mxu1 %v5483_v31  ;;  %v5549_v42 = vld [vmem:[%s10272_s1 + $0x80] sm:$0xff]  ;;  %v5555_v43 = vld [vmem:[%s10272_s1 + $0xd8] sm:$0xff]  ;;  %v5561_v44 = vld [vmem:[%s10272_s1 + $0x68] sm:$0xff] }
  0x1c   :  { %279 = vmatpush1.msra.mxu0 %v5429_v22  ;;  %350 = vmatpush1.msra.mxu1 %v5495_v33  ;;  %10841 = vst [vmem:[#allocation6_spill] sm:$0xff] %v5561_v44  ;;  %v5567_v45 = vld [vmem:[%s10272_s1 + $0xd0] sm:$0xff]  ;;  %v5573_v46 = vld [vmem:[%s10272_s1 + $0x60] sm:$0xff]  ;;  %v5579_v47 = vld [vmem:[%s10272_s1 + $0xb8] sm:$0xff] }
  0x1d   :  { %280 = vmatprep.subr.mxu0 %v5441_v24  ;;  %351 = vmatprep.subr.mxu1 %v5507_v35  ;;  %10842 = vst [vmem:[#allocation7_spill] sm:$0xff] %v5573_v46  ;;  %v5585_v48 = vld [vmem:[%s10272_s1 + $0x48] sm:$0xff]  ;;  %v5591_v49 = vld [vmem:[%s10272_s1 + $0xb0] sm:$0xff]  ;;  %v5597_v50 = vld [vmem:[%s10272_s1 + $0x40] sm:$0xff] }
  0x1e   :  { %281 = vmatpush1.msra.mxu0 %v5453_v26  ;;  %352 = vmatpush1.msra.mxu1 %v5519_v37  ;;  %10843 = vst [vmem:[#allocation8_spill] sm:$0xff] %v5585_v48  ;;  %10844 = vst [vmem:[#allocation9_spill] sm:$0xff] %v5597_v50  ;;  %v5603_v51 = vld [vmem:[%s10272_s1 + $0x98] sm:$0xff]  ;;  %v5609_v52 = vld [vmem:[%s10272_s1 + $0x28] sm:$0xff] }
  0x1f   :  { %282 = vmatprep.subr.mxu0 %v5465_v28  ;;  %353 = vmatprep.subr.mxu1 %v5531_v39  ;;  %10845 = vst [vmem:[#allocation10_spill] sm:$0xff] %v5609_v52  ;;  %v5615_v53 = vld [vmem:[%s10272_s1 + $0x90] sm:$0xff]  ;;  %v5621_v54 = vld [vmem:[%s10272_s1 + $0x20] sm:$0xff]  ;;  %v5627_v55 = vld [vmem:[%s10272_s1 + $0x78] sm:$0xff] }
  0x20   :  { %283 = vmatpush1.msra.mxu0 %v5477_v30  ;;  %354 = vmatpush1.msra.mxu1 %v5543_v41  ;;  %10846 = vst [vmem:[#allocation11_spill] sm:$0xff] %v5615_v53  ;;  %10847 = vst [vmem:[#allocation12_spill] sm:$0xff] %v5621_v54  ;;  %v5633_v56 = vld [vmem:[%s10272_s1 + $0x8] sm:$0xff]  ;;  %v5639_v57 = vld [vmem:[%s10272_s1 + $0x70] sm:$0xff] }
  0x21   :  { %284 = vmatprep.subr.mxu0 %v5489_v32  ;;  %355 = vmatprep.subr.mxu1 %v5555_v43  ;;  %10848 = vst [vmem:[#allocation13_spill] sm:$0xff] %v5627_v55  ;;  %10849 = vst [vmem:[#allocation14_spill] sm:$0xff] %v5633_v56  ;;  %v5645_v58 = vld [vmem:[%s10272_s1] sm:$0xff]  ;;  %v5651_v59 = vld [vmem:[%s10272_s1 + $0x58] sm:$0xff] }
  0x22   :  { %285 = vmatpush1.msra.mxu0 %v5501_v34  ;;  %356 = vmatpush1.msra.mxu1 %v5567_v45  ;;  %10850 = vst [vmem:[#allocation15_spill] sm:$0xff] %v5639_v57  ;;  %10851 = vst [vmem:[#allocation16_spill] sm:$0xff] %v5645_v58  ;;  %v5658_v60 = vld [vmem:[%s10272_s1 + $0x50] sm:$0xff]  ;;  %v5665_v61 = vld [vmem:[%s10272_s1 + $0x38] sm:$0xff] }
  0x23   :  { %286 = vmatprep.subr.mxu0 %v5513_v36  ;;  %357 = vmatprep.subr.mxu1 %v5579_v47  ;;  %10852 = vst [vmem:[#allocation17_spill] sm:$0xff] %v5651_v59  ;;  %10853 = vst [vmem:[#allocation18_spill] sm:$0xff] %v5658_v60  ;;  %v5670_v62 = vld [vmem:[%s10273_s2 + $0x1e8] sm:$0xff]  ;;  %v5677_v63 = vld [vmem:[%s10272_s1 + $0x30] sm:$0xff] }
  0x24   :  { %287 = vmatpush1.msra.mxu0 %v5525_v38  ;;  %358 = vmatpush1.msra.mxu1 %v5591_v49  ;;  %10854 = vst [vmem:[#allocation19_spill] sm:$0xff] %v5665_v61  ;;  %10855 = vst [vmem:[#allocation20_spill] sm:$0xff] %v5670_v62  ;;  %v5682_v0 = vld [vmem:[%s10273_s2 + $0x1e0] sm:$0xff] }
  0x25   :  { %288 = vmatprep.subr.mxu0 %v5537_v40  ;;  %359 = vmatprep.subr.mxu1 %v5603_v51  ;;  %10856 = vst [vmem:[#allocation21_spill] sm:$0xff] %v5677_v63  ;;  %10857 = vst [vmem:[#allocation22_spill] sm:$0xff] %v5682_v0 }
  0x26   :  { %289 = vmatpush1.msra.mxu0 %v5549_v42  ;;  %360 = vmatpush1.msra.mxu1 %v5615_v53 }
  0x27   :  { %290 = vmatprep.subr.mxu0 %v5561_v44  ;;  %361 = vmatprep.subr.mxu1 %v5627_v55 }
  0x28   :  { %291 = vmatpush1.msra.mxu0 %v5573_v46  ;;  %362 = vmatpush1.msra.mxu1 %v5639_v57 }
  0x29   :  { %292 = vmatprep.subr.mxu0 %v5585_v48  ;;  %363 = vmatprep.subr.mxu1 %v5651_v59  ;;  %v6108_v59 = vld [vmem:[#allocation3 + $0x1b0] sm:$0xff] }
  0x2a   :  { %293 = vmatpush1.msra.mxu0 %v5597_v50  ;;  %364 = vmatpush1.msra.mxu1 %v5658_v60  ;;  %v5706_v60 = vld [vmem:[%s10273_s2 + $0x1c0] sm:$0xff]  ;;  %v5712_v50 = vld [vmem:[%s10273_s2 + $0x1f8] sm:$0xff]  ;;  %10934 = vst [vmem:[#allocation98_spill] sm:$0xff] %v6108_v59  ;;  %v6204_v48 = vld [vmem:[#allocation3 + $0xb0] sm:$0xff] }
  0x2b   :  { %294 = vmatprep.subr.mxu0 %v5609_v52  ;;  %365 = vmatprep.subr.mxu1 %v5665_v61  ;;  %v5700_v52 = vld [vmem:[%s10272_s1 + $0x10] sm:$0xff]  ;;  %10862 = vst [vmem:[#allocation26_spill] sm:$0xff] %v5706_v60  ;;  %10863 = vst [vmem:[#allocation27_spill] sm:$0xff] %v5712_v50  ;;  %v6100_v61 = vld [vmem:[#allocation3 + $0x1a8] sm:$0xff] }
  0x2c   :  { %295 = vmatpush1.msra.mxu0 %v5621_v54  ;;  %v5694_v54 = vld [vmem:[%s10273_s2 + $0x1c8] sm:$0xff]  ;;  %10861 = vst [vmem:[#allocation25_spill] sm:$0xff] %v5700_v52  ;;  %366 = vmatpush1.msra.mxu1 %v5677_v63  ;;  %10931 = vst [vmem:[#allocation95_spill] sm:$0xff] %v6100_v61 }
  0x2d   :  { %296 = vmatprep.subr.mxu0 %v5633_v56  ;;  %v10858_v56 = vmov 0.0   ;;  %10860 = vst [vmem:[#allocation24_spill] sm:$0xff] %v5694_v54  ;;  %v5725_v63 = vld [vmem:[%s10273_s2 + $0x1a8] sm:$0xff]  ;;  %10966 = vst [vmem:[#allocation130_spill] sm:$0xff] %v6204_v48 }
  0x2e   :  { %297 = vmatpush1.msra.mxu0 %v5645_v58  ;;  %v5689_v58 = vld [vmem:[%s10272_s1 + $0x18] sm:$0xff]  ;;  %10865 = vst [vmem:[#allocation29_spill] sm:$0xff] %v5725_v63 }
  0x2f   :  { %331 = vmatmul.mubr.f32.vlgmr.msra.gmra.mxu0 %v10858_v56  ;;  %10859 = vst [vmem:[#allocation23_spill] sm:$0xff] %v5689_v58  ;;  %408 = vmatprep.subr.mxu0 %v5670_v62  ;;  %v5719_v62 = vld [vmem:[%s10273_s2 + $0x1f0] sm:$0xff] }
  0x30   :  { %409 = vmatpush1.msra.mxu0 %v5682_v0  ;;  %367 = vmatprep.subr.mxu1 %v5689_v58  ;;  %10864 = vst [vmem:[#allocation28_spill] sm:$0xff] %v5719_v62  ;;  %v5731_v0 = vld [vmem:[%s10273_s2 + $0x1d8] sm:$0xff]  ;;  %v5737_v58 = vld [vmem:[%s10273_s2 + $0x1a0] sm:$0xff] }
  0x31   :  { %410 = vmatprep.subr.mxu0 %v5694_v54  ;;  %368 = vmatpush1.msra.mxu1 %v5700_v52  ;;  %10866 = vst [vmem:[#allocation30_spill] sm:$0xff] %v5731_v0  ;;  %10867 = vst [vmem:[#allocation31_spill] sm:$0xff] %v5737_v58  ;;  %v5744_v54 = vld [vmem:[%s10273_s2 + $0x1d0] sm:$0xff]  ;;  %v5749_v52 = vld [vmem:[%s10273_s2 + $0x188] sm:$0xff] }
  0x32   :  { %411 = vmatpush1.msra.mxu0 %v5706_v60  ;;  %402 = vmatmul.mubr.f32.vlgmr.msra.gmra.mxu1 %v10858_v56  ;;  %10868 = vst [vmem:[#allocation32_spill] sm:$0xff] %v5744_v54  ;;  %10869 = vst [vmem:[#allocation33_spill] sm:$0xff] %v5749_v52  ;;  %v5756_v60 = vld [vmem:[%s10273_s2 + $0x1b8] sm:$0xff] }
  0x33   :  { %479 = vmatprep.subr.mxu1 %v5712_v50  ;;  %412 = vmatprep.subr.mxu0 %v5725_v63  ;;  %10870 = vst [vmem:[#allocation34_spill] sm:$0xff] %v5756_v60  ;;  %v5761_v50 = vld [vmem:[%s10273_s2 + $0x180] sm:$0xff]  ;;  %v5775_v63 = vld [vmem:[%s10273_s2 + $0x198] sm:$0xff] }
  0x34   :  { %480 = vmatpush1.msra.mxu1 %v5719_v62  ;;  %10871 = vst [vmem:[#allocation35_spill] sm:$0xff] %v5761_v50  ;;  %413 = vmatpush1.msra.mxu0 %v5737_v58  ;;  %v5768_v62 = vld [vmem:[%s10273_s2 + $0x1b0] sm:$0xff]  ;;  %10873 = vst [vmem:[#allocation37_spill] sm:$0xff] %v5775_v63 }
  0x35   :  { %481 = vmatprep.subr.mxu1 %v5731_v0  ;;  %10872 = vst [vmem:[#allocation36_spill] sm:$0xff] %v5768_v62  ;;  %414 = vmatprep.subr.mxu0 %v5749_v52  ;;  %v5782_v58 = vld [vmem:[%s10273_s2 + $0x190] sm:$0xff]  ;;  %v5792_v52 = vld [vmem:[%s10273_s2 + $0x168] sm:$0xff] }
  0x36   :  { %482 = vmatpush1.msra.mxu1 %v5744_v54  ;;  %415 = vmatpush1.msra.mxu0 %v5761_v50  ;;  %10874 = vst [vmem:[#allocation38_spill] sm:$0xff] %v5782_v58  ;;  %10875 = vst [vmem:[#allocation39_spill] sm:$0xff] %v5792_v52  ;;  %v5797_v50 = vld [vmem:[%s10273_s2 + $0x178] sm:$0xff]  ;;  %v6088_v0 = vld [vmem:[#allocation3 + $0x1c8] sm:$0xff] }
  0x37   :  { %483 = vmatprep.subr.mxu1 %v5756_v60  ;;  %472 = vmatprep.mubr.f32.mxu0 %v10858_v56  ;;  %10876 = vst [vmem:[#allocation40_spill] sm:$0xff] %v5797_v50  ;;  %v6076_v60 = vld [vmem:[#allocation3 + $0x1e8] sm:$0xff]  ;;  %v6078_v54 = vld [vmem:[#allocation3 + $0x1f8] sm:$0xff]  ;;  %10927 = vst [vmem:[#allocation91_spill] sm:$0xff] %v6088_v0 }
  0x38   :  { %484 = vmatpush1.msra.mxu1 %v5768_v62  ;;  %543 = vmatprep.mubr.f32.mxu1 %v10858_v56  ;;  %v6031_v62 = vld [vmem:[%s10273_s2 + $0x28] sm:$0xff]  ;;  %10923 = vst [vmem:[#allocation87_spill] sm:$0xff] %v6076_v60  ;;  %10924 = vst [vmem:[#allocation88_spill] sm:$0xff] %v6078_v54 }
  0x39   :  { %485 = vmatprep.subr.mxu1 %v5775_v63  ;;  %416 = vmatprep.subr.mxu0 %v5792_v52  ;;  %v5804_v63 = vld [vmem:[%s10273_s2 + $0x160] sm:$0xff]  ;;  %v5816_v52 = vld [vmem:[%s10273_s2 + $0x148] sm:$0xff]  ;;  %10915 = vst [vmem:[#allocation79_spill] sm:$0xff] %v6031_v62 }
  0x3a   :  { %486 = vmatpush1.msra.mxu1 %v5782_v58  ;;  %10877 = vst [vmem:[#allocation41_spill] sm:$0xff] %v5804_v63  ;;  %v5809_v58 = vld [vmem:[%s10273_s2 + $0x170] sm:$0xff]  ;;  %417 = vmatpush1.msra.mxu0 %v5804_v63  ;;  %10879 = vst [vmem:[#allocation43_spill] sm:$0xff] %v5816_v52  ;;  %v5828_v63 = vld [vmem:[%s10273_s2 + $0x140] sm:$0xff] }
  0x3b   :  { %487 = vmatprep.subr.mxu1 %v5797_v50  ;;  %10878 = vst [vmem:[#allocation42_spill] sm:$0xff] %v5809_v58  ;;  %v5821_v50 = vld [vmem:[%s10273_s2 + $0x158] sm:$0xff]  ;;  %418 = vmatprep.subr.mxu0 %v5816_v52  ;;  %10881 = vst [vmem:[#allocation45_spill] sm:$0xff] %v5828_v63  ;;  %v5840_v52 = vld [vmem:[%s10273_s2 + $0x128] sm:$0xff] }
  0x3c   :  { %488 = vmatpush1.msra.mxu1 %v5809_v58  ;;  %10880 = vst [vmem:[#allocation44_spill] sm:$0xff] %v5821_v50  ;;  %v5833_v58 = vld [vmem:[%s10273_s2 + $0x150] sm:$0xff]  ;;  %419 = vmatpush1.msra.mxu0 %v5828_v63  ;;  %10883 = vst [vmem:[#allocation47_spill] sm:$0xff] %v5840_v52  ;;  %v5852_v63 = vld [vmem:[%s10273_s2 + $0x120] sm:$0xff] }
  0x3d   :  { %489 = vmatprep.subr.mxu1 %v5821_v50  ;;  %10882 = vst [vmem:[#allocation46_spill] sm:$0xff] %v5833_v58  ;;  %v5845_v50 = vld [vmem:[%s10273_s2 + $0x138] sm:$0xff]  ;;  %420 = vmatprep.subr.mxu0 %v5840_v52  ;;  %10885 = vst [vmem:[#allocation49_spill] sm:$0xff] %v5852_v63  ;;  %v5864_v52 = vld [vmem:[%s10273_s2 + $0x108] sm:$0xff] }
  0x3e   :  { %490 = vmatpush1.msra.mxu1 %v5833_v58  ;;  %10884 = vst [vmem:[#allocation48_spill] sm:$0xff] %v5845_v50  ;;  %v5857_v58 = vld [vmem:[%s10273_s2 + $0x130] sm:$0xff]  ;;  %421 = vmatpush1.msra.mxu0 %v5852_v63  ;;  %10887 = vst [vmem:[#allocation51_spill] sm:$0xff] %v5864_v52  ;;  %v5876_v63 = vld [vmem:[%s10273_s2 + $0x100] sm:$0xff] }
  0x3f   :  { %491 = vmatprep.subr.mxu1 %v5845_v50  ;;  %10886 = vst [vmem:[#allocation50_spill] sm:$0xff] %v5857_v58  ;;  %v5869_v50 = vld [vmem:[%s10273_s2 + $0x118] sm:$0xff]  ;;  %422 = vmatprep.subr.mxu0 %v5864_v52  ;;  %10889 = vst [vmem:[#allocation53_spill] sm:$0xff] %v5876_v63  ;;  %v5888_v52 = vld [vmem:[%s10273_s2 + $0xe8] sm:$0xff] }
  0x40   :  { %492 = vmatpush1.msra.mxu1 %v5857_v58  ;;  %10888 = vst [vmem:[#allocation52_spill] sm:$0xff] %v5869_v50  ;;  %v5881_v58 = vld [vmem:[%s10273_s2 + $0x110] sm:$0xff]  ;;  %423 = vmatpush1.msra.mxu0 %v5876_v63  ;;  %10891 = vst [vmem:[#allocation55_spill] sm:$0xff] %v5888_v52  ;;  %v5900_v63 = vld [vmem:[%s10273_s2 + $0xe0] sm:$0xff] }
  0x41   :  { %493 = vmatprep.subr.mxu1 %v5869_v50  ;;  %10890 = vst [vmem:[#allocation54_spill] sm:$0xff] %v5881_v58  ;;  %v5893_v50 = vld [vmem:[%s10273_s2 + $0xf8] sm:$0xff]  ;;  %424 = vmatprep.subr.mxu0 %v5888_v52  ;;  %10893 = vst [vmem:[#allocation57_spill] sm:$0xff] %v5900_v63  ;;  %v5912_v52 = vld [vmem:[%s10273_s2 + $0xc8] sm:$0xff] }
  0x42   :  { %494 = vmatpush1.msra.mxu1 %v5881_v58  ;;  %10892 = vst [vmem:[#allocation56_spill] sm:$0xff] %v5893_v50  ;;  %v5905_v58 = vld [vmem:[%s10273_s2 + $0xf0] sm:$0xff]  ;;  %425 = vmatpush1.msra.mxu0 %v5900_v63  ;;  %10895 = vst [vmem:[#allocation59_spill] sm:$0xff] %v5912_v52  ;;  %v5924_v63 = vld [vmem:[%s10273_s2 + $0xc0] sm:$0xff] }
  0x43   :  { %495 = vmatprep.subr.mxu1 %v5893_v50  ;;  %10894 = vst [vmem:[#allocation58_spill] sm:$0xff] %v5905_v58  ;;  %v5917_v50 = vld [vmem:[%s10273_s2 + $0xd8] sm:$0xff]  ;;  %426 = vmatprep.subr.mxu0 %v5912_v52  ;;  %10897 = vst [vmem:[#allocation61_spill] sm:$0xff] %v5924_v63  ;;  %v5936_v52 = vld [vmem:[%s10273_s2 + $0xa8] sm:$0xff] }
  0x44   :  { %496 = vmatpush1.msra.mxu1 %v5905_v58  ;;  %10896 = vst [vmem:[#allocation60_spill] sm:$0xff] %v5917_v50  ;;  %v5929_v58 = vld [vmem:[%s10273_s2 + $0xd0] sm:$0xff]  ;;  %427 = vmatpush1.msra.mxu0 %v5924_v63  ;;  %10899 = vst [vmem:[#allocation63_spill] sm:$0xff] %v5936_v52  ;;  %v5948_v63 = vld [vmem:[%s10273_s2 + $0xa0] sm:$0xff] }
  0x45   :  { %497 = vmatprep.subr.mxu1 %v5917_v50  ;;  %10898 = vst [vmem:[#allocation62_spill] sm:$0xff] %v5929_v58  ;;  %v5941_v50 = vld [vmem:[%s10273_s2 + $0xb8] sm:$0xff]  ;;  %428 = vmatprep.subr.mxu0 %v5936_v52  ;;  %10901 = vst [vmem:[#allocation65_spill] sm:$0xff] %v5948_v63  ;;  %v5960_v52 = vld [vmem:[%s10273_s2 + $0x88] sm:$0xff] }
  0x46   :  { %498 = vmatpush1.msra.mxu1 %v5929_v58  ;;  %10900 = vst [vmem:[#allocation64_spill] sm:$0xff] %v5941_v50  ;;  %v5953_v58 = vld [vmem:[%s10273_s2 + $0xb0] sm:$0xff]  ;;  %429 = vmatpush1.msra.mxu0 %v5948_v63  ;;  %10903 = vst [vmem:[#allocation67_spill] sm:$0xff] %v5960_v52  ;;  %v5972_v63 = vld [vmem:[%s10273_s2 + $0x80] sm:$0xff] }
  0x47   :  { %499 = vmatprep.subr.mxu1 %v5941_v50  ;;  %10902 = vst [vmem:[#allocation66_spill] sm:$0xff] %v5953_v58  ;;  %v5965_v50 = vld [vmem:[%s10273_s2 + $0x98] sm:$0xff]  ;;  %430 = vmatprep.subr.mxu0 %v5960_v52  ;;  %10905 = vst [vmem:[#allocation69_spill] sm:$0xff] %v5972_v63  ;;  %v5984_v52 = vld [vmem:[%s10273_s2 + $0x68] sm:$0xff] }
  0x48   :  { %500 = vmatpush1.msra.mxu1 %v5953_v58  ;;  %10904 = vst [vmem:[#allocation68_spill] sm:$0xff] %v5965_v50  ;;  %v5977_v58 = vld [vmem:[%s10273_s2 + $0x90] sm:$0xff]  ;;  %431 = vmatpush1.msra.mxu0 %v5972_v63  ;;  %10907 = vst [vmem:[#allocation71_spill] sm:$0xff] %v5984_v52  ;;  %v5996_v63 = vld [vmem:[%s10273_s2 + $0x60] sm:$0xff] }
  0x49   :  { %501 = vmatprep.subr.mxu1 %v5965_v50  ;;  %10906 = vst [vmem:[#allocation70_spill] sm:$0xff] %v5977_v58  ;;  %v5989_v50 = vld [vmem:[%s10273_s2 + $0x78] sm:$0xff]  ;;  %432 = vmatprep.subr.mxu0 %v5984_v52  ;;  %10909 = vst [vmem:[#allocation73_spill] sm:$0xff] %v5996_v63  ;;  %v6008_v52 = vld [vmem:[%s10273_s2 + $0x48] sm:$0xff] }
  0x4a   :  { %502 = vmatpush1.msra.mxu1 %v5977_v58  ;;  %10908 = vst [vmem:[#allocation72_spill] sm:$0xff] %v5989_v50  ;;  %v6001_v58 = vld [vmem:[%s10273_s2 + $0x70] sm:$0xff]  ;;  %433 = vmatpush1.msra.mxu0 %v5996_v63  ;;  %10911 = vst [vmem:[#allocation75_spill] sm:$0xff] %v6008_v52  ;;  %v6020_v63 = vld [vmem:[%s10273_s2 + $0x40] sm:$0xff] }
  0x4b   :  { %503 = vmatprep.subr.mxu1 %v5989_v50  ;;  %10910 = vst [vmem:[#allocation74_spill] sm:$0xff] %v6001_v58  ;;  %v6013_v50 = vld [vmem:[%s10273_s2 + $0x58] sm:$0xff]  ;;  %434 = vmatprep.subr.mxu0 %v6008_v52  ;;  %10913 = vst [vmem:[#allocation77_spill] sm:$0xff] %v6020_v63  ;;  %v6048_v52 = vld [vmem:[%s10273_s2 + $0x30] sm:$0xff] }
  0x4c   :  { %504 = vmatpush1.msra.mxu1 %v6001_v58  ;;  %10912 = vst [vmem:[#allocation76_spill] sm:$0xff] %v6013_v50  ;;  %435 = vmatpush1.msra.mxu0 %v6020_v63  ;;  %v6026_v58 = vld [vmem:[%s10273_s2 + $0x50] sm:$0xff]  ;;  %v6043_v63 = vld [vmem:[%s10273_s2 + $0x20] sm:$0xff]  ;;  %10918 = vst [vmem:[#allocation82_spill] sm:$0xff] %v6048_v52 }
  0x4d   :  { %505 = vmatprep.subr.mxu1 %v6013_v50  ;;  %10914 = vst [vmem:[#allocation78_spill] sm:$0xff] %v6026_v58  ;;  %v6036_v50 = vld [vmem:[%s10273_s2 + $0x38] sm:$0xff]  ;;  %436 = vmatprep.subr.mxu0 %v6031_v62  ;;  %10917 = vst [vmem:[#allocation81_spill] sm:$0xff] %v6043_v63 }
  0x4e   :  { %10916 = vst [vmem:[#allocation80_spill] sm:$0xff] %v6036_v50  ;;  %506 = vmatpush1.msra.mxu1 %v6026_v58  ;;  %437 = vmatpush1.msra.mxu0 %v6043_v63  ;;  %v6055_v58 = vld [vmem:[%s10273_s2 + $0x8] sm:$0xff]  ;;  %v6060_v62 = vld [vmem:[%s10273_s2 + $0x18] sm:$0xff]  ;;  %v6072_v63 = vld [vmem:[%s10273_s2 + $0x10] sm:$0xff] }
  0x4f   :  { %507 = vmatprep.subr.mxu1 %v6036_v50  ;;  %10919 = vst [vmem:[#allocation83_spill] sm:$0xff] %v6055_v58  ;;  %10920 = vst [vmem:[#allocation84_spill] sm:$0xff] %v6060_v62  ;;  %438 = vmatprep.subr.mxu0 %v6055_v58  ;;  %v6067_v50 = vld [vmem:[%s10273_s2] sm:$0xff] }
  0x50   :  { %508 = vmatpush1.msra.mxu1 %v6048_v52  ;;  %10921 = vst [vmem:[#allocation85_spill] sm:$0xff] %v6067_v50  ;;  %10922 = vst [vmem:[#allocation86_spill] sm:$0xff] %v6072_v63  ;;  %439 = vmatpush1.msra.mxu0 %v6067_v50  ;;  %v6082_v58 = vld [vmem:[#allocation3 + $0x1e0] sm:$0xff]  ;;  %v6084_v52 = vld [vmem:[#allocation3 + $0x1f0] sm:$0xff] }
  0x51   :  { %509 = vmatprep.subr.mxu1 %v6060_v62  ;;  %473 = vmatmul.mubr.f32.vlgmr.msra.gmra.mxu0 %v10858_v56  ;;  %10925 = vst [vmem:[#allocation89_spill] sm:$0xff] %v6082_v58  ;;  %10926 = vst [vmem:[#allocation90_spill] sm:$0xff] %v6084_v52  ;;  %v6090_v62 = vld [vmem:[#allocation3 + $0x1d8] sm:$0xff]  ;;  %v6094_v50 = vld [vmem:[#allocation3 + $0x1c0] sm:$0xff] }
  0x52   :  { %510 = vmatpush1.msra.mxu1 %v6072_v63  ;;  %582 = vmatprep.subr.mxu0 %v6076_v60  ;;  %10928 = vst [vmem:[#allocation92_spill] sm:$0xff] %v6090_v62  ;;  %10929 = vst [vmem:[#allocation93_spill] sm:$0xff] %v6094_v50  ;;  %v6096_v63 = vld [vmem:[#allocation3 + $0x1d0] sm:$0xff]  ;;  %v6102_v60 = vld [vmem:[#allocation3 + $0x1b8] sm:$0xff] }
  0x53   :  { %653 = vmatprep.subr.mxu1 %v6078_v54  ;;  %544 = vmatmul.mubr.f32.vlgmr.msra.gmra.mxu1 %v10858_v56  ;;  %10930 = vst [vmem:[#allocation94_spill] sm:$0xff] %v6096_v63  ;;  %10932 = vst [vmem:[#allocation96_spill] sm:$0xff] %v6102_v60  ;;  %v6106_v54 = vld [vmem:[#allocation3 + $0x1a0] sm:$0xff] }
  0x54   :  { %583 = vmatpush1.msra.mxu0 %v6082_v58  ;;  %654 = vmatpush1.msra.mxu1 %v6084_v52  ;;  %10933 = vst [vmem:[#allocation97_spill] sm:$0xff] %v6106_v54  ;;  %v6112_v58 = vld [vmem:[#allocation3 + $0x188] sm:$0xff]  ;;  %v6114_v52 = vld [vmem:[#allocation3 + $0x198] sm:$0xff] }
  0x55   :  { %584 = vmatprep.subr.mxu0 %v6088_v0  ;;  %655 = vmatprep.subr.mxu1 %v6090_v62  ;;  %10935 = vst [vmem:[#allocation99_spill] sm:$0xff] %v6112_v58  ;;  %10936 = vst [vmem:[#allocation100_spill] sm:$0xff] %v6114_v52  ;;  %v6118_v0 = vld [vmem:[#allocation3 + $0x180] sm:$0xff]  ;;  %v6120_v62 = vld [vmem:[#allocation3 + $0x190] sm:$0xff] }
  0x56   :  { %585 = vmatpush1.msra.mxu0 %v6094_v50  ;;  %656 = vmatpush1.msra.mxu1 %v6096_v63  ;;  %10937 = vst [vmem:[#allocation101_spill] sm:$0xff] %v6118_v0  ;;  %10938 = vst [vmem:[#allocation102_spill] sm:$0xff] %v6120_v62  ;;  %v6124_v50 = vld [vmem:[#allocation3 + $0x168] sm:$0xff]  ;;  %v6126_v63 = vld [vmem:[#allocation3 + $0x178] sm:$0xff] }
  0x57   :  { %586 = vmatprep.subr.mxu0 %v6100_v61  ;;  %657 = vmatprep.subr.mxu1 %v6102_v60  ;;  %10939 = vst [vmem:[#allocation103_spill] sm:$0xff] %v6124_v50  ;;  %10940 = vst [vmem:[#allocation104_spill] sm:$0xff] %v6126_v63  ;;  %v6130_v61 = vld [vmem:[#allocation3 + $0x160] sm:$0xff]  ;;  %v6132_v60 = vld [vmem:[#allocation3 + $0x170] sm:$0xff] }
  0x58   :  { %587 = vmatpush1.msra.mxu0 %v6106_v54  ;;  %658 = vmatpush1.msra.mxu1 %v6108_v59  ;;  %10941 = vst [vmem:[#allocation105_spill] sm:$0xff] %v6130_v61  ;;  %10942 = vst [vmem:[#allocation106_spill] sm:$0xff] %v6132_v60  ;;  %v6136_v54 = vld [vmem:[#allocation3 + $0x148] sm:$0xff]  ;;  %v6138_v59 = vld [vmem:[#allocation3 + $0x158] sm:$0xff] }
  0x59   :  { %588 = vmatprep.subr.mxu0 %v6112_v58  ;;  %659 = vmatprep.subr.mxu1 %v6114_v52  ;;  %10943 = vst [vmem:[#allocation107_spill] sm:$0xff] %v6136_v54  ;;  %10944 = vst [vmem:[#allocation108_spill] sm:$0xff] %v6138_v59  ;;  %v6142_v58 = vld [vmem:[#allocation3 + $0x140] sm:$0xff]  ;;  %v6144_v52 = vld [vmem:[#allocation3 + $0x150] sm:$0xff] }
  0x5a   :  { %589 = vmatpush1.msra.mxu0 %v6118_v0  ;;  %660 = vmatpush1.msra.mxu1 %v6120_v62  ;;  %10945 = vst [vmem:[#allocation109_spill] sm:$0xff] %v6142_v58  ;;  %10946 = vst [vmem:[#allocation110_spill] sm:$0xff] %v6144_v52  ;;  %v6148_v0 = vld [vmem:[#allocation3 + $0x128] sm:$0xff]  ;;  %v6150_v62 = vld [vmem:[#allocation3 + $0x138] sm:$0xff] }
  0x5b   :  { %590 = vmatprep.subr.mxu0 %v6124_v50  ;;  %661 = vmatprep.subr.mxu1 %v6126_v63  ;;  %10947 = vst [vmem:[#allocation111_spill] sm:$0xff] %v6148_v0  ;;  %10948 = vst [vmem:[#allocation112_spill] sm:$0xff] %v6150_v62  ;;  %v6154_v50 = vld [vmem:[#allocation3 + $0x120] sm:$0xff]  ;;  %v6156_v63 = vld [vmem:[#allocation3 + $0x130] sm:$0xff] }
  0x5c   :  { %591 = vmatpush1.msra.mxu0 %v6130_v61  ;;  %662 = vmatpush1.msra.mxu1 %v6132_v60  ;;  %10949 = vst [vmem:[#allocation113_spill] sm:$0xff] %v6154_v50  ;;  %10950 = vst [vmem:[#allocation114_spill] sm:$0xff] %v6156_v63  ;;  %v6160_v61 = vld [vmem:[#allocation3 + $0x108] sm:$0xff]  ;;  %v6162_v60 = vld [vmem:[#allocation3 + $0x118] sm:$0xff] }
  0x5d   :  { %592 = vmatprep.subr.mxu0 %v6136_v54  ;;  %663 = vmatprep.subr.mxu1 %v6138_v59  ;;  %10951 = vst [vmem:[#allocation115_spill] sm:$0xff] %v6160_v61  ;;  %10952 = vst [vmem:[#allocation116_spill] sm:$0xff] %v6162_v60  ;;  %v6166_v54 = vld [vmem:[#allocation3 + $0x100] sm:$0xff]  ;;  %v6168_v59 = vld [vmem:[#allocation3 + $0x110] sm:$0xff] }
  0x5e   :  { %593 = vmatpush1.msra.mxu0 %v6142_v58  ;;  %664 = vmatpush1.msra.mxu1 %v6144_v52  ;;  %10953 = vst [vmem:[#allocation117_spill] sm:$0xff] %v6166_v54  ;;  %10954 = vst [vmem:[#allocation118_spill] sm:$0xff] %v6168_v59  ;;  %v6172_v58 = vld [vmem:[#allocation3 + $0xe8] sm:$0xff]  ;;  %v6174_v52 = vld [vmem:[#allocation3 + $0xf8] sm:$0xff] }
  0x5f   :  { %594 = vmatprep.subr.mxu0 %v6148_v0  ;;  %665 = vmatprep.subr.mxu1 %v6150_v62  ;;  %10955 = vst [vmem:[#allocation119_spill] sm:$0xff] %v6172_v58  ;;  %10956 = vst [vmem:[#allocation120_spill] sm:$0xff] %v6174_v52  ;;  %v6178_v0 = vld [vmem:[#allocation3 + $0xe0] sm:$0xff]  ;;  %v6180_v62 = vld [vmem:[#allocation3 + $0xf0] sm:$0xff] }
  0x60   :  { %595 = vmatpush1.msra.mxu0 %v6154_v50  ;;  %666 = vmatpush1.msra.mxu1 %v6156_v63  ;;  %10957 = vst [vmem:[#allocation121_spill] sm:$0xff] %v6178_v0  ;;  %10958 = vst [vmem:[#allocation122_spill] sm:$0xff] %v6180_v62  ;;  %v6184_v50 = vld [vmem:[#allocation3 + $0xc8] sm:$0xff]  ;;  %v6186_v63 = vld [vmem:[#allocation3 + $0xd8] sm:$0xff] }
  0x61   :  { %596 = vmatprep.subr.mxu0 %v6160_v61  ;;  %667 = vmatprep.subr.mxu1 %v6162_v60  ;;  %10959 = vst [vmem:[#allocation123_spill] sm:$0xff] %v6184_v50  ;;  %10960 = vst [vmem:[#allocation124_spill] sm:$0xff] %v6186_v63  ;;  %v6188_v61 = vld [vmem:[#allocation3 + $0xc0] sm:$0xff]  ;;  %v6192_v60 = vld [vmem:[#allocation3 + $0xd0] sm:$0xff] }
  0x62   :  { %597 = vmatpush1.msra.mxu0 %v6166_v54  ;;  %668 = vmatpush1.msra.mxu1 %v6168_v59  ;;  %10961 = vst [vmem:[#allocation125_spill] sm:$0xff] %v6188_v61  ;;  %10962 = vst [vmem:[#allocation126_spill] sm:$0xff] %v6192_v60  ;;  %v6194_v54 = vld [vmem:[#allocation3 + $0xa8] sm:$0xff]  ;;  %v6198_v59 = vld [vmem:[#allocation3 + $0xb8] sm:$0xff] }
  0x63   :  { %598 = vmatprep.subr.mxu0 %v6172_v58  ;;  %669 = vmatprep.subr.mxu1 %v6174_v52  ;;  %10963 = vst [vmem:[#allocation127_spill] sm:$0xff] %v6194_v54  ;;  %10964 = vst [vmem:[#allocation128_spill] sm:$0xff] %v6198_v59  ;;  %v6200_v58 = vld [vmem:[#allocation3 + $0xa0] sm:$0xff]  ;;  %v6206_v52 = vld [vmem:[#allocation3 + $0x88] sm:$0xff] }
  0x64   :  { %599 = vmatpush1.msra.mxu0 %v6178_v0  ;;  %670 = vmatpush1.msra.mxu1 %v6180_v62  ;;  %10965 = vst [vmem:[#allocation129_spill] sm:$0xff] %v6200_v58  ;;  %10967 = vst [vmem:[#allocation131_spill] sm:$0xff] %v6206_v52  ;;  %v6210_v0 = vld [vmem:[#allocation3 + $0x98] sm:$0xff]  ;;  %v6212_v62 = vld [vmem:[#allocation3 + $0x80] sm:$0xff] }
  0x65   :  { %600 = vmatprep.subr.mxu0 %v6184_v50  ;;  %671 = vmatprep.subr.mxu1 %v6186_v63  ;;  %10968 = vst [vmem:[#allocation132_spill] sm:$0xff] %v6210_v0  ;;  %10969 = vst [vmem:[#allocation133_spill] sm:$0xff] %v6212_v62  ;;  %v6216_v50 = vld [vmem:[#allocation3 + $0x90] sm:$0xff]  ;;  %v6218_v63 = vld [vmem:[#allocation3 + $0x68] sm:$0xff] }
  0x66   :  { %601 = vmatpush1.msra.mxu0 %v6188_v61  ;;  %672 = vmatpush1.msra.mxu1 %v6192_v60  ;;  %10970 = vst [vmem:[#allocation134_spill] sm:$0xff] %v6216_v50  ;;  %10971 = vst [vmem:[#allocation135_spill] sm:$0xff] %v6218_v63  ;;  %v6222_v61 = vld [vmem:[#allocation3 + $0x78] sm:$0xff]  ;;  %v6224_v60 = vld [vmem:[#allocation3 + $0x60] sm:$0xff] }
  0x67   :  { %602 = vmatprep.subr.mxu0 %v6194_v54  ;;  %673 = vmatprep.subr.mxu1 %v6198_v59  ;;  %10972 = vst [vmem:[#allocation136_spill] sm:$0xff] %v6222_v61  ;;  %10973 = vst [vmem:[#allocation137_spill] sm:$0xff] %v6224_v60  ;;  %v6228_v54 = vld [vmem:[#allocation3 + $0x70] sm:$0xff]  ;;  %v6230_v59 = vld [vmem:[#allocation3 + $0x48] sm:$0xff] }
  0x68   :  { %603 = vmatpush1.msra.mxu0 %v6200_v58  ;;  %674 = vmatpush1.msra.mxu1 %v6204_v48  ;;  %10974 = vst [vmem:[#allocation138_spill] sm:$0xff] %v6228_v54  ;;  %10975 = vst [vmem:[#allocation139_spill] sm:$0xff] %v6230_v59  ;;  %v6234_v58 = vld [vmem:[#allocation3 + $0x58] sm:$0xff]  ;;  %v6236_v48 = vld [vmem:[#allocation3 + $0x40] sm:$0xff] }
  0x69   :  { %604 = vmatprep.subr.mxu0 %v6206_v52  ;;  %675 = vmatprep.subr.mxu1 %v6210_v0  ;;  %10976 = vst [vmem:[#allocation140_spill] sm:$0xff] %v6234_v58  ;;  %10977 = vst [vmem:[#allocation141_spill] sm:$0xff] %v6236_v48  ;;  %v6240_v52 = vld [vmem:[#allocation3 + $0x50] sm:$0xff]  ;;  %v6242_v0 = vld [vmem:[#allocation3 + $0x28] sm:$0xff] }
  0x6a   :  { %605 = vmatpush1.msra.mxu0 %v6212_v62  ;;  %676 = vmatpush1.msra.mxu1 %v6216_v50  ;;  %10978 = vst [vmem:[#allocation142_spill] sm:$0xff] %v6240_v52  ;;  %10979 = vst [vmem:[#allocation143_spill] sm:$0xff] %v6242_v0  ;;  %v6246_v62 = vld [vmem:[#allocation3 + $0x38] sm:$0xff]  ;;  %v6248_v50 = vld [vmem:[#allocation3 + $0x20] sm:$0xff] }
  0x6b   :  { %606 = vmatprep.subr.mxu0 %v6218_v63  ;;  %677 = vmatprep.subr.mxu1 %v6222_v61  ;;  %10980 = vst [vmem:[#allocation144_spill] sm:$0xff] %v6246_v62  ;;  %10981 = vst [vmem:[#allocation145_spill] sm:$0xff] %v6248_v50  ;;  %v6252_v63 = vld [vmem:[#allocation3 + $0x30] sm:$0xff]  ;;  %v6254_v61 = vld [vmem:[#allocation3 + $0x8] sm:$0xff] }
  0x6c   :  { %607 = vmatpush1.msra.mxu0 %v6224_v60  ;;  %678 = vmatpush1.msra.mxu1 %v6228_v54  ;;  %10982 = vst [vmem:[#allocation146_spill] sm:$0xff] %v6252_v63  ;;  %10983 = vst [vmem:[#allocation147_spill] sm:$0xff] %v6254_v61  ;;  %v6258_v60 = vld [vmem:[#allocation3 + $0x18] sm:$0xff]  ;;  %v6260_v54 = vld [vmem:[#allocation3] sm:$0xff] }
  0x6d   :  { %608 = vmatprep.subr.mxu0 %v6230_v59  ;;  %679 = vmatprep.subr.mxu1 %v6234_v58  ;;  %10984 = vst [vmem:[#allocation148_spill] sm:$0xff] %v6258_v60  ;;  %10985 = vst [vmem:[#allocation149_spill] sm:$0xff] %v6260_v54  ;;  %v6264_v59 = vld [vmem:[#allocation3 + $0x10] sm:$0xff] }
  0x6e   :  { %609 = vmatpush1.msra.mxu0 %v6236_v48  ;;  %680 = vmatpush1.msra.mxu1 %v6240_v52  ;;  %10986 = vst [vmem:[#allocation150_spill] sm:$0xff] %v6264_v59  ;;  %v552_v48 = vld [vmem:[%s10271_s0 + $0x10] sm:$0xff] }
  0x6f   :  { %610 = vmatprep.subr.mxu0 %v6242_v0  ;;  %681 = vmatprep.subr.mxu1 %v6246_v62 }
  0x70   :  { %611 = vmatpush1.msra.mxu0 %v6248_v50  ;;  %682 = vmatpush1.msra.mxu1 %v6252_v63  ;;  %v550_v63 = vld [vmem:[%s10271_s0] sm:$0xff] }
  0x71   :  { %612 = vmatprep.subr.mxu0 %v6254_v61  ;;  %683 = vmatprep.subr.mxu1 %v6258_v60  ;;  %v551_v60 = vld [vmem:[%s10271_s0 + $0x8] sm:$0xff] }
  0x72   :  { %613 = vmatpush1.msra.mxu0 %v6260_v54  ;;  %684 = vmatpush1.msra.mxu1 %v6264_v59 }
  0x73   :  { %646 = vmatprep.mubr.f32.mxu0 %v10858_v56  ;;  %717 = vmatprep.mubr.f32.mxu1 %v10858_v56 }
  0x74   :  { %752 = vmatprep.subr.mxu0 %v5308_v1  ;;  %823 = vmatprep.subr.mxu1 %v5353_v9  ;;  %v553_v9 = vld [vmem:[%s10271_s0 + $0x18] sm:$0xff] }
  0xef   :  { %v332_v50 = vpop.f32.mrf.mxu0 }
  0xf0   :  { %v554_v54 = vadd.f32 %v550_v63, %v332_v50 }
  0xf1   :  { %v334_v61 = vpop.f32.mrf.mxu0 }
  0xf2   :  { %v4267_v59 = vmul.f32 -1.442695, %v554_v54  ;;  %v555_v62 = vadd.f32 %v551_v60, %v334_v61  ;;  %v403_v52 = vpop.f32.mrf.mxu1 }
  0xf3   :  { %v556_v56 = vadd.f32 %v552_v48, %v403_v52 }
  0xf4   :  { %4401 = vpow2.f32 %v4267_v59  ;;  %v4268_v0 = vmul.f32 -1.442695, %v555_v62  ;;  %v405_v1 = vpop.f32.mrf.mxu1 }
  0xf5   :  { %v557_v58 = vadd.f32 %v553_v9, %v405_v1  ;;  %v11037_v1 = vld [vmem:[#allocation55_spill] sm:$0xff]  ;;  %v11038_v9 = vld [vmem:[#allocation56_spill] sm:$0xff] }
  0xf6   :  { %4403 = vpow2.f32 %v4268_v0 }
  0xf7   :  { %v4269_v57 = vmul.f32 -1.442695, %v557_v58  ;;  %4405 = vtanh.f32 %v556_v56  ;;  %v11036_v58 = vld [vmem:[#allocation54_spill] sm:$0xff] }
  0xf9   :  { %4407 = vpow2.f32 %v4269_v57  ;;  %v11035_v57 = vld [vmem:[#allocation53_spill] sm:$0xff] }
 0x101   :  { %v4402_v50 = vpop.eup %4401 }
 0x102   :  { %v561_v63 = vadd.f32 1.0, %v4402_v50  ;;  %v11039_v50 = vld [vmem:[#allocation57_spill] sm:$0xff] }
 0x103   :  { %v4404_v54 = vpop.eup %4403 }
 0x104   :  { %4409 = vrcp.f32 %v561_v63  ;;  %v567_v59 = vadd.f32 1.0, %v4404_v54  ;;  %v4406_v0 = vpop.eup %4405  ;;  %v11040_v63 = vld [vmem:[#allocation58_spill] sm:$0xff]  ;;  %v11041_v54 = vld [vmem:[#allocation59_spill] sm:$0xff] }
 0x106   :  { %4411 = vrcp.f32 %v567_v59  ;;  %v4408_v60 = vpop.eup %4407  ;;  %v11042_v59 = vld [vmem:[#allocation60_spill] sm:$0xff] }
 0x107   :  { %v574_v46 = vadd.f32 1.0, %v4408_v60  ;;  %v11044_v60 = vld [vmem:[#allocation62_spill] sm:$0xff] }
 0x109   :  { %4413 = vrcp.f32 %v574_v46  ;;  %v11030_v46 = vld [vmem:[#allocation48_spill] sm:$0xff] }
 0x111   :  { %v4410_v61 = vpop.eup %4409 }
 0x112   :  { %v578_v44 = vmul.f32 %v4410_v61, %v4406_v0  ;;  %v11043_v0 = vld [vmem:[#allocation61_spill] sm:$0xff]  ;;  %v11045_v61 = vld [vmem:[#allocation63_spill] sm:$0xff] }
 0x113   :  { %v4412_v62 = vpop.eup %4411 }
 0x114   :  { %v577_v55 = vmul.f32 0.0, %v4412_v62  ;;  %v11046_v62 = vld [vmem:[#allocation64_spill] sm:$0xff] }
 0x116   :  { %v6287_v53 = vadd.f32 %v578_v44, %v577_v55  ;;  %v4414_v48 = vpop.eup %4413  ;;  %v11028_v44 = vld [vmem:[#allocation46_spill] sm:$0xff]  ;;  %v11034_v55 = vld [vmem:[#allocation52_spill] sm:$0xff] }
 0x118   :  { %4415 = vtanh.f32 %v6287_v53 }
 0x125   :  { %v4416_v52 = vpop.eup %4415 }
 0x126   :  { %v6290_v56 = vmul.f32 %v4416_v52, %v4414_v48  ;;  %v11047_v48 = vld [vmem:[#allocation65_spill] sm:$0xff]  ;;  %v11048_v52 = vld [vmem:[#allocation66_spill] sm:$0xff] }
 0x128   :  { %647 = vmatmul.mubr.f32.vlgmr.msra.gmra.mxu0 %v6290_v56  ;;  %718 = vmatmul.mubr.f32.vlgmr.msra.gmra.mxu1 %v6290_v56 }
 0x129   :  { %753 = vmatpush1.msra.mxu0 %v5313_v2  ;;  %824 = vmatpush1.msra.mxu1 %v5365_v11  ;;  %v10987_v2 = vld [vmem:[#allocation11_spill] sm:$0xff]  ;;  %v10995_v11 = vld [vmem:[#allocation18_spill] sm:$0xff] }
 0x12a   :  { %754 = vmatprep.subr.mxu0 %v5318_v3  ;;  %825 = vmatprep.subr.mxu1 %v5377_v13  ;;  %v10988_v3 = vld [vmem:[#allocation6_spill] sm:$0xff]  ;;  %v10997_v13 = vld [vmem:[#allocation19_spill] sm:$0xff] }
 0x12b   :  { %755 = vmatpush1.msra.mxu0 %v5324_v4  ;;  %826 = vmatpush1.msra.mxu1 %v5382_v14  ;;  %v10989_v4 = vld [vmem:[#allocation13_spill] sm:$0xff]  ;;  %v10998_v14 = vld [vmem:[#allocation12_spill] sm:$0xff] }
 0x12c   :  { %756 = vmatprep.subr.mxu0 %v5330_v5  ;;  %827 = vmatprep.subr.mxu1 %v5394_v16  ;;  %v10990_v5 = vld [vmem:[#allocation7_spill] sm:$0xff]  ;;  %v11000_v16 = vld [vmem:[#allocation14_spill] sm:$0xff] }
 0x12d   :  { %757 = vmatpush1.msra.mxu0 %v5336_v6  ;;  %828 = vmatpush1.msra.mxu1 %v5406_v18  ;;  %v10991_v6 = vld [vmem:[#allocation15_spill] sm:$0xff]  ;;  %v11002_v18 = vld [vmem:[#allocation16_spill] sm:$0xff] }
 0x12e   :  { %758 = vmatprep.subr.mxu0 %v5342_v7  ;;  %829 = vmatprep.subr.mxu1 %v5411_v19  ;;  %v10992_v7 = vld [vmem:[#allocation8_spill] sm:$0xff]  ;;  %v11003_v19 = vmov 0.0  }
 0x12f   :  { %759 = vmatpush1.msra.mxu0 %v5348_v8  ;;  %830 = vmatpush1.msra.mxu1 %v5423_v21  ;;  %v10993_v8 = vld [vmem:[#allocation17_spill] sm:$0xff]  ;;  %v11005_v21 = vld [vmem:[#allocation20_spill] sm:$0xff] }
 0x130   :  { %760 = vmatprep.subr.mxu0 %v5359_v10  ;;  %831 = vmatprep.subr.mxu1 %v5435_v23  ;;  %v10994_v10 = vld [vmem:[#allocation9_spill] sm:$0xff]  ;;  %v11007_v23 = vld [vmem:[#allocation22_spill] sm:$0xff] }
 0x131   :  { %761 = vmatpush1.msra.mxu0 %v5371_v12  ;;  %832 = vmatpush1.msra.mxu1 %v5447_v25  ;;  %v10996_v12 = vld [vmem:[#allocation10_spill] sm:$0xff]  ;;  %v11009_v25 = vld [vmem:[#allocation24_spill] sm:$0xff] }
 0x132   :  { %762 = vmatprep.subr.mxu0 %v5388_v15  ;;  %833 = vmatprep.subr.mxu1 %v5459_v27  ;;  %v10999_v15 = vld [vmem:[#allocation21_spill] sm:$0xff]  ;;  %v11011_v27 = vld [vmem:[#allocation26_spill] sm:$0xff] }
 0x133   :  { %763 = vmatpush1.msra.mxu0 %v5400_v17  ;;  %834 = vmatpush1.msra.mxu1 %v5471_v29  ;;  %v11001_v17 = vld [vmem:[#allocation23_spill] sm:$0xff]  ;;  %v11013_v29 = vld [vmem:[#allocation29_spill] sm:$0xff] }
 0x134   :  { %764 = vmatprep.subr.mxu0 %v5417_v20  ;;  %835 = vmatprep.subr.mxu1 %v5483_v31  ;;  %v11004_v20 = vld [vmem:[#allocation25_spill] sm:$0xff]  ;;  %v11015_v31 = vld [vmem:[#allocation31_spill] sm:$0xff] }
 0x135   :  { %765 = vmatpush1.msra.mxu0 %v5429_v22  ;;  %836 = vmatpush1.msra.mxu1 %v5495_v33  ;;  %v11006_v22 = vld [vmem:[#allocation27_spill] sm:$0xff]  ;;  %v11017_v33 = vld [vmem:[#allocation33_spill] sm:$0xff] }
 0x136   :  { %766 = vmatprep.subr.mxu0 %v5441_v24  ;;  %837 = vmatprep.subr.mxu1 %v5507_v35  ;;  %v11008_v24 = vld [vmem:[#allocation28_spill] sm:$0xff]  ;;  %v11019_v35 = vld [vmem:[#allocation35_spill] sm:$0xff] }
 0x137   :  { %767 = vmatpush1.msra.mxu0 %v5453_v26  ;;  %838 = vmatpush1.msra.mxu1 %v5519_v37  ;;  %v11010_v26 = vld [vmem:[#allocation30_spill] sm:$0xff]  ;;  %v11021_v37 = vld [vmem:[#allocation39_spill] sm:$0xff] }
 0x138   :  { %768 = vmatprep.subr.mxu0 %v5465_v28  ;;  %839 = vmatprep.subr.mxu1 %v5531_v39  ;;  %v11012_v28 = vld [vmem:[#allocation32_spill] sm:$0xff]  ;;  %v11023_v39 = vld [vmem:[#allocation41_spill] sm:$0xff] }
 0x139   :  { %769 = vmatpush1.msra.mxu0 %v5477_v30  ;;  %840 = vmatpush1.msra.mxu1 %v5543_v41  ;;  %v11014_v30 = vld [vmem:[#allocation34_spill] sm:$0xff]  ;;  %v11025_v41 = vld [vmem:[#allocation43_spill] sm:$0xff] }
 0x13a   :  { %770 = vmatprep.subr.mxu0 %v5489_v32  ;;  %841 = vmatprep.subr.mxu1 %v5555_v43  ;;  %v11016_v32 = vld [vmem:[#allocation36_spill] sm:$0xff]  ;;  %v11027_v43 = vld [vmem:[#allocation45_spill] sm:$0xff] }
 0x13b   :  { %771 = vmatpush1.msra.mxu0 %v5501_v34  ;;  %842 = vmatpush1.msra.mxu1 %v5567_v45  ;;  %v11018_v34 = vld [vmem:[#allocation37_spill] sm:$0xff]  ;;  %v11029_v45 = vld [vmem:[#allocation47_spill] sm:$0xff] }
 0x13c   :  { %772 = vmatprep.subr.mxu0 %v5513_v36  ;;  %843 = vmatprep.subr.mxu1 %v5579_v47  ;;  %v11020_v36 = vld [vmem:[#allocation38_spill] sm:$0xff]  ;;  %v11031_v47 = vld [vmem:[#allocation49_spill] sm:$0xff] }
 0x13d   :  { %773 = vmatpush1.msra.mxu0 %v5525_v38  ;;  %844 = vmatpush1.msra.mxu1 %v5591_v49  ;;  %v11022_v38 = vld [vmem:[#allocation40_spill] sm:$0xff]  ;;  %v11032_v49 = vld [vmem:[#allocation50_spill] sm:$0xff] }
 0x13e   :  { %774 = vmatprep.subr.mxu0 %v5537_v40  ;;  %845 = vmatprep.subr.mxu1 %v5603_v51  ;;  %v11024_v40 = vld [vmem:[#allocation42_spill] sm:$0xff]  ;;  %v11033_v51 = vld [vmem:[#allocation51_spill] sm:$0xff] }
 0x13f   :  { %775 = vmatpush1.msra.mxu0 %v5549_v42  ;;  %846 = vmatpush1.msra.mxu1 %v10987_v2  ;;  %v11026_v42 = vld [vmem:[#allocation44_spill] sm:$0xff] }
 0x140   :  { %776 = vmatprep.subr.mxu0 %v10988_v3  ;;  %847 = vmatprep.subr.mxu1 %v10989_v4  ;;  %v11050_v2 = vld [vmem:[#allocation68_spill] sm:$0xff]  ;;  %v11051_v3 = vld [vmem:[#allocation69_spill] sm:$0xff]  ;;  %v11052_v4 = vld [vmem:[#allocation70_spill] sm:$0xff] }
 0x141   :  { %777 = vmatpush1.msra.mxu0 %v10990_v5  ;;  %848 = vmatpush1.msra.mxu1 %v10991_v6  ;;  %v11053_v5 = vld [vmem:[#allocation71_spill] sm:$0xff]  ;;  %v11054_v6 = vld [vmem:[#allocation72_spill] sm:$0xff] }
 0x142   :  { %778 = vmatprep.subr.mxu0 %v10992_v7  ;;  %849 = vmatprep.subr.mxu1 %v10993_v8  ;;  %v11055_v7 = vld [vmem:[#allocation73_spill] sm:$0xff]  ;;  %v11056_v8 = vld [vmem:[#allocation74_spill] sm:$0xff] }
 0x143   :  { %779 = vmatpush1.msra.mxu0 %v10994_v10  ;;  %850 = vmatpush1.msra.mxu1 %v10995_v11  ;;  %v11057_v10 = vld [vmem:[#allocation75_spill] sm:$0xff]  ;;  %v11058_v11 = vld [vmem:[#allocation76_spill] sm:$0xff] }
 0x144   :  { %780 = vmatprep.subr.mxu0 %v10996_v12  ;;  %851 = vmatprep.subr.mxu1 %v10997_v13  ;;  %v11059_v12 = vld [vmem:[#allocation77_spill] sm:$0xff]  ;;  %v11060_v13 = vld [vmem:[#allocation78_spill] sm:$0xff] }
 0x145   :  { %781 = vmatpush1.msra.mxu0 %v10998_v14  ;;  %852 = vmatpush1.msra.mxu1 %v10999_v15  ;;  %v11061_v14 = vld [vmem:[#allocation79_spill] sm:$0xff]  ;;  %v11062_v15 = vld [vmem:[#allocation80_spill] sm:$0xff] }
 0x146   :  { %782 = vmatprep.subr.mxu0 %v11000_v16  ;;  %853 = vmatprep.subr.mxu1 %v11001_v17  ;;  %v11063_v16 = vld [vmem:[#allocation81_spill] sm:$0xff]  ;;  %v11064_v17 = vld [vmem:[#allocation82_spill] sm:$0xff] }
 0x147   :  { %783 = vmatpush1.msra.mxu0 %v11002_v18  ;;  %816 = vmatprep.mubr.f32.mxu0 %v11003_v19  ;;  %v11065_v18 = vld [vmem:[#allocation83_spill] sm:$0xff] }
 0x148   :  { %854 = vmatpush1.msra.mxu1 %v11004_v20  ;;  %887 = vmatprep.mubr.f32.mxu1 %v11003_v19  ;;  %v11066_v20 = vld [vmem:[#allocation84_spill] sm:$0xff] }
 0x149   :  { %817 = vmatmul.mubr.f32.vlgmr.msra.gmra.mxu0 %v6290_v56  ;;  %888 = vmatmul.mubr.f32.vlgmr.msra.gmra.mxu1 %v6290_v56  ;;  %v11049_v56 = vld [vmem:[#allocation67_spill] sm:$0xff] }
 0x14a   :  { %894 = vmatprep.subr.mxu0 %v11005_v21  ;;  %965 = vmatprep.subr.mxu1 %v11006_v22  ;;  %v11067_v21 = vld [vmem:[#allocation85_spill] sm:$0xff]  ;;  %v11068_v22 = vld [vmem:[#allocation86_spill] sm:$0xff] }
 0x14b   :  { %895 = vmatpush1.msra.mxu0 %v11007_v23  ;;  %966 = vmatpush1.msra.mxu1 %v11008_v24  ;;  %v11069_v23 = vld [vmem:[#allocation87_spill] sm:$0xff]  ;;  %v11070_v24 = vld [vmem:[#allocation88_spill] sm:$0xff] }
 0x14c   :  { %896 = vmatprep.subr.mxu0 %v11009_v25  ;;  %967 = vmatprep.subr.mxu1 %v11010_v26  ;;  %v246_v25 = vlaneseq }
 0x14d   :  { %897 = vmatpush1.msra.mxu0 %v11011_v27  ;;  %968 = vmatpush1.msra.mxu1 %v11012_v28  ;;  %v474_v27 = vpop.f32.mrf.mxu0 }
 0x14e   :  { %898 = vmatprep.subr.mxu0 %v11013_v29  ;;  %969 = vmatprep.subr.mxu1 %v11014_v30  ;;  %v247_v26 = vshrl.u32 %v246_v25, 7  ;;  %v244_v29 = vld [vmem:[%s10275_s4] sm:$0xf]  ;;  %v545_v30 = vpop.f32.mrf.mxu1 }
 0x14f   :  { %899 = vmatpush1.msra.mxu0 %v11015_v31  ;;  %970 = vmatpush1.msra.mxu1 %v11016_v32  ;;  %v476_v32 = vpop.f32.mrf.mxu0 }
 0x150   :  { %900 = vmatprep.subr.mxu0 %v11017_v33  ;;  %971 = vmatprep.subr.mxu1 %v11018_v34  ;;  %v248_v28 = vsub.s32 0, %v247_v26  ;;  %v252_v31 = vsub.s32 1, %v247_v26 }
 0x151   :  { %901 = vmatpush1.msra.mxu0 %v11019_v35  ;;  %972 = vmatpush1.msra.mxu1 %v11020_v36  ;;  %v547_v35 = vpop.f32.mrf.mxu1 }
 0x152   :  { %902 = vmatprep.subr.mxu0 %v11021_v37  ;;  %973 = vmatprep.subr.mxu1 %v11022_v38  ;;  %v6431_v33 = vrot.slane %v244_v29, %v248_v28  ;;  %v6433_v37 = vrot.slane %v244_v29, %v252_v31  ;;  %v11072_v28 = vld [vmem:[#allocation90_spill] sm:$0xff]  ;;  %v11075_v31 = vld [vmem:[#allocation93_spill] sm:$0xff] }
 0x153   :  { %903 = vmatpush1.msra.mxu0 %v11023_v39  ;;  %974 = vmatpush1.msra.mxu1 %v11024_v40 }
 0x154   :  { %904 = vmatprep.subr.mxu0 %v11025_v41  ;;  %975 = vmatprep.subr.mxu1 %v11026_v42 }
 0x155   :  { %905 = vmatpush1.msra.mxu0 %v11027_v43  ;;  %976 = vmatpush1.msra.mxu1 %v11028_v44  ;;  %v260_v44 = vsub.s32 3, %v247_v26 }
 0x156   :  { %906 = vmatprep.subr.mxu0 %v11029_v45  ;;  %977 = vmatprep.subr.mxu1 %v11030_v46 }
 0x157   :  { %907 = vmatpush1.msra.mxu0 %v11031_v47  ;;  %978 = vmatpush1.msra.mxu1 %v11032_v49  ;;  %v6437_v47 = vrot.slane %v244_v29, %v260_v44 }
 0x158   :  { %908 = vmatprep.subr.mxu0 %v11033_v51  ;;  %979 = vmatprep.subr.mxu1 %v11034_v55  ;;  %v256_v51 = vsub.s32 2, %v247_v26 }
 0x159   :  { %909 = vmatpush1.msra.mxu0 %v11035_v57  ;;  %980 = vmatpush1.msra.mxu1 %v11036_v58 }
 0x15a   :  { %910 = vmatprep.subr.mxu0 %v11037_v1  ;;  %981 = vmatprep.subr.mxu1 %v11038_v9  ;;  %v6440_v57 = vrot.slane %v244_v29, %v256_v51  ;;  %v11073_v29 = vld [vmem:[#allocation91_spill] sm:$0xff]  ;;  %v11087_v51 = vld [vmem:[#allocation105_spill] sm:$0xff] }
 0x15b   :  { %911 = vmatpush1.msra.mxu0 %v11039_v50  ;;  %982 = vmatpush1.msra.mxu1 %v11040_v63 }
 0x15c   :  { %912 = vmatprep.subr.mxu0 %v11041_v54  ;;  %983 = vmatprep.subr.mxu1 %v11042_v59 }
 0x15d   :  { %913 = vmatpush1.msra.mxu0 %v11043_v0  ;;  %984 = vmatpush1.msra.mxu1 %v11044_v60  ;;  %v4273_v0 = vld [vmem:[%s10271_s0 + $0x20] sm:$0xff] }
 0x15e   :  { %914 = vmatprep.subr.mxu0 %v11045_v61  ;;  %985 = vmatprep.subr.mxu1 %v11046_v62  ;;  %v4274_v61 = vld [vmem:[%s10271_s0 + $0x28] sm:$0xff] }
 0x15f   :  { %915 = vmatpush1.msra.mxu0 %v11047_v48  ;;  %986 = vmatpush1.msra.mxu1 %v11048_v52 }
 0x160   :  { %916 = vmatprep.subr.mxu0 %v11049_v56  ;;  %987 = vmatprep.subr.mxu1 %v11050_v2 }
 0x161   :  { %917 = vmatpush1.msra.mxu0 %v11051_v3  ;;  %988 = vmatpush1.msra.mxu1 %v11052_v4 }
 0x162   :  { %918 = vmatprep.subr.mxu0 %v11053_v5  ;;  %989 = vmatprep.subr.mxu1 %v11054_v6 }
 0x163   :  { %919 = vmatpush1.msra.mxu0 %v11055_v7  ;;  %990 = vmatpush1.msra.mxu1 %v11056_v8 }
 0x164   :  { %920 = vmatprep.subr.mxu0 %v11057_v10  ;;  %991 = vmatprep.subr.mxu1 %v11058_v11 }
 0x165   :  { %921 = vmatpush1.msra.mxu0 %v11059_v12  ;;  %992 = vmatpush1.msra.mxu1 %v11060_v13 }
 0x166   :  { %922 = vmatprep.subr.mxu0 %v11061_v14  ;;  %993 = vmatprep.subr.mxu1 %v11062_v15  ;;  %v4276_v14 = vld [vmem:[%s10271_s0 + $0x38] sm:$0xff]  ;;  %v4275_v15 = vld [vmem:[%s10271_s0 + $0x30] sm:$0xff] }
 0x167   :  { %923 = vmatpush1.msra.mxu0 %v11063_v16  ;;  %994 = vmatpush1.msra.mxu1 %v11064_v17 }
 0x168   :  { %924 = vmatprep.subr.mxu0 %v11065_v18  ;;  %995 = vmatprep.subr.mxu1 %v11066_v20 }
 0x169   :  { %925 = vmatpush1.msra.mxu0 %v11067_v21  ;;  %996 = vmatpush1.msra.mxu1 %v11068_v22 }
 0x16a   :  { %958 = vmatprep.mubr.f32.mxu0 %v11003_v19  ;;  %1029 = vmatprep.mubr.f32.mxu1 %v11003_v19 }
 0x16b   :  { %1069 = vmatprep.subr.mxu0 %v11069_v23  ;;  %1140 = vmatprep.subr.mxu1 %v11070_v24 }
 0x1e8   :  { %v648_v34 = vpop.f32.mrf.mxu0  ;;  %v719_v40 = vpop.f32.mrf.mxu1 }
 0x1e9   :  { %v649_v36 = vadd.f32 %v648_v34, %v474_v27  ;;  %v720_v58 = vadd.f32 %v719_v40, %v545_v30  ;;  %v11071_v27 = vld [vmem:[#allocation89_spill] sm:$0xff]  ;;  %v11074_v30 = vld [vmem:[#allocation92_spill] sm:$0xff]  ;;  %v11077_v34 = vld [vmem:[#allocation95_spill] sm:$0xff] }
 0x1ea   :  { %v650_v38 = vpop.f32.mrf.mxu0  ;;  %v721_v46 = vpop.f32.mrf.mxu1  ;;  %v11082_v40 = vld [vmem:[#allocation100_spill] sm:$0xff] }
 0x1eb   :  { %v724_v39 = vadd.f32 %v649_v36, %v6431_v33  ;;  %v651_v41 = vadd.f32 %v650_v38, %v476_v32  ;;  %v722_v49 = vadd.f32 %v721_v46, %v547_v35  ;;  %v726_v50 = vadd.f32 %v720_v58, %v6440_v57  ;;  %v11076_v32 = vld [vmem:[#allocation94_spill] sm:$0xff]  ;;  %v11078_v35 = vld [vmem:[#allocation96_spill] sm:$0xff]  ;;  %v11079_v36 = vld [vmem:[#allocation97_spill] sm:$0xff] }
 0x1ec   :  { %v11080_v38 = vld [vmem:[#allocation98_spill] sm:$0xff]  ;;  %v11086_v46 = vld [vmem:[#allocation104_spill] sm:$0xff] }
 0x1ed   :  { %v4270_v42 = vmul.f32 -1.442695, %v724_v39  ;;  %v725_v43 = vadd.f32 %v651_v41, %v6433_v37  ;;  %v727_v55 = vadd.f32 %v722_v49, %v6437_v47  ;;  %v11081_v39 = vld [vmem:[#allocation99_spill] sm:$0xff] }
 0x1ef   :  { %4417 = vpow2.f32 %v4270_v42  ;;  %v4271_v45 = vmul.f32 -1.442695, %v725_v43  ;;  %v4272_v1 = vmul.f32 -1.442695, %v727_v55  ;;  %v11083_v42 = vld [vmem:[#allocation101_spill] sm:$0xff]  ;;  %v11084_v43 = vld [vmem:[#allocation102_spill] sm:$0xff] }
 0x1f0   :  { %v11088_v55 = vld [vmem:[#allocation106_spill] sm:$0xff] }
 0x1f1   :  { %4419 = vpow2.f32 %v4271_v45  ;;  %v11085_v45 = vld [vmem:[#allocation103_spill] sm:$0xff] }
 0x1f2   :  { %4421 = vpow2.f32 %v4272_v1  ;;  %v11089_v1 = vld [vmem:[#allocation107_spill] sm:$0xff] }
 0x1fc   :  { %v4418_v9 = vpop.eup %4417 }
 0x1fd   :  { %v731_v63 = vadd.f32 1.0, %v4418_v9  ;;  %v11090_v9 = vld [vmem:[#allocation108_spill] sm:$0xff] }
 0x1fe   :  { %v4420_v54 = vpop.eup %4419 }
 0x1ff   :  { %4423 = vrcp.f32 %v731_v63  ;;  %v737_v59 = vadd.f32 1.0, %v4420_v54  ;;  %v4422_v48 = vpop.eup %4421  ;;  %v11091_v54 = vld [vmem:[#allocation109_spill] sm:$0xff] }
 0x200   :  { %4425 = vtanh.f32 %v726_v50  ;;  %v744_v6 = vadd.f32 1.0, %v4422_v48  ;;  %v11095_v48 = vld [vmem:[#allocation113_spill] sm:$0xff] }
 0x201   :  { %4427 = vrcp.f32 %v737_v59  ;;  %v11092_v59 = vld [vmem:[#allocation110_spill] sm:$0xff] }
 0x209   :  { %v818_v60 = vpop.f32.mrf.mxu0  ;;  %v889_v11 = vpop.f32.mrf.mxu1 }
 0x20a   :  { %v1041_v62 = vadd.f32 %v4273_v0, %v818_v60  ;;  %v1043_v17 = vadd.f32 %v4275_v15, %v889_v11  ;;  %v11093_v0 = vld [vmem:[#allocation111_spill] sm:$0xff]  ;;  %v11094_v60 = vld [vmem:[#allocation112_spill] sm:$0xff]  ;;  %v11107_v11 = vld [vmem:[#allocation125_spill] sm:$0xff] }
 0x20b   :  { %v820_v52 = vpop.f32.mrf.mxu0  ;;  %v891_v13 = vpop.f32.mrf.mxu1  ;;  %v11110_v15 = vld [vmem:[#allocation128_spill] sm:$0xff] }
 0x20c   :  { %v4424_v56 = vpop.eup %4423  ;;  %v4277_v2 = vmul.f32 -1.442695, %v1041_v62  ;;  %v1042_v3 = vadd.f32 %v4274_v61, %v820_v52  ;;  %v1044_v16 = vadd.f32 %v4276_v14, %v891_v13  ;;  %v11096_v52 = vld [vmem:[#allocation114_spill] sm:$0xff]  ;;  %v11109_v14 = vld [vmem:[#allocation127_spill] sm:$0xff] }
 0x20d   :  { %v4426_v4 = vpop.eup %4425  ;;  %v11108_v13 = vld [vmem:[#allocation126_spill] sm:$0xff] }
 0x20e   :  { %v4428_v5 = vpop.eup %4427  ;;  %4429 = vpow2.f32 %v4277_v2  ;;  %v4278_v7 = vmul.f32 -1.442695, %v1042_v3  ;;  %v748_v10 = vmul.f32 %v4426_v4, %v4424_v56  ;;  %v4279_v20 = vmul.f32 -1.442695, %v1044_v16  ;;  %v11097_v56 = vld [vmem:[#allocation115_spill] sm:$0xff]  ;;  %v11098_v2 = vld [vmem:[#allocation116_spill] sm:$0xff] }
 0x20f   :  { %v747_v8 = vmul.f32 0.0, %v4428_v5  ;;  %v11100_v3 = vld [vmem:[#allocation118_spill] sm:$0xff]  ;;  %v11101_v4 = vld [vmem:[#allocation119_spill] sm:$0xff]  ;;  %v11102_v5 = vld [vmem:[#allocation120_spill] sm:$0xff] }
 0x210   :  { %4431 = vpow2.f32 %v4278_v7  ;;  %v11104_v7 = vld [vmem:[#allocation122_spill] sm:$0xff]  ;;  %v11111_v16 = vld [vmem:[#allocation129_spill] sm:$0xff] }
 0x211   :  { %v6449_v12 = vadd.f32 %v748_v10, %v747_v8  ;;  %4433 = vrcp.f32 %v744_v6  ;;  %v11103_v6 = vld [vmem:[#allocation121_spill] sm:$0xff]  ;;  %v11105_v8 = vld [vmem:[#allocation123_spill] sm:$0xff]  ;;  %v11106_v10 = vld [vmem:[#allocation124_spill] sm:$0xff] }
 0x213   :  { %4435 = vtanh.f32 %v6449_v12 }
 0x214   :  { %4437 = vtanh.f32 %v1043_v17  ;;  %v11112_v17 = vld [vmem:[#allocation130_spill] sm:$0xff] }
 0x21b   :  { %v4430_v18 = vpop.eup %4429 }
 0x21c   :  { %v1048_v21 = vadd.f32 1.0, %v4430_v18  ;;  %v11113_v18 = vld [vmem:[#allocation131_spill] sm:$0xff] }
 0x21d   :  { %v4432_v22 = vpop.eup %4431 }
 0x21e   :  { %4439 = vrcp.f32 %v1048_v21  ;;  %v1054_v23 = vadd.f32 1.0, %v4432_v22  ;;  %v4434_v24 = vpop.eup %4433  ;;  %v11115_v21 = vld [vmem:[#allocation133_spill] sm:$0xff]  ;;  %v11116_v22 = vld [vmem:[#allocation134_spill] sm:$0xff] }
 0x21f   :  { %4441 = vpow2.f32 %v4279_v20  ;;  %v11114_v20 = vld [vmem:[#allocation132_spill] sm:$0xff] }
 0x220   :  { %v4436_v25 = vpop.eup %4435  ;;  %4443 = vrcp.f32 %v1054_v23  ;;  %v11117_v23 = vld [vmem:[#allocation135_spill] sm:$0xff] }
 0x221   :  { %v751_v26 = vmul.f32 %v4436_v25, %v4434_v24  ;;  %v4438_v41 = vpop.eup %4437  ;;  %v11118_v24 = vld [vmem:[#allocation136_spill] sm:$0xff]  ;;  %v11119_v25 = vld [vmem:[#allocation137_spill] sm:$0xff] }
 0x223   :  { %959 = vmatmul.mubr.f32.vlgmr.msra.gmra.mxu0 %v751_v26  ;;  %1030 = vmatmul.mubr.f32.vlgmr.msra.gmra.mxu1 %v751_v26  ;;  %v11120_v26 = vld [vmem:[#allocation138_spill] sm:$0xff] }
 0x224   :  { %1070 = vmatpush1.msra.mxu0 %v11071_v27  ;;  %1141 = vmatpush1.msra.mxu1 %v11072_v28  ;;  %v11121_v27 = vld [vmem:[#allocation139_spill] sm:$0xff]  ;;  %v11122_v28 = vld [vmem:[#allocation140_spill] sm:$0xff] }
 0x225   :  { %1071 = vmatprep.subr.mxu0 %v11073_v29  ;;  %1142 = vmatprep.subr.mxu1 %v11074_v30  ;;  %v11123_v29 = vld [vmem:[#allocation141_spill] sm:$0xff]  ;;  %v11124_v30 = vld [vmem:[#allocation142_spill] sm:$0xff] }
 0x226   :  { %1072 = vmatpush1.msra.mxu0 %v11075_v31  ;;  %1143 = vmatpush1.msra.mxu1 %v11076_v32  ;;  %v11125_v32 = vld [vmem:[#allocation143_spill] sm:$0xff] }
 0x227   :  { %1073 = vmatprep.subr.mxu0 %v11077_v34  ;;  %1144 = vmatprep.subr.mxu1 %v11078_v35  ;;  %v11126_v34 = vld [vmem:[#allocation144_spill] sm:$0xff]  ;;  %v11127_v35 = vld [vmem:[#allocation145_spill] sm:$0xff] }
 0x228   :  { %1074 = vmatpush1.msra.mxu0 %v11079_v36  ;;  %1145 = vmatpush1.msra.mxu1 %v11080_v38  ;;  %v11128_v36 = vld [vmem:[#allocation146_spill] sm:$0xff] }
 0x229   :  { %1075 = vmatprep.subr.mxu0 %v11081_v39  ;;  %1146 = vmatprep.subr.mxu1 %v11082_v40  ;;  %v11129_v39 = vld [vmem:[#allocation147_spill] sm:$0xff]  ;;  %v11130_v40 = vld [vmem:[#allocation148_spill] sm:$0xff] }
 0x22a   :  { %1076 = vmatpush1.msra.mxu0 %v11083_v42  ;;  %1147 = vmatpush1.msra.mxu1 %v11084_v43  ;;  %v11132_v43 = vld [vmem:[#allocation150_spill] sm:$0xff] }
 0x22b   :  { %v4440_v44 = vpop.eup %4439  ;;  %1077 = vmatprep.subr.mxu0 %v11085_v45  ;;  %1148 = vmatprep.subr.mxu1 %v11086_v46  ;;  %v6539_v45 = vld [vmem:[%s10272_s1 + $0x1f8] sm:$0xff]  ;;  %v6545_v46 = vld [vmem:[%s10272_s1 + $0x1e0] sm:$0xff] }
 0x22c   :  { %v4442_v49 = vpop.eup %4441  ;;  %1078 = vmatpush1.msra.mxu0 %v11087_v51  ;;  %1149 = vmatpush1.msra.mxu1 %v11088_v55  ;;  %v1065_v50 = vmul.f32 %v4440_v44, %v4438_v41  ;;  %v11131_v41 = vld [vmem:[#allocation149_spill] sm:$0xff]  ;;  %v6533_v44 = vld [vmem:[%s10272_s1 + $0x1e8] sm:$0xff] }
 0x22d   :  { %v4444_v58 = vpop.eup %4443  ;;  %1079 = vmatprep.subr.mxu0 %v11089_v1  ;;  %1150 = vmatprep.subr.mxu1 %v11090_v9  ;;  %v1061_v62 = vadd.f32 1.0, %v4442_v49  ;;  %v6551_v49 = vld [vmem:[%s10272_s1 + $0x1f0] sm:$0xff]  ;;  %v6557_v51 = vld [vmem:[%s10272_s1 + $0x1c8] sm:$0xff]  ;;  %v6563_v55 = vld [vmem:[%s10272_s1 + $0x1d8] sm:$0xff] }
 0x22e   :  { %v1064_v63 = vmul.f32 %v4444_v58, %v6287_v53  ;;  %1080 = vmatpush1.msra.mxu0 %v11091_v54  ;;  %1151 = vmatpush1.msra.mxu1 %v11092_v59  ;;  %v11099_v53 = vld [vmem:[#allocation117_spill] sm:$0xff]  ;;  %v6569_v58 = vld [vmem:[%s10272_s1 + $0x1c0] sm:$0xff]  ;;  %v6575_v1 = vld [vmem:[%s10272_s1 + $0x1d0] sm:$0xff] }
 0x22f   :  { %1081 = vmatprep.subr.mxu0 %v11093_v0  ;;  %1152 = vmatprep.subr.mxu1 %v11094_v60  ;;  %v6581_v9 = vld [vmem:[%s10272_s1 + $0x1a8] sm:$0xff]  ;;  %v6599_v54 = vld [vmem:[%s10272_s1 + $0x1b0] sm:$0xff]  ;;  %v6611_v0 = vld [vmem:[%s10272_s1 + $0x198] sm:$0xff] }
 0x230   :  { %v6483_v61 = vadd.f32 %v1065_v50, %v1064_v63  ;;  %1082 = vmatpush1.msra.mxu0 %v11095_v48  ;;  %1153 = vmatpush1.msra.mxu1 %v11096_v52  ;;  %v6587_v50 = vld [vmem:[%s10272_s1 + $0x1b8] sm:$0xff]  ;;  %v6593_v63 = vld [vmem:[%s10272_s1 + $0x1a0] sm:$0xff]  ;;  %v6605_v59 = vld [vmem:[%s10272_s1 + $0x188] sm:$0xff] }
 0x231   :  { %1083 = vmatprep.subr.mxu0 %v11097_v56  ;;  %1154 = vmatprep.subr.mxu1 %v11098_v2  ;;  %v6617_v60 = vld [vmem:[%s10272_s1 + $0x180] sm:$0xff]  ;;  %v6629_v48 = vld [vmem:[%s10272_s1 + $0x168] sm:$0xff]  ;;  %v6635_v52 = vld [vmem:[%s10272_s1 + $0x178] sm:$0xff] }
 0x232   :  { %1084 = vmatpush1.msra.mxu0 %v11099_v53  ;;  %1155 = vmatpush1.msra.mxu1 %v11100_v3  ;;  %4445 = vtanh.f32 %v6483_v61  ;;  %v6641_v56 = vld [vmem:[%s10272_s1 + $0x160] sm:$0xff]  ;;  %v6647_v2 = vld [vmem:[%s10272_s1 + $0x170] sm:$0xff]  ;;  %v6653_v53 = vld [vmem:[%s10272_s1 + $0x148] sm:$0xff] }
 0x233   :  { %1085 = vmatprep.subr.mxu0 %v11101_v4  ;;  %1156 = vmatprep.subr.mxu1 %v11102_v5  ;;  %4447 = vrcp.f32 %v1061_v62  ;;  %v6623_v62 = vld [vmem:[%s10272_s1 + $0x190] sm:$0xff]  ;;  %v6659_v3 = vld [vmem:[%s10272_s1 + $0x158] sm:$0xff]  ;;  %v6665_v4 = vld [vmem:[%s10272_s1 + $0x140] sm:$0xff] }
 0x234   :  { %1086 = vmatpush1.msra.mxu0 %v11103_v6  ;;  %1157 = vmatpush1.msra.mxu1 %v11104_v7  ;;  %v6671_v5 = vld [vmem:[%s10272_s1 + $0x150] sm:$0xff]  ;;  %v6677_v6 = vld [vmem:[%s10272_s1 + $0x128] sm:$0xff]  ;;  %v6683_v7 = vld [vmem:[%s10272_s1 + $0x138] sm:$0xff] }
 0x235   :  { %1087 = vmatprep.subr.mxu0 %v11105_v8  ;;  %1158 = vmatprep.subr.mxu1 %v11106_v10  ;;  %v6689_v8 = vld [vmem:[%s10272_s1 + $0x120] sm:$0xff]  ;;  %v6695_v10 = vld [vmem:[%s10272_s1 + $0x130] sm:$0xff] }
 0x236   :  { %1088 = vmatpush1.msra.mxu0 %v11107_v11  ;;  %1159 = vmatpush1.msra.mxu1 %v11108_v13  ;;  %v6701_v11 = vld [vmem:[%s10272_s1 + $0x108] sm:$0xff]  ;;  %v6707_v13 = vld [vmem:[%s10272_s1 + $0x118] sm:$0xff] }
 0x237   :  { %1089 = vmatprep.subr.mxu0 %v11109_v14  ;;  %1160 = vmatprep.subr.mxu1 %v11110_v15  ;;  %v6713_v14 = vld [vmem:[%s10272_s1 + $0x100] sm:$0xff]  ;;  %v6719_v15 = vld [vmem:[%s10272_s1 + $0x110] sm:$0xff] }
 0x238   :  { %1090 = vmatpush1.msra.mxu0 %v11111_v16  ;;  %1161 = vmatpush1.msra.mxu1 %v11112_v17  ;;  %v6725_v16 = vld [vmem:[%s10272_s1 + $0xe8] sm:$0xff]  ;;  %v6731_v17 = vld [vmem:[%s10272_s1 + $0xf8] sm:$0xff] }
 0x239   :  { %1091 = vmatprep.subr.mxu0 %v11113_v18  ;;  %1162 = vmatprep.subr.mxu1 %v11114_v20  ;;  %v6737_v18 = vld [vmem:[%s10272_s1 + $0xe0] sm:$0xff]  ;;  %v6743_v20 = vld [vmem:[%s10272_s1 + $0xf0] sm:$0xff] }
 0x23a   :  { %1092 = vmatpush1.msra.mxu0 %v11115_v21  ;;  %1163 = vmatpush1.msra.mxu1 %v11116_v22  ;;  %v6749_v21 = vld [vmem:[%s10272_s1 + $0xc8] sm:$0xff]  ;;  %v6755_v22 = vld [vmem:[%s10272_s1 + $0xd8] sm:$0xff] }
 0x23b   :  { %1093 = vmatprep.subr.mxu0 %v11117_v23  ;;  %1164 = vmatprep.subr.mxu1 %v11118_v24  ;;  %11133 = vst [vmem:[#allocation11_spill] sm:$0xff] %v6755_v22  ;;  %v6761_v23 = vld [vmem:[%s10272_s1 + $0xc0] sm:$0xff]  ;;  %v6767_v24 = vld [vmem:[%s10272_s1 + $0xd0] sm:$0xff] }
 0x23c   :  { %1094 = vmatpush1.msra.mxu0 %v11119_v25  ;;  %1165 = vmatpush1.msra.mxu1 %v11120_v26  ;;  %11134 = vst [vmem:[#allocation6_spill] sm:$0xff] %v6761_v23  ;;  %11135 = vst [vmem:[#allocation13_spill] sm:$0xff] %v6767_v24  ;;  %v6773_v25 = vld [vmem:[%s10272_s1 + $0xa8] sm:$0xff]  ;;  %v6779_v26 = vld [vmem:[%s10272_s1 + $0xb8] sm:$0xff] }
 0x23d   :  { %1095 = vmatprep.subr.mxu0 %v11121_v27  ;;  %1166 = vmatprep.subr.mxu1 %v11122_v28  ;;  %11136 = vst [vmem:[#allocation7_spill] sm:$0xff] %v6773_v25  ;;  %11137 = vst [vmem:[#allocation15_spill] sm:$0xff] %v6779_v26  ;;  %v6785_v27 = vld [vmem:[%s10272_s1 + $0xa0] sm:$0xff]  ;;  %v6791_v28 = vld [vmem:[%s10272_s1 + $0xb0] sm:$0xff] }
 0x23e   :  { %1096 = vmatpush1.msra.mxu0 %v11123_v29  ;;  %1167 = vmatpush1.msra.mxu1 %v11124_v30  ;;  %11138 = vst [vmem:[#allocation8_spill] sm:$0xff] %v6785_v27  ;;  %11139 = vst [vmem:[#allocation17_spill] sm:$0xff] %v6791_v28  ;;  %v6797_v29 = vld [vmem:[%s10272_s1 + $0x88] sm:$0xff]  ;;  %v6803_v30 = vld [vmem:[%s10272_s1 + $0x98] sm:$0xff] }
 0x23f   :  { %v4446_v31 = vpop.eup %4445  ;;  %1097 = vmatprep.subr.mxu0 %v11125_v32  ;;  %1168 = vmatprep.subr.mxu1 %v11126_v34  ;;  %11140 = vst [vmem:[#allocation9_spill] sm:$0xff] %v6797_v29  ;;  %11141 = vst [vmem:[#allocation18_spill] sm:$0xff] %v6803_v30  ;;  %v6815_v32 = vld [vmem:[%s10272_s1 + $0x90] sm:$0xff]  ;;  %v6821_v34 = vld [vmem:[%s10272_s1 + $0x68] sm:$0xff] }
 0x240   :  { %1098 = vmatpush1.msra.mxu0 %v11127_v35  ;;  %1169 = vmatpush1.msra.mxu1 %v11128_v36  ;;  %v4448_v38 = vpop.eup %4447  ;;  %11143 = vst [vmem:[#allocation19_spill] sm:$0xff] %v6815_v32  ;;  %11144 = vst [vmem:[#allocation12_spill] sm:$0xff] %v6821_v34  ;;  %v6827_v35 = vld [vmem:[%s10272_s1 + $0x78] sm:$0xff]  ;;  %v6833_v36 = vld [vmem:[%s10272_s1 + $0x60] sm:$0xff] }
 0x241   :  { %1099 = vmatprep.subr.mxu0 %v11129_v39  ;;  %1170 = vmatprep.subr.mxu1 %v11130_v40  ;;  %v6524_v42 = vmul.f32 %v4448_v38, %v4446_v31  ;;  %v6809_v31 = vld [vmem:[%s10272_s1 + $0x80] sm:$0xff]  ;;  %11145 = vst [vmem:[#allocation21_spill] sm:$0xff] %v6827_v35  ;;  %11146 = vst [vmem:[#allocation14_spill] sm:$0xff] %v6833_v36  ;;  %v6839_v38 = vld [vmem:[%s10272_s1 + $0x70] sm:$0xff] }
 0x242   :  { %1100 = vmatpush1.msra.mxu0 %v11131_v41  ;;  %1133 = vmatprep.mubr.f32.mxu0 %v11003_v19  ;;  %11142 = vst [vmem:[#allocation10_spill] sm:$0xff] %v6809_v31  ;;  %11147 = vst [vmem:[#allocation23_spill] sm:$0xff] %v6839_v38  ;;  %v6845_v39 = vld [vmem:[%s10272_s1 + $0x48] sm:$0xff]  ;;  %v6851_v40 = vld [vmem:[%s10272_s1 + $0x58] sm:$0xff] }
 0x243   :  { %1171 = vmatpush1.msra.mxu1 %v11132_v43  ;;  %1204 = vmatprep.mubr.f32.mxu1 %v11003_v19  ;;  %11148 = vst [vmem:[#allocation16_spill] sm:$0xff] %v6845_v39  ;;  %11149 = vst [vmem:[#allocation25_spill] sm:$0xff] %v6851_v40  ;;  %v6857_v41 = vld [vmem:[%s10272_s1 + $0x40] sm:$0xff]  ;;  %v6863_v43 = vld [vmem:[%s10272_s1 + $0x50] sm:$0xff] }
 0x244   :  { %1134 = vmatmul.mubr.f32.vlgmr.msra.gmra.mxu0 %v6524_v42  ;;  %1205 = vmatmul.mubr.f32.vlgmr.msra.gmra.mxu1 %v6524_v42  ;;  %11150 = vst [vmem:[#allocation20_spill] sm:$0xff] %v6857_v41  ;;  %11151 = vst [vmem:[#allocation27_spill] sm:$0xff] %v6863_v43 }
 0x245   :  { %1239 = vmatprep.subr.mxu0 %v6533_v44  ;;  %1310 = vmatprep.subr.mxu1 %v6539_v45 }
 0x246   :  { %1240 = vmatpush1.msra.mxu0 %v6545_v46  ;;  %1311 = vmatpush1.msra.mxu1 %v6551_v49 }
 0x247   :  { %1241 = vmatprep.subr.mxu0 %v6557_v51  ;;  %1312 = vmatprep.subr.mxu1 %v6563_v55 }
 0x248   :  { %1242 = vmatpush1.msra.mxu0 %v6569_v58  ;;  %1313 = vmatpush1.msra.mxu1 %v6575_v1 }
 0x249   :  { %1243 = vmatprep.subr.mxu0 %v6581_v9  ;;  %1314 = vmatprep.subr.mxu1 %v6587_v50 }
 0x24a   :  { %1244 = vmatpush1.msra.mxu0 %v6593_v63  ;;  %1315 = vmatpush1.msra.mxu1 %v6599_v54 }
 0x24b   :  { %1245 = vmatprep.subr.mxu0 %v6605_v59  ;;  %1316 = vmatprep.subr.mxu1 %v6611_v0 }
 0x24c   :  { %1246 = vmatpush1.msra.mxu0 %v6617_v60  ;;  %1317 = vmatpush1.msra.mxu1 %v6623_v62 }
 0x24d   :  { %1247 = vmatprep.subr.mxu0 %v6629_v48  ;;  %1318 = vmatprep.subr.mxu1 %v6635_v52 }
 0x24e   :  { %1248 = vmatpush1.msra.mxu0 %v6641_v56  ;;  %1319 = vmatpush1.msra.mxu1 %v6647_v2 }
 0x24f   :  { %1249 = vmatprep.subr.mxu0 %v6653_v53  ;;  %1320 = vmatprep.subr.mxu1 %v6659_v3 }
 0x250   :  { %1250 = vmatpush1.msra.mxu0 %v6665_v4  ;;  %1321 = vmatpush1.msra.mxu1 %v6671_v5 }
 0x251   :  { %1251 = vmatprep.subr.mxu0 %v6677_v6  ;;  %1322 = vmatprep.subr.mxu1 %v6683_v7 }
 0x252   :  { %1252 = vmatpush1.msra.mxu0 %v6689_v8  ;;  %1323 = vmatpush1.msra.mxu1 %v6695_v10 }
 0x253   :  { %1253 = vmatprep.subr.mxu0 %v6701_v11  ;;  %1324 = vmatprep.subr.mxu1 %v6707_v13 }
 0x254   :  { %1254 = vmatpush1.msra.mxu0 %v6713_v14  ;;  %1325 = vmatpush1.msra.mxu1 %v6719_v15 }
 0x255   :  { %1255 = vmatprep.subr.mxu0 %v6725_v16  ;;  %1326 = vmatprep.subr.mxu1 %v6731_v17 }
 0x256   :  { %1256 = vmatpush1.msra.mxu0 %v6737_v18  ;;  %1327 = vmatpush1.msra.mxu1 %v6743_v20 }
 0x257   :  { %1257 = vmatprep.subr.mxu0 %v6749_v21  ;;  %1328 = vmatprep.subr.mxu1 %v6755_v22 }
 0x258   :  { %1258 = vmatpush1.msra.mxu0 %v6761_v23  ;;  %1329 = vmatpush1.msra.mxu1 %v6767_v24 }
 0x259   :  { %1259 = vmatprep.subr.mxu0 %v6773_v25  ;;  %1330 = vmatprep.subr.mxu1 %v6779_v26 }
 0x25a   :  { %1260 = vmatpush1.msra.mxu0 %v6785_v27  ;;  %1331 = vmatpush1.msra.mxu1 %v6791_v28 }
 0x25b   :  { %1261 = vmatprep.subr.mxu0 %v6797_v29  ;;  %1332 = vmatprep.subr.mxu1 %v6803_v30 }
 0x25c   :  { %1262 = vmatpush1.msra.mxu0 %v6809_v31  ;;  %1333 = vmatpush1.msra.mxu1 %v6815_v32 }
 0x25d   :  { %1263 = vmatprep.subr.mxu0 %v6821_v34  ;;  %1334 = vmatprep.subr.mxu1 %v6827_v35 }
 0x25e   :  { %1264 = vmatpush1.msra.mxu0 %v6833_v36  ;;  %1335 = vmatpush1.msra.mxu1 %v6839_v38 }
 0x25f   :  { %1265 = vmatprep.subr.mxu0 %v6845_v39  ;;  %1336 = vmatprep.subr.mxu1 %v6851_v40  ;;  %v6869_v39 = vld [vmem:[%s10272_s1 + $0x28] sm:$0xff]  ;;  %v6875_v40 = vld [vmem:[%s10272_s1 + $0x38] sm:$0xff] }
 0x260   :  { %1266 = vmatpush1.msra.mxu0 %v6857_v41  ;;  %1337 = vmatpush1.msra.mxu1 %v6863_v43  ;;  %11152 = vst [vmem:[#allocation22_spill] sm:$0xff] %v6869_v39  ;;  %11153 = vst [vmem:[#allocation28_spill] sm:$0xff] %v6875_v40  ;;  %v6881_v41 = vld [vmem:[%s10272_s1 + $0x20] sm:$0xff]  ;;  %v6887_v43 = vld [vmem:[%s10272_s1 + $0x30] sm:$0xff] }
 0x261   :  { %1267 = vmatprep.subr.mxu0 %v6869_v39  ;;  %1338 = vmatprep.subr.mxu1 %v6875_v40  ;;  %11154 = vst [vmem:[#allocation24_spill] sm:$0xff] %v6881_v41  ;;  %11155 = vst [vmem:[#allocation30_spill] sm:$0xff] %v6887_v43  ;;  %v6893_v39 = vld [vmem:[%s10272_s1 + $0x8] sm:$0xff]  ;;  %v6899_v40 = vld [vmem:[%s10272_s1 + $0x18] sm:$0xff] }
 0x262   :  { %1268 = vmatpush1.msra.mxu0 %v6881_v41  ;;  %1339 = vmatpush1.msra.mxu1 %v6887_v43  ;;  %11156 = vst [vmem:[#allocation26_spill] sm:$0xff] %v6893_v39  ;;  %11157 = vst [vmem:[#allocation32_spill] sm:$0xff] %v6899_v40  ;;  %v6905_v41 = vld [vmem:[%s10272_s1] sm:$0xff] }
 0x263   :  { %1269 = vmatprep.subr.mxu0 %v6893_v39  ;;  %1340 = vmatprep.subr.mxu1 %v6899_v40  ;;  %11158 = vst [vmem:[#allocation29_spill] sm:$0xff] %v6905_v41  ;;  %v6912_v39 = vld [vmem:[%s10272_s1 + $0x10] sm:$0xff]  ;;  %v6921_v40 = vld [vmem:[%s10273_s2 + $0x1e8] sm:$0xff] }
 0x264   :  { %1270 = vmatpush1.msra.mxu0 %v6905_v41  ;;  %1303 = vmatprep.mubr.f32.mxu0 %v11003_v19  ;;  %11159 = vst [vmem:[#allocation34_spill] sm:$0xff] %v6912_v39  ;;  %11160 = vst [vmem:[#allocation31_spill] sm:$0xff] %v6921_v40  ;;  %v6927_v41 = vld [vmem:[%s10273_s2 + $0x1f8] sm:$0xff] }
 0x265   :  { %1341 = vmatpush1.msra.mxu1 %v6912_v39  ;;  %1374 = vmatprep.mubr.f32.mxu1 %v11003_v19  ;;  %11161 = vst [vmem:[#allocation36_spill] sm:$0xff] %v6927_v41  ;;  %v6933_v39 = vld [vmem:[%s10273_s2 + $0x1e0] sm:$0xff] }
 0x266   :  { %1304 = vmatmul.mubr.f32.vlgmr.msra.gmra.mxu0 %v6524_v42  ;;  %1375 = vmatmul.mubr.f32.vlgmr.msra.gmra.mxu1 %v6524_v42  ;;  %11162 = vst [vmem:[#allocation33_spill] sm:$0xff] %v6933_v39  ;;  %v6939_v42 = vld [vmem:[%s10273_s2 + $0x1f0] sm:$0xff] }
 0x267   :  { %1381 = vmatprep.subr.mxu0 %v6921_v40  ;;  %1452 = vmatprep.subr.mxu1 %v6927_v41  ;;  %11163 = vst [vmem:[#allocation37_spill] sm:$0xff] %v6939_v42  ;;  %v6945_v40 = vld [vmem:[%s10273_s2 + $0x1c8] sm:$0xff]  ;;  %v6951_v41 = vld [vmem:[%s10273_s2 + $0x1d8] sm:$0xff] }
 0x268   :  { %1382 = vmatpush1.msra.mxu0 %v6933_v39  ;;  %1453 = vmatpush1.msra.mxu1 %v6939_v42  ;;  %11164 = vst [vmem:[#allocation35_spill] sm:$0xff] %v6945_v40  ;;  %11165 = vst [vmem:[#allocation38_spill] sm:$0xff] %v6951_v41  ;;  %v6957_v39 = vld [vmem:[%s10273_s2 + $0x1c0] sm:$0xff]  ;;  %v6963_v42 = vld [vmem:[%s10273_s2 + $0x1d0] sm:$0xff] }
 0x269   :  { %1383 = vmatprep.subr.mxu0 %v6945_v40  ;;  %1454 = vmatprep.subr.mxu1 %v6951_v41  ;;  %11166 = vst [vmem:[#allocation39_spill] sm:$0xff] %v6957_v39  ;;  %11167 = vst [vmem:[#allocation40_spill] sm:$0xff] %v6963_v42  ;;  %v6969_v40 = vld [vmem:[%s10273_s2 + $0x1a8] sm:$0xff]  ;;  %v6975_v41 = vld [vmem:[%s10273_s2 + $0x1b8] sm:$0xff] }
 0x26a   :  { %1384 = vmatpush1.msra.mxu0 %v6957_v39  ;;  %1455 = vmatpush1.msra.mxu1 %v6963_v42  ;;  %11168 = vst [vmem:[#allocation41_spill] sm:$0xff] %v6969_v40  ;;  %11169 = vst [vmem:[#allocation42_spill] sm:$0xff] %v6975_v41  ;;  %v6981_v39 = vld [vmem:[%s10273_s2 + $0x1a0] sm:$0xff]  ;;  %v6987_v42 = vld [vmem:[%s10273_s2 + $0x1b0] sm:$0xff] }
 0x26b   :  { %1385 = vmatprep.subr.mxu0 %v6969_v40  ;;  %1456 = vmatprep.subr.mxu1 %v6975_v41  ;;  %11170 = vst [vmem:[#allocation43_spill] sm:$0xff] %v6981_v39  ;;  %11171 = vst [vmem:[#allocation44_spill] sm:$0xff] %v6987_v42  ;;  %v6993_v40 = vld [vmem:[%s10273_s2 + $0x188] sm:$0xff]  ;;  %v6999_v41 = vld [vmem:[%s10273_s2 + $0x198] sm:$0xff] }
 0x26c   :  { %1386 = vmatpush1.msra.mxu0 %v6981_v39  ;;  %1457 = vmatpush1.msra.mxu1 %v6987_v42  ;;  %11172 = vst [vmem:[#allocation45_spill] sm:$0xff] %v6993_v40  ;;  %11173 = vst [vmem:[#allocation46_spill] sm:$0xff] %v6999_v41  ;;  %v7005_v39 = vld [vmem:[%s10273_s2 + $0x180] sm:$0xff]  ;;  %v7011_v42 = vld [vmem:[%s10273_s2 + $0x190] sm:$0xff] }
 0x26d   :  { %1387 = vmatprep.subr.mxu0 %v6993_v40  ;;  %1458 = vmatprep.subr.mxu1 %v6999_v41  ;;  %11174 = vst [vmem:[#allocation47_spill] sm:$0xff] %v7005_v39  ;;  %11175 = vst [vmem:[#allocation48_spill] sm:$0xff] %v7011_v42  ;;  %v7017_v40 = vld [vmem:[%s10273_s2 + $0x168] sm:$0xff]  ;;  %v7023_v41 = vld [vmem:[%s10273_s2 + $0x178] sm:$0xff] }
 0x26e   :  { %1388 = vmatpush1.msra.mxu0 %v7005_v39  ;;  %1459 = vmatpush1.msra.mxu1 %v7011_v42  ;;  %11176 = vst [vmem:[#allocation49_spill] sm:$0xff] %v7017_v40  ;;  %11177 = vst [vmem:[#allocation50_spill] sm:$0xff] %v7023_v41  ;;  %v7029_v39 = vld [vmem:[%s10273_s2 + $0x160] sm:$0xff]  ;;  %v7035_v42 = vld [vmem:[%s10273_s2 + $0x170] sm:$0xff] }
 0x26f   :  { %1389 = vmatprep.subr.mxu0 %v7017_v40  ;;  %1460 = vmatprep.subr.mxu1 %v7023_v41  ;;  %11178 = vst [vmem:[#allocation51_spill] sm:$0xff] %v7029_v39  ;;  %11179 = vst [vmem:[#allocation52_spill] sm:$0xff] %v7035_v42  ;;  %v7041_v40 = vld [vmem:[%s10273_s2 + $0x148] sm:$0xff]  ;;  %v7047_v41 = vld [vmem:[%s10273_s2 + $0x158] sm:$0xff] }
 0x270   :  { %1390 = vmatpush1.msra.mxu0 %v7029_v39  ;;  %1461 = vmatpush1.msra.mxu1 %v7035_v42  ;;  %11180 = vst [vmem:[#allocation53_spill] sm:$0xff] %v7041_v40  ;;  %11181 = vst [vmem:[#allocation54_spill] sm:$0xff] %v7047_v41  ;;  %v7053_v39 = vld [vmem:[%s10273_s2 + $0x140] sm:$0xff]  ;;  %v7059_v42 = vld [vmem:[%s10273_s2 + $0x150] sm:$0xff] }
 0x271   :  { %1391 = vmatprep.subr.mxu0 %v7041_v40  ;;  %1462 = vmatprep.subr.mxu1 %v7047_v41  ;;  %11182 = vst [vmem:[#allocation55_spill] sm:$0xff] %v7053_v39  ;;  %11183 = vst [vmem:[#allocation56_spill] sm:$0xff] %v7059_v42  ;;  %v7065_v40 = vld [vmem:[%s10273_s2 + $0x128] sm:$0xff]  ;;  %v7071_v41 = vld [vmem:[%s10273_s2 + $0x138] sm:$0xff] }
 0x272   :  { %1392 = vmatpush1.msra.mxu0 %v7053_v39  ;;  %1463 = vmatpush1.msra.mxu1 %v7059_v42  ;;  %11184 = vst [vmem:[#allocation57_spill] sm:$0xff] %v7065_v40  ;;  %11185 = vst [vmem:[#allocation58_spill] sm:$0xff] %v7071_v41  ;;  %v7077_v39 = vld [vmem:[%s10273_s2 + $0x120] sm:$0xff]  ;;  %v7083_v42 = vld [vmem:[%s10273_s2 + $0x130] sm:$0xff] }
 0x273   :  { %1393 = vmatprep.subr.mxu0 %v7065_v40  ;;  %1464 = vmatprep.subr.mxu1 %v7071_v41  ;;  %11186 = vst [vmem:[#allocation59_spill] sm:$0xff] %v7077_v39  ;;  %11187 = vst [vmem:[#allocation60_spill] sm:$0xff] %v7083_v42  ;;  %v7089_v40 = vld [vmem:[%s10273_s2 + $0x108] sm:$0xff]  ;;  %v7095_v41 = vld [vmem:[%s10273_s2 + $0x118] sm:$0xff] }
 0x274   :  { %1394 = vmatpush1.msra.mxu0 %v7077_v39  ;;  %1465 = vmatpush1.msra.mxu1 %v7083_v42  ;;  %11188 = vst [vmem:[#allocation61_spill] sm:$0xff] %v7089_v40  ;;  %11189 = vst [vmem:[#allocation62_spill] sm:$0xff] %v7095_v41  ;;  %v7101_v39 = vld [vmem:[%s10273_s2 + $0x100] sm:$0xff]  ;;  %v7107_v42 = vld [vmem:[%s10273_s2 + $0x110] sm:$0xff] }
 0x275   :  { %1395 = vmatprep.subr.mxu0 %v7089_v40  ;;  %1466 = vmatprep.subr.mxu1 %v7095_v41  ;;  %11190 = vst [vmem:[#allocation63_spill] sm:$0xff] %v7101_v39  ;;  %11191 = vst [vmem:[#allocation64_spill] sm:$0xff] %v7107_v42  ;;  %v7113_v40 = vld [vmem:[%s10273_s2 + $0xe8] sm:$0xff]  ;;  %v7119_v41 = vld [vmem:[%s10273_s2 + $0xf8] sm:$0xff] }
 0x276   :  { %1396 = vmatpush1.msra.mxu0 %v7101_v39  ;;  %1467 = vmatpush1.msra.mxu1 %v7107_v42  ;;  %11192 = vst [vmem:[#allocation65_spill] sm:$0xff] %v7113_v40  ;;  %11193 = vst [vmem:[#allocation66_spill] sm:$0xff] %v7119_v41  ;;  %v7125_v39 = vld [vmem:[%s10273_s2 + $0xe0] sm:$0xff]  ;;  %v7131_v42 = vld [vmem:[%s10273_s2 + $0xf0] sm:$0xff] }
 0x277   :  { %1397 = vmatprep.subr.mxu0 %v7113_v40  ;;  %1468 = vmatprep.subr.mxu1 %v7119_v41  ;;  %11194 = vst [vmem:[#allocation67_spill] sm:$0xff] %v7125_v39  ;;  %11195 = vst [vmem:[#allocation68_spill] sm:$0xff] %v7131_v42  ;;  %v7137_v40 = vld [vmem:[%s10273_s2 + $0xc8] sm:$0xff]  ;;  %v7143_v41 = vld [vmem:[%s10273_s2 + $0xd8] sm:$0xff] }
 0x278   :  { %1398 = vmatpush1.msra.mxu0 %v7125_v39  ;;  %1469 = vmatpush1.msra.mxu1 %v7131_v42  ;;  %11196 = vst [vmem:[#allocation69_spill] sm:$0xff] %v7137_v40  ;;  %11197 = vst [vmem:[#allocation70_spill] sm:$0xff] %v7143_v41  ;;  %v7149_v39 = vld [vmem:[%s10273_s2 + $0xc0] sm:$0xff]  ;;  %v7155_v42 = vld [vmem:[%s10273_s2 + $0xd0] sm:$0xff] }
 0x279   :  { %1399 = vmatprep.subr.mxu0 %v7137_v40  ;;  %1470 = vmatprep.subr.mxu1 %v7143_v41  ;;  %11198 = vst [vmem:[#allocation71_spill] sm:$0xff] %v7149_v39  ;;  %11199 = vst [vmem:[#allocation72_spill] sm:$0xff] %v7155_v42  ;;  %v7161_v40 = vld [vmem:[%s10273_s2 + $0xa8] sm:$0xff]  ;;  %v7167_v41 = vld [vmem:[%s10273_s2 + $0xb8] sm:$0xff] }
 0x27a   :  { %1400 = vmatpush1.msra.mxu0 %v7149_v39  ;;  %1471 = vmatpush1.msra.mxu1 %v7155_v42  ;;  %11200 = vst [vmem:[#allocation73_spill] sm:$0xff] %v7161_v40  ;;  %11201 = vst [vmem:[#allocation74_spill] sm:$0xff] %v7167_v41  ;;  %v7173_v39 = vld [vmem:[%s10273_s2 + $0xa0] sm:$0xff]  ;;  %v7179_v42 = vld [vmem:[%s10273_s2 + $0xb0] sm:$0xff] }
 0x27b   :  { %1401 = vmatprep.subr.mxu0 %v7161_v40  ;;  %1472 = vmatprep.subr.mxu1 %v7167_v41  ;;  %11202 = vst [vmem:[#allocation75_spill] sm:$0xff] %v7173_v39  ;;  %11203 = vst [vmem:[#allocation76_spill] sm:$0xff] %v7179_v42  ;;  %v7185_v40 = vld [vmem:[%s10273_s2 + $0x88] sm:$0xff]  ;;  %v7191_v41 = vld [vmem:[%s10273_s2 + $0x98] sm:$0xff] }
 0x27c   :  { %1402 = vmatpush1.msra.mxu0 %v7173_v39  ;;  %1473 = vmatpush1.msra.mxu1 %v7179_v42  ;;  %11204 = vst [vmem:[#allocation77_spill] sm:$0xff] %v7185_v40  ;;  %11205 = vst [vmem:[#allocation78_spill] sm:$0xff] %v7191_v41  ;;  %v7197_v39 = vld [vmem:[%s10273_s2 + $0x80] sm:$0xff]  ;;  %v7203_v42 = vld [vmem:[%s10273_s2 + $0x90] sm:$0xff] }
 0x27d   :  { %1403 = vmatprep.subr.mxu0 %v7185_v40  ;;  %1474 = vmatprep.subr.mxu1 %v7191_v41  ;;  %11206 = vst [vmem:[#allocation79_spill] sm:$0xff] %v7197_v39  ;;  %11207 = vst [vmem:[#allocation80_spill] sm:$0xff] %v7203_v42  ;;  %v7209_v40 = vld [vmem:[%s10273_s2 + $0x68] sm:$0xff]  ;;  %v7215_v41 = vld [vmem:[%s10273_s2 + $0x78] sm:$0xff] }
 0x27e   :  { %1404 = vmatpush1.msra.mxu0 %v7197_v39  ;;  %1475 = vmatpush1.msra.mxu1 %v7203_v42  ;;  %11208 = vst [vmem:[#allocation81_spill] sm:$0xff] %v7209_v40  ;;  %11209 = vst [vmem:[#allocation82_spill] sm:$0xff] %v7215_v41  ;;  %v7221_v39 = vld [vmem:[%s10273_s2 + $0x60] sm:$0xff]  ;;  %v7227_v42 = vld [vmem:[%s10273_s2 + $0x70] sm:$0xff] }
 0x27f   :  { %1405 = vmatprep.subr.mxu0 %v7209_v40  ;;  %1476 = vmatprep.subr.mxu1 %v7215_v41  ;;  %11210 = vst [vmem:[#allocation83_spill] sm:$0xff] %v7221_v39  ;;  %11211 = vst [vmem:[#allocation84_spill] sm:$0xff] %v7227_v42  ;;  %v7233_v40 = vld [vmem:[%s10273_s2 + $0x48] sm:$0xff]  ;;  %v7239_v41 = vld [vmem:[%s10273_s2 + $0x58] sm:$0xff] }
 0x280   :  { %1406 = vmatpush1.msra.mxu0 %v7221_v39  ;;  %1477 = vmatpush1.msra.mxu1 %v7227_v42  ;;  %11212 = vst [vmem:[#allocation85_spill] sm:$0xff] %v7233_v40  ;;  %11213 = vst [vmem:[#allocation86_spill] sm:$0xff] %v7239_v41  ;;  %v7245_v39 = vld [vmem:[%s10273_s2 + $0x40] sm:$0xff]  ;;  %v7251_v42 = vld [vmem:[%s10273_s2 + $0x50] sm:$0xff] }
 0x281   :  { %1407 = vmatprep.subr.mxu0 %v7233_v40  ;;  %1478 = vmatprep.subr.mxu1 %v7239_v41  ;;  %11214 = vst [vmem:[#allocation87_spill] sm:$0xff] %v7245_v39  ;;  %11215 = vst [vmem:[#allocation88_spill] sm:$0xff] %v7251_v42  ;;  %v7257_v40 = vld [vmem:[%s10273_s2 + $0x28] sm:$0xff]  ;;  %v7263_v41 = vld [vmem:[%s10273_s2 + $0x38] sm:$0xff] }
 0x282   :  { %1408 = vmatpush1.msra.mxu0 %v7245_v39  ;;  %1479 = vmatpush1.msra.mxu1 %v7251_v42  ;;  %11216 = vst [vmem:[#allocation89_spill] sm:$0xff] %v7257_v40  ;;  %11217 = vst [vmem:[#allocation90_spill] sm:$0xff] %v7263_v41  ;;  %v7269_v39 = vld [vmem:[%s10273_s2 + $0x20] sm:$0xff]  ;;  %v7275_v42 = vld [vmem:[%s10273_s2 + $0x30] sm:$0xff] }
 0x283   :  { %1409 = vmatprep.subr.mxu0 %v7257_v40  ;;  %1480 = vmatprep.subr.mxu1 %v7263_v41  ;;  %11218 = vst [vmem:[#allocation91_spill] sm:$0xff] %v7269_v39  ;;  %11219 = vst [vmem:[#allocation92_spill] sm:$0xff] %v7275_v42  ;;  %v7281_v40 = vld [vmem:[%s10273_s2 + $0x8] sm:$0xff]  ;;  %v7287_v41 = vld [vmem:[%s10273_s2 + $0x18] sm:$0xff] }
 0x284   :  { %1410 = vmatpush1.msra.mxu0 %v7269_v39  ;;  %1481 = vmatpush1.msra.mxu1 %v7275_v42  ;;  %11220 = vst [vmem:[#allocation93_spill] sm:$0xff] %v7281_v40  ;;  %11221 = vst [vmem:[#allocation94_spill] sm:$0xff] %v7287_v41  ;;  %v7293_v39 = vld [vmem:[%s10273_s2] sm:$0xff]  ;;  %v7299_v42 = vld [vmem:[%s10273_s2 + $0x10] sm:$0xff] }
 0x285   :  { %1411 = vmatprep.subr.mxu0 %v7281_v40  ;;  %1482 = vmatprep.subr.mxu1 %v7287_v41  ;;  %11222 = vst [vmem:[#allocation95_spill] sm:$0xff] %v7293_v39  ;;  %11223 = vst [vmem:[#allocation96_spill] sm:$0xff] %v7299_v42  ;;  %v7304_v40 = vld [vmem:[#allocation3 + $0x1e8] sm:$0xff]  ;;  %v7307_v41 = vld [vmem:[#allocation3 + $0x1f8] sm:$0xff] }
 0x286   :  { %1412 = vmatpush1.msra.mxu0 %v7293_v39  ;;  %1483 = vmatpush1.msra.mxu1 %v7299_v42  ;;  %11224 = vst [vmem:[#allocation97_spill] sm:$0xff] %v7304_v40  ;;  %11225 = vst [vmem:[#allocation98_spill] sm:$0xff] %v7307_v41 }
 0x287   :  { %1445 = vmatprep.mubr.f32.mxu0 %v11003_v19  ;;  %1516 = vmatprep.mubr.f32.mxu1 %v11003_v19 }
 0x288   :  { %1556 = vmatprep.subr.mxu0 %v7304_v40  ;;  %1627 = vmatprep.subr.mxu1 %v7307_v41 }
 0x2e3   :  { %v960_v39 = vpop.f32.mrf.mxu0  ;;  %v1031_v43 = vpop.f32.mrf.mxu1 }
 0x2e5   :  { %v962_v38 = vpop.f32.mrf.mxu0  ;;  %v1033_v35 = vpop.f32.mrf.mxu1 }
 0x304   :  { %v1135_v36 = vpop.f32.mrf.mxu0  ;;  %v1206_v31 = vpop.f32.mrf.mxu1 }
 0x305   :  { %v1136_v34 = vadd.f32 %v1135_v36, %v960_v39  ;;  %v1207_v25 = vadd.f32 %v1206_v31, %v1031_v43 }
 0x306   :  { %v1137_v32 = vpop.f32.mrf.mxu0  ;;  %v1208_v27 = vpop.f32.mrf.mxu1 }
 0x307   :  { %v1211_v42 = vadd.f32 %v1136_v34, %v6431_v33  ;;  %v1138_v30 = vadd.f32 %v1137_v32, %v962_v38  ;;  %v1209_v26 = vadd.f32 %v1208_v27, %v1033_v35  ;;  %v1213_v36 = vadd.f32 %v1207_v25, %v6440_v57 }
 0x309   :  { %v4280_v29 = vmul.f32 -1.442695, %v1211_v42  ;;  %v1212_v28 = vadd.f32 %v1138_v30, %v6433_v37  ;;  %v1214_v41 = vadd.f32 %v1209_v26, %v6437_v47  ;;  %v4284_v26 = vld [vmem:[%s10271_s0 + $0x48] sm:$0xff] }
 0x30b   :  { %4449 = vpow2.f32 %v4280_v29  ;;  %v4281_v40 = vmul.f32 -1.442695, %v1212_v28  ;;  %v4282_v24 = vmul.f32 -1.442695, %v1214_v41  ;;  %v4283_v28 = vld [vmem:[%s10271_s0 + $0x40] sm:$0xff] }
 0x30d   :  { %4451 = vpow2.f32 %v4281_v40 }
 0x30e   :  { %4453 = vpow2.f32 %v4282_v24 }
 0x318   :  { %v4450_v23 = vpop.eup %4449 }
 0x319   :  { %v1218_v39 = vadd.f32 1.0, %v4450_v23 }
 0x31a   :  { %v4452_v22 = vpop.eup %4451 }
 0x31b   :  { %4455 = vrcp.f32 %v1218_v39  ;;  %v1224_v32 = vadd.f32 1.0, %v4452_v22  ;;  %v4454_v27 = vpop.eup %4453  ;;  %v4286_v39 = vld [vmem:[%s10271_s0 + $0x58] sm:$0xff] }
 0x31c   :  { %4457 = vtanh.f32 %v1213_v36  ;;  %v1231_v22 = vadd.f32 1.0, %v4454_v27 }
 0x31d   :  { %4459 = vrcp.f32 %v1224_v32 }
 0x326   :  { %v1305_v29 = vpop.f32.mrf.mxu0  ;;  %v1376_v41 = vpop.f32.mrf.mxu1 }
 0x327   :  { %v1528_v30 = vadd.f32 %v4283_v28, %v1305_v29  ;;  %v4285_v28 = vld [vmem:[%s10271_s0 + $0x50] sm:$0xff] }
 0x328   :  { %v4456_v31 = vpop.eup %4455  ;;  %v1307_v25 = vpop.f32.mrf.mxu0 }
 0x329   :  { %v4458_v23 = vpop.eup %4457  ;;  %v4287_v34 = vmul.f32 -1.442695, %v1528_v30  ;;  %v1529_v24 = vadd.f32 %v4284_v26, %v1307_v25  ;;  %v1378_v36 = vpop.f32.mrf.mxu1  ;;  %v1530_v26 = vadd.f32 %v4285_v28, %v1376_v41  ;;  %v7345_v41 = vld [vmem:[#allocation3 + $0x1d0] sm:$0xff]  ;;  %v7360_v28 = vld [vmem:[#allocation3 + $0x188] sm:$0xff] }
 0x32a   :  { %v4460_v35 = vpop.eup %4459  ;;  %v1235_v38 = vmul.f32 %v4458_v23, %v4456_v31  ;;  %v1531_v32 = vadd.f32 %v4286_v39, %v1378_v36  ;;  %v7351_v36 = vld [vmem:[#allocation3 + $0x1b8] sm:$0xff]  ;;  %v7354_v39 = vld [vmem:[#allocation3 + $0x1a0] sm:$0xff]  ;;  %11228 = vst [vmem:[#allocation101_spill] sm:$0xff] %v7360_v28 }
 0x32b   :  { %v1234_v40 = vmul.f32 %v4460_v35, %v6449_v12  ;;  %4461 = vpow2.f32 %v4287_v34  ;;  %v4288_v43 = vmul.f32 -1.442695, %v1529_v24  ;;  %v7330_v24 = vld [vmem:[#allocation3 + $0x1e0] sm:$0xff]  ;;  %v7333_v35 = vld [vmem:[#allocation3 + $0x1f0] sm:$0xff]  ;;  %11226 = vst [vmem:[#allocation99_spill] sm:$0xff] %v7354_v39 }
 0x32c   :  { %v4289_v12 = vmul.f32 -1.442695, %v1531_v32  ;;  %v7357_v32 = vld [vmem:[#allocation3 + $0x1b0] sm:$0xff] }
 0x32d   :  { %4463 = vpow2.f32 %v4288_v43  ;;  %v7321_v42 = vadd.f32 %v1235_v38, %v1234_v40  ;;  %v7339_v38 = vld [vmem:[#allocation3 + $0x1d8] sm:$0xff]  ;;  %v7342_v40 = vld [vmem:[#allocation3 + $0x1c0] sm:$0xff]  ;;  %v7348_v43 = vld [vmem:[#allocation3 + $0x1a8] sm:$0xff]  ;;  %11227 = vst [vmem:[#allocation100_spill] sm:$0xff] %v7357_v32 }
 0x32e   :  { %4465 = vrcp.f32 %v1231_v22  ;;  %v7336_v22 = vld [vmem:[#allocation3 + $0x1c8] sm:$0xff] }
 0x32f   :  { %4467 = vtanh.f32 %v7321_v42 }
 0x330   :  { %4469 = vpow2.f32 %v4289_v12  ;;  %v7363_v12 = vld [vmem:[#allocation3 + $0x198] sm:$0xff] }
 0x331   :  { %11229 = vst [vmem:[#allocation102_spill] sm:$0xff] %v7363_v12 }
 0x338   :  { %v4462_v29 = vpop.eup %4461 }
 0x339   :  { %v1535_v27 = vadd.f32 1.0, %v4462_v29  ;;  %v7366_v29 = vld [vmem:[#allocation3 + $0x180] sm:$0xff] }
 0x33a   :  { %v4464_v30 = vpop.eup %4463  ;;  %11230 = vst [vmem:[#allocation103_spill] sm:$0xff] %v7366_v29 }
 0x33b   :  { %v4466_v31 = vpop.eup %4465  ;;  %4471 = vrcp.f32 %v1535_v27  ;;  %v1541_v25 = vadd.f32 1.0, %v4464_v30  ;;  %v7372_v30 = vld [vmem:[#allocation3 + $0x168] sm:$0xff] }
 0x33c   :  { %v4468_v23 = vpop.eup %4467  ;;  %4473 = vtanh.f32 %v1530_v26  ;;  %v7369_v26 = vld [vmem:[#allocation3 + $0x190] sm:$0xff]  ;;  %11232 = vst [vmem:[#allocation105_spill] sm:$0xff] %v7372_v30 }
 0x33d   :  { %4475 = vrcp.f32 %v1541_v25  ;;  %v1238_v34 = vmul.f32 %v4468_v23, %v4466_v31  ;;  %11231 = vst [vmem:[#allocation104_spill] sm:$0xff] %v7369_v26  ;;  %v4470_v27 = vpop.eup %4469  ;;  %v7375_v31 = vld [vmem:[#allocation3 + $0x178] sm:$0xff]  ;;  %v7378_v23 = vld [vmem:[#allocation3 + $0x160] sm:$0xff] }
 0x33e   :  { %11233 = vst [vmem:[#allocation106_spill] sm:$0xff] %v7375_v31  ;;  %11234 = vst [vmem:[#allocation107_spill] sm:$0xff] %v7378_v23 }
 0x33f   :  { %1446 = vmatmul.mubr.f32.vlgmr.msra.gmra.mxu0 %v1238_v34  ;;  %1517 = vmatmul.mubr.f32.vlgmr.msra.gmra.mxu1 %v1238_v34  ;;  %v7381_v34 = vld [vmem:[#allocation3 + $0x170] sm:$0xff] }
 0x340   :  { %1557 = vmatpush1.msra.mxu0 %v7330_v24  ;;  %1628 = vmatpush1.msra.mxu1 %v7333_v35  ;;  %11235 = vst [vmem:[#allocation108_spill] sm:$0xff] %v7381_v34 }
 0x341   :  { %1558 = vmatprep.subr.mxu0 %v7336_v22  ;;  %1629 = vmatprep.subr.mxu1 %v7339_v38 }
 0x342   :  { %1559 = vmatpush1.msra.mxu0 %v7342_v40  ;;  %1630 = vmatpush1.msra.mxu1 %v7345_v41 }
 0x343   :  { %1560 = vmatprep.subr.mxu0 %v7348_v43  ;;  %1631 = vmatprep.subr.mxu1 %v7351_v36 }
 0x344   :  { %1561 = vmatpush1.msra.mxu0 %v7354_v39  ;;  %1632 = vmatpush1.msra.mxu1 %v7357_v32  ;;  %v7397_v39 = vld [vmem:[#allocation3 + $0x128] sm:$0xff] }
 0x345   :  { %1562 = vmatprep.subr.mxu0 %v7360_v28  ;;  %1633 = vmatprep.subr.mxu1 %v7363_v12  ;;  %v7387_v12 = vld [vmem:[#allocation3 + $0x158] sm:$0xff]  ;;  %v7390_v28 = vld [vmem:[#allocation3 + $0x140] sm:$0xff] }
 0x346   :  { %1563 = vmatpush1.msra.mxu0 %v7366_v29  ;;  %1634 = vmatpush1.msra.mxu1 %v7369_v26  ;;  %v7384_v26 = vld [vmem:[#allocation3 + $0x148] sm:$0xff]  ;;  %11237 = vst [vmem:[#allocation110_spill] sm:$0xff] %v7390_v28 }
 0x347   :  { %1564 = vmatprep.subr.mxu0 %v7372_v30  ;;  %1635 = vmatprep.subr.mxu1 %v7375_v31  ;;  %11236 = vst [vmem:[#allocation109_spill] sm:$0xff] %v7384_v26  ;;  %v1548_v31 = vadd.f32 1.0, %v4470_v27  ;;  %v7403_v27 = vld [vmem:[#allocation3 + $0x120] sm:$0xff] }
 0x348   :  { %v4472_v25 = vpop.eup %4471  ;;  %1565 = vmatpush1.msra.mxu0 %v7378_v23  ;;  %1636 = vmatpush1.msra.mxu1 %v7381_v34  ;;  %v7393_v23 = vld [vmem:[#allocation3 + $0x150] sm:$0xff] }
 0x349   :  { %v4474_v29 = vpop.eup %4473  ;;  %1566 = vmatprep.subr.mxu0 %v7384_v26  ;;  %1637 = vmatprep.subr.mxu1 %v7387_v12  ;;  %11238 = vst [vmem:[#allocation111_spill] sm:$0xff] %v7393_v23  ;;  %v7400_v26 = vld [vmem:[#allocation3 + $0x138] sm:$0xff]  ;;  %4477 = vrcp.f32 %v1548_v31  ;;  %v7433_v31 = vld [vmem:[#allocation3 + $0xf0] sm:$0xff] }
 0x34a   :  { %v4476_v30 = vpop.eup %4475  ;;  %1567 = vmatpush1.msra.mxu0 %v7390_v28  ;;  %1638 = vmatpush1.msra.mxu1 %v7393_v23  ;;  %v1552_v34 = vmul.f32 %v4474_v29, %v4472_v25  ;;  %v7406_v28 = vld [vmem:[#allocation3 + $0x130] sm:$0xff]  ;;  %v7411_v29 = vld [vmem:[#allocation3 + $0x108] sm:$0xff]  ;;  %11247 = vst [vmem:[#allocation120_spill] sm:$0xff] %v7433_v31 }
 0x34b   :  { %v1551_v32 = vmul.f32 %v4476_v30, %v6483_v61  ;;  %1568 = vmatprep.subr.mxu0 %v7397_v39  ;;  %1639 = vmatprep.subr.mxu1 %v7400_v26  ;;  %11239 = vst [vmem:[#allocation112_spill] sm:$0xff] %v7406_v28  ;;  %11240 = vst [vmem:[#allocation113_spill] sm:$0xff] %v7411_v29  ;;  %v7414_v61 = vld [vmem:[#allocation3 + $0x118] sm:$0xff]  ;;  %v7417_v30 = vld [vmem:[#allocation3 + $0x100] sm:$0xff] }
 0x34c   :  { %1569 = vmatpush1.msra.mxu0 %v7403_v27  ;;  %1640 = vmatpush1.msra.mxu1 %v7406_v28  ;;  %11241 = vst [vmem:[#allocation114_spill] sm:$0xff] %v7414_v61  ;;  %11242 = vst [vmem:[#allocation115_spill] sm:$0xff] %v7417_v30  ;;  %v7420_v25 = vld [vmem:[#allocation3 + $0x110] sm:$0xff]  ;;  %v7423_v28 = vld [vmem:[#allocation3 + $0xe8] sm:$0xff] }
 0x34d   :  { %v7409_v23 = vadd.f32 %v1552_v34, %v1551_v32  ;;  %1570 = vmatprep.subr.mxu0 %v7411_v29  ;;  %1641 = vmatprep.subr.mxu1 %v7414_v61  ;;  %11243 = vst [vmem:[#allocation116_spill] sm:$0xff] %v7420_v25  ;;  %11244 = vst [vmem:[#allocation117_spill] sm:$0xff] %v7423_v28  ;;  %v7426_v32 = vld [vmem:[#allocation3 + $0xf8] sm:$0xff]  ;;  %v7430_v34 = vld [vmem:[#allocation3 + $0xe0] sm:$0xff] }
 0x34e   :  { %1571 = vmatpush1.msra.mxu0 %v7417_v30  ;;  %1642 = vmatpush1.msra.mxu1 %v7420_v25  ;;  %11245 = vst [vmem:[#allocation118_spill] sm:$0xff] %v7426_v32  ;;  %11246 = vst [vmem:[#allocation119_spill] sm:$0xff] %v7430_v34  ;;  %v7436_v30 = vld [vmem:[#allocation3 + $0xc8] sm:$0xff]  ;;  %v7439_v25 = vld [vmem:[#allocation3 + $0xd8] sm:$0xff] }
 0x34f   :  { %1572 = vmatprep.subr.mxu0 %v7423_v28  ;;  %1643 = vmatprep.subr.mxu1 %v7426_v32  ;;  %4479 = vtanh.f32 %v7409_v23  ;;  %11248 = vst [vmem:[#allocation121_spill] sm:$0xff] %v7436_v30  ;;  %11249 = vst [vmem:[#allocation122_spill] sm:$0xff] %v7439_v25  ;;  %v7442_v28 = vld [vmem:[#allocation3 + $0xc0] sm:$0xff]  ;;  %v7445_v32 = vld [vmem:[#allocation3 + $0xd0] sm:$0xff] }
 0x350   :  { %1573 = vmatpush1.msra.mxu0 %v7430_v34  ;;  %1644 = vmatpush1.msra.mxu1 %v7433_v31  ;;  %11250 = vst [vmem:[#allocation123_spill] sm:$0xff] %v7442_v28  ;;  %11251 = vst [vmem:[#allocation124_spill] sm:$0xff] %v7445_v32  ;;  %v7448_v34 = vld [vmem:[#allocation3 + $0xa8] sm:$0xff]  ;;  %v7451_v31 = vld [vmem:[#allocation3 + $0xb8] sm:$0xff] }
 0x351   :  { %1574 = vmatprep.subr.mxu0 %v7436_v30  ;;  %1645 = vmatprep.subr.mxu1 %v7439_v25  ;;  %11252 = vst [vmem:[#allocation125_spill] sm:$0xff] %v7448_v34  ;;  %11253 = vst [vmem:[#allocation126_spill] sm:$0xff] %v7451_v31  ;;  %v7454_v30 = vld [vmem:[#allocation3 + $0xa0] sm:$0xff]  ;;  %v7457_v25 = vld [vmem:[#allocation3 + $0xb0] sm:$0xff] }
 0x352   :  { %1575 = vmatpush1.msra.mxu0 %v7442_v28  ;;  %1646 = vmatpush1.msra.mxu1 %v7445_v32  ;;  %11254 = vst [vmem:[#allocation127_spill] sm:$0xff] %v7454_v30  ;;  %11255 = vst [vmem:[#allocation128_spill] sm:$0xff] %v7457_v25  ;;  %v7460_v28 = vld [vmem:[#allocation3 + $0x88] sm:$0xff]  ;;  %v7463_v32 = vld [vmem:[#allocation3 + $0x98] sm:$0xff] }
 0x353   :  { %1576 = vmatprep.subr.mxu0 %v7448_v34  ;;  %1647 = vmatprep.subr.mxu1 %v7451_v31  ;;  %11256 = vst [vmem:[#allocation129_spill] sm:$0xff] %v7460_v28  ;;  %11257 = vst [vmem:[#allocation130_spill] sm:$0xff] %v7463_v32  ;;  %v7466_v34 = vld [vmem:[#allocation3 + $0x80] sm:$0xff]  ;;  %v7469_v31 = vld [vmem:[#allocation3 + $0x90] sm:$0xff] }
 0x354   :  { %1577 = vmatpush1.msra.mxu0 %v7454_v30  ;;  %1648 = vmatpush1.msra.mxu1 %v7457_v25  ;;  %11258 = vst [vmem:[#allocation131_spill] sm:$0xff] %v7466_v34  ;;  %11259 = vst [vmem:[#allocation132_spill] sm:$0xff] %v7469_v31  ;;  %v7472_v30 = vld [vmem:[#allocation3 + $0x68] sm:$0xff]  ;;  %v7475_v25 = vld [vmem:[#allocation3 + $0x78] sm:$0xff] }
 0x355   :  { %1578 = vmatprep.subr.mxu0 %v7460_v28  ;;  %1649 = vmatprep.subr.mxu1 %v7463_v32  ;;  %11260 = vst [vmem:[#allocation133_spill] sm:$0xff] %v7472_v30  ;;  %11261 = vst [vmem:[#allocation134_spill] sm:$0xff] %v7475_v25  ;;  %v7478_v28 = vld [vmem:[#allocation3 + $0x60] sm:$0xff]  ;;  %v7481_v32 = vld [vmem:[#allocation3 + $0x70] sm:$0xff] }
 0x356   :  { %1579 = vmatpush1.msra.mxu0 %v7466_v34  ;;  %1650 = vmatpush1.msra.mxu1 %v7469_v31  ;;  %11262 = vst [vmem:[#allocation135_spill] sm:$0xff] %v7478_v28  ;;  %11263 = vst [vmem:[#allocation136_spill] sm:$0xff] %v7481_v32  ;;  %v7484_v34 = vld [vmem:[#allocation3 + $0x48] sm:$0xff]  ;;  %v7487_v31 = vld [vmem:[#allocation3 + $0x58] sm:$0xff] }
 0x357   :  { %1580 = vmatprep.subr.mxu0 %v7472_v30  ;;  %1651 = vmatprep.subr.mxu1 %v7475_v25  ;;  %11264 = vst [vmem:[#allocation137_spill] sm:$0xff] %v7484_v34  ;;  %11265 = vst [vmem:[#allocation138_spill] sm:$0xff] %v7487_v31  ;;  %v7490_v30 = vld [vmem:[#allocation3 + $0x40] sm:$0xff]  ;;  %v7493_v25 = vld [vmem:[#allocation3 + $0x50] sm:$0xff] }
 0x358   :  { %1581 = vmatpush1.msra.mxu0 %v7478_v28  ;;  %1652 = vmatpush1.msra.mxu1 %v7481_v32  ;;  %11266 = vst [vmem:[#allocation139_spill] sm:$0xff] %v7490_v30  ;;  %11267 = vst [vmem:[#allocation140_spill] sm:$0xff] %v7493_v25  ;;  %v4478_v28 = vpop.eup %4477  ;;  %v7496_v61 = vld [vmem:[#allocation3 + $0x28] sm:$0xff]  ;;  %v7499_v32 = vld [vmem:[#allocation3 + $0x38] sm:$0xff] }
 0x359   :  { %1582 = vmatprep.subr.mxu0 %v7484_v34  ;;  %1653 = vmatprep.subr.mxu1 %v7487_v31  ;;  %11268 = vst [vmem:[#allocation141_spill] sm:$0xff] %v7496_v61  ;;  %11269 = vst [vmem:[#allocation142_spill] sm:$0xff] %v7499_v32  ;;  %v7502_v29 = vld [vmem:[#allocation3 + $0x20] sm:$0xff]  ;;  %v7505_v31 = vld [vmem:[#allocation3 + $0x30] sm:$0xff] }
 0x35a   :  { %1583 = vmatpush1.msra.mxu0 %v7490_v30  ;;  %1654 = vmatpush1.msra.mxu1 %v7493_v25  ;;  %11270 = vst [vmem:[#allocation143_spill] sm:$0xff] %v7502_v29  ;;  %v7508_v30 = vld [vmem:[#allocation3 + $0x8] sm:$0xff]  ;;  %v7511_v25 = vld [vmem:[#allocation3 + $0x18] sm:$0xff] }
 0x35b   :  { %1584 = vmatprep.subr.mxu0 %v7496_v61  ;;  %1655 = vmatprep.subr.mxu1 %v7499_v32  ;;  %v7516_v32 = vld [vmem:[#allocation3] sm:$0xff] }
 0x35c   :  { %v4480_v34 = vpop.eup %4479  ;;  %1585 = vmatpush1.msra.mxu0 %v7502_v29  ;;  %1656 = vmatpush1.msra.mxu1 %v7505_v31  ;;  %v7520_v29 = vld [vmem:[#allocation3 + $0x10] sm:$0xff] }
 0x35d   :  { %1586 = vmatprep.subr.mxu0 %v7508_v30  ;;  %1657 = vmatprep.subr.mxu1 %v7511_v25  ;;  %v7514_v61 = vmul.f32 %v4480_v34, %v4478_v28  ;;  %v11308_v28 = vld [vmem:[#allocation43_spill] sm:$0xff]  ;;  %v11310_v34 = vld [vmem:[#allocation45_spill] sm:$0xff] }
 0x35e   :  { %1587 = vmatpush1.msra.mxu0 %v7516_v32  ;;  %1620 = vmatprep.mubr.f32.mxu0 %v11003_v19 }
 0x35f   :  { %1658 = vmatpush1.msra.mxu1 %v7520_v29  ;;  %1691 = vmatprep.mubr.f32.mxu1 %v11003_v19 }
 0x360   :  { %1621 = vmatmul.mubr.f32.vlgmr.msra.gmra.mxu0 %v7514_v61  ;;  %1692 = vmatmul.mubr.f32.vlgmr.msra.gmra.mxu1 %v7514_v61 }
 0x361   :  { %1726 = vmatprep.subr.mxu0 %v6533_v44  ;;  %1797 = vmatprep.subr.mxu1 %v6539_v45  ;;  %v11271_v44 = vld [vmem:[#allocation11_spill] sm:$0xff]  ;;  %v11272_v45 = vld [vmem:[#allocation6_spill] sm:$0xff] }
 0x362   :  { %1727 = vmatpush1.msra.mxu0 %v6545_v46  ;;  %1798 = vmatpush1.msra.mxu1 %v6551_v49  ;;  %v11273_v46 = vld [vmem:[#allocation13_spill] sm:$0xff]  ;;  %v11274_v49 = vld [vmem:[#allocation7_spill] sm:$0xff] }
 0x363   :  { %1728 = vmatprep.subr.mxu0 %v6557_v51  ;;  %1799 = vmatprep.subr.mxu1 %v6563_v55  ;;  %v11275_v51 = vld [vmem:[#allocation15_spill] sm:$0xff]  ;;  %v11276_v55 = vld [vmem:[#allocation8_spill] sm:$0xff] }
 0x364   :  { %1729 = vmatpush1.msra.mxu0 %v6569_v58  ;;  %1800 = vmatpush1.msra.mxu1 %v6575_v1  ;;  %v11277_v58 = vld [vmem:[#allocation17_spill] sm:$0xff] }
 0x365   :  { %1730 = vmatprep.subr.mxu0 %v6581_v9  ;;  %1801 = vmatprep.subr.mxu1 %v6587_v50  ;;  %v11278_v1 = vld [vmem:[#allocation9_spill] sm:$0xff]  ;;  %v11279_v9 = vld [vmem:[#allocation18_spill] sm:$0xff] }
 0x366   :  { %1731 = vmatpush1.msra.mxu0 %v6593_v63  ;;  %1802 = vmatpush1.msra.mxu1 %v6599_v54  ;;  %v11280_v50 = vld [vmem:[#allocation10_spill] sm:$0xff]  ;;  %v11281_v63 = vld [vmem:[#allocation19_spill] sm:$0xff]  ;;  %v11282_v54 = vld [vmem:[#allocation12_spill] sm:$0xff] }
 0x367   :  { %1732 = vmatprep.subr.mxu0 %v6605_v59  ;;  %1803 = vmatprep.subr.mxu1 %v6611_v0  ;;  %v11283_v59 = vld [vmem:[#allocation21_spill] sm:$0xff]  ;;  %v11284_v0 = vld [vmem:[#allocation14_spill] sm:$0xff] }
 0x368   :  { %1733 = vmatpush1.msra.mxu0 %v6617_v60  ;;  %1804 = vmatpush1.msra.mxu1 %v6623_v62  ;;  %v11285_v60 = vld [vmem:[#allocation23_spill] sm:$0xff]  ;;  %v11286_v62 = vld [vmem:[#allocation16_spill] sm:$0xff] }
 0x369   :  { %1734 = vmatprep.subr.mxu0 %v6629_v48  ;;  %1805 = vmatprep.subr.mxu1 %v6635_v52  ;;  %v11287_v48 = vld [vmem:[#allocation25_spill] sm:$0xff]  ;;  %v11288_v52 = vld [vmem:[#allocation20_spill] sm:$0xff] }
 0x36a   :  { %1735 = vmatpush1.msra.mxu0 %v6641_v56  ;;  %1806 = vmatpush1.msra.mxu1 %v6647_v2  ;;  %v11289_v56 = vld [vmem:[#allocation27_spill] sm:$0xff]  ;;  %v11290_v2 = vld [vmem:[#allocation22_spill] sm:$0xff] }
 0x36b   :  { %1736 = vmatprep.subr.mxu0 %v6653_v53  ;;  %1807 = vmatprep.subr.mxu1 %v6659_v3  ;;  %v11291_v53 = vld [vmem:[#allocation28_spill] sm:$0xff] }
 0x36c   :  { %1737 = vmatpush1.msra.mxu0 %v6665_v4  ;;  %1808 = vmatpush1.msra.mxu1 %v6671_v5  ;;  %v11292_v3 = vld [vmem:[#allocation24_spill] sm:$0xff]  ;;  %v11293_v4 = vld [vmem:[#allocation30_spill] sm:$0xff] }
 0x36d   :  { %1738 = vmatprep.subr.mxu0 %v6677_v6  ;;  %1809 = vmatprep.subr.mxu1 %v6683_v7  ;;  %v11294_v5 = vld [vmem:[#allocation26_spill] sm:$0xff]  ;;  %v11295_v6 = vld [vmem:[#allocation32_spill] sm:$0xff]  ;;  %v11296_v7 = vld [vmem:[#allocation29_spill] sm:$0xff] }
 0x36e   :  { %1739 = vmatpush1.msra.mxu0 %v6689_v8  ;;  %1810 = vmatpush1.msra.mxu1 %v6695_v10  ;;  %v11297_v8 = vld [vmem:[#allocation34_spill] sm:$0xff]  ;;  %v11298_v10 = vld [vmem:[#allocation31_spill] sm:$0xff] }
 0x36f   :  { %1740 = vmatprep.subr.mxu0 %v6701_v11  ;;  %1811 = vmatprep.subr.mxu1 %v6707_v13  ;;  %v11299_v11 = vld [vmem:[#allocation36_spill] sm:$0xff]  ;;  %v11300_v13 = vld [vmem:[#allocation33_spill] sm:$0xff] }
 0x370   :  { %1741 = vmatpush1.msra.mxu0 %v6713_v14  ;;  %1812 = vmatpush1.msra.mxu1 %v6719_v15  ;;  %v11301_v14 = vld [vmem:[#allocation37_spill] sm:$0xff]  ;;  %v11302_v15 = vld [vmem:[#allocation35_spill] sm:$0xff] }
 0x371   :  { %1742 = vmatprep.subr.mxu0 %v6725_v16  ;;  %1813 = vmatprep.subr.mxu1 %v6731_v17  ;;  %v11303_v16 = vld [vmem:[#allocation38_spill] sm:$0xff]  ;;  %v11304_v17 = vld [vmem:[#allocation39_spill] sm:$0xff] }
 0x372   :  { %1743 = vmatpush1.msra.mxu0 %v6737_v18  ;;  %1814 = vmatpush1.msra.mxu1 %v6743_v20  ;;  %v11305_v18 = vld [vmem:[#allocation40_spill] sm:$0xff]  ;;  %v11306_v20 = vld [vmem:[#allocation41_spill] sm:$0xff] }
 0x373   :  { %1744 = vmatprep.subr.mxu0 %v6749_v21  ;;  %1815 = vmatprep.subr.mxu1 %v11271_v44  ;;  %v11307_v21 = vld [vmem:[#allocation42_spill] sm:$0xff] }
 0x374   :  { %1745 = vmatpush1.msra.mxu0 %v11272_v45  ;;  %1816 = vmatpush1.msra.mxu1 %v11273_v46  ;;  %v11311_v44 = vld [vmem:[#allocation46_spill] sm:$0xff]  ;;  %v11312_v45 = vld [vmem:[#allocation47_spill] sm:$0xff]  ;;  %v11313_v46 = vld [vmem:[#allocation48_spill] sm:$0xff] }
 0x375   :  { %1746 = vmatprep.subr.mxu0 %v11274_v49  ;;  %1817 = vmatprep.subr.mxu1 %v11275_v51  ;;  %v11314_v49 = vld [vmem:[#allocation49_spill] sm:$0xff]  ;;  %v11315_v51 = vld [vmem:[#allocation50_spill] sm:$0xff] }
 0x376   :  { %1747 = vmatpush1.msra.mxu0 %v11276_v55  ;;  %1818 = vmatpush1.msra.mxu1 %v11277_v58  ;;  %v11316_v55 = vld [vmem:[#allocation51_spill] sm:$0xff]  ;;  %v11317_v58 = vld [vmem:[#allocation52_spill] sm:$0xff] }
 0x377   :  { %1748 = vmatprep.subr.mxu0 %v11278_v1  ;;  %1819 = vmatprep.subr.mxu1 %v11279_v9  ;;  %v11318_v1 = vld [vmem:[#allocation53_spill] sm:$0xff]  ;;  %v11319_v9 = vld [vmem:[#allocation54_spill] sm:$0xff] }
 0x378   :  { %1749 = vmatpush1.msra.mxu0 %v11280_v50  ;;  %1820 = vmatpush1.msra.mxu1 %v11281_v63  ;;  %v11320_v50 = vld [vmem:[#allocation55_spill] sm:$0xff]  ;;  %v11321_v63 = vld [vmem:[#allocation56_spill] sm:$0xff] }
 0x379   :  { %1750 = vmatprep.subr.mxu0 %v11282_v54  ;;  %1821 = vmatprep.subr.mxu1 %v11283_v59  ;;  %v11322_v54 = vld [vmem:[#allocation57_spill] sm:$0xff]  ;;  %v11323_v59 = vld [vmem:[#allocation58_spill] sm:$0xff] }
 0x37a   :  { %1751 = vmatpush1.msra.mxu0 %v11284_v0  ;;  %1822 = vmatpush1.msra.mxu1 %v11285_v60  ;;  %v11324_v0 = vld [vmem:[#allocation59_spill] sm:$0xff]  ;;  %v11325_v60 = vld [vmem:[#allocation60_spill] sm:$0xff] }
 0x37b   :  { %1752 = vmatprep.subr.mxu0 %v11286_v62  ;;  %1823 = vmatprep.subr.mxu1 %v11287_v48  ;;  %v11326_v62 = vld [vmem:[#allocation61_spill] sm:$0xff]  ;;  %v11327_v48 = vld [vmem:[#allocation62_spill] sm:$0xff] }
 0x37c   :  { %1753 = vmatpush1.msra.mxu0 %v11288_v52  ;;  %1824 = vmatpush1.msra.mxu1 %v11289_v56  ;;  %v11328_v52 = vld [vmem:[#allocation63_spill] sm:$0xff]  ;;  %v11329_v56 = vld [vmem:[#allocation64_spill] sm:$0xff] }
 0x37d   :  { %1754 = vmatprep.subr.mxu0 %v11290_v2  ;;  %1825 = vmatprep.subr.mxu1 %v11291_v53  ;;  %v11330_v2 = vld [vmem:[#allocation65_spill] sm:$0xff]  ;;  %v11331_v53 = vld [vmem:[#allocation66_spill] sm:$0xff] }
 0x37e   :  { %1755 = vmatpush1.msra.mxu0 %v11292_v3  ;;  %1826 = vmatpush1.msra.mxu1 %v11293_v4  ;;  %v11332_v3 = vld [vmem:[#allocation67_spill] sm:$0xff]  ;;  %v11333_v4 = vld [vmem:[#allocation68_spill] sm:$0xff] }
 0x37f   :  { %1756 = vmatprep.subr.mxu0 %v11294_v5  ;;  %1827 = vmatprep.subr.mxu1 %v11295_v6  ;;  %v11334_v5 = vld [vmem:[#allocation69_spill] sm:$0xff]  ;;  %v11335_v6 = vld [vmem:[#allocation70_spill] sm:$0xff] }
 0x380   :  { %1757 = vmatpush1.msra.mxu0 %v11296_v7  ;;  %1790 = vmatprep.mubr.f32.mxu0 %v11003_v19  ;;  %v11336_v7 = vld [vmem:[#allocation71_spill] sm:$0xff] }
 0x381   :  { %1828 = vmatpush1.msra.mxu1 %v11297_v8  ;;  %1861 = vmatprep.mubr.f32.mxu1 %v11003_v19  ;;  %v11337_v8 = vld [vmem:[#allocation72_spill] sm:$0xff] }
 0x382   :  { %1791 = vmatmul.mubr.f32.vlgmr.msra.gmra.mxu0 %v7514_v61  ;;  %1862 = vmatmul.mubr.f32.vlgmr.msra.gmra.mxu1 %v7514_v61  ;;  %v11309_v61 = vld [vmem:[#allocation44_spill] sm:$0xff] }
 0x383   :  { %1868 = vmatprep.subr.mxu0 %v11298_v10  ;;  %1939 = vmatprep.subr.mxu1 %v11299_v11  ;;  %v11338_v10 = vld [vmem:[#allocation73_spill] sm:$0xff]  ;;  %v11339_v11 = vld [vmem:[#allocation74_spill] sm:$0xff] }
 0x384   :  { %1869 = vmatpush1.msra.mxu0 %v11300_v13  ;;  %1940 = vmatpush1.msra.mxu1 %v11301_v14  ;;  %v11340_v13 = vld [vmem:[#allocation75_spill] sm:$0xff]  ;;  %v11341_v14 = vld [vmem:[#allocation76_spill] sm:$0xff] }
 0x385   :  { %1870 = vmatprep.subr.mxu0 %v11302_v15  ;;  %1941 = vmatprep.subr.mxu1 %v11303_v16  ;;  %v11342_v15 = vld [vmem:[#allocation77_spill] sm:$0xff]  ;;  %v11343_v16 = vld [vmem:[#allocation78_spill] sm:$0xff] }
 0x386   :  { %1871 = vmatpush1.msra.mxu0 %v11304_v17  ;;  %1942 = vmatpush1.msra.mxu1 %v11305_v18  ;;  %v11344_v17 = vld [vmem:[#allocation79_spill] sm:$0xff]  ;;  %v11345_v18 = vld [vmem:[#allocation80_spill] sm:$0xff] }
 0x387   :  { %1872 = vmatprep.subr.mxu0 %v11306_v20  ;;  %1943 = vmatprep.subr.mxu1 %v11307_v21  ;;  %v11346_v20 = vld [vmem:[#allocation81_spill] sm:$0xff]  ;;  %v11347_v21 = vld [vmem:[#allocation82_spill] sm:$0xff] }
 0x388   :  { %1873 = vmatpush1.msra.mxu0 %v11308_v28  ;;  %1944 = vmatpush1.msra.mxu1 %v11309_v61  ;;  %v11348_v28 = vld [vmem:[#allocation83_spill] sm:$0xff]  ;;  %v11349_v61 = vld [vmem:[#allocation84_spill] sm:$0xff] }
 0x389   :  { %1874 = vmatprep.subr.mxu0 %v11310_v34  ;;  %1945 = vmatprep.subr.mxu1 %v11311_v44  ;;  %v11350_v34 = vld [vmem:[#allocation85_spill] sm:$0xff]  ;;  %v11351_v44 = vld [vmem:[#allocation86_spill] sm:$0xff] }
 0x38a   :  { %1875 = vmatpush1.msra.mxu0 %v11312_v45  ;;  %1946 = vmatpush1.msra.mxu1 %v11313_v46  ;;  %v11352_v45 = vld [vmem:[#allocation87_spill] sm:$0xff]  ;;  %v11353_v46 = vld [vmem:[#allocation88_spill] sm:$0xff] }
 0x38b   :  { %1876 = vmatprep.subr.mxu0 %v11314_v49  ;;  %1947 = vmatprep.subr.mxu1 %v11315_v51  ;;  %v11354_v49 = vld [vmem:[#allocation89_spill] sm:$0xff]  ;;  %v11355_v51 = vld [vmem:[#allocation90_spill] sm:$0xff] }
 0x38c   :  { %1877 = vmatpush1.msra.mxu0 %v11316_v55  ;;  %1948 = vmatpush1.msra.mxu1 %v11317_v58  ;;  %v11356_v55 = vld [vmem:[#allocation91_spill] sm:$0xff]  ;;  %v11357_v58 = vld [vmem:[#allocation92_spill] sm:$0xff] }
 0x38d   :  { %1878 = vmatprep.subr.mxu0 %v11318_v1  ;;  %1949 = vmatprep.subr.mxu1 %v11319_v9  ;;  %v11358_v1 = vld [vmem:[#allocation93_spill] sm:$0xff]  ;;  %v11359_v9 = vld [vmem:[#allocation94_spill] sm:$0xff] }
 0x38e   :  { %1879 = vmatpush1.msra.mxu0 %v11320_v50  ;;  %1950 = vmatpush1.msra.mxu1 %v11321_v63  ;;  %v11360_v50 = vld [vmem:[#allocation95_spill] sm:$0xff]  ;;  %v11361_v63 = vld [vmem:[#allocation96_spill] sm:$0xff] }
 0x38f   :  { %1880 = vmatprep.subr.mxu0 %v11322_v54  ;;  %1951 = vmatprep.subr.mxu1 %v11323_v59  ;;  %v11362_v54 = vld [vmem:[#allocation97_spill] sm:$0xff]  ;;  %v11363_v59 = vld [vmem:[#allocation98_spill] sm:$0xff] }
 0x390   :  { %1881 = vmatpush1.msra.mxu0 %v11324_v0  ;;  %1952 = vmatpush1.msra.mxu1 %v11325_v60 }
 0x391   :  { %1882 = vmatprep.subr.mxu0 %v11326_v62  ;;  %1953 = vmatprep.subr.mxu1 %v11327_v48 }
 0x392   :  { %1883 = vmatpush1.msra.mxu0 %v11328_v52  ;;  %1954 = vmatpush1.msra.mxu1 %v11329_v56 }
 0x393   :  { %1884 = vmatprep.subr.mxu0 %v11330_v2  ;;  %1955 = vmatprep.subr.mxu1 %v11331_v53 }
 0x394   :  { %1885 = vmatpush1.msra.mxu0 %v11332_v3  ;;  %1956 = vmatpush1.msra.mxu1 %v11333_v4 }
 0x395   :  { %1886 = vmatprep.subr.mxu0 %v11334_v5  ;;  %1957 = vmatprep.subr.mxu1 %v11335_v6 }
 0x396   :  { %1887 = vmatpush1.msra.mxu0 %v11336_v7  ;;  %1958 = vmatpush1.msra.mxu1 %v11337_v8 }
 0x397   :  { %1888 = vmatprep.subr.mxu0 %v11338_v10  ;;  %1959 = vmatprep.subr.mxu1 %v11339_v11 }
 0x398   :  { %1889 = vmatpush1.msra.mxu0 %v11340_v13  ;;  %1960 = vmatpush1.msra.mxu1 %v11341_v14 }
 0x399   :  { %1890 = vmatprep.subr.mxu0 %v11342_v15  ;;  %1961 = vmatprep.subr.mxu1 %v11343_v16 }
 0x39a   :  { %1891 = vmatpush1.msra.mxu0 %v11344_v17  ;;  %1962 = vmatpush1.msra.mxu1 %v11345_v18 }
 0x39b   :  { %1892 = vmatprep.subr.mxu0 %v11346_v20  ;;  %1963 = vmatprep.subr.mxu1 %v11347_v21  ;;  %v4293_v21 = vld [vmem:[%s10271_s0 + $0x60] sm:$0xff] }
 0x39c   :  { %1893 = vmatpush1.msra.mxu0 %v11348_v28  ;;  %1964 = vmatpush1.msra.mxu1 %v11349_v61  ;;  %v4294_v61 = vld [vmem:[%s10271_s0 + $0x68] sm:$0xff] }
 0x39d   :  { %1894 = vmatprep.subr.mxu0 %v11350_v34  ;;  %1965 = vmatprep.subr.mxu1 %v11351_v44 }
 0x39e   :  { %1895 = vmatpush1.msra.mxu0 %v11352_v45  ;;  %1966 = vmatpush1.msra.mxu1 %v11353_v46 }
 0x39f   :  { %1896 = vmatprep.subr.mxu0 %v11354_v49  ;;  %1967 = vmatprep.subr.mxu1 %v11355_v51 }
 0x3a0   :  { %1897 = vmatpush1.msra.mxu0 %v11356_v55  ;;  %1968 = vmatpush1.msra.mxu1 %v11357_v58 }
 0x3a1   :  { %1898 = vmatprep.subr.mxu0 %v11358_v1  ;;  %1969 = vmatprep.subr.mxu1 %v11359_v9 }
 0x3a2   :  { %1899 = vmatpush1.msra.mxu0 %v11360_v50  ;;  %1970 = vmatpush1.msra.mxu1 %v11361_v63 }
 0x3a3   :  { %1932 = vmatprep.mubr.f32.mxu0 %v11003_v19  ;;  %2003 = vmatprep.mubr.f32.mxu1 %v11003_v19 }
 0x3a4   :  { %2043 = vmatprep.subr.mxu0 %v11362_v54  ;;  %2114 = vmatprep.subr.mxu1 %v11363_v59 }
 0x3ff   :  { %v1447_v0 = vpop.f32.mrf.mxu0  ;;  %v1518_v60 = vpop.f32.mrf.mxu1 }
 0x401   :  { %v1449_v62 = vpop.f32.mrf.mxu0  ;;  %v1520_v52 = vpop.f32.mrf.mxu1 }
 0x420   :  { %v1622_v48 = vpop.f32.mrf.mxu0  ;;  %v1693_v3 = vpop.f32.mrf.mxu1 }
 0x421   :  { %v1623_v56 = vadd.f32 %v1622_v48, %v1447_v0  ;;  %v1694_v13 = vadd.f32 %v1693_v3, %v1518_v60  ;;  %v4296_v60 = vld [vmem:[%s10271_s0 + $0x78] sm:$0xff]  ;;  %v4295_v48 = vld [vmem:[%s10271_s0 + $0x70] sm:$0xff] }
 0x422   :  { %v1624_v2 = vpop.f32.mrf.mxu0  ;;  %v1695_v8 = vpop.f32.mrf.mxu1 }
 0x423   :  { %v1698_v53 = vadd.f32 %v1623_v56, %v6431_v33  ;;  %v1625_v4 = vadd.f32 %v1624_v2, %v1449_v62  ;;  %v1696_v10 = vadd.f32 %v1695_v8, %v1520_v52  ;;  %v1700_v16 = vadd.f32 %v1694_v13, %v6440_v57  ;;  %v11365_v8 = vld [vmem:[#allocation100_spill] sm:$0xff] }
 0x425   :  { %v4290_v5 = vmul.f32 -1.442695, %v1698_v53  ;;  %v1699_v6 = vadd.f32 %v1625_v4, %v6433_v37  ;;  %v1701_v11 = vadd.f32 %v1696_v10, %v6437_v47  ;;  %v11366_v10 = vld [vmem:[#allocation101_spill] sm:$0xff] }
 0x427   :  { %4481 = vpow2.f32 %v4290_v5  ;;  %v4291_v7 = vmul.f32 -1.442695, %v1699_v6  ;;  %v4292_v14 = vmul.f32 -1.442695, %v1701_v11  ;;  %v11372_v11 = vld [vmem:[#allocation107_spill] sm:$0xff] }
 0x429   :  { %4483 = vpow2.f32 %v4291_v7  ;;  %v11364_v7 = vld [vmem:[#allocation99_spill] sm:$0xff] }
 0x42a   :  { %4485 = vpow2.f32 %v4292_v14  ;;  %v11374_v14 = vld [vmem:[#allocation109_spill] sm:$0xff] }
 0x434   :  { %v4482_v15 = vpop.eup %4481 }
 0x435   :  { %v1705_v17 = vadd.f32 1.0, %v4482_v15 }
 0x436   :  { %v4484_v18 = vpop.eup %4483 }
 0x437   :  { %4487 = vrcp.f32 %v1705_v17  ;;  %v1711_v20 = vadd.f32 1.0, %v4484_v18  ;;  %v4486_v34 = vpop.eup %4485  ;;  %v11375_v17 = vld [vmem:[#allocation110_spill] sm:$0xff]  ;;  %v11376_v18 = vld [vmem:[#allocation111_spill] sm:$0xff] }
 0x438   :  { %4489 = vtanh.f32 %v1700_v16  ;;  %v1718_v1 = vadd.f32 1.0, %v4486_v34  ;;  %v11379_v34 = vld [vmem:[#allocation114_spill] sm:$0xff] }
 0x439   :  { %4491 = vrcp.f32 %v1711_v20 }
 0x442   :  { %v1792_v28 = vpop.f32.mrf.mxu0  ;;  %v1863_v63 = vpop.f32.mrf.mxu1 }
 0x443   :  { %v2015_v44 = vadd.f32 %v4293_v21, %v1792_v28  ;;  %v2017_v56 = vadd.f32 %v4295_v48, %v1863_v63  ;;  %v11377_v28 = vld [vmem:[#allocation112_spill] sm:$0xff]  ;;  %v11394_v63 = vld [vmem:[#allocation129_spill] sm:$0xff]  ;;  %v11399_v48 = vld [vmem:[#allocation134_spill] sm:$0xff] }
 0x444   :  { %v4488_v45 = vpop.eup %4487  ;;  %v1794_v46 = vpop.f32.mrf.mxu0 }
 0x445   :  { %v4490_v49 = vpop.eup %4489  ;;  %v4297_v51 = vmul.f32 -1.442695, %v2015_v44  ;;  %v2016_v55 = vadd.f32 %v4294_v61, %v1794_v46  ;;  %v1865_v0 = vpop.f32.mrf.mxu1  ;;  %v11380_v44 = vld [vmem:[#allocation115_spill] sm:$0xff]  ;;  %v11386_v46 = vld [vmem:[#allocation121_spill] sm:$0xff] }
 0x446   :  { %v4492_v58 = vpop.eup %4491  ;;  %v1722_v9 = vmul.f32 %v4490_v49, %v4488_v45  ;;  %v2018_v62 = vadd.f32 %v4296_v60, %v1865_v0  ;;  %v11381_v45 = vld [vmem:[#allocation116_spill] sm:$0xff]  ;;  %v11387_v49 = vld [vmem:[#allocation122_spill] sm:$0xff]  ;;  %v11396_v0 = vld [vmem:[#allocation131_spill] sm:$0xff] }
 0x447   :  { %v1721_v50 = vmul.f32 %v4492_v58, %v7321_v42  ;;  %4493 = vpow2.f32 %v4297_v51  ;;  %v4298_v54 = vmul.f32 -1.442695, %v2016_v55  ;;  %v11388_v51 = vld [vmem:[#allocation123_spill] sm:$0xff]  ;;  %v11389_v55 = vld [vmem:[#allocation124_spill] sm:$0xff]  ;;  %v11390_v58 = vld [vmem:[#allocation125_spill] sm:$0xff] }
 0x448   :  { %v4299_v42 = vmul.f32 -1.442695, %v2018_v62  ;;  %v11397_v60 = vld [vmem:[#allocation132_spill] sm:$0xff]  ;;  %v11398_v62 = vld [vmem:[#allocation133_spill] sm:$0xff] }
 0x449   :  { %4495 = vpow2.f32 %v4298_v54  ;;  %v7673_v59 = vadd.f32 %v1722_v9, %v1721_v50  ;;  %v11392_v9 = vld [vmem:[#allocation127_spill] sm:$0xff]  ;;  %v11393_v50 = vld [vmem:[#allocation128_spill] sm:$0xff]  ;;  %v11395_v54 = vld [vmem:[#allocation130_spill] sm:$0xff] }
 0x44a   :  { %4497 = vrcp.f32 %v1718_v1  ;;  %v11391_v1 = vld [vmem:[#allocation126_spill] sm:$0xff] }
 0x44b   :  { %4499 = vtanh.f32 %v7673_v59 }
 0x44c   :  { %4501 = vpow2.f32 %v4299_v42  ;;  %v11400_v42 = vld [vmem:[#allocation135_spill] sm:$0xff] }
 0x454   :  { %v4494_v52 = vpop.eup %4493 }
 0x455   :  { %v2022_v2 = vadd.f32 1.0, %v4494_v52  ;;  %v11401_v52 = vld [vmem:[#allocation136_spill] sm:$0xff] }
 0x456   :  { %v4496_v53 = vpop.eup %4495 }
 0x457   :  { %v4498_v3 = vpop.eup %4497  ;;  %4503 = vrcp.f32 %v2022_v2  ;;  %v2028_v4 = vadd.f32 1.0, %v4496_v53  ;;  %v11403_v2 = vld [vmem:[#allocation138_spill] sm:$0xff]  ;;  %v11404_v53 = vld [vmem:[#allocation139_spill] sm:$0xff] }
 0x458   :  { %v4500_v5 = vpop.eup %4499  ;;  %4505 = vtanh.f32 %v2017_v56  ;;  %v11402_v56 = vld [vmem:[#allocation137_spill] sm:$0xff] }
 0x459   :  { %4507 = vrcp.f32 %v2028_v4  ;;  %v1725_v6 = vmul.f32 %v4500_v5, %v4498_v3  ;;  %v11405_v3 = vld [vmem:[#allocation140_spill] sm:$0xff]  ;;  %v11406_v5 = vld [vmem:[#allocation141_spill] sm:$0xff] }
 0x45b   :  { %1933 = vmatmul.mubr.f32.vlgmr.msra.gmra.mxu0 %v1725_v6  ;;  %2004 = vmatmul.mubr.f32.vlgmr.msra.gmra.mxu1 %v1725_v6  ;;  %v11407_v6 = vld [vmem:[#allocation142_spill] sm:$0xff] }
 0x45c   :  { %2044 = vmatpush1.msra.mxu0 %v7330_v24  ;;  %2115 = vmatpush1.msra.mxu1 %v7333_v35  ;;  %v11367_v24 = vld [vmem:[#allocation102_spill] sm:$0xff]  ;;  %v11368_v35 = vld [vmem:[#allocation103_spill] sm:$0xff] }
 0x45d   :  { %2045 = vmatprep.subr.mxu0 %v7336_v22  ;;  %2116 = vmatprep.subr.mxu1 %v7339_v38  ;;  %v11369_v22 = vld [vmem:[#allocation104_spill] sm:$0xff]  ;;  %v4502_v38 = vpop.eup %4501 }
 0x45e   :  { %2046 = vmatpush1.msra.mxu0 %v7342_v40  ;;  %2117 = vmatpush1.msra.mxu1 %v7345_v41  ;;  %v11370_v40 = vld [vmem:[#allocation105_spill] sm:$0xff]  ;;  %v11371_v41 = vld [vmem:[#allocation106_spill] sm:$0xff]  ;;  %v2035_v16 = vadd.f32 1.0, %v4502_v38  ;;  %v7805_v38 = vld [vmem:[%s10272_s1 + $0x1a8] sm:$0xff] }
 0x45f   :  { %2047 = vmatprep.subr.mxu0 %v7348_v43  ;;  %2118 = vmatprep.subr.mxu1 %v7351_v36  ;;  %v11373_v36 = vld [vmem:[#allocation108_spill] sm:$0xff] }
 0x460   :  { %2048 = vmatpush1.msra.mxu0 %v11364_v7  ;;  %2119 = vmatpush1.msra.mxu1 %v11365_v8  ;;  %4509 = vrcp.f32 %v2035_v16  ;;  %v11408_v8 = vld [vmem:[#allocation143_spill] sm:$0xff]  ;;  %v7859_v16 = vld [vmem:[%s10272_s1 + $0x178] sm:$0xff] }
 0x461   :  { %2049 = vmatprep.subr.mxu0 %v11366_v10  ;;  %2120 = vmatprep.subr.mxu1 %v11367_v24  ;;  %v7787_v24 = vld [vmem:[%s10272_s1 + $0x1d8] sm:$0xff] }
 0x462   :  { %2050 = vmatpush1.msra.mxu0 %v11368_v35  ;;  %2121 = vmatpush1.msra.mxu1 %v11369_v22  ;;  %v7793_v35 = vld [vmem:[%s10272_s1 + $0x1c0] sm:$0xff]  ;;  %v7799_v22 = vld [vmem:[%s10272_s1 + $0x1d0] sm:$0xff] }
 0x463   :  { %2051 = vmatprep.subr.mxu0 %v11370_v40  ;;  %2122 = vmatprep.subr.mxu1 %v11371_v41  ;;  %v7811_v40 = vld [vmem:[%s10272_s1 + $0x1b8] sm:$0xff]  ;;  %v7817_v41 = vld [vmem:[%s10272_s1 + $0x1a0] sm:$0xff] }
 0x464   :  { %v4504_v43 = vpop.eup %4503  ;;  %2052 = vmatpush1.msra.mxu0 %v11372_v11  ;;  %2123 = vmatpush1.msra.mxu1 %v11373_v36  ;;  %v7829_v11 = vld [vmem:[%s10272_s1 + $0x188] sm:$0xff]  ;;  %v7835_v36 = vld [vmem:[%s10272_s1 + $0x198] sm:$0xff] }
 0x465   :  { %v4506_v13 = vpop.eup %4505  ;;  %2053 = vmatprep.subr.mxu0 %v11374_v14  ;;  %2124 = vmatprep.subr.mxu1 %v7387_v12  ;;  %v11378_v12 = vld [vmem:[#allocation113_spill] sm:$0xff]  ;;  %v7847_v14 = vld [vmem:[%s10272_s1 + $0x190] sm:$0xff] }
 0x466   :  { %v4508_v15 = vpop.eup %4507  ;;  %2054 = vmatpush1.msra.mxu0 %v11375_v17  ;;  %2125 = vmatpush1.msra.mxu1 %v11376_v18  ;;  %v2039_v20 = vmul.f32 %v4506_v13, %v4504_v43  ;;  %v7823_v43 = vld [vmem:[%s10272_s1 + $0x1b0] sm:$0xff]  ;;  %v7841_v13 = vld [vmem:[%s10272_s1 + $0x180] sm:$0xff] }
 0x467   :  { %v2038_v21 = vmul.f32 %v4508_v15, %v7409_v23  ;;  %2055 = vmatprep.subr.mxu0 %v7397_v39  ;;  %2126 = vmatprep.subr.mxu1 %v7400_v26  ;;  %v11382_v23 = vld [vmem:[#allocation117_spill] sm:$0xff]  ;;  %v11383_v39 = vld [vmem:[#allocation118_spill] sm:$0xff]  ;;  %v11384_v26 = vld [vmem:[#allocation119_spill] sm:$0xff] }
 0x468   :  { %2056 = vmatpush1.msra.mxu0 %v7403_v27  ;;  %2127 = vmatpush1.msra.mxu1 %v11377_v28  ;;  %v11385_v27 = vld [vmem:[#allocation120_spill] sm:$0xff]  ;;  %v7853_v15 = vld [vmem:[%s10272_s1 + $0x168] sm:$0xff]  ;;  %v7865_v17 = vld [vmem:[%s10272_s1 + $0x160] sm:$0xff] }
 0x469   :  { %v7709_v61 = vadd.f32 %v2039_v20, %v2038_v21  ;;  %2057 = vmatprep.subr.mxu0 %v11378_v12  ;;  %2128 = vmatprep.subr.mxu1 %v11379_v34  ;;  %v7871_v18 = vld [vmem:[%s10272_s1 + $0x170] sm:$0xff]  ;;  %v7877_v20 = vld [vmem:[%s10272_s1 + $0x148] sm:$0xff]  ;;  %v7883_v21 = vld [vmem:[%s10272_s1 + $0x158] sm:$0xff] }
 0x46a   :  { %2058 = vmatpush1.msra.mxu0 %v11380_v44  ;;  %2129 = vmatpush1.msra.mxu1 %v11381_v45  ;;  %v7889_v28 = vld [vmem:[%s10272_s1 + $0x140] sm:$0xff]  ;;  %v7895_v12 = vld [vmem:[%s10272_s1 + $0x150] sm:$0xff]  ;;  %v7901_v34 = vld [vmem:[%s10272_s1 + $0x128] sm:$0xff] }
 0x46b   :  { %2059 = vmatprep.subr.mxu0 %v11382_v23  ;;  %2130 = vmatprep.subr.mxu1 %v11383_v39  ;;  %4511 = vtanh.f32 %v7709_v61  ;;  %v7907_v44 = vld [vmem:[%s10272_s1 + $0x138] sm:$0xff]  ;;  %v7913_v45 = vld [vmem:[%s10272_s1 + $0x120] sm:$0xff]  ;;  %v7919_v23 = vld [vmem:[%s10272_s1 + $0x130] sm:$0xff] }
 0x46c   :  { %2060 = vmatpush1.msra.mxu0 %v11384_v26  ;;  %2131 = vmatpush1.msra.mxu1 %v11385_v27  ;;  %v7925_v39 = vld [vmem:[%s10272_s1 + $0x108] sm:$0xff]  ;;  %v7931_v26 = vld [vmem:[%s10272_s1 + $0x118] sm:$0xff]  ;;  %v7937_v27 = vld [vmem:[%s10272_s1 + $0x100] sm:$0xff] }
 0x46d   :  { %2061 = vmatprep.subr.mxu0 %v11386_v46  ;;  %2132 = vmatprep.subr.mxu1 %v11387_v49  ;;  %v4510_v4 = vpop.eup %4509  ;;  %v7943_v46 = vld [vmem:[%s10272_s1 + $0x110] sm:$0xff]  ;;  %v7949_v49 = vld [vmem:[%s10272_s1 + $0xe8] sm:$0xff] }
 0x46e   :  { %2062 = vmatpush1.msra.mxu0 %v11388_v51  ;;  %2133 = vmatpush1.msra.mxu1 %v11389_v55  ;;  %v7955_v51 = vld [vmem:[%s10272_s1 + $0xf8] sm:$0xff]  ;;  %v7961_v55 = vld [vmem:[%s10272_s1 + $0xe0] sm:$0xff] }
 0x46f   :  { %2063 = vmatprep.subr.mxu0 %v11390_v58  ;;  %2134 = vmatprep.subr.mxu1 %v11391_v1  ;;  %v7967_v58 = vld [vmem:[%s10272_s1 + $0xf0] sm:$0xff]  ;;  %v7973_v1 = vld [vmem:[%s10272_s1 + $0xc8] sm:$0xff] }
 0x470   :  { %2064 = vmatpush1.msra.mxu0 %v11392_v9  ;;  %2135 = vmatpush1.msra.mxu1 %v11393_v50  ;;  %v7979_v9 = vld [vmem:[%s10272_s1 + $0xd8] sm:$0xff]  ;;  %v7985_v50 = vld [vmem:[%s10272_s1 + $0xc0] sm:$0xff] }
 0x471   :  { %2065 = vmatprep.subr.mxu0 %v11394_v63  ;;  %2136 = vmatprep.subr.mxu1 %v11395_v54  ;;  %11409 = vst [vmem:[#allocation144_spill] sm:$0xff] %v7979_v9  ;;  %11410 = vst [vmem:[#allocation145_spill] sm:$0xff] %v7985_v50  ;;  %v7991_v63 = vld [vmem:[%s10272_s1 + $0xd0] sm:$0xff]  ;;  %v7997_v54 = vld [vmem:[%s10272_s1 + $0xa8] sm:$0xff] }
 0x472   :  { %2066 = vmatpush1.msra.mxu0 %v11396_v0  ;;  %2137 = vmatpush1.msra.mxu1 %v11397_v60  ;;  %11411 = vst [vmem:[#allocation146_spill] sm:$0xff] %v7991_v63  ;;  %11412 = vst [vmem:[#allocation147_spill] sm:$0xff] %v7997_v54  ;;  %v8003_v0 = vld [vmem:[%s10272_s1 + $0xb8] sm:$0xff]  ;;  %v8009_v60 = vld [vmem:[%s10272_s1 + $0xa0] sm:$0xff] }
 0x473   :  { %2067 = vmatprep.subr.mxu0 %v11398_v62  ;;  %2138 = vmatprep.subr.mxu1 %v11399_v48  ;;  %11413 = vst [vmem:[#allocation148_spill] sm:$0xff] %v8003_v0  ;;  %11414 = vst [vmem:[#allocation149_spill] sm:$0xff] %v8009_v60  ;;  %v8015_v62 = vld [vmem:[%s10272_s1 + $0xb0] sm:$0xff]  ;;  %v8021_v48 = vld [vmem:[%s10272_s1 + $0x88] sm:$0xff] }
 0x474   :  { %2068 = vmatpush1.msra.mxu0 %v11400_v42  ;;  %2139 = vmatpush1.msra.mxu1 %v11401_v52  ;;  %11415 = vst [vmem:[#allocation150_spill] sm:$0xff] %v8015_v62  ;;  %11416 = vst [vmem:[#allocation11_spill] sm:$0xff] %v8021_v48  ;;  %v8027_v42 = vld [vmem:[%s10272_s1 + $0x98] sm:$0xff]  ;;  %v8033_v52 = vld [vmem:[%s10272_s1 + $0x80] sm:$0xff] }
 0x475   :  { %2069 = vmatprep.subr.mxu0 %v11402_v56  ;;  %2140 = vmatprep.subr.mxu1 %v11403_v2  ;;  %11417 = vst [vmem:[#allocation6_spill] sm:$0xff] %v8027_v42  ;;  %11418 = vst [vmem:[#allocation13_spill] sm:$0xff] %v8033_v52  ;;  %v8039_v56 = vld [vmem:[%s10272_s1 + $0x90] sm:$0xff]  ;;  %v8045_v2 = vld [vmem:[%s10272_s1 + $0x68] sm:$0xff] }
 0x476   :  { %2070 = vmatpush1.msra.mxu0 %v11404_v53  ;;  %2141 = vmatpush1.msra.mxu1 %v11405_v3  ;;  %11419 = vst [vmem:[#allocation7_spill] sm:$0xff] %v8039_v56  ;;  %11420 = vst [vmem:[#allocation15_spill] sm:$0xff] %v8045_v2  ;;  %v8051_v53 = vld [vmem:[%s10272_s1 + $0x78] sm:$0xff]  ;;  %v8057_v3 = vld [vmem:[%s10272_s1 + $0x60] sm:$0xff] }
 0x477   :  { %2071 = vmatprep.subr.mxu0 %v11406_v5  ;;  %2142 = vmatprep.subr.mxu1 %v11407_v6  ;;  %11421 = vst [vmem:[#allocation8_spill] sm:$0xff] %v8051_v53  ;;  %11422 = vst [vmem:[#allocation17_spill] sm:$0xff] %v8057_v3  ;;  %v8069_v5 = vld [vmem:[%s10272_s1 + $0x48] sm:$0xff]  ;;  %v8075_v6 = vld [vmem:[%s10272_s1 + $0x58] sm:$0xff] }
 0x478   :  { %v4512_v7 = vpop.eup %4511  ;;  %2072 = vmatpush1.msra.mxu0 %v11408_v8  ;;  %2143 = vmatpush1.msra.mxu1 %v7505_v31  ;;  %v7781_v31 = vld [vmem:[%s10272_s1 + $0x1c8] sm:$0xff]  ;;  %11424 = vst [vmem:[#allocation18_spill] sm:$0xff] %v8069_v5  ;;  %11425 = vst [vmem:[#allocation10_spill] sm:$0xff] %v8075_v6  ;;  %v8087_v8 = vld [vmem:[%s10272_s1 + $0x50] sm:$0xff] }
 0x479   :  { %2073 = vmatprep.subr.mxu0 %v7508_v30  ;;  %2144 = vmatprep.subr.mxu1 %v7511_v25  ;;  %v7746_v10 = vmul.f32 %v4512_v7, %v4510_v4  ;;  %v7757_v30 = vld [vmem:[%s10272_s1 + $0x1e8] sm:$0xff]  ;;  %v7763_v25 = vld [vmem:[%s10272_s1 + $0x1f8] sm:$0xff]  ;;  %v8063_v4 = vld [vmem:[%s10272_s1 + $0x70] sm:$0xff]  ;;  %11427 = vst [vmem:[#allocation12_spill] sm:$0xff] %v8087_v8 }
 0x47a   :  { %2074 = vmatpush1.msra.mxu0 %v7516_v32  ;;  %2107 = vmatprep.mubr.f32.mxu0 %v11003_v19  ;;  %v7775_v32 = vld [vmem:[%s10272_s1 + $0x1f0] sm:$0xff]  ;;  %11423 = vst [vmem:[#allocation9_spill] sm:$0xff] %v8063_v4  ;;  %v8081_v7 = vld [vmem:[%s10272_s1 + $0x40] sm:$0xff] }
 0x47b   :  { %2145 = vmatpush1.msra.mxu1 %v7520_v29  ;;  %2178 = vmatprep.mubr.f32.mxu1 %v11003_v19  ;;  %v7769_v29 = vld [vmem:[%s10272_s1 + $0x1e0] sm:$0xff]  ;;  %11426 = vst [vmem:[#allocation19_spill] sm:$0xff] %v8081_v7 }
 0x47c   :  { %2108 = vmatmul.mubr.f32.vlgmr.msra.gmra.mxu0 %v7746_v10  ;;  %2179 = vmatmul.mubr.f32.vlgmr.msra.gmra.mxu1 %v7746_v10 }
 0x47d   :  { %2213 = vmatprep.subr.mxu0 %v7757_v30  ;;  %2284 = vmatprep.subr.mxu1 %v7763_v25 }
 0x47e   :  { %2214 = vmatpush1.msra.mxu0 %v7769_v29  ;;  %2285 = vmatpush1.msra.mxu1 %v7775_v32 }
 0x47f   :  { %2215 = vmatprep.subr.mxu0 %v7781_v31  ;;  %2286 = vmatprep.subr.mxu1 %v7787_v24 }
 0x480   :  { %2216 = vmatpush1.msra.mxu0 %v7793_v35  ;;  %2287 = vmatpush1.msra.mxu1 %v7799_v22 }
 0x481   :  { %2217 = vmatprep.subr.mxu0 %v7805_v38  ;;  %2288 = vmatprep.subr.mxu1 %v7811_v40 }
 0x482   :  { %2218 = vmatpush1.msra.mxu0 %v7817_v41  ;;  %2289 = vmatpush1.msra.mxu1 %v7823_v43 }
 0x483   :  { %2219 = vmatprep.subr.mxu0 %v7829_v11  ;;  %2290 = vmatprep.subr.mxu1 %v7835_v36 }
 0x484   :  { %2220 = vmatpush1.msra.mxu0 %v7841_v13  ;;  %2291 = vmatpush1.msra.mxu1 %v7847_v14 }
 0x485   :  { %2221 = vmatprep.subr.mxu0 %v7853_v15  ;;  %2292 = vmatprep.subr.mxu1 %v7859_v16 }
 0x486   :  { %2222 = vmatpush1.msra.mxu0 %v7865_v17  ;;  %2293 = vmatpush1.msra.mxu1 %v7871_v18 }
 0x487   :  { %2223 = vmatprep.subr.mxu0 %v7877_v20  ;;  %2294 = vmatprep.subr.mxu1 %v7883_v21 }
 0x488   :  { %2224 = vmatpush1.msra.mxu0 %v7889_v28  ;;  %2295 = vmatpush1.msra.mxu1 %v7895_v12 }
 0x489   :  { %2225 = vmatprep.subr.mxu0 %v7901_v34  ;;  %2296 = vmatprep.subr.mxu1 %v7907_v44 }
 0x48a   :  { %2226 = vmatpush1.msra.mxu0 %v7913_v45  ;;  %2297 = vmatpush1.msra.mxu1 %v7919_v23 }
 0x48b   :  { %2227 = vmatprep.subr.mxu0 %v7925_v39  ;;  %2298 = vmatprep.subr.mxu1 %v7931_v26 }
 0x48c   :  { %2228 = vmatpush1.msra.mxu0 %v7937_v27  ;;  %2299 = vmatpush1.msra.mxu1 %v7943_v46 }
 0x48d   :  { %2229 = vmatprep.subr.mxu0 %v7949_v49  ;;  %2300 = vmatprep.subr.mxu1 %v7955_v51 }
 0x48e   :  { %2230 = vmatpush1.msra.mxu0 %v7961_v55  ;;  %2301 = vmatpush1.msra.mxu1 %v7967_v58 }
 0x48f   :  { %2231 = vmatprep.subr.mxu0 %v7973_v1  ;;  %2302 = vmatprep.subr.mxu1 %v7979_v9 }
 0x490   :  { %2232 = vmatpush1.msra.mxu0 %v7985_v50  ;;  %2303 = vmatpush1.msra.mxu1 %v7991_v63 }
 0x491   :  { %2233 = vmatprep.subr.mxu0 %v7997_v54  ;;  %2304 = vmatprep.subr.mxu1 %v8003_v0 }
 0x492   :  { %2234 = vmatpush1.msra.mxu0 %v8009_v60  ;;  %2305 = vmatpush1.msra.mxu1 %v8015_v62 }
 0x493   :  { %2235 = vmatprep.subr.mxu0 %v8021_v48  ;;  %2306 = vmatprep.subr.mxu1 %v8027_v42 }
 0x494   :  { %2236 = vmatpush1.msra.mxu0 %v8033_v52  ;;  %2307 = vmatpush1.msra.mxu1 %v8039_v56 }
 0x495   :  { %2237 = vmatprep.subr.mxu0 %v8045_v2  ;;  %2308 = vmatprep.subr.mxu1 %v8051_v53 }
 0x496   :  { %2238 = vmatpush1.msra.mxu0 %v8057_v3  ;;  %2309 = vmatpush1.msra.mxu1 %v8063_v4 }
 0x497   :  { %2239 = vmatprep.subr.mxu0 %v8069_v5  ;;  %2310 = vmatprep.subr.mxu1 %v8075_v6  ;;  %v8093_v5 = vld [vmem:[%s10272_s1 + $0x28] sm:$0xff]  ;;  %v8099_v6 = vld [vmem:[%s10272_s1 + $0x38] sm:$0xff] }
 0x498   :  { %2240 = vmatpush1.msra.mxu0 %v8081_v7  ;;  %2311 = vmatpush1.msra.mxu1 %v8087_v8  ;;  %11428 = vst [vmem:[#allocation21_spill] sm:$0xff] %v8093_v5  ;;  %11429 = vst [vmem:[#allocation14_spill] sm:$0xff] %v8099_v6  ;;  %v8105_v7 = vld [vmem:[%s10272_s1 + $0x20] sm:$0xff]  ;;  %v8111_v8 = vld [vmem:[%s10272_s1 + $0x30] sm:$0xff] }
 0x499   :  { %2241 = vmatprep.subr.mxu0 %v8093_v5  ;;  %2312 = vmatprep.subr.mxu1 %v8099_v6  ;;  %11430 = vst [vmem:[#allocation23_spill] sm:$0xff] %v8105_v7  ;;  %11431 = vst [vmem:[#allocation16_spill] sm:$0xff] %v8111_v8  ;;  %v8117_v5 = vld [vmem:[%s10272_s1 + $0x8] sm:$0xff]  ;;  %v8123_v6 = vld [vmem:[%s10272_s1 + $0x18] sm:$0xff] }
 0x49a   :  { %2242 = vmatpush1.msra.mxu0 %v8105_v7  ;;  %2313 = vmatpush1.msra.mxu1 %v8111_v8  ;;  %11432 = vst [vmem:[#allocation25_spill] sm:$0xff] %v8117_v5  ;;  %11433 = vst [vmem:[#allocation20_spill] sm:$0xff] %v8123_v6  ;;  %v8129_v7 = vld [vmem:[%s10272_s1] sm:$0xff] }
 0x49b   :  { %2243 = vmatprep.subr.mxu0 %v8117_v5  ;;  %2314 = vmatprep.subr.mxu1 %v8123_v6  ;;  %11434 = vst [vmem:[#allocation27_spill] sm:$0xff] %v8129_v7  ;;  %v8136_v5 = vld [vmem:[%s10272_s1 + $0x10] sm:$0xff]  ;;  %v8145_v6 = vld [vmem:[%s10273_s2 + $0x1e8] sm:$0xff] }
 0x49c   :  { %2244 = vmatpush1.msra.mxu0 %v8129_v7  ;;  %2277 = vmatprep.mubr.f32.mxu0 %v11003_v19  ;;  %11435 = vst [vmem:[#allocation22_spill] sm:$0xff] %v8136_v5  ;;  %11436 = vst [vmem:[#allocation28_spill] sm:$0xff] %v8145_v6  ;;  %v8151_v7 = vld [vmem:[%s10273_s2 + $0x1f8] sm:$0xff] }
 0x49d   :  { %2315 = vmatpush1.msra.mxu1 %v8136_v5  ;;  %2348 = vmatprep.mubr.f32.mxu1 %v11003_v19  ;;  %11437 = vst [vmem:[#allocation24_spill] sm:$0xff] %v8151_v7  ;;  %v8157_v5 = vld [vmem:[%s10273_s2 + $0x1e0] sm:$0xff] }
 0x49e   :  { %2278 = vmatmul.mubr.f32.vlgmr.msra.gmra.mxu0 %v7746_v10  ;;  %2349 = vmatmul.mubr.f32.vlgmr.msra.gmra.mxu1 %v7746_v10  ;;  %11438 = vst [vmem:[#allocation30_spill] sm:$0xff] %v8157_v5  ;;  %v8163_v10 = vld [vmem:[%s10273_s2 + $0x1f0] sm:$0xff] }
 0x49f   :  { %2355 = vmatprep.subr.mxu0 %v8145_v6  ;;  %2426 = vmatprep.subr.mxu1 %v8151_v7  ;;  %11439 = vst [vmem:[#allocation26_spill] sm:$0xff] %v8163_v10  ;;  %v8169_v6 = vld [vmem:[%s10273_s2 + $0x1c8] sm:$0xff]  ;;  %v8175_v7 = vld [vmem:[%s10273_s2 + $0x1d8] sm:$0xff] }
 0x4a0   :  { %2356 = vmatpush1.msra.mxu0 %v8157_v5  ;;  %2427 = vmatpush1.msra.mxu1 %v8163_v10  ;;  %11440 = vst [vmem:[#allocation32_spill] sm:$0xff] %v8169_v6  ;;  %11441 = vst [vmem:[#allocation29_spill] sm:$0xff] %v8175_v7  ;;  %v8181_v5 = vld [vmem:[%s10273_s2 + $0x1c0] sm:$0xff]  ;;  %v8187_v10 = vld [vmem:[%s10273_s2 + $0x1d0] sm:$0xff] }
 0x4a1   :  { %2357 = vmatprep.subr.mxu0 %v8169_v6  ;;  %2428 = vmatprep.subr.mxu1 %v8175_v7  ;;  %11442 = vst [vmem:[#allocation34_spill] sm:$0xff] %v8181_v5  ;;  %11443 = vst [vmem:[#allocation31_spill] sm:$0xff] %v8187_v10  ;;  %v8193_v6 = vld [vmem:[%s10273_s2 + $0x1a8] sm:$0xff]  ;;  %v8199_v7 = vld [vmem:[%s10273_s2 + $0x1b8] sm:$0xff] }
 0x4a2   :  { %2358 = vmatpush1.msra.mxu0 %v8181_v5  ;;  %2429 = vmatpush1.msra.mxu1 %v8187_v10  ;;  %11444 = vst [vmem:[#allocation36_spill] sm:$0xff] %v8193_v6  ;;  %11445 = vst [vmem:[#allocation33_spill] sm:$0xff] %v8199_v7  ;;  %v8205_v5 = vld [vmem:[%s10273_s2 + $0x1a0] sm:$0xff]  ;;  %v8211_v10 = vld [vmem:[%s10273_s2 + $0x1b0] sm:$0xff] }
 0x4a3   :  { %2359 = vmatprep.subr.mxu0 %v8193_v6  ;;  %2430 = vmatprep.subr.mxu1 %v8199_v7  ;;  %11446 = vst [vmem:[#allocation37_spill] sm:$0xff] %v8205_v5  ;;  %11447 = vst [vmem:[#allocation35_spill] sm:$0xff] %v8211_v10  ;;  %v8217_v6 = vld [vmem:[%s10273_s2 + $0x188] sm:$0xff]  ;;  %v8223_v7 = vld [vmem:[%s10273_s2 + $0x198] sm:$0xff] }
 0x4a4   :  { %2360 = vmatpush1.msra.mxu0 %v8205_v5  ;;  %2431 = vmatpush1.msra.mxu1 %v8211_v10  ;;  %11448 = vst [vmem:[#allocation38_spill] sm:$0xff] %v8217_v6  ;;  %11449 = vst [vmem:[#allocation39_spill] sm:$0xff] %v8223_v7  ;;  %v8229_v5 = vld [vmem:[%s10273_s2 + $0x180] sm:$0xff]  ;;  %v8235_v10 = vld [vmem:[%s10273_s2 + $0x190] sm:$0xff] }
 0x4a5   :  { %2361 = vmatprep.subr.mxu0 %v8217_v6  ;;  %2432 = vmatprep.subr.mxu1 %v8223_v7  ;;  %11450 = vst [vmem:[#allocation40_spill] sm:$0xff] %v8229_v5  ;;  %11451 = vst [vmem:[#allocation41_spill] sm:$0xff] %v8235_v10  ;;  %v8241_v6 = vld [vmem:[%s10273_s2 + $0x168] sm:$0xff]  ;;  %v8247_v7 = vld [vmem:[%s10273_s2 + $0x178] sm:$0xff] }
 0x4a6   :  { %2362 = vmatpush1.msra.mxu0 %v8229_v5  ;;  %2433 = vmatpush1.msra.mxu1 %v8235_v10  ;;  %11452 = vst [vmem:[#allocation42_spill] sm:$0xff] %v8241_v6  ;;  %11453 = vst [vmem:[#allocation43_spill] sm:$0xff] %v8247_v7  ;;  %v8253_v5 = vld [vmem:[%s10273_s2 + $0x160] sm:$0xff]  ;;  %v8259_v10 = vld [vmem:[%s10273_s2 + $0x170] sm:$0xff] }
 0x4a7   :  { %2363 = vmatprep.subr.mxu0 %v8241_v6  ;;  %2434 = vmatprep.subr.mxu1 %v8247_v7  ;;  %11454 = vst [vmem:[#allocation44_spill] sm:$0xff] %v8253_v5  ;;  %11455 = vst [vmem:[#allocation45_spill] sm:$0xff] %v8259_v10  ;;  %v8265_v6 = vld [vmem:[%s10273_s2 + $0x148] sm:$0xff]  ;;  %v8271_v7 = vld [vmem:[%s10273_s2 + $0x158] sm:$0xff] }
 0x4a8   :  { %2364 = vmatpush1.msra.mxu0 %v8253_v5  ;;  %2435 = vmatpush1.msra.mxu1 %v8259_v10  ;;  %11456 = vst [vmem:[#allocation46_spill] sm:$0xff] %v8265_v6  ;;  %11457 = vst [vmem:[#allocation47_spill] sm:$0xff] %v8271_v7  ;;  %v8277_v5 = vld [vmem:[%s10273_s2 + $0x140] sm:$0xff]  ;;  %v8283_v10 = vld [vmem:[%s10273_s2 + $0x150] sm:$0xff] }
 0x4a9   :  { %2365 = vmatprep.subr.mxu0 %v8265_v6  ;;  %2436 = vmatprep.subr.mxu1 %v8271_v7  ;;  %11458 = vst [vmem:[#allocation48_spill] sm:$0xff] %v8277_v5  ;;  %11459 = vst [vmem:[#allocation49_spill] sm:$0xff] %v8283_v10  ;;  %v8289_v6 = vld [vmem:[%s10273_s2 + $0x128] sm:$0xff]  ;;  %v8295_v7 = vld [vmem:[%s10273_s2 + $0x138] sm:$0xff] }
 0x4aa   :  { %2366 = vmatpush1.msra.mxu0 %v8277_v5  ;;  %2437 = vmatpush1.msra.mxu1 %v8283_v10  ;;  %11460 = vst [vmem:[#allocation50_spill] sm:$0xff] %v8289_v6  ;;  %11461 = vst [vmem:[#allocation51_spill] sm:$0xff] %v8295_v7  ;;  %v8301_v5 = vld [vmem:[%s10273_s2 + $0x120] sm:$0xff]  ;;  %v8307_v10 = vld [vmem:[%s10273_s2 + $0x130] sm:$0xff] }
 0x4ab   :  { %2367 = vmatprep.subr.mxu0 %v8289_v6  ;;  %2438 = vmatprep.subr.mxu1 %v8295_v7  ;;  %11462 = vst [vmem:[#allocation52_spill] sm:$0xff] %v8301_v5  ;;  %11463 = vst [vmem:[#allocation53_spill] sm:$0xff] %v8307_v10  ;;  %v8313_v6 = vld [vmem:[%s10273_s2 + $0x108] sm:$0xff]  ;;  %v8319_v7 = vld [vmem:[%s10273_s2 + $0x118] sm:$0xff] }
 0x4ac   :  { %2368 = vmatpush1.msra.mxu0 %v8301_v5  ;;  %2439 = vmatpush1.msra.mxu1 %v8307_v10  ;;  %11464 = vst [vmem:[#allocation54_spill] sm:$0xff] %v8313_v6  ;;  %11465 = vst [vmem:[#allocation55_spill] sm:$0xff] %v8319_v7  ;;  %v8325_v5 = vld [vmem:[%s10273_s2 + $0x100] sm:$0xff]  ;;  %v8331_v10 = vld [vmem:[%s10273_s2 + $0x110] sm:$0xff] }
 0x4ad   :  { %2369 = vmatprep.subr.mxu0 %v8313_v6  ;;  %2440 = vmatprep.subr.mxu1 %v8319_v7  ;;  %11466 = vst [vmem:[#allocation56_spill] sm:$0xff] %v8325_v5  ;;  %11467 = vst [vmem:[#allocation57_spill] sm:$0xff] %v8331_v10  ;;  %v8337_v6 = vld [vmem:[%s10273_s2 + $0xe8] sm:$0xff]  ;;  %v8343_v7 = vld [vmem:[%s10273_s2 + $0xf8] sm:$0xff] }
 0x4ae   :  { %2370 = vmatpush1.msra.mxu0 %v8325_v5  ;;  %2441 = vmatpush1.msra.mxu1 %v8331_v10  ;;  %11468 = vst [vmem:[#allocation58_spill] sm:$0xff] %v8337_v6  ;;  %11469 = vst [vmem:[#allocation59_spill] sm:$0xff] %v8343_v7  ;;  %v8349_v5 = vld [vmem:[%s10273_s2 + $0xe0] sm:$0xff]  ;;  %v8355_v10 = vld [vmem:[%s10273_s2 + $0xf0] sm:$0xff] }
 0x4af   :  { %2371 = vmatprep.subr.mxu0 %v8337_v6  ;;  %2442 = vmatprep.subr.mxu1 %v8343_v7  ;;  %11470 = vst [vmem:[#allocation60_spill] sm:$0xff] %v8349_v5  ;;  %11471 = vst [vmem:[#allocation61_spill] sm:$0xff] %v8355_v10  ;;  %v8361_v6 = vld [vmem:[%s10273_s2 + $0xc8] sm:$0xff]  ;;  %v8367_v7 = vld [vmem:[%s10273_s2 + $0xd8] sm:$0xff] }
 0x4b0   :  { %2372 = vmatpush1.msra.mxu0 %v8349_v5  ;;  %2443 = vmatpush1.msra.mxu1 %v8355_v10  ;;  %11472 = vst [vmem:[#allocation62_spill] sm:$0xff] %v8361_v6  ;;  %11473 = vst [vmem:[#allocation63_spill] sm:$0xff] %v8367_v7  ;;  %v8373_v5 = vld [vmem:[%s10273_s2 + $0xc0] sm:$0xff]  ;;  %v8379_v10 = vld [vmem:[%s10273_s2 + $0xd0] sm:$0xff] }
 0x4b1   :  { %2373 = vmatprep.subr.mxu0 %v8361_v6  ;;  %2444 = vmatprep.subr.mxu1 %v8367_v7  ;;  %11474 = vst [vmem:[#allocation64_spill] sm:$0xff] %v8373_v5  ;;  %11475 = vst [vmem:[#allocation65_spill] sm:$0xff] %v8379_v10  ;;  %v8385_v6 = vld [vmem:[%s10273_s2 + $0xa8] sm:$0xff]  ;;  %v8391_v7 = vld [vmem:[%s10273_s2 + $0xb8] sm:$0xff] }
 0x4b2   :  { %2374 = vmatpush1.msra.mxu0 %v8373_v5  ;;  %2445 = vmatpush1.msra.mxu1 %v8379_v10  ;;  %11476 = vst [vmem:[#allocation66_spill] sm:$0xff] %v8385_v6  ;;  %11477 = vst [vmem:[#allocation67_spill] sm:$0xff] %v8391_v7  ;;  %v8397_v5 = vld [vmem:[%s10273_s2 + $0xa0] sm:$0xff]  ;;  %v8403_v10 = vld [vmem:[%s10273_s2 + $0xb0] sm:$0xff] }
 0x4b3   :  { %2375 = vmatprep.subr.mxu0 %v8385_v6  ;;  %2446 = vmatprep.subr.mxu1 %v8391_v7  ;;  %11478 = vst [vmem:[#allocation68_spill] sm:$0xff] %v8397_v5  ;;  %11479 = vst [vmem:[#allocation69_spill] sm:$0xff] %v8403_v10  ;;  %v8409_v6 = vld [vmem:[%s10273_s2 + $0x88] sm:$0xff]  ;;  %v8415_v7 = vld [vmem:[%s10273_s2 + $0x98] sm:$0xff] }
 0x4b4   :  { %2376 = vmatpush1.msra.mxu0 %v8397_v5  ;;  %2447 = vmatpush1.msra.mxu1 %v8403_v10  ;;  %11480 = vst [vmem:[#allocation70_spill] sm:$0xff] %v8409_v6  ;;  %11481 = vst [vmem:[#allocation71_spill] sm:$0xff] %v8415_v7  ;;  %v8421_v5 = vld [vmem:[%s10273_s2 + $0x80] sm:$0xff]  ;;  %v8427_v10 = vld [vmem:[%s10273_s2 + $0x90] sm:$0xff] }
 0x4b5   :  { %2377 = vmatprep.subr.mxu0 %v8409_v6  ;;  %2448 = vmatprep.subr.mxu1 %v8415_v7  ;;  %11482 = vst [vmem:[#allocation72_spill] sm:$0xff] %v8421_v5  ;;  %11483 = vst [vmem:[#allocation73_spill] sm:$0xff] %v8427_v10  ;;  %v8433_v6 = vld [vmem:[%s10273_s2 + $0x68] sm:$0xff]  ;;  %v8439_v7 = vld [vmem:[%s10273_s2 + $0x78] sm:$0xff] }
 0x4b6   :  { %2378 = vmatpush1.msra.mxu0 %v8421_v5  ;;  %2449 = vmatpush1.msra.mxu1 %v8427_v10  ;;  %11484 = vst [vmem:[#allocation74_spill] sm:$0xff] %v8433_v6  ;;  %11485 = vst [vmem:[#allocation75_spill] sm:$0xff] %v8439_v7  ;;  %v8445_v5 = vld [vmem:[%s10273_s2 + $0x60] sm:$0xff]  ;;  %v8451_v10 = vld [vmem:[%s10273_s2 + $0x70] sm:$0xff] }
 0x4b7   :  { %2379 = vmatprep.subr.mxu0 %v8433_v6  ;;  %2450 = vmatprep.subr.mxu1 %v8439_v7  ;;  %11486 = vst [vmem:[#allocation76_spill] sm:$0xff] %v8445_v5  ;;  %11487 = vst [vmem:[#allocation77_spill] sm:$0xff] %v8451_v10  ;;  %v8457_v6 = vld [vmem:[%s10273_s2 + $0x48] sm:$0xff]  ;;  %v8463_v7 = vld [vmem:[%s10273_s2 + $0x58] sm:$0xff] }
 0x4b8   :  { %2380 = vmatpush1.msra.mxu0 %v8445_v5  ;;  %2451 = vmatpush1.msra.mxu1 %v8451_v10  ;;  %11488 = vst [vmem:[#allocation78_spill] sm:$0xff] %v8457_v6  ;;  %11489 = vst [vmem:[#allocation79_spill] sm:$0xff] %v8463_v7  ;;  %v8469_v5 = vld [vmem:[%s10273_s2 + $0x40] sm:$0xff]  ;;  %v8475_v10 = vld [vmem:[%s10273_s2 + $0x50] sm:$0xff] }
 0x4b9   :  { %2381 = vmatprep.subr.mxu0 %v8457_v6  ;;  %2452 = vmatprep.subr.mxu1 %v8463_v7  ;;  %11490 = vst [vmem:[#allocation80_spill] sm:$0xff] %v8469_v5  ;;  %11491 = vst [vmem:[#allocation81_spill] sm:$0xff] %v8475_v10  ;;  %v8481_v6 = vld [vmem:[%s10273_s2 + $0x28] sm:$0xff]  ;;  %v8487_v7 = vld [vmem:[%s10273_s2 + $0x38] sm:$0xff] }
 0x4ba   :  { %2382 = vmatpush1.msra.mxu0 %v8469_v5  ;;  %2453 = vmatpush1.msra.mxu1 %v8475_v10  ;;  %11492 = vst [vmem:[#allocation82_spill] sm:$0xff] %v8481_v6  ;;  %11493 = vst [vmem:[#allocation83_spill] sm:$0xff] %v8487_v7  ;;  %v8493_v5 = vld [vmem:[%s10273_s2 + $0x20] sm:$0xff]  ;;  %v8499_v10 = vld [vmem:[%s10273_s2 + $0x30] sm:$0xff] }
 0x4bb   :  { %2383 = vmatprep.subr.mxu0 %v8481_v6  ;;  %2454 = vmatprep.subr.mxu1 %v8487_v7  ;;  %11494 = vst [vmem:[#allocation84_spill] sm:$0xff] %v8493_v5  ;;  %11495 = vst [vmem:[#allocation85_spill] sm:$0xff] %v8499_v10  ;;  %v8505_v6 = vld [vmem:[%s10273_s2 + $0x8] sm:$0xff]  ;;  %v8511_v7 = vld [vmem:[%s10273_s2 + $0x18] sm:$0xff] }
 0x4bc   :  { %2384 = vmatpush1.msra.mxu0 %v8493_v5  ;;  %2455 = vmatpush1.msra.mxu1 %v8499_v10  ;;  %11496 = vst [vmem:[#allocation86_spill] sm:$0xff] %v8505_v6  ;;  %11497 = vst [vmem:[#allocation87_spill] sm:$0xff] %v8511_v7  ;;  %v8517_v5 = vld [vmem:[%s10273_s2] sm:$0xff]  ;;  %v8523_v10 = vld [vmem:[%s10273_s2 + $0x10] sm:$0xff] }
 0x4bd   :  { %2385 = vmatprep.subr.mxu0 %v8505_v6  ;;  %2456 = vmatprep.subr.mxu1 %v8511_v7  ;;  %11498 = vst [vmem:[#allocation88_spill] sm:$0xff] %v8517_v5  ;;  %11499 = vst [vmem:[#allocation89_spill] sm:$0xff] %v8523_v10  ;;  %v8528_v6 = vld [vmem:[#allocation3 + $0x1e8] sm:$0xff]  ;;  %v8531_v7 = vld [vmem:[#allocation3 + $0x1f8] sm:$0xff] }
 0x4be   :  { %2386 = vmatpush1.msra.mxu0 %v8517_v5  ;;  %2457 = vmatpush1.msra.mxu1 %v8523_v10  ;;  %11500 = vst [vmem:[#allocation90_spill] sm:$0xff] %v8528_v6  ;;  %11501 = vst [vmem:[#allocation91_spill] sm:$0xff] %v8531_v7 }
 0x4bf   :  { %2419 = vmatprep.mubr.f32.mxu0 %v11003_v19  ;;  %2490 = vmatprep.mubr.f32.mxu1 %v11003_v19 }
 0x4c0   :  { %2530 = vmatprep.subr.mxu0 %v8528_v6  ;;  %2601 = vmatprep.subr.mxu1 %v8531_v7 }
 0x51b   :  { %v1934_v5 = vpop.f32.mrf.mxu0  ;;  %v2005_v8 = vpop.f32.mrf.mxu1 }
 0x51d   :  { %v1936_v4 = vpop.f32.mrf.mxu0  ;;  %v2007_v53 = vpop.f32.mrf.mxu1 }
 0x53c   :  { %v2109_v3 = vpop.f32.mrf.mxu0  ;;  %v2180_v52 = vpop.f32.mrf.mxu1 }
 0x53d   :  { %v2110_v2 = vadd.f32 %v2109_v3, %v1934_v5  ;;  %v2181_v54 = vadd.f32 %v2180_v52, %v2005_v8 }
 0x53e   :  { %v2111_v56 = vpop.f32.mrf.mxu0  ;;  %v2182_v60 = vpop.f32.mrf.mxu1 }
 0x53f   :  { %v2185_v10 = vadd.f32 %v2110_v2, %v6431_v33  ;;  %v2112_v42 = vadd.f32 %v2111_v56, %v1936_v4  ;;  %v2183_v0 = vadd.f32 %v2182_v60, %v2007_v53  ;;  %v2187_v3 = vadd.f32 %v2181_v54, %v6440_v57 }
 0x541   :  { %v4300_v48 = vmul.f32 -1.442695, %v2185_v10  ;;  %v2186_v62 = vadd.f32 %v2112_v42, %v6433_v37  ;;  %v2188_v7 = vadd.f32 %v2183_v0, %v6437_v47  ;;  %v4304_v0 = vld [vmem:[%s10271_s0 + $0x88] sm:$0xff] }
 0x543   :  { %4513 = vpow2.f32 %v4300_v48  ;;  %v4301_v6 = vmul.f32 -1.442695, %v2186_v62  ;;  %v4302_v63 = vmul.f32 -1.442695, %v2188_v7  ;;  %v4303_v62 = vld [vmem:[%s10271_s0 + $0x80] sm:$0xff] }
 0x545   :  { %4515 = vpow2.f32 %v4301_v6 }
 0x546   :  { %4517 = vpow2.f32 %v4302_v63 }
 0x550   :  { %v4514_v50 = vpop.eup %4513 }
 0x551   :  { %v2192_v5 = vadd.f32 1.0, %v4514_v50 }
 0x552   :  { %v4516_v9 = vpop.eup %4515 }
 0x553   :  { %4519 = vrcp.f32 %v2192_v5  ;;  %v2198_v56 = vadd.f32 1.0, %v4516_v9  ;;  %v4518_v60 = vpop.eup %4517  ;;  %v4306_v5 = vld [vmem:[%s10271_s0 + $0x98] sm:$0xff] }
 0x554   :  { %4521 = vtanh.f32 %v2187_v3  ;;  %v2205_v9 = vadd.f32 1.0, %v4518_v60 }
 0x555   :  { %4523 = vrcp.f32 %v2198_v56 }
 0x55e   :  { %v2279_v48 = vpop.f32.mrf.mxu0  ;;  %v2350_v7 = vpop.f32.mrf.mxu1 }
 0x55f   :  { %v2502_v42 = vadd.f32 %v4303_v62, %v2279_v48  ;;  %v4305_v62 = vld [vmem:[%s10271_s0 + $0x90] sm:$0xff] }
 0x560   :  { %v4520_v52 = vpop.eup %4519  ;;  %v2281_v54 = vpop.f32.mrf.mxu0 }
 0x561   :  { %v4522_v50 = vpop.eup %4521  ;;  %v4307_v2 = vmul.f32 -1.442695, %v2502_v42  ;;  %v2503_v63 = vadd.f32 %v4304_v0, %v2281_v54  ;;  %v2352_v3 = vpop.f32.mrf.mxu1  ;;  %v2504_v0 = vadd.f32 %v4305_v62, %v2350_v7  ;;  %v8569_v7 = vld [vmem:[#allocation3 + $0x1d0] sm:$0xff]  ;;  %v8584_v62 = vld [vmem:[#allocation3 + $0x188] sm:$0xff] }
 0x562   :  { %v4524_v53 = vpop.eup %4523  ;;  %v2209_v4 = vmul.f32 %v4522_v50, %v4520_v52  ;;  %v2505_v56 = vadd.f32 %v4306_v5, %v2352_v3  ;;  %v8575_v3 = vld [vmem:[#allocation3 + $0x1b8] sm:$0xff]  ;;  %v8578_v5 = vld [vmem:[#allocation3 + $0x1a0] sm:$0xff]  ;;  %11504 = vst [vmem:[#allocation94_spill] sm:$0xff] %v8584_v62 }
 0x563   :  { %v2208_v6 = vmul.f32 %v4524_v53, %v7673_v59  ;;  %4525 = vpow2.f32 %v4307_v2  ;;  %v4308_v8 = vmul.f32 -1.442695, %v2503_v63  ;;  %v8554_v63 = vld [vmem:[#allocation3 + $0x1e0] sm:$0xff]  ;;  %v8557_v53 = vld [vmem:[#allocation3 + $0x1f0] sm:$0xff]  ;;  %11502 = vst [vmem:[#allocation92_spill] sm:$0xff] %v8578_v5 }
 0x564   :  { %v4309_v59 = vmul.f32 -1.442695, %v2505_v56  ;;  %v8581_v56 = vld [vmem:[#allocation3 + $0x1b0] sm:$0xff] }
 0x565   :  { %4527 = vpow2.f32 %v4308_v8  ;;  %v8545_v10 = vadd.f32 %v2209_v4, %v2208_v6  ;;  %v8563_v4 = vld [vmem:[#allocation3 + $0x1d8] sm:$0xff]  ;;  %v8566_v6 = vld [vmem:[#allocation3 + $0x1c0] sm:$0xff]  ;;  %v8572_v8 = vld [vmem:[#allocation3 + $0x1a8] sm:$0xff]  ;;  %11503 = vst [vmem:[#allocation93_spill] sm:$0xff] %v8581_v56 }
 0x566   :  { %4529 = vrcp.f32 %v2205_v9  ;;  %v8560_v9 = vld [vmem:[#allocation3 + $0x1c8] sm:$0xff] }
 0x567   :  { %4531 = vtanh.f32 %v8545_v10 }
 0x568   :  { %4533 = vpow2.f32 %v4309_v59  ;;  %v8587_v59 = vld [vmem:[#allocation3 + $0x198] sm:$0xff] }
 0x569   :  { %11505 = vst [vmem:[#allocation95_spill] sm:$0xff] %v8587_v59 }
 0x570   :  { %v4526_v48 = vpop.eup %4525 }
 0x571   :  { %v2509_v60 = vadd.f32 1.0, %v4526_v48  ;;  %v8590_v48 = vld [vmem:[#allocation3 + $0x180] sm:$0xff] }
 0x572   :  { %v4528_v42 = vpop.eup %4527  ;;  %11506 = vst [vmem:[#allocation96_spill] sm:$0xff] %v8590_v48 }
 0x573   :  { %v4530_v52 = vpop.eup %4529  ;;  %4535 = vrcp.f32 %v2509_v60  ;;  %v2515_v54 = vadd.f32 1.0, %v4528_v42  ;;  %v8596_v42 = vld [vmem:[#allocation3 + $0x168] sm:$0xff] }
 0x574   :  { %v4532_v50 = vpop.eup %4531  ;;  %4537 = vtanh.f32 %v2504_v0  ;;  %v8593_v0 = vld [vmem:[#allocation3 + $0x190] sm:$0xff]  ;;  %11508 = vst [vmem:[#allocation98_spill] sm:$0xff] %v8596_v42 }
 0x575   :  { %4539 = vrcp.f32 %v2515_v54  ;;  %v2212_v2 = vmul.f32 %v4532_v50, %v4530_v52  ;;  %11507 = vst [vmem:[#allocation97_spill] sm:$0xff] %v8593_v0  ;;  %v4534_v60 = vpop.eup %4533  ;;  %v8599_v52 = vld [vmem:[#allocation3 + $0x178] sm:$0xff]  ;;  %v8602_v50 = vld [vmem:[#allocation3 + $0x160] sm:$0xff] }
 0x576   :  { %11509 = vst [vmem:[#allocation99_spill] sm:$0xff] %v8599_v52  ;;  %11510 = vst [vmem:[#allocation100_spill] sm:$0xff] %v8602_v50 }
 0x577   :  { %2420 = vmatmul.mubr.f32.vlgmr.msra.gmra.mxu0 %v2212_v2  ;;  %2491 = vmatmul.mubr.f32.vlgmr.msra.gmra.mxu1 %v2212_v2  ;;  %v8605_v2 = vld [vmem:[#allocation3 + $0x170] sm:$0xff] }
 0x578   :  { %2531 = vmatpush1.msra.mxu0 %v8554_v63  ;;  %2602 = vmatpush1.msra.mxu1 %v8557_v53  ;;  %11511 = vst [vmem:[#allocation101_spill] sm:$0xff] %v8605_v2 }
 0x579   :  { %2532 = vmatprep.subr.mxu0 %v8560_v9  ;;  %2603 = vmatprep.subr.mxu1 %v8563_v4 }
 0x57a   :  { %2533 = vmatpush1.msra.mxu0 %v8566_v6  ;;  %2604 = vmatpush1.msra.mxu1 %v8569_v7 }
 0x57b   :  { %2534 = vmatprep.subr.mxu0 %v8572_v8  ;;  %2605 = vmatprep.subr.mxu1 %v8575_v3 }
 0x57c   :  { %2535 = vmatpush1.msra.mxu0 %v8578_v5  ;;  %2606 = vmatpush1.msra.mxu1 %v8581_v56  ;;  %v8621_v5 = vld [vmem:[#allocation3 + $0x128] sm:$0xff] }
 0x57d   :  { %2536 = vmatprep.subr.mxu0 %v8584_v62  ;;  %2607 = vmatprep.subr.mxu1 %v8587_v59  ;;  %v8611_v59 = vld [vmem:[#allocation3 + $0x158] sm:$0xff]  ;;  %v8614_v62 = vld [vmem:[#allocation3 + $0x140] sm:$0xff] }
 0x57e   :  { %2537 = vmatpush1.msra.mxu0 %v8590_v48  ;;  %2608 = vmatpush1.msra.mxu1 %v8593_v0  ;;  %v8608_v0 = vld [vmem:[#allocation3 + $0x148] sm:$0xff]  ;;  %11513 = vst [vmem:[#allocation103_spill] sm:$0xff] %v8614_v62 }
 0x57f   :  { %2538 = vmatprep.subr.mxu0 %v8596_v42  ;;  %2609 = vmatprep.subr.mxu1 %v8599_v52  ;;  %11512 = vst [vmem:[#allocation102_spill] sm:$0xff] %v8608_v0  ;;  %v2522_v52 = vadd.f32 1.0, %v4534_v60  ;;  %v8627_v60 = vld [vmem:[#allocation3 + $0x120] sm:$0xff] }
 0x580   :  { %v4536_v54 = vpop.eup %4535  ;;  %2539 = vmatpush1.msra.mxu0 %v8602_v50  ;;  %2610 = vmatpush1.msra.mxu1 %v8605_v2  ;;  %v8617_v50 = vld [vmem:[#allocation3 + $0x150] sm:$0xff] }
 0x581   :  { %v4538_v48 = vpop.eup %4537  ;;  %2540 = vmatprep.subr.mxu0 %v8608_v0  ;;  %2611 = vmatprep.subr.mxu1 %v8611_v59  ;;  %11514 = vst [vmem:[#allocation104_spill] sm:$0xff] %v8617_v50  ;;  %v8624_v0 = vld [vmem:[#allocation3 + $0x138] sm:$0xff]  ;;  %4541 = vrcp.f32 %v2522_v52  ;;  %v8657_v52 = vld [vmem:[#allocation3 + $0xf0] sm:$0xff] }
 0x582   :  { %v4540_v42 = vpop.eup %4539  ;;  %2541 = vmatpush1.msra.mxu0 %v8614_v62  ;;  %2612 = vmatpush1.msra.mxu1 %v8617_v50  ;;  %v2526_v2 = vmul.f32 %v4538_v48, %v4536_v54  ;;  %v8630_v62 = vld [vmem:[#allocation3 + $0x130] sm:$0xff]  ;;  %v8635_v48 = vld [vmem:[#allocation3 + $0x108] sm:$0xff]  ;;  %11523 = vst [vmem:[#allocation113_spill] sm:$0xff] %v8657_v52 }
 0x583   :  { %v2525_v56 = vmul.f32 %v4540_v42, %v7709_v61  ;;  %2542 = vmatprep.subr.mxu0 %v8621_v5  ;;  %2613 = vmatprep.subr.mxu1 %v8624_v0  ;;  %11515 = vst [vmem:[#allocation105_spill] sm:$0xff] %v8630_v62  ;;  %11516 = vst [vmem:[#allocation106_spill] sm:$0xff] %v8635_v48  ;;  %v8638_v61 = vld [vmem:[#allocation3 + $0x118] sm:$0xff]  ;;  %v8641_v42 = vld [vmem:[#allocation3 + $0x100] sm:$0xff] }
 0x584   :  { %2543 = vmatpush1.msra.mxu0 %v8627_v60  ;;  %2614 = vmatpush1.msra.mxu1 %v8630_v62  ;;  %11517 = vst [vmem:[#allocation107_spill] sm:$0xff] %v8638_v61  ;;  %11518 = vst [vmem:[#allocation108_spill] sm:$0xff] %v8641_v42  ;;  %v8644_v54 = vld [vmem:[#allocation3 + $0x110] sm:$0xff]  ;;  %v8647_v62 = vld [vmem:[#allocation3 + $0xe8] sm:$0xff] }
 0x585   :  { %v8633_v50 = vadd.f32 %v2526_v2, %v2525_v56  ;;  %2544 = vmatprep.subr.mxu0 %v8635_v48  ;;  %2615 = vmatprep.subr.mxu1 %v8638_v61  ;;  %11519 = vst [vmem:[#allocation109_spill] sm:$0xff] %v8644_v54  ;;  %11520 = vst [vmem:[#allocation110_spill] sm:$0xff] %v8647_v62  ;;  %v8650_v56 = vld [vmem:[#allocation3 + $0xf8] sm:$0xff]  ;;  %v8654_v2 = vld [vmem:[#allocation3 + $0xe0] sm:$0xff] }
 0x586   :  { %2545 = vmatpush1.msra.mxu0 %v8641_v42  ;;  %2616 = vmatpush1.msra.mxu1 %v8644_v54  ;;  %11521 = vst [vmem:[#allocation111_spill] sm:$0xff] %v8650_v56  ;;  %11522 = vst [vmem:[#allocation112_spill] sm:$0xff] %v8654_v2  ;;  %v8660_v42 = vld [vmem:[#allocation3 + $0xc8] sm:$0xff]  ;;  %v8663_v54 = vld [vmem:[#allocation3 + $0xd8] sm:$0xff] }
 0x587   :  { %2546 = vmatprep.subr.mxu0 %v8647_v62  ;;  %2617 = vmatprep.subr.mxu1 %v8650_v56  ;;  %4543 = vtanh.f32 %v8633_v50  ;;  %11524 = vst [vmem:[#allocation114_spill] sm:$0xff] %v8660_v42  ;;  %11525 = vst [vmem:[#allocation115_spill] sm:$0xff] %v8663_v54  ;;  %v8666_v62 = vld [vmem:[#allocation3 + $0xc0] sm:$0xff]  ;;  %v8669_v56 = vld [vmem:[#allocation3 + $0xd0] sm:$0xff] }
 0x588   :  { %2547 = vmatpush1.msra.mxu0 %v8654_v2  ;;  %2618 = vmatpush1.msra.mxu1 %v8657_v52  ;;  %11526 = vst [vmem:[#allocation116_spill] sm:$0xff] %v8666_v62  ;;  %11527 = vst [vmem:[#allocation117_spill] sm:$0xff] %v8669_v56  ;;  %v8672_v2 = vld [vmem:[#allocation3 + $0xa8] sm:$0xff]  ;;  %v8675_v52 = vld [vmem:[#allocation3 + $0xb8] sm:$0xff] }
 0x589   :  { %2548 = vmatprep.subr.mxu0 %v8660_v42  ;;  %2619 = vmatprep.subr.mxu1 %v8663_v54  ;;  %11528 = vst [vmem:[#allocation118_spill] sm:$0xff] %v8672_v2  ;;  %11529 = vst [vmem:[#allocation119_spill] sm:$0xff] %v8675_v52  ;;  %v8678_v42 = vld [vmem:[#allocation3 + $0xa0] sm:$0xff]  ;;  %v8681_v54 = vld [vmem:[#allocation3 + $0xb0] sm:$0xff] }
 0x58a   :  { %2549 = vmatpush1.msra.mxu0 %v8666_v62  ;;  %2620 = vmatpush1.msra.mxu1 %v8669_v56  ;;  %11530 = vst [vmem:[#allocation120_spill] sm:$0xff] %v8678_v42  ;;  %11531 = vst [vmem:[#allocation121_spill] sm:$0xff] %v8681_v54  ;;  %v8684_v62 = vld [vmem:[#allocation3 + $0x88] sm:$0xff]  ;;  %v8687_v56 = vld [vmem:[#allocation3 + $0x98] sm:$0xff] }
 0x58b   :  { %2550 = vmatprep.subr.mxu0 %v8672_v2  ;;  %2621 = vmatprep.subr.mxu1 %v8675_v52  ;;  %11532 = vst [vmem:[#allocation122_spill] sm:$0xff] %v8684_v62  ;;  %11533 = vst [vmem:[#allocation123_spill] sm:$0xff] %v8687_v56  ;;  %v8690_v2 = vld [vmem:[#allocation3 + $0x80] sm:$0xff]  ;;  %v8693_v52 = vld [vmem:[#allocation3 + $0x90] sm:$0xff] }
 0x58c   :  { %2551 = vmatpush1.msra.mxu0 %v8678_v42  ;;  %2622 = vmatpush1.msra.mxu1 %v8681_v54  ;;  %11534 = vst [vmem:[#allocation124_spill] sm:$0xff] %v8690_v2  ;;  %11535 = vst [vmem:[#allocation125_spill] sm:$0xff] %v8693_v52  ;;  %v8696_v42 = vld [vmem:[#allocation3 + $0x68] sm:$0xff]  ;;  %v8699_v54 = vld [vmem:[#allocation3 + $0x78] sm:$0xff] }
 0x58d   :  { %2552 = vmatprep.subr.mxu0 %v8684_v62  ;;  %2623 = vmatprep.subr.mxu1 %v8687_v56  ;;  %11536 = vst [vmem:[#allocation126_spill] sm:$0xff] %v8696_v42  ;;  %11537 = vst [vmem:[#allocation127_spill] sm:$0xff] %v8699_v54  ;;  %v8702_v62 = vld [vmem:[#allocation3 + $0x60] sm:$0xff]  ;;  %v8705_v56 = vld [vmem:[#allocation3 + $0x70] sm:$0xff] }
 0x58e   :  { %2553 = vmatpush1.msra.mxu0 %v8690_v2  ;;  %2624 = vmatpush1.msra.mxu1 %v8693_v52  ;;  %11538 = vst [vmem:[#allocation128_spill] sm:$0xff] %v8702_v62  ;;  %11539 = vst [vmem:[#allocation129_spill] sm:$0xff] %v8705_v56  ;;  %v8708_v2 = vld [vmem:[#allocation3 + $0x48] sm:$0xff]  ;;  %v8711_v52 = vld [vmem:[#allocation3 + $0x58] sm:$0xff] }
 0x58f   :  { %2554 = vmatprep.subr.mxu0 %v8696_v42  ;;  %2625 = vmatprep.subr.mxu1 %v8699_v54  ;;  %11540 = vst [vmem:[#allocation130_spill] sm:$0xff] %v8708_v2  ;;  %11541 = vst [vmem:[#allocation131_spill] sm:$0xff] %v8711_v52  ;;  %v8714_v42 = vld [vmem:[#allocation3 + $0x40] sm:$0xff]  ;;  %v8717_v54 = vld [vmem:[#allocation3 + $0x50] sm:$0xff] }
 0x590   :  { %2555 = vmatpush1.msra.mxu0 %v8702_v62  ;;  %2626 = vmatpush1.msra.mxu1 %v8705_v56  ;;  %11542 = vst [vmem:[#allocation132_spill] sm:$0xff] %v8714_v42  ;;  %11543 = vst [vmem:[#allocation133_spill] sm:$0xff] %v8717_v54  ;;  %v4542_v62 = vpop.eup %4541  ;;  %v8720_v61 = vld [vmem:[#allocation3 + $0x28] sm:$0xff]  ;;  %v8723_v56 = vld [vmem:[#allocation3 + $0x38] sm:$0xff] }
 0x591   :  { %2556 = vmatprep.subr.mxu0 %v8708_v2  ;;  %2627 = vmatprep.subr.mxu1 %v8711_v52  ;;  %11544 = vst [vmem:[#allocation134_spill] sm:$0xff] %v8720_v61  ;;  %11545 = vst [vmem:[#allocation135_spill] sm:$0xff] %v8723_v56  ;;  %v8726_v48 = vld [vmem:[#allocation3 + $0x20] sm:$0xff]  ;;  %v8729_v52 = vld [vmem:[#allocation3 + $0x30] sm:$0xff] }
 0x592   :  { %2557 = vmatpush1.msra.mxu0 %v8714_v42  ;;  %2628 = vmatpush1.msra.mxu1 %v8717_v54  ;;  %11546 = vst [vmem:[#allocation136_spill] sm:$0xff] %v8726_v48  ;;  %v8732_v42 = vld [vmem:[#allocation3 + $0x8] sm:$0xff]  ;;  %v8735_v54 = vld [vmem:[#allocation3 + $0x18] sm:$0xff] }
 0x593   :  { %2558 = vmatprep.subr.mxu0 %v8720_v61  ;;  %2629 = vmatprep.subr.mxu1 %v8723_v56  ;;  %v8740_v56 = vld [vmem:[#allocation3] sm:$0xff] }
 0x594   :  { %v4544_v2 = vpop.eup %4543  ;;  %2559 = vmatpush1.msra.mxu0 %v8726_v48  ;;  %2630 = vmatpush1.msra.mxu1 %v8729_v52  ;;  %v8744_v48 = vld [vmem:[#allocation3 + $0x10] sm:$0xff] }
 0x595   :  { %2560 = vmatprep.subr.mxu0 %v8732_v42  ;;  %2631 = vmatprep.subr.mxu1 %v8735_v54  ;;  %v8738_v61 = vmul.f32 %v4544_v2, %v4542_v62  ;;  %v11584_v62 = vld [vmem:[#allocation37_spill] sm:$0xff]  ;;  %v11586_v2 = vld [vmem:[#allocation38_spill] sm:$0xff] }
 0x596   :  { %2561 = vmatpush1.msra.mxu0 %v8740_v56  ;;  %2594 = vmatprep.mubr.f32.mxu0 %v11003_v19 }
 0x597   :  { %2632 = vmatpush1.msra.mxu1 %v8744_v48  ;;  %2665 = vmatprep.mubr.f32.mxu1 %v11003_v19 }
 0x598   :  { %2595 = vmatmul.mubr.f32.vlgmr.msra.gmra.mxu0 %v8738_v61  ;;  %2666 = vmatmul.mubr.f32.vlgmr.msra.gmra.mxu1 %v8738_v61 }
 0x599   :  { %2700 = vmatprep.subr.mxu0 %v7757_v30  ;;  %2771 = vmatprep.subr.mxu1 %v7763_v25  ;;  %v11547_v30 = vld [vmem:[#allocation144_spill] sm:$0xff]  ;;  %v11548_v25 = vld [vmem:[#allocation145_spill] sm:$0xff] }
 0x59a   :  { %2701 = vmatpush1.msra.mxu0 %v7769_v29  ;;  %2772 = vmatpush1.msra.mxu1 %v7775_v32  ;;  %v11549_v29 = vld [vmem:[#allocation146_spill] sm:$0xff]  ;;  %v11550_v32 = vld [vmem:[#allocation147_spill] sm:$0xff] }
 0x59b   :  { %2702 = vmatprep.subr.mxu0 %v7781_v31  ;;  %2773 = vmatprep.subr.mxu1 %v7787_v24  ;;  %v11551_v31 = vld [vmem:[#allocation148_spill] sm:$0xff]  ;;  %v11552_v24 = vld [vmem:[#allocation149_spill] sm:$0xff] }
 0x59c   :  { %2703 = vmatpush1.msra.mxu0 %v7793_v35  ;;  %2774 = vmatpush1.msra.mxu1 %v7799_v22  ;;  %v11553_v35 = vld [vmem:[#allocation150_spill] sm:$0xff]  ;;  %v11554_v22 = vld [vmem:[#allocation11_spill] sm:$0xff] }
 0x59d   :  { %2704 = vmatprep.subr.mxu0 %v7805_v38  ;;  %2775 = vmatprep.subr.mxu1 %v7811_v40  ;;  %v11555_v38 = vld [vmem:[#allocation6_spill] sm:$0xff]  ;;  %v11556_v40 = vld [vmem:[#allocation13_spill] sm:$0xff] }
 0x59e   :  { %2705 = vmatpush1.msra.mxu0 %v7817_v41  ;;  %2776 = vmatpush1.msra.mxu1 %v7823_v43  ;;  %v11557_v41 = vld [vmem:[#allocation7_spill] sm:$0xff] }
 0x59f   :  { %2706 = vmatprep.subr.mxu0 %v7829_v11  ;;  %2777 = vmatprep.subr.mxu1 %v7835_v36  ;;  %v11558_v43 = vld [vmem:[#allocation15_spill] sm:$0xff]  ;;  %v11559_v11 = vld [vmem:[#allocation8_spill] sm:$0xff]  ;;  %v11560_v36 = vld [vmem:[#allocation17_spill] sm:$0xff] }
 0x5a0   :  { %2707 = vmatpush1.msra.mxu0 %v7841_v13  ;;  %2778 = vmatpush1.msra.mxu1 %v7847_v14  ;;  %v11561_v13 = vld [vmem:[#allocation9_spill] sm:$0xff]  ;;  %v11562_v14 = vld [vmem:[#allocation18_spill] sm:$0xff] }
 0x5a1   :  { %2708 = vmatprep.subr.mxu0 %v7853_v15  ;;  %2779 = vmatprep.subr.mxu1 %v7859_v16  ;;  %v11563_v15 = vld [vmem:[#allocation10_spill] sm:$0xff]  ;;  %v11564_v16 = vld [vmem:[#allocation19_spill] sm:$0xff] }
 0x5a2   :  { %2709 = vmatpush1.msra.mxu0 %v7865_v17  ;;  %2780 = vmatpush1.msra.mxu1 %v7871_v18  ;;  %v11565_v17 = vld [vmem:[#allocation12_spill] sm:$0xff]  ;;  %v11566_v18 = vld [vmem:[#allocation21_spill] sm:$0xff] }
 0x5a3   :  { %2710 = vmatprep.subr.mxu0 %v7877_v20  ;;  %2781 = vmatprep.subr.mxu1 %v7883_v21  ;;  %v11567_v20 = vld [vmem:[#allocation14_spill] sm:$0xff]  ;;  %v11568_v21 = vld [vmem:[#allocation23_spill] sm:$0xff] }
 0x5a4   :  { %2711 = vmatpush1.msra.mxu0 %v7889_v28  ;;  %2782 = vmatpush1.msra.mxu1 %v7895_v12  ;;  %v11569_v28 = vld [vmem:[#allocation16_spill] sm:$0xff]  ;;  %v11570_v12 = vld [vmem:[#allocation25_spill] sm:$0xff] }
 0x5a5   :  { %2712 = vmatprep.subr.mxu0 %v7901_v34  ;;  %2783 = vmatprep.subr.mxu1 %v7907_v44  ;;  %v11571_v34 = vld [vmem:[#allocation20_spill] sm:$0xff]  ;;  %v11572_v44 = vld [vmem:[#allocation27_spill] sm:$0xff] }
 0x5a6   :  { %2713 = vmatpush1.msra.mxu0 %v7913_v45  ;;  %2784 = vmatpush1.msra.mxu1 %v7919_v23  ;;  %v11573_v45 = vld [vmem:[#allocation22_spill] sm:$0xff]  ;;  %v11574_v23 = vld [vmem:[#allocation28_spill] sm:$0xff] }
 0x5a7   :  { %2714 = vmatprep.subr.mxu0 %v7925_v39  ;;  %2785 = vmatprep.subr.mxu1 %v7931_v26  ;;  %v11575_v39 = vld [vmem:[#allocation24_spill] sm:$0xff]  ;;  %v11576_v26 = vld [vmem:[#allocation30_spill] sm:$0xff] }
 0x5a8   :  { %2715 = vmatpush1.msra.mxu0 %v7937_v27  ;;  %2786 = vmatpush1.msra.mxu1 %v7943_v46  ;;  %v11577_v27 = vld [vmem:[#allocation26_spill] sm:$0xff]  ;;  %v11578_v46 = vld [vmem:[#allocation32_spill] sm:$0xff] }
 0x5a9   :  { %2716 = vmatprep.subr.mxu0 %v7949_v49  ;;  %2787 = vmatprep.subr.mxu1 %v7955_v51  ;;  %v11579_v49 = vld [vmem:[#allocation29_spill] sm:$0xff]  ;;  %v11580_v51 = vld [vmem:[#allocation34_spill] sm:$0xff] }
 0x5aa   :  { %2717 = vmatpush1.msra.mxu0 %v7961_v55  ;;  %2788 = vmatpush1.msra.mxu1 %v7967_v58  ;;  %v11581_v55 = vld [vmem:[#allocation31_spill] sm:$0xff]  ;;  %v11582_v58 = vld [vmem:[#allocation36_spill] sm:$0xff] }
 0x5ab   :  { %2718 = vmatprep.subr.mxu0 %v7973_v1  ;;  %2789 = vmatprep.subr.mxu1 %v11547_v30  ;;  %v11583_v1 = vld [vmem:[#allocation33_spill] sm:$0xff]  ;;  %v11587_v30 = vld [vmem:[#allocation39_spill] sm:$0xff] }
 0x5ac   :  { %2719 = vmatpush1.msra.mxu0 %v11548_v25  ;;  %2790 = vmatpush1.msra.mxu1 %v11549_v29  ;;  %v11588_v25 = vld [vmem:[#allocation40_spill] sm:$0xff]  ;;  %v11589_v29 = vld [vmem:[#allocation41_spill] sm:$0xff] }
 0x5ad   :  { %2720 = vmatprep.subr.mxu0 %v11550_v32  ;;  %2791 = vmatprep.subr.mxu1 %v11551_v31  ;;  %v11590_v32 = vld [vmem:[#allocation42_spill] sm:$0xff]  ;;  %v11591_v31 = vld [vmem:[#allocation43_spill] sm:$0xff] }
 0x5ae   :  { %2721 = vmatpush1.msra.mxu0 %v11552_v24  ;;  %2792 = vmatpush1.msra.mxu1 %v11553_v35  ;;  %v11592_v24 = vld [vmem:[#allocation44_spill] sm:$0xff]  ;;  %v11593_v35 = vld [vmem:[#allocation45_spill] sm:$0xff] }
 0x5af   :  { %2722 = vmatprep.subr.mxu0 %v11554_v22  ;;  %2793 = vmatprep.subr.mxu1 %v11555_v38  ;;  %v11594_v22 = vld [vmem:[#allocation46_spill] sm:$0xff]  ;;  %v11595_v38 = vld [vmem:[#allocation47_spill] sm:$0xff] }
 0x5b0   :  { %2723 = vmatpush1.msra.mxu0 %v11556_v40  ;;  %2794 = vmatpush1.msra.mxu1 %v11557_v41  ;;  %v11596_v40 = vld [vmem:[#allocation48_spill] sm:$0xff]  ;;  %v11597_v41 = vld [vmem:[#allocation49_spill] sm:$0xff] }
 0x5b1   :  { %2724 = vmatprep.subr.mxu0 %v11558_v43  ;;  %2795 = vmatprep.subr.mxu1 %v11559_v11  ;;  %v11598_v43 = vld [vmem:[#allocation50_spill] sm:$0xff]  ;;  %v11599_v11 = vld [vmem:[#allocation51_spill] sm:$0xff] }
 0x5b2   :  { %2725 = vmatpush1.msra.mxu0 %v11560_v36  ;;  %2796 = vmatpush1.msra.mxu1 %v11561_v13  ;;  %v11600_v36 = vld [vmem:[#allocation52_spill] sm:$0xff]  ;;  %v11601_v13 = vld [vmem:[#allocation53_spill] sm:$0xff] }
 0x5b3   :  { %2726 = vmatprep.subr.mxu0 %v11562_v14  ;;  %2797 = vmatprep.subr.mxu1 %v11563_v15  ;;  %v11602_v14 = vld [vmem:[#allocation54_spill] sm:$0xff]  ;;  %v11603_v15 = vld [vmem:[#allocation55_spill] sm:$0xff] }
 0x5b4   :  { %2727 = vmatpush1.msra.mxu0 %v11564_v16  ;;  %2798 = vmatpush1.msra.mxu1 %v11565_v17  ;;  %v11604_v16 = vld [vmem:[#allocation56_spill] sm:$0xff]  ;;  %v11605_v17 = vld [vmem:[#allocation57_spill] sm:$0xff] }
 0x5b5   :  { %2728 = vmatprep.subr.mxu0 %v11566_v18  ;;  %2799 = vmatprep.subr.mxu1 %v11567_v20  ;;  %v11606_v18 = vld [vmem:[#allocation58_spill] sm:$0xff]  ;;  %v11607_v20 = vld [vmem:[#allocation59_spill] sm:$0xff] }
 0x5b6   :  { %2729 = vmatpush1.msra.mxu0 %v11568_v21  ;;  %2800 = vmatpush1.msra.mxu1 %v11569_v28  ;;  %v11608_v21 = vld [vmem:[#allocation60_spill] sm:$0xff]  ;;  %v11609_v28 = vld [vmem:[#allocation61_spill] sm:$0xff] }
 0x5b7   :  { %2730 = vmatprep.subr.mxu0 %v11570_v12  ;;  %2801 = vmatprep.subr.mxu1 %v11571_v34  ;;  %v11610_v12 = vld [vmem:[#allocation62_spill] sm:$0xff]  ;;  %v11611_v34 = vld [vmem:[#allocation63_spill] sm:$0xff] }
 0x5b8   :  { %2731 = vmatpush1.msra.mxu0 %v11572_v44  ;;  %2764 = vmatprep.mubr.f32.mxu0 %v11003_v19  ;;  %v11612_v44 = vld [vmem:[#allocation64_spill] sm:$0xff] }
 0x5b9   :  { %2802 = vmatpush1.msra.mxu1 %v11573_v45  ;;  %2835 = vmatprep.mubr.f32.mxu1 %v11003_v19  ;;  %v11613_v45 = vld [vmem:[#allocation65_spill] sm:$0xff] }
 0x5ba   :  { %2765 = vmatmul.mubr.f32.vlgmr.msra.gmra.mxu0 %v8738_v61  ;;  %2836 = vmatmul.mubr.f32.vlgmr.msra.gmra.mxu1 %v8738_v61  ;;  %v11585_v61 = vld [vmem:[#allocation35_spill] sm:$0xff] }
 0x5bb   :  { %2842 = vmatprep.subr.mxu0 %v11574_v23  ;;  %2913 = vmatprep.subr.mxu1 %v11575_v39  ;;  %v11614_v23 = vld [vmem:[#allocation66_spill] sm:$0xff]  ;;  %v11615_v39 = vld [vmem:[#allocation67_spill] sm:$0xff] }
 0x5bc   :  { %2843 = vmatpush1.msra.mxu0 %v11576_v26  ;;  %2914 = vmatpush1.msra.mxu1 %v11577_v27  ;;  %v11616_v26 = vld [vmem:[#allocation68_spill] sm:$0xff]  ;;  %v11617_v27 = vld [vmem:[#allocation69_spill] sm:$0xff] }
 0x5bd   :  { %2844 = vmatprep.subr.mxu0 %v11578_v46  ;;  %2915 = vmatprep.subr.mxu1 %v11579_v49  ;;  %v11618_v46 = vld [vmem:[#allocation70_spill] sm:$0xff]  ;;  %v11619_v49 = vld [vmem:[#allocation71_spill] sm:$0xff] }
 0x5be   :  { %2845 = vmatpush1.msra.mxu0 %v11580_v51  ;;  %2916 = vmatpush1.msra.mxu1 %v11581_v55  ;;  %v11620_v51 = vld [vmem:[#allocation72_spill] sm:$0xff]  ;;  %v11621_v55 = vld [vmem:[#allocation73_spill] sm:$0xff] }
 0x5bf   :  { %2846 = vmatprep.subr.mxu0 %v11582_v58  ;;  %2917 = vmatprep.subr.mxu1 %v11583_v1  ;;  %v11622_v58 = vld [vmem:[#allocation74_spill] sm:$0xff]  ;;  %v11623_v1 = vld [vmem:[#allocation75_spill] sm:$0xff] }
 0x5c0   :  { %2847 = vmatpush1.msra.mxu0 %v11584_v62  ;;  %2918 = vmatpush1.msra.mxu1 %v11585_v61  ;;  %v11624_v62 = vld [vmem:[#allocation76_spill] sm:$0xff]  ;;  %v11625_v61 = vld [vmem:[#allocation77_spill] sm:$0xff] }
 0x5c1   :  { %2848 = vmatprep.subr.mxu0 %v11586_v2  ;;  %2919 = vmatprep.subr.mxu1 %v11587_v30  ;;  %v11626_v2 = vld [vmem:[#allocation78_spill] sm:$0xff]  ;;  %v11627_v30 = vld [vmem:[#allocation79_spill] sm:$0xff] }
 0x5c2   :  { %2849 = vmatpush1.msra.mxu0 %v11588_v25  ;;  %2920 = vmatpush1.msra.mxu1 %v11589_v29  ;;  %v11628_v25 = vld [vmem:[#allocation80_spill] sm:$0xff]  ;;  %v11629_v29 = vld [vmem:[#allocation81_spill] sm:$0xff] }
 0x5c3   :  { %2850 = vmatprep.subr.mxu0 %v11590_v32  ;;  %2921 = vmatprep.subr.mxu1 %v11591_v31  ;;  %v11630_v32 = vld [vmem:[#allocation82_spill] sm:$0xff]  ;;  %v11631_v31 = vld [vmem:[#allocation83_spill] sm:$0xff] }
 0x5c4   :  { %2851 = vmatpush1.msra.mxu0 %v11592_v24  ;;  %2922 = vmatpush1.msra.mxu1 %v11593_v35  ;;  %v11632_v24 = vld [vmem:[#allocation84_spill] sm:$0xff]  ;;  %v11633_v35 = vld [vmem:[#allocation85_spill] sm:$0xff] }
 0x5c5   :  { %2852 = vmatprep.subr.mxu0 %v11594_v22  ;;  %2923 = vmatprep.subr.mxu1 %v11595_v38  ;;  %v11634_v22 = vld [vmem:[#allocation86_spill] sm:$0xff]  ;;  %v11635_v38 = vld [vmem:[#allocation87_spill] sm:$0xff] }
 0x5c6   :  { %2853 = vmatpush1.msra.mxu0 %v11596_v40  ;;  %2924 = vmatpush1.msra.mxu1 %v11597_v41  ;;  %v11636_v40 = vld [vmem:[#allocation88_spill] sm:$0xff]  ;;  %v11637_v41 = vld [vmem:[#allocation89_spill] sm:$0xff] }
 0x5c7   :  { %2854 = vmatprep.subr.mxu0 %v11598_v43  ;;  %2925 = vmatprep.subr.mxu1 %v11599_v11  ;;  %v11638_v43 = vld [vmem:[#allocation90_spill] sm:$0xff]  ;;  %v11639_v11 = vld [vmem:[#allocation91_spill] sm:$0xff] }
 0x5c8   :  { %2855 = vmatpush1.msra.mxu0 %v11600_v36  ;;  %2926 = vmatpush1.msra.mxu1 %v11601_v13 }
 0x5c9   :  { %2856 = vmatprep.subr.mxu0 %v11602_v14  ;;  %2927 = vmatprep.subr.mxu1 %v11603_v15 }
 0x5ca   :  { %2857 = vmatpush1.msra.mxu0 %v11604_v16  ;;  %2928 = vmatpush1.msra.mxu1 %v11605_v17 }
 0x5cb   :  { %2858 = vmatprep.subr.mxu0 %v11606_v18  ;;  %2929 = vmatprep.subr.mxu1 %v11607_v20 }
 0x5cc   :  { %2859 = vmatpush1.msra.mxu0 %v11608_v21  ;;  %2930 = vmatpush1.msra.mxu1 %v11609_v28 }
 0x5cd   :  { %2860 = vmatprep.subr.mxu0 %v11610_v12  ;;  %2931 = vmatprep.subr.mxu1 %v11611_v34 }
 0x5ce   :  { %2861 = vmatpush1.msra.mxu0 %v11612_v44  ;;  %2932 = vmatpush1.msra.mxu1 %v11613_v45 }
 0x5cf   :  { %2862 = vmatprep.subr.mxu0 %v11614_v23  ;;  %2933 = vmatprep.subr.mxu1 %v11615_v39 }
 0x5d0   :  { %2863 = vmatpush1.msra.mxu0 %v11616_v26  ;;  %2934 = vmatpush1.msra.mxu1 %v11617_v27 }
 0x5d1   :  { %2864 = vmatprep.subr.mxu0 %v11618_v46  ;;  %2935 = vmatprep.subr.mxu1 %v11619_v49 }
 0x5d2   :  { %2865 = vmatpush1.msra.mxu0 %v11620_v51  ;;  %2936 = vmatpush1.msra.mxu1 %v11621_v55 }
 0x5d3   :  { %2866 = vmatprep.subr.mxu0 %v11622_v58  ;;  %2937 = vmatprep.subr.mxu1 %v11623_v1  ;;  %v4313_v1 = vld [vmem:[%s10271_s0 + $0xa0] sm:$0xff] }
 0x5d4   :  { %2867 = vmatpush1.msra.mxu0 %v11624_v62  ;;  %2938 = vmatpush1.msra.mxu1 %v11625_v61  ;;  %v4314_v61 = vld [vmem:[%s10271_s0 + $0xa8] sm:$0xff] }
 0x5d5   :  { %2868 = vmatprep.subr.mxu0 %v11626_v2  ;;  %2939 = vmatprep.subr.mxu1 %v11627_v30 }
 0x5d6   :  { %2869 = vmatpush1.msra.mxu0 %v11628_v25  ;;  %2940 = vmatpush1.msra.mxu1 %v11629_v29 }
 0x5d7   :  { %2870 = vmatprep.subr.mxu0 %v11630_v32  ;;  %2941 = vmatprep.subr.mxu1 %v11631_v31 }
 0x5d8   :  { %2871 = vmatpush1.msra.mxu0 %v11632_v24  ;;  %2942 = vmatpush1.msra.mxu1 %v11633_v35 }
 0x5d9   :  { %2872 = vmatprep.subr.mxu0 %v11634_v22  ;;  %2943 = vmatprep.subr.mxu1 %v11635_v38 }
 0x5da   :  { %2873 = vmatpush1.msra.mxu0 %v11636_v40  ;;  %2944 = vmatpush1.msra.mxu1 %v11637_v41 }
 0x5db   :  { %2906 = vmatprep.mubr.f32.mxu0 %v11003_v19  ;;  %2977 = vmatprep.mubr.f32.mxu1 %v11003_v19 }
 0x5dc   :  { %3017 = vmatprep.subr.mxu0 %v11638_v43  ;;  %3088 = vmatprep.subr.mxu1 %v11639_v11 }
 0x637   :  { %v2421_v36 = vpop.f32.mrf.mxu0  ;;  %v2492_v13 = vpop.f32.mrf.mxu1 }
 0x639   :  { %v2423_v14 = vpop.f32.mrf.mxu0  ;;  %v2494_v16 = vpop.f32.mrf.mxu1 }
 0x658   :  { %v2596_v15 = vpop.f32.mrf.mxu0  ;;  %v2667_v21 = vpop.f32.mrf.mxu1 }
 0x659   :  { %v2597_v17 = vadd.f32 %v2596_v15, %v2421_v36  ;;  %v2668_v26 = vadd.f32 %v2667_v21, %v2492_v13  ;;  %v4316_v13 = vld [vmem:[%s10271_s0 + $0xb8] sm:$0xff]  ;;  %v4315_v15 = vld [vmem:[%s10271_s0 + $0xb0] sm:$0xff] }
 0x65a   :  { %v2598_v18 = vpop.f32.mrf.mxu0  ;;  %v2669_v45 = vpop.f32.mrf.mxu1 }
 0x65b   :  { %v2672_v20 = vadd.f32 %v2597_v17, %v6431_v33  ;;  %v2599_v28 = vadd.f32 %v2598_v18, %v2423_v14  ;;  %v2670_v23 = vadd.f32 %v2669_v45, %v2494_v16  ;;  %v2674_v49 = vadd.f32 %v2668_v26, %v6440_v57  ;;  %v11641_v45 = vld [vmem:[#allocation93_spill] sm:$0xff] }
 0x65d   :  { %v4310_v12 = vmul.f32 -1.442695, %v2672_v20  ;;  %v2673_v34 = vadd.f32 %v2599_v28, %v6433_v37  ;;  %v2675_v39 = vadd.f32 %v2670_v23, %v6437_v47  ;;  %v11642_v23 = vld [vmem:[#allocation94_spill] sm:$0xff] }
 0x65f   :  { %4545 = vpow2.f32 %v4310_v12  ;;  %v4311_v44 = vmul.f32 -1.442695, %v2673_v34  ;;  %v4312_v27 = vmul.f32 -1.442695, %v2675_v39  ;;  %v11648_v39 = vld [vmem:[#allocation100_spill] sm:$0xff] }
 0x661   :  { %4547 = vpow2.f32 %v4311_v44  ;;  %v11640_v44 = vld [vmem:[#allocation92_spill] sm:$0xff] }
 0x662   :  { %4549 = vpow2.f32 %v4312_v27  ;;  %v11650_v27 = vld [vmem:[#allocation102_spill] sm:$0xff] }
 0x66c   :  { %v4546_v46 = vpop.eup %4545 }
 0x66d   :  { %v2679_v51 = vadd.f32 1.0, %v4546_v46 }
 0x66e   :  { %v4548_v55 = vpop.eup %4547 }
 0x66f   :  { %4551 = vrcp.f32 %v2679_v51  ;;  %v2685_v58 = vadd.f32 1.0, %v4548_v55  ;;  %v4550_v2 = vpop.eup %4549  ;;  %v11651_v51 = vld [vmem:[#allocation103_spill] sm:$0xff]  ;;  %v11652_v55 = vld [vmem:[#allocation104_spill] sm:$0xff] }
 0x670   :  { %4553 = vtanh.f32 %v2674_v49  ;;  %v2692_v22 = vadd.f32 1.0, %v4550_v2  ;;  %v11655_v2 = vld [vmem:[#allocation107_spill] sm:$0xff] }
 0x671   :  { %4555 = vrcp.f32 %v2685_v58 }
 0x67a   :  { %v2766_v62 = vpop.f32.mrf.mxu0  ;;  %v2837_v41 = vpop.f32.mrf.mxu1 }
 0x67b   :  { %v2989_v30 = vadd.f32 %v4313_v1, %v2766_v62  ;;  %v2991_v17 = vadd.f32 %v4315_v15, %v2837_v41  ;;  %v11653_v62 = vld [vmem:[#allocation105_spill] sm:$0xff]  ;;  %v11670_v41 = vld [vmem:[#allocation122_spill] sm:$0xff]  ;;  %v11675_v15 = vld [vmem:[#allocation127_spill] sm:$0xff] }
 0x67c   :  { %v4552_v25 = vpop.eup %4551  ;;  %v2768_v29 = vpop.f32.mrf.mxu0 }
 0x67d   :  { %v4554_v32 = vpop.eup %4553  ;;  %v4317_v31 = vmul.f32 -1.442695, %v2989_v30  ;;  %v2990_v24 = vadd.f32 %v4314_v61, %v2768_v29  ;;  %v2839_v36 = vpop.f32.mrf.mxu1  ;;  %v11656_v30 = vld [vmem:[#allocation108_spill] sm:$0xff]  ;;  %v11662_v29 = vld [vmem:[#allocation114_spill] sm:$0xff] }
 0x67e   :  { %v4556_v35 = vpop.eup %4555  ;;  %v2696_v38 = vmul.f32 %v4554_v32, %v4552_v25  ;;  %v2992_v14 = vadd.f32 %v4316_v13, %v2839_v36  ;;  %v11657_v25 = vld [vmem:[#allocation109_spill] sm:$0xff]  ;;  %v11663_v32 = vld [vmem:[#allocation115_spill] sm:$0xff]  ;;  %v11672_v36 = vld [vmem:[#allocation124_spill] sm:$0xff] }
 0x67f   :  { %v2695_v40 = vmul.f32 %v4556_v35, %v8545_v10  ;;  %4557 = vpow2.f32 %v4317_v31  ;;  %v4318_v43 = vmul.f32 -1.442695, %v2990_v24  ;;  %v11664_v31 = vld [vmem:[#allocation116_spill] sm:$0xff]  ;;  %v11665_v24 = vld [vmem:[#allocation117_spill] sm:$0xff]  ;;  %v11666_v35 = vld [vmem:[#allocation118_spill] sm:$0xff] }
 0x680   :  { %v4319_v10 = vmul.f32 -1.442695, %v2992_v14  ;;  %v11673_v13 = vld [vmem:[#allocation125_spill] sm:$0xff]  ;;  %v11674_v14 = vld [vmem:[#allocation126_spill] sm:$0xff] }
 0x681   :  { %4559 = vpow2.f32 %v4318_v43  ;;  %v8897_v11 = vadd.f32 %v2696_v38, %v2695_v40  ;;  %v11668_v38 = vld [vmem:[#allocation120_spill] sm:$0xff]  ;;  %v11669_v40 = vld [vmem:[#allocation121_spill] sm:$0xff]  ;;  %v11671_v43 = vld [vmem:[#allocation123_spill] sm:$0xff] }
 0x682   :  { %4561 = vrcp.f32 %v2692_v22  ;;  %v11667_v22 = vld [vmem:[#allocation119_spill] sm:$0xff] }
 0x683   :  { %4563 = vtanh.f32 %v8897_v11 }
 0x684   :  { %4565 = vpow2.f32 %v4319_v10  ;;  %v11676_v10 = vld [vmem:[#allocation128_spill] sm:$0xff] }
 0x68c   :  { %v4558_v16 = vpop.eup %4557 }
 0x68d   :  { %v2996_v18 = vadd.f32 1.0, %v4558_v16  ;;  %v11677_v16 = vld [vmem:[#allocation129_spill] sm:$0xff] }
 0x68e   :  { %v4560_v20 = vpop.eup %4559 }
 0x68f   :  { %v4562_v21 = vpop.eup %4561  ;;  %4567 = vrcp.f32 %v2996_v18  ;;  %v3002_v28 = vadd.f32 1.0, %v4560_v20  ;;  %v11679_v18 = vld [vmem:[#allocation131_spill] sm:$0xff]  ;;  %v11680_v20 = vld [vmem:[#allocation132_spill] sm:$0xff] }
 0x690   :  { %v4564_v12 = vpop.eup %4563  ;;  %4569 = vtanh.f32 %v2991_v17  ;;  %v11678_v17 = vld [vmem:[#allocation130_spill] sm:$0xff] }
 0x691   :  { %4571 = vrcp.f32 %v3002_v28  ;;  %v2699_v34 = vmul.f32 %v4564_v12, %v4562_v21  ;;  %v11681_v21 = vld [vmem:[#allocation133_spill] sm:$0xff]  ;;  %v11682_v12 = vld [vmem:[#allocation134_spill] sm:$0xff] }
 0x693   :  { %2907 = vmatmul.mubr.f32.vlgmr.msra.gmra.mxu0 %v2699_v34  ;;  %2978 = vmatmul.mubr.f32.vlgmr.msra.gmra.mxu1 %v2699_v34  ;;  %v11683_v34 = vld [vmem:[#allocation135_spill] sm:$0xff] }
 0x694   :  { %3018 = vmatpush1.msra.mxu0 %v8554_v63  ;;  %3089 = vmatpush1.msra.mxu1 %v8557_v53  ;;  %v11643_v63 = vld [vmem:[#allocation95_spill] sm:$0xff]  ;;  %v11644_v53 = vld [vmem:[#allocation96_spill] sm:$0xff] }
 0x695   :  { %3019 = vmatprep.subr.mxu0 %v8560_v9  ;;  %3090 = vmatprep.subr.mxu1 %v8563_v4  ;;  %v11645_v9 = vld [vmem:[#allocation97_spill] sm:$0xff]  ;;  %v4566_v4 = vpop.eup %4565 }
 0x696   :  { %3020 = vmatpush1.msra.mxu0 %v8566_v6  ;;  %3091 = vmatpush1.msra.mxu1 %v8569_v7  ;;  %v11646_v6 = vld [vmem:[#allocation98_spill] sm:$0xff]  ;;  %v11647_v7 = vld [vmem:[#allocation99_spill] sm:$0xff]  ;;  %v3009_v49 = vadd.f32 1.0, %v4566_v4 }
 0x697   :  { %3021 = vmatprep.subr.mxu0 %v8572_v8  ;;  %3092 = vmatprep.subr.mxu1 %v8575_v3  ;;  %v11649_v3 = vld [vmem:[#allocation101_spill] sm:$0xff]  ;;  %v9029_v4 = vld [vmem:[%s10272_s1 + $0x1a8] sm:$0xff] }
 0x698   :  { %3022 = vmatpush1.msra.mxu0 %v11640_v44  ;;  %3093 = vmatpush1.msra.mxu1 %v11641_v45  ;;  %4573 = vrcp.f32 %v3009_v49  ;;  %v11684_v45 = vld [vmem:[#allocation136_spill] sm:$0xff]  ;;  %v9083_v49 = vld [vmem:[%s10272_s1 + $0x178] sm:$0xff] }
 0x699   :  { %3023 = vmatprep.subr.mxu0 %v11642_v23  ;;  %3094 = vmatprep.subr.mxu1 %v11643_v63  ;;  %v9011_v63 = vld [vmem:[%s10272_s1 + $0x1d8] sm:$0xff] }
 0x69a   :  { %3024 = vmatpush1.msra.mxu0 %v11644_v53  ;;  %3095 = vmatpush1.msra.mxu1 %v11645_v9  ;;  %v9017_v53 = vld [vmem:[%s10272_s1 + $0x1c0] sm:$0xff]  ;;  %v9023_v9 = vld [vmem:[%s10272_s1 + $0x1d0] sm:$0xff] }
 0x69b   :  { %3025 = vmatprep.subr.mxu0 %v11646_v6  ;;  %3096 = vmatprep.subr.mxu1 %v11647_v7  ;;  %v9035_v6 = vld [vmem:[%s10272_s1 + $0x1b8] sm:$0xff]  ;;  %v9041_v7 = vld [vmem:[%s10272_s1 + $0x1a0] sm:$0xff] }
 0x69c   :  { %v4568_v8 = vpop.eup %4567  ;;  %3026 = vmatpush1.msra.mxu0 %v11648_v39  ;;  %3097 = vmatpush1.msra.mxu1 %v11649_v3  ;;  %v9053_v39 = vld [vmem:[%s10272_s1 + $0x188] sm:$0xff]  ;;  %v9059_v3 = vld [vmem:[%s10272_s1 + $0x198] sm:$0xff] }
 0x69d   :  { %v4570_v26 = vpop.eup %4569  ;;  %3027 = vmatprep.subr.mxu0 %v11650_v27  ;;  %3098 = vmatprep.subr.mxu1 %v8611_v59  ;;  %v11654_v59 = vld [vmem:[#allocation106_spill] sm:$0xff]  ;;  %v9071_v27 = vld [vmem:[%s10272_s1 + $0x190] sm:$0xff] }
 0x69e   :  { %v4572_v46 = vpop.eup %4571  ;;  %3028 = vmatpush1.msra.mxu0 %v11651_v51  ;;  %3099 = vmatpush1.msra.mxu1 %v11652_v55  ;;  %v3013_v58 = vmul.f32 %v4570_v26, %v4568_v8  ;;  %v9047_v8 = vld [vmem:[%s10272_s1 + $0x1b0] sm:$0xff]  ;;  %v9065_v26 = vld [vmem:[%s10272_s1 + $0x180] sm:$0xff] }
 0x69f   :  { %v3012_v1 = vmul.f32 %v4572_v46, %v8633_v50  ;;  %3029 = vmatprep.subr.mxu0 %v8621_v5  ;;  %3100 = vmatprep.subr.mxu1 %v8624_v0  ;;  %v11658_v50 = vld [vmem:[#allocation110_spill] sm:$0xff]  ;;  %v11659_v5 = vld [vmem:[#allocation111_spill] sm:$0xff]  ;;  %v11660_v0 = vld [vmem:[#allocation112_spill] sm:$0xff] }
 0x6a0   :  { %3030 = vmatpush1.msra.mxu0 %v8627_v60  ;;  %3101 = vmatpush1.msra.mxu1 %v11653_v62  ;;  %v11661_v60 = vld [vmem:[#allocation113_spill] sm:$0xff]  ;;  %v9077_v46 = vld [vmem:[%s10272_s1 + $0x168] sm:$0xff]  ;;  %v9089_v51 = vld [vmem:[%s10272_s1 + $0x160] sm:$0xff] }
 0x6a1   :  { %v8933_v61 = vadd.f32 %v3013_v58, %v3012_v1  ;;  %3031 = vmatprep.subr.mxu0 %v11654_v59  ;;  %3102 = vmatprep.subr.mxu1 %v11655_v2  ;;  %v9095_v55 = vld [vmem:[%s10272_s1 + $0x170] sm:$0xff]  ;;  %v9101_v58 = vld [vmem:[%s10272_s1 + $0x148] sm:$0xff]  ;;  %v9107_v1 = vld [vmem:[%s10272_s1 + $0x158] sm:$0xff] }
 0x6a2   :  { %3032 = vmatpush1.msra.mxu0 %v11656_v30  ;;  %3103 = vmatpush1.msra.mxu1 %v11657_v25  ;;  %v9113_v62 = vld [vmem:[%s10272_s1 + $0x140] sm:$0xff]  ;;  %v9119_v59 = vld [vmem:[%s10272_s1 + $0x150] sm:$0xff]  ;;  %v9125_v2 = vld [vmem:[%s10272_s1 + $0x128] sm:$0xff] }
 0x6a3   :  { %3033 = vmatprep.subr.mxu0 %v11658_v50  ;;  %3104 = vmatprep.subr.mxu1 %v11659_v5  ;;  %4575 = vtanh.f32 %v8933_v61  ;;  %v9131_v30 = vld [vmem:[%s10272_s1 + $0x138] sm:$0xff]  ;;  %v9137_v25 = vld [vmem:[%s10272_s1 + $0x120] sm:$0xff]  ;;  %v9143_v50 = vld [vmem:[%s10272_s1 + $0x130] sm:$0xff] }
 0x6a4   :  { %3034 = vmatpush1.msra.mxu0 %v11660_v0  ;;  %3105 = vmatpush1.msra.mxu1 %v11661_v60  ;;  %v9149_v5 = vld [vmem:[%s10272_s1 + $0x108] sm:$0xff]  ;;  %v9155_v0 = vld [vmem:[%s10272_s1 + $0x118] sm:$0xff]  ;;  %v9161_v60 = vld [vmem:[%s10272_s1 + $0x100] sm:$0xff] }
 0x6a5   :  { %3035 = vmatprep.subr.mxu0 %v11662_v29  ;;  %3106 = vmatprep.subr.mxu1 %v11663_v32  ;;  %v4574_v28 = vpop.eup %4573  ;;  %v9167_v29 = vld [vmem:[%s10272_s1 + $0x110] sm:$0xff]  ;;  %v9173_v32 = vld [vmem:[%s10272_s1 + $0xe8] sm:$0xff] }
 0x6a6   :  { %3036 = vmatpush1.msra.mxu0 %v11664_v31  ;;  %3107 = vmatpush1.msra.mxu1 %v11665_v24  ;;  %v9179_v31 = vld [vmem:[%s10272_s1 + $0xf8] sm:$0xff]  ;;  %v9185_v24 = vld [vmem:[%s10272_s1 + $0xe0] sm:$0xff] }
 0x6a7   :  { %3037 = vmatprep.subr.mxu0 %v11666_v35  ;;  %3108 = vmatprep.subr.mxu1 %v11667_v22  ;;  %v9191_v35 = vld [vmem:[%s10272_s1 + $0xf0] sm:$0xff]  ;;  %v9197_v22 = vld [vmem:[%s10272_s1 + $0xc8] sm:$0xff] }
 0x6a8   :  { %3038 = vmatpush1.msra.mxu0 %v11668_v38  ;;  %3109 = vmatpush1.msra.mxu1 %v11669_v40  ;;  %v9203_v38 = vld [vmem:[%s10272_s1 + $0xd8] sm:$0xff]  ;;  %v9209_v40 = vld [vmem:[%s10272_s1 + $0xc0] sm:$0xff] }
 0x6a9   :  { %3039 = vmatprep.subr.mxu0 %v11670_v41  ;;  %3110 = vmatprep.subr.mxu1 %v11671_v43  ;;  %11685 = vst [vmem:[#allocation137_spill] sm:$0xff] %v9203_v38  ;;  %11686 = vst [vmem:[#allocation138_spill] sm:$0xff] %v9209_v40  ;;  %v9215_v41 = vld [vmem:[%s10272_s1 + $0xd0] sm:$0xff]  ;;  %v9221_v43 = vld [vmem:[%s10272_s1 + $0xa8] sm:$0xff] }
 0x6aa   :  { %3040 = vmatpush1.msra.mxu0 %v11672_v36  ;;  %3111 = vmatpush1.msra.mxu1 %v11673_v13  ;;  %11687 = vst [vmem:[#allocation139_spill] sm:$0xff] %v9215_v41  ;;  %11688 = vst [vmem:[#allocation140_spill] sm:$0xff] %v9221_v43  ;;  %v9227_v36 = vld [vmem:[%s10272_s1 + $0xb8] sm:$0xff]  ;;  %v9233_v13 = vld [vmem:[%s10272_s1 + $0xa0] sm:$0xff] }
 0x6ab   :  { %3041 = vmatprep.subr.mxu0 %v11674_v14  ;;  %3112 = vmatprep.subr.mxu1 %v11675_v15  ;;  %11689 = vst [vmem:[#allocation141_spill] sm:$0xff] %v9227_v36  ;;  %11690 = vst [vmem:[#allocation142_spill] sm:$0xff] %v9233_v13  ;;  %v9239_v14 = vld [vmem:[%s10272_s1 + $0xb0] sm:$0xff]  ;;  %v9245_v15 = vld [vmem:[%s10272_s1 + $0x88] sm:$0xff] }
 0x6ac   :  { %3042 = vmatpush1.msra.mxu0 %v11676_v10  ;;  %3113 = vmatpush1.msra.mxu1 %v11677_v16  ;;  %11691 = vst [vmem:[#allocation143_spill] sm:$0xff] %v9239_v14  ;;  %11692 = vst [vmem:[#allocation144_spill] sm:$0xff] %v9245_v15  ;;  %v9251_v10 = vld [vmem:[%s10272_s1 + $0x98] sm:$0xff]  ;;  %v9257_v16 = vld [vmem:[%s10272_s1 + $0x80] sm:$0xff] }
 0x6ad   :  { %3043 = vmatprep.subr.mxu0 %v11678_v17  ;;  %3114 = vmatprep.subr.mxu1 %v11679_v18  ;;  %11693 = vst [vmem:[#allocation145_spill] sm:$0xff] %v9251_v10  ;;  %11694 = vst [vmem:[#allocation146_spill] sm:$0xff] %v9257_v16  ;;  %v9263_v17 = vld [vmem:[%s10272_s1 + $0x90] sm:$0xff]  ;;  %v9269_v18 = vld [vmem:[%s10272_s1 + $0x68] sm:$0xff] }
 0x6ae   :  { %3044 = vmatpush1.msra.mxu0 %v11680_v20  ;;  %3115 = vmatpush1.msra.mxu1 %v11681_v21  ;;  %11695 = vst [vmem:[#allocation147_spill] sm:$0xff] %v9263_v17  ;;  %11696 = vst [vmem:[#allocation148_spill] sm:$0xff] %v9269_v18  ;;  %v9275_v20 = vld [vmem:[%s10272_s1 + $0x78] sm:$0xff]  ;;  %v9281_v21 = vld [vmem:[%s10272_s1 + $0x60] sm:$0xff] }
 0x6af   :  { %3045 = vmatprep.subr.mxu0 %v11682_v12  ;;  %3116 = vmatprep.subr.mxu1 %v11683_v34  ;;  %11697 = vst [vmem:[#allocation149_spill] sm:$0xff] %v9275_v20  ;;  %11698 = vst [vmem:[#allocation150_spill] sm:$0xff] %v9281_v21  ;;  %v9293_v12 = vld [vmem:[%s10272_s1 + $0x48] sm:$0xff]  ;;  %v9299_v34 = vld [vmem:[%s10272_s1 + $0x58] sm:$0xff] }
 0x6b0   :  { %v4576_v44 = vpop.eup %4575  ;;  %3046 = vmatpush1.msra.mxu0 %v11684_v45  ;;  %3117 = vmatpush1.msra.mxu1 %v8729_v52  ;;  %v9005_v52 = vld [vmem:[%s10272_s1 + $0x1c8] sm:$0xff]  ;;  %11700 = vst [vmem:[#allocation6_spill] sm:$0xff] %v9293_v12  ;;  %11701 = vst [vmem:[#allocation13_spill] sm:$0xff] %v9299_v34  ;;  %v9311_v45 = vld [vmem:[%s10272_s1 + $0x50] sm:$0xff] }
 0x6b1   :  { %3047 = vmatprep.subr.mxu0 %v8732_v42  ;;  %3118 = vmatprep.subr.mxu1 %v8735_v54  ;;  %v8970_v23 = vmul.f32 %v4576_v44, %v4574_v28  ;;  %v8981_v42 = vld [vmem:[%s10272_s1 + $0x1e8] sm:$0xff]  ;;  %v8987_v54 = vld [vmem:[%s10272_s1 + $0x1f8] sm:$0xff]  ;;  %v9287_v28 = vld [vmem:[%s10272_s1 + $0x70] sm:$0xff]  ;;  %11703 = vst [vmem:[#allocation15_spill] sm:$0xff] %v9311_v45 }
 0x6b2   :  { %3048 = vmatpush1.msra.mxu0 %v8740_v56  ;;  %3081 = vmatprep.mubr.f32.mxu0 %v11003_v19  ;;  %v8999_v56 = vld [vmem:[%s10272_s1 + $0x1f0] sm:$0xff]  ;;  %11699 = vst [vmem:[#allocation11_spill] sm:$0xff] %v9287_v28  ;;  %v9305_v44 = vld [vmem:[%s10272_s1 + $0x40] sm:$0xff] }
 0x6b3   :  { %3119 = vmatpush1.msra.mxu1 %v8744_v48  ;;  %3152 = vmatprep.mubr.f32.mxu1 %v11003_v19  ;;  %v8993_v48 = vld [vmem:[%s10272_s1 + $0x1e0] sm:$0xff]  ;;  %11702 = vst [vmem:[#allocation7_spill] sm:$0xff] %v9305_v44 }
 0x6b4   :  { %3082 = vmatmul.mubr.f32.vlgmr.msra.gmra.mxu0 %v8970_v23  ;;  %3153 = vmatmul.mubr.f32.vlgmr.msra.gmra.mxu1 %v8970_v23 }
 0x6b5   :  { %3187 = vmatprep.subr.mxu0 %v8981_v42  ;;  %3258 = vmatprep.subr.mxu1 %v8987_v54 }
 0x6b6   :  { %3188 = vmatpush1.msra.mxu0 %v8993_v48  ;;  %3259 = vmatpush1.msra.mxu1 %v8999_v56 }
 0x6b7   :  { %3189 = vmatprep.subr.mxu0 %v9005_v52  ;;  %3260 = vmatprep.subr.mxu1 %v9011_v63 }
 0x6b8   :  { %3190 = vmatpush1.msra.mxu0 %v9017_v53  ;;  %3261 = vmatpush1.msra.mxu1 %v9023_v9 }
 0x6b9   :  { %3191 = vmatprep.subr.mxu0 %v9029_v4  ;;  %3262 = vmatprep.subr.mxu1 %v9035_v6 }
 0x6ba   :  { %3192 = vmatpush1.msra.mxu0 %v9041_v7  ;;  %3263 = vmatpush1.msra.mxu1 %v9047_v8 }
 0x6bb   :  { %3193 = vmatprep.subr.mxu0 %v9053_v39  ;;  %3264 = vmatprep.subr.mxu1 %v9059_v3 }
 0x6bc   :  { %3194 = vmatpush1.msra.mxu0 %v9065_v26  ;;  %3265 = vmatpush1.msra.mxu1 %v9071_v27 }
 0x6bd   :  { %3195 = vmatprep.subr.mxu0 %v9077_v46  ;;  %3266 = vmatprep.subr.mxu1 %v9083_v49 }
 0x6be   :  { %3196 = vmatpush1.msra.mxu0 %v9089_v51  ;;  %3267 = vmatpush1.msra.mxu1 %v9095_v55 }
 0x6bf   :  { %3197 = vmatprep.subr.mxu0 %v9101_v58  ;;  %3268 = vmatprep.subr.mxu1 %v9107_v1 }
 0x6c0   :  { %3198 = vmatpush1.msra.mxu0 %v9113_v62  ;;  %3269 = vmatpush1.msra.mxu1 %v9119_v59 }
 0x6c1   :  { %3199 = vmatprep.subr.mxu0 %v9125_v2  ;;  %3270 = vmatprep.subr.mxu1 %v9131_v30 }
 0x6c2   :  { %3200 = vmatpush1.msra.mxu0 %v9137_v25  ;;  %3271 = vmatpush1.msra.mxu1 %v9143_v50 }
 0x6c3   :  { %3201 = vmatprep.subr.mxu0 %v9149_v5  ;;  %3272 = vmatprep.subr.mxu1 %v9155_v0 }
 0x6c4   :  { %3202 = vmatpush1.msra.mxu0 %v9161_v60  ;;  %3273 = vmatpush1.msra.mxu1 %v9167_v29 }
 0x6c5   :  { %3203 = vmatprep.subr.mxu0 %v9173_v32  ;;  %3274 = vmatprep.subr.mxu1 %v9179_v31 }
 0x6c6   :  { %3204 = vmatpush1.msra.mxu0 %v9185_v24  ;;  %3275 = vmatpush1.msra.mxu1 %v9191_v35 }
 0x6c7   :  { %3205 = vmatprep.subr.mxu0 %v9197_v22  ;;  %3276 = vmatprep.subr.mxu1 %v9203_v38 }
 0x6c8   :  { %3206 = vmatpush1.msra.mxu0 %v9209_v40  ;;  %3277 = vmatpush1.msra.mxu1 %v9215_v41 }
 0x6c9   :  { %3207 = vmatprep.subr.mxu0 %v9221_v43  ;;  %3278 = vmatprep.subr.mxu1 %v9227_v36 }
 0x6ca   :  { %3208 = vmatpush1.msra.mxu0 %v9233_v13  ;;  %3279 = vmatpush1.msra.mxu1 %v9239_v14 }
 0x6cb   :  { %3209 = vmatprep.subr.mxu0 %v9245_v15  ;;  %3280 = vmatprep.subr.mxu1 %v9251_v10 }
 0x6cc   :  { %3210 = vmatpush1.msra.mxu0 %v9257_v16  ;;  %3281 = vmatpush1.msra.mxu1 %v9263_v17 }
 0x6cd   :  { %3211 = vmatprep.subr.mxu0 %v9269_v18  ;;  %3282 = vmatprep.subr.mxu1 %v9275_v20 }
 0x6ce   :  { %3212 = vmatpush1.msra.mxu0 %v9281_v21  ;;  %3283 = vmatpush1.msra.mxu1 %v9287_v28 }
 0x6cf   :  { %3213 = vmatprep.subr.mxu0 %v9293_v12  ;;  %3284 = vmatprep.subr.mxu1 %v9299_v34  ;;  %v9317_v12 = vld [vmem:[%s10272_s1 + $0x28] sm:$0xff]  ;;  %v9323_v34 = vld [vmem:[%s10272_s1 + $0x38] sm:$0xff] }
 0x6d0   :  { %3214 = vmatpush1.msra.mxu0 %v9305_v44  ;;  %3285 = vmatpush1.msra.mxu1 %v9311_v45  ;;  %11704 = vst [vmem:[#allocation8_spill] sm:$0xff] %v9317_v12  ;;  %11705 = vst [vmem:[#allocation17_spill] sm:$0xff] %v9323_v34  ;;  %v9329_v44 = vld [vmem:[%s10272_s1 + $0x20] sm:$0xff]  ;;  %v9335_v45 = vld [vmem:[%s10272_s1 + $0x30] sm:$0xff] }
 0x6d1   :  { %3215 = vmatprep.subr.mxu0 %v9317_v12  ;;  %3286 = vmatprep.subr.mxu1 %v9323_v34  ;;  %11706 = vst [vmem:[#allocation9_spill] sm:$0xff] %v9329_v44  ;;  %11707 = vst [vmem:[#allocation18_spill] sm:$0xff] %v9335_v45  ;;  %v9341_v12 = vld [vmem:[%s10272_s1 + $0x8] sm:$0xff]  ;;  %v9347_v34 = vld [vmem:[%s10272_s1 + $0x18] sm:$0xff] }
 0x6d2   :  { %3216 = vmatpush1.msra.mxu0 %v9329_v44  ;;  %3287 = vmatpush1.msra.mxu1 %v9335_v45  ;;  %11708 = vst [vmem:[#allocation10_spill] sm:$0xff] %v9341_v12  ;;  %11709 = vst [vmem:[#allocation19_spill] sm:$0xff] %v9347_v34  ;;  %v9353_v44 = vld [vmem:[%s10272_s1] sm:$0xff] }
 0x6d3   :  { %3217 = vmatprep.subr.mxu0 %v9341_v12  ;;  %3288 = vmatprep.subr.mxu1 %v9347_v34  ;;  %11710 = vst [vmem:[#allocation12_spill] sm:$0xff] %v9353_v44  ;;  %v9360_v12 = vld [vmem:[%s10272_s1 + $0x10] sm:$0xff]  ;;  %v9369_v34 = vld [vmem:[%s10273_s2 + $0x1e8] sm:$0xff] }
 0x6d4   :  { %3218 = vmatpush1.msra.mxu0 %v9353_v44  ;;  %3251 = vmatprep.mubr.f32.mxu0 %v11003_v19  ;;  %11711 = vst [vmem:[#allocation21_spill] sm:$0xff] %v9360_v12  ;;  %11712 = vst [vmem:[#allocation14_spill] sm:$0xff] %v9369_v34  ;;  %v9375_v44 = vld [vmem:[%s10273_s2 + $0x1f8] sm:$0xff] }
 0x6d5   :  { %3289 = vmatpush1.msra.mxu1 %v9360_v12  ;;  %3322 = vmatprep.mubr.f32.mxu1 %v11003_v19  ;;  %11713 = vst [vmem:[#allocation23_spill] sm:$0xff] %v9375_v44  ;;  %v9381_v12 = vld [vmem:[%s10273_s2 + $0x1e0] sm:$0xff] }
 0x6d6   :  { %3252 = vmatmul.mubr.f32.vlgmr.msra.gmra.mxu0 %v8970_v23  ;;  %3323 = vmatmul.mubr.f32.vlgmr.msra.gmra.mxu1 %v8970_v23  ;;  %11714 = vst [vmem:[#allocation16_spill] sm:$0xff] %v9381_v12  ;;  %v9387_v23 = vld [vmem:[%s10273_s2 + $0x1f0] sm:$0xff] }
 0x6d7   :  { %3329 = vmatprep.subr.mxu0 %v9369_v34  ;;  %3400 = vmatprep.subr.mxu1 %v9375_v44  ;;  %11715 = vst [vmem:[#allocation25_spill] sm:$0xff] %v9387_v23  ;;  %v9393_v34 = vld [vmem:[%s10273_s2 + $0x1c8] sm:$0xff]  ;;  %v9399_v44 = vld [vmem:[%s10273_s2 + $0x1d8] sm:$0xff] }
 0x6d8   :  { %3330 = vmatpush1.msra.mxu0 %v9381_v12  ;;  %3401 = vmatpush1.msra.mxu1 %v9387_v23  ;;  %11716 = vst [vmem:[#allocation20_spill] sm:$0xff] %v9393_v34  ;;  %11717 = vst [vmem:[#allocation27_spill] sm:$0xff] %v9399_v44  ;;  %v9405_v12 = vld [vmem:[%s10273_s2 + $0x1c0] sm:$0xff]  ;;  %v9411_v23 = vld [vmem:[%s10273_s2 + $0x1d0] sm:$0xff] }
 0x6d9   :  { %3331 = vmatprep.subr.mxu0 %v9393_v34  ;;  %3402 = vmatprep.subr.mxu1 %v9399_v44  ;;  %11718 = vst [vmem:[#allocation22_spill] sm:$0xff] %v9405_v12  ;;  %11719 = vst [vmem:[#allocation28_spill] sm:$0xff] %v9411_v23  ;;  %v9417_v34 = vld [vmem:[%s10273_s2 + $0x1a8] sm:$0xff]  ;;  %v9423_v44 = vld [vmem:[%s10273_s2 + $0x1b8] sm:$0xff] }
 0x6da   :  { %3332 = vmatpush1.msra.mxu0 %v9405_v12  ;;  %3403 = vmatpush1.msra.mxu1 %v9411_v23  ;;  %11720 = vst [vmem:[#allocation24_spill] sm:$0xff] %v9417_v34  ;;  %11721 = vst [vmem:[#allocation30_spill] sm:$0xff] %v9423_v44  ;;  %v9429_v12 = vld [vmem:[%s10273_s2 + $0x1a0] sm:$0xff]  ;;  %v9435_v23 = vld [vmem:[%s10273_s2 + $0x1b0] sm:$0xff] }
 0x6db   :  { %3333 = vmatprep.subr.mxu0 %v9417_v34  ;;  %3404 = vmatprep.subr.mxu1 %v9423_v44  ;;  %11722 = vst [vmem:[#allocation26_spill] sm:$0xff] %v9429_v12  ;;  %11723 = vst [vmem:[#allocation32_spill] sm:$0xff] %v9435_v23  ;;  %v9441_v34 = vld [vmem:[%s10273_s2 + $0x188] sm:$0xff]  ;;  %v9447_v44 = vld [vmem:[%s10273_s2 + $0x198] sm:$0xff] }
 0x6dc   :  { %3334 = vmatpush1.msra.mxu0 %v9429_v12  ;;  %3405 = vmatpush1.msra.mxu1 %v9435_v23  ;;  %11724 = vst [vmem:[#allocation29_spill] sm:$0xff] %v9441_v34  ;;  %11725 = vst [vmem:[#allocation34_spill] sm:$0xff] %v9447_v44  ;;  %v9453_v12 = vld [vmem:[%s10273_s2 + $0x180] sm:$0xff]  ;;  %v9459_v23 = vld [vmem:[%s10273_s2 + $0x190] sm:$0xff] }
 0x6dd   :  { %3335 = vmatprep.subr.mxu0 %v9441_v34  ;;  %3406 = vmatprep.subr.mxu1 %v9447_v44  ;;  %11726 = vst [vmem:[#allocation31_spill] sm:$0xff] %v9453_v12  ;;  %11727 = vst [vmem:[#allocation36_spill] sm:$0xff] %v9459_v23  ;;  %v9465_v34 = vld [vmem:[%s10273_s2 + $0x168] sm:$0xff]  ;;  %v9471_v44 = vld [vmem:[%s10273_s2 + $0x178] sm:$0xff] }
 0x6de   :  { %3336 = vmatpush1.msra.mxu0 %v9453_v12  ;;  %3407 = vmatpush1.msra.mxu1 %v9459_v23  ;;  %11728 = vst [vmem:[#allocation33_spill] sm:$0xff] %v9465_v34  ;;  %11729 = vst [vmem:[#allocation37_spill] sm:$0xff] %v9471_v44  ;;  %v9477_v12 = vld [vmem:[%s10273_s2 + $0x160] sm:$0xff]  ;;  %v9483_v23 = vld [vmem:[%s10273_s2 + $0x170] sm:$0xff] }
 0x6df   :  { %3337 = vmatprep.subr.mxu0 %v9465_v34  ;;  %3408 = vmatprep.subr.mxu1 %v9471_v44  ;;  %11730 = vst [vmem:[#allocation35_spill] sm:$0xff] %v9477_v12  ;;  %11731 = vst [vmem:[#allocation38_spill] sm:$0xff] %v9483_v23  ;;  %v9489_v34 = vld [vmem:[%s10273_s2 + $0x148] sm:$0xff]  ;;  %v9495_v44 = vld [vmem:[%s10273_s2 + $0x158] sm:$0xff] }
 0x6e0   :  { %3338 = vmatpush1.msra.mxu0 %v9477_v12  ;;  %3409 = vmatpush1.msra.mxu1 %v9483_v23  ;;  %11732 = vst [vmem:[#allocation39_spill] sm:$0xff] %v9489_v34  ;;  %11733 = vst [vmem:[#allocation40_spill] sm:$0xff] %v9495_v44  ;;  %v9501_v12 = vld [vmem:[%s10273_s2 + $0x140] sm:$0xff]  ;;  %v9507_v23 = vld [vmem:[%s10273_s2 + $0x150] sm:$0xff] }
 0x6e1   :  { %3339 = vmatprep.subr.mxu0 %v9489_v34  ;;  %3410 = vmatprep.subr.mxu1 %v9495_v44  ;;  %11734 = vst [vmem:[#allocation41_spill] sm:$0xff] %v9501_v12  ;;  %11735 = vst [vmem:[#allocation42_spill] sm:$0xff] %v9507_v23  ;;  %v9513_v34 = vld [vmem:[%s10273_s2 + $0x128] sm:$0xff]  ;;  %v9519_v44 = vld [vmem:[%s10273_s2 + $0x138] sm:$0xff] }
 0x6e2   :  { %3340 = vmatpush1.msra.mxu0 %v9501_v12  ;;  %3411 = vmatpush1.msra.mxu1 %v9507_v23  ;;  %11736 = vst [vmem:[#allocation43_spill] sm:$0xff] %v9513_v34  ;;  %11737 = vst [vmem:[#allocation44_spill] sm:$0xff] %v9519_v44  ;;  %v9525_v12 = vld [vmem:[%s10273_s2 + $0x120] sm:$0xff]  ;;  %v9531_v23 = vld [vmem:[%s10273_s2 + $0x130] sm:$0xff] }
 0x6e3   :  { %3341 = vmatprep.subr.mxu0 %v9513_v34  ;;  %3412 = vmatprep.subr.mxu1 %v9519_v44  ;;  %11738 = vst [vmem:[#allocation45_spill] sm:$0xff] %v9525_v12  ;;  %11739 = vst [vmem:[#allocation46_spill] sm:$0xff] %v9531_v23  ;;  %v9537_v34 = vld [vmem:[%s10273_s2 + $0x108] sm:$0xff]  ;;  %v9543_v44 = vld [vmem:[%s10273_s2 + $0x118] sm:$0xff] }
 0x6e4   :  { %3342 = vmatpush1.msra.mxu0 %v9525_v12  ;;  %3413 = vmatpush1.msra.mxu1 %v9531_v23  ;;  %11740 = vst [vmem:[#allocation47_spill] sm:$0xff] %v9537_v34  ;;  %11741 = vst [vmem:[#allocation48_spill] sm:$0xff] %v9543_v44  ;;  %v9549_v12 = vld [vmem:[%s10273_s2 + $0x100] sm:$0xff]  ;;  %v9555_v23 = vld [vmem:[%s10273_s2 + $0x110] sm:$0xff] }
 0x6e5   :  { %3343 = vmatprep.subr.mxu0 %v9537_v34  ;;  %3414 = vmatprep.subr.mxu1 %v9543_v44  ;;  %11742 = vst [vmem:[#allocation49_spill] sm:$0xff] %v9549_v12  ;;  %11743 = vst [vmem:[#allocation50_spill] sm:$0xff] %v9555_v23  ;;  %v9561_v34 = vld [vmem:[%s10273_s2 + $0xe8] sm:$0xff]  ;;  %v9567_v44 = vld [vmem:[%s10273_s2 + $0xf8] sm:$0xff] }
 0x6e6   :  { %3344 = vmatpush1.msra.mxu0 %v9549_v12  ;;  %3415 = vmatpush1.msra.mxu1 %v9555_v23  ;;  %11744 = vst [vmem:[#allocation51_spill] sm:$0xff] %v9561_v34  ;;  %11745 = vst [vmem:[#allocation52_spill] sm:$0xff] %v9567_v44  ;;  %v9573_v12 = vld [vmem:[%s10273_s2 + $0xe0] sm:$0xff]  ;;  %v9579_v23 = vld [vmem:[%s10273_s2 + $0xf0] sm:$0xff] }
 0x6e7   :  { %3345 = vmatprep.subr.mxu0 %v9561_v34  ;;  %3416 = vmatprep.subr.mxu1 %v9567_v44  ;;  %11746 = vst [vmem:[#allocation53_spill] sm:$0xff] %v9573_v12  ;;  %11747 = vst [vmem:[#allocation54_spill] sm:$0xff] %v9579_v23  ;;  %v9585_v34 = vld [vmem:[%s10273_s2 + $0xc8] sm:$0xff]  ;;  %v9591_v44 = vld [vmem:[%s10273_s2 + $0xd8] sm:$0xff] }
 0x6e8   :  { %3346 = vmatpush1.msra.mxu0 %v9573_v12  ;;  %3417 = vmatpush1.msra.mxu1 %v9579_v23  ;;  %11748 = vst [vmem:[#allocation55_spill] sm:$0xff] %v9585_v34  ;;  %11749 = vst [vmem:[#allocation56_spill] sm:$0xff] %v9591_v44  ;;  %v9597_v12 = vld [vmem:[%s10273_s2 + $0xc0] sm:$0xff]  ;;  %v9603_v23 = vld [vmem:[%s10273_s2 + $0xd0] sm:$0xff] }
 0x6e9   :  { %3347 = vmatprep.subr.mxu0 %v9585_v34  ;;  %3418 = vmatprep.subr.mxu1 %v9591_v44  ;;  %11750 = vst [vmem:[#allocation57_spill] sm:$0xff] %v9597_v12  ;;  %11751 = vst [vmem:[#allocation58_spill] sm:$0xff] %v9603_v23  ;;  %v9609_v34 = vld [vmem:[%s10273_s2 + $0xa8] sm:$0xff]  ;;  %v9615_v44 = vld [vmem:[%s10273_s2 + $0xb8] sm:$0xff] }
 0x6ea   :  { %3348 = vmatpush1.msra.mxu0 %v9597_v12  ;;  %3419 = vmatpush1.msra.mxu1 %v9603_v23  ;;  %11752 = vst [vmem:[#allocation59_spill] sm:$0xff] %v9609_v34  ;;  %11753 = vst [vmem:[#allocation60_spill] sm:$0xff] %v9615_v44  ;;  %v9621_v12 = vld [vmem:[%s10273_s2 + $0xa0] sm:$0xff]  ;;  %v9627_v23 = vld [vmem:[%s10273_s2 + $0xb0] sm:$0xff] }
 0x6eb   :  { %3349 = vmatprep.subr.mxu0 %v9609_v34  ;;  %3420 = vmatprep.subr.mxu1 %v9615_v44  ;;  %11754 = vst [vmem:[#allocation61_spill] sm:$0xff] %v9621_v12  ;;  %11755 = vst [vmem:[#allocation62_spill] sm:$0xff] %v9627_v23  ;;  %v9633_v34 = vld [vmem:[%s10273_s2 + $0x88] sm:$0xff]  ;;  %v9639_v44 = vld [vmem:[%s10273_s2 + $0x98] sm:$0xff] }
 0x6ec   :  { %3350 = vmatpush1.msra.mxu0 %v9621_v12  ;;  %3421 = vmatpush1.msra.mxu1 %v9627_v23  ;;  %11756 = vst [vmem:[#allocation63_spill] sm:$0xff] %v9633_v34  ;;  %11757 = vst [vmem:[#allocation64_spill] sm:$0xff] %v9639_v44  ;;  %v9645_v12 = vld [vmem:[%s10273_s2 + $0x80] sm:$0xff]  ;;  %v9651_v23 = vld [vmem:[%s10273_s2 + $0x90] sm:$0xff] }
 0x6ed   :  { %3351 = vmatprep.subr.mxu0 %v9633_v34  ;;  %3422 = vmatprep.subr.mxu1 %v9639_v44  ;;  %11758 = vst [vmem:[#allocation65_spill] sm:$0xff] %v9645_v12  ;;  %11759 = vst [vmem:[#allocation66_spill] sm:$0xff] %v9651_v23  ;;  %v9657_v34 = vld [vmem:[%s10273_s2 + $0x68] sm:$0xff]  ;;  %v9663_v44 = vld [vmem:[%s10273_s2 + $0x78] sm:$0xff] }
 0x6ee   :  { %3352 = vmatpush1.msra.mxu0 %v9645_v12  ;;  %3423 = vmatpush1.msra.mxu1 %v9651_v23  ;;  %11760 = vst [vmem:[#allocation67_spill] sm:$0xff] %v9657_v34  ;;  %11761 = vst [vmem:[#allocation68_spill] sm:$0xff] %v9663_v44  ;;  %v9669_v12 = vld [vmem:[%s10273_s2 + $0x60] sm:$0xff]  ;;  %v9675_v23 = vld [vmem:[%s10273_s2 + $0x70] sm:$0xff] }
 0x6ef   :  { %3353 = vmatprep.subr.mxu0 %v9657_v34  ;;  %3424 = vmatprep.subr.mxu1 %v9663_v44  ;;  %11762 = vst [vmem:[#allocation69_spill] sm:$0xff] %v9669_v12  ;;  %11763 = vst [vmem:[#allocation70_spill] sm:$0xff] %v9675_v23  ;;  %v9681_v34 = vld [vmem:[%s10273_s2 + $0x48] sm:$0xff]  ;;  %v9687_v44 = vld [vmem:[%s10273_s2 + $0x58] sm:$0xff] }
 0x6f0   :  { %3354 = vmatpush1.msra.mxu0 %v9669_v12  ;;  %3425 = vmatpush1.msra.mxu1 %v9675_v23  ;;  %11764 = vst [vmem:[#allocation71_spill] sm:$0xff] %v9681_v34  ;;  %11765 = vst [vmem:[#allocation72_spill] sm:$0xff] %v9687_v44  ;;  %v9693_v12 = vld [vmem:[%s10273_s2 + $0x40] sm:$0xff]  ;;  %v9699_v23 = vld [vmem:[%s10273_s2 + $0x50] sm:$0xff] }
 0x6f1   :  { %3355 = vmatprep.subr.mxu0 %v9681_v34  ;;  %3426 = vmatprep.subr.mxu1 %v9687_v44  ;;  %11766 = vst [vmem:[#allocation73_spill] sm:$0xff] %v9693_v12  ;;  %11767 = vst [vmem:[#allocation74_spill] sm:$0xff] %v9699_v23  ;;  %v9705_v34 = vld [vmem:[%s10273_s2 + $0x28] sm:$0xff]  ;;  %v9711_v44 = vld [vmem:[%s10273_s2 + $0x38] sm:$0xff] }
 0x6f2   :  { %3356 = vmatpush1.msra.mxu0 %v9693_v12  ;;  %3427 = vmatpush1.msra.mxu1 %v9699_v23  ;;  %11768 = vst [vmem:[#allocation75_spill] sm:$0xff] %v9705_v34  ;;  %11769 = vst [vmem:[#allocation76_spill] sm:$0xff] %v9711_v44  ;;  %v9717_v12 = vld [vmem:[%s10273_s2 + $0x20] sm:$0xff]  ;;  %v9723_v23 = vld [vmem:[%s10273_s2 + $0x30] sm:$0xff] }
 0x6f3   :  { %3357 = vmatprep.subr.mxu0 %v9705_v34  ;;  %3428 = vmatprep.subr.mxu1 %v9711_v44  ;;  %11770 = vst [vmem:[#allocation77_spill] sm:$0xff] %v9717_v12  ;;  %11771 = vst [vmem:[#allocation78_spill] sm:$0xff] %v9723_v23  ;;  %v9729_v34 = vld [vmem:[%s10273_s2 + $0x8] sm:$0xff]  ;;  %v9735_v44 = vld [vmem:[%s10273_s2 + $0x18] sm:$0xff] }
 0x6f4   :  { %3358 = vmatpush1.msra.mxu0 %v9717_v12  ;;  %3429 = vmatpush1.msra.mxu1 %v9723_v23  ;;  %11772 = vst [vmem:[#allocation79_spill] sm:$0xff] %v9729_v34  ;;  %11773 = vst [vmem:[#allocation80_spill] sm:$0xff] %v9735_v44  ;;  %v9741_v12 = vld [vmem:[%s10273_s2] sm:$0xff]  ;;  %v9747_v23 = vld [vmem:[%s10273_s2 + $0x10] sm:$0xff] }
 0x6f5   :  { %3359 = vmatprep.subr.mxu0 %v9729_v34  ;;  %3430 = vmatprep.subr.mxu1 %v9735_v44  ;;  %11774 = vst [vmem:[#allocation81_spill] sm:$0xff] %v9741_v12  ;;  %11775 = vst [vmem:[#allocation82_spill] sm:$0xff] %v9747_v23  ;;  %v9752_v34 = vld [vmem:[#allocation3 + $0x1e8] sm:$0xff]  ;;  %v9755_v44 = vld [vmem:[#allocation3 + $0x1f8] sm:$0xff] }
 0x6f6   :  { %3360 = vmatpush1.msra.mxu0 %v9741_v12  ;;  %3431 = vmatpush1.msra.mxu1 %v9747_v23  ;;  %11776 = vst [vmem:[#allocation83_spill] sm:$0xff] %v9752_v34  ;;  %11777 = vst [vmem:[#allocation84_spill] sm:$0xff] %v9755_v44 }
 0x6f7   :  { %3393 = vmatprep.mubr.f32.mxu0 %v11003_v19  ;;  %3464 = vmatprep.mubr.f32.mxu1 %v11003_v19 }
 0x6f8   :  { %3504 = vmatprep.subr.mxu0 %v9752_v34  ;;  %3575 = vmatprep.subr.mxu1 %v9755_v44 }
 0x753   :  { %v2908_v12 = vpop.f32.mrf.mxu0  ;;  %v2979_v45 = vpop.f32.mrf.mxu1 }
 0x755   :  { %v2910_v28 = vpop.f32.mrf.mxu0  ;;  %v2981_v20 = vpop.f32.mrf.mxu1 }
 0x774   :  { %v3083_v21 = vpop.f32.mrf.mxu0  ;;  %v3154_v16 = vpop.f32.mrf.mxu1 }
 0x775   :  { %v3084_v18 = vadd.f32 %v3083_v21, %v2908_v12  ;;  %v3155_v43 = vadd.f32 %v3154_v16, %v2979_v45 }
 0x776   :  { %v3085_v17 = vpop.f32.mrf.mxu0  ;;  %v3156_v13 = vpop.f32.mrf.mxu1 }
 0x777   :  { %v3159_v23 = vadd.f32 %v3084_v18, %v6431_v33  ;;  %v3086_v10 = vadd.f32 %v3085_v17, %v2910_v28  ;;  %v3157_v36 = vadd.f32 %v3156_v13, %v2981_v20  ;;  %v3161_v21 = vadd.f32 %v3155_v43, %v6440_v57 }
 0x779   :  { %v4320_v15 = vmul.f32 -1.442695, %v3159_v23  ;;  %v3160_v14 = vadd.f32 %v3086_v10, %v6433_v37  ;;  %v3162_v44 = vadd.f32 %v3157_v36, %v6437_v47  ;;  %v4324_v36 = vld [vmem:[%s10271_s0 + $0xc8] sm:$0xff] }
 0x77b   :  { %4577 = vpow2.f32 %v4320_v15  ;;  %v4321_v34 = vmul.f32 -1.442695, %v3160_v14  ;;  %v4322_v41 = vmul.f32 -1.442695, %v3162_v44  ;;  %v4323_v14 = vld [vmem:[%s10271_s0 + $0xc0] sm:$0xff] }
 0x77d   :  { %4579 = vpow2.f32 %v4321_v34 }
 0x77e   :  { %4581 = vpow2.f32 %v4322_v41 }
 0x788   :  { %v4578_v40 = vpop.eup %4577 }
 0x789   :  { %v3166_v12 = vadd.f32 1.0, %v4578_v40 }
 0x78a   :  { %v4580_v38 = vpop.eup %4579 }
 0x78b   :  { %4583 = vrcp.f32 %v3166_v12  ;;  %v3172_v17 = vadd.f32 1.0, %v4580_v38  ;;  %v4582_v13 = vpop.eup %4581  ;;  %v4326_v12 = vld [vmem:[%s10271_s0 + $0xd8] sm:$0xff] }
 0x78c   :  { %4585 = vtanh.f32 %v3161_v21  ;;  %v3179_v38 = vadd.f32 1.0, %v4582_v13 }
 0x78d   :  { %4587 = vrcp.f32 %v3172_v17 }
 0x796   :  { %v3253_v15 = vpop.f32.mrf.mxu0  ;;  %v3324_v44 = vpop.f32.mrf.mxu1 }
 0x797   :  { %v3476_v10 = vadd.f32 %v4323_v14, %v3253_v15  ;;  %v4325_v14 = vld [vmem:[%s10271_s0 + $0xd0] sm:$0xff] }
 0x798   :  { %v4584_v16 = vpop.eup %4583  ;;  %v3255_v43 = vpop.f32.mrf.mxu0 }
 0x799   :  { %v4586_v40 = vpop.eup %4585  ;;  %v4327_v18 = vmul.f32 -1.442695, %v3476_v10  ;;  %v3477_v41 = vadd.f32 %v4324_v36, %v3255_v43  ;;  %v3326_v21 = vpop.f32.mrf.mxu1  ;;  %v3478_v36 = vadd.f32 %v4325_v14, %v3324_v44  ;;  %v9793_v44 = vld [vmem:[#allocation3 + $0x1d0] sm:$0xff]  ;;  %v9808_v14 = vld [vmem:[#allocation3 + $0x188] sm:$0xff] }
 0x79a   :  { %v4588_v20 = vpop.eup %4587  ;;  %v3183_v28 = vmul.f32 %v4586_v40, %v4584_v16  ;;  %v3479_v17 = vadd.f32 %v4326_v12, %v3326_v21  ;;  %v9799_v21 = vld [vmem:[#allocation3 + $0x1b8] sm:$0xff]  ;;  %v9802_v12 = vld [vmem:[#allocation3 + $0x1a0] sm:$0xff]  ;;  %11780 = vst [vmem:[#allocation87_spill] sm:$0xff] %v9808_v14 }
 0x79b   :  { %v3182_v34 = vmul.f32 %v4588_v20, %v8897_v11  ;;  %4589 = vpow2.f32 %v4327_v18  ;;  %v4328_v45 = vmul.f32 -1.442695, %v3477_v41  ;;  %v9778_v41 = vld [vmem:[#allocation3 + $0x1e0] sm:$0xff]  ;;  %v9781_v20 = vld [vmem:[#allocation3 + $0x1f0] sm:$0xff]  ;;  %11778 = vst [vmem:[#allocation85_spill] sm:$0xff] %v9802_v12 }
 0x79c   :  { %v4329_v11 = vmul.f32 -1.442695, %v3479_v17  ;;  %v9805_v17 = vld [vmem:[#allocation3 + $0x1b0] sm:$0xff] }
 0x79d   :  { %4591 = vpow2.f32 %v4328_v45  ;;  %v9769_v23 = vadd.f32 %v3183_v28, %v3182_v34  ;;  %v9787_v28 = vld [vmem:[#allocation3 + $0x1d8] sm:$0xff]  ;;  %v9790_v34 = vld [vmem:[#allocation3 + $0x1c0] sm:$0xff]  ;;  %v9796_v45 = vld [vmem:[#allocation3 + $0x1a8] sm:$0xff]  ;;  %11779 = vst [vmem:[#allocation86_spill] sm:$0xff] %v9805_v17 }
 0x79e   :  { %4593 = vrcp.f32 %v3179_v38  ;;  %v9784_v38 = vld [vmem:[#allocation3 + $0x1c8] sm:$0xff] }
 0x79f   :  { %4595 = vtanh.f32 %v9769_v23 }
 0x7a0   :  { %4597 = vpow2.f32 %v4329_v11  ;;  %v9811_v11 = vld [vmem:[#allocation3 + $0x198] sm:$0xff] }
 0x7a1   :  { %11781 = vst [vmem:[#allocation88_spill] sm:$0xff] %v9811_v11 }
 0x7a8   :  { %v4590_v15 = vpop.eup %4589 }
 0x7a9   :  { %v3483_v13 = vadd.f32 1.0, %v4590_v15  ;;  %v9814_v15 = vld [vmem:[#allocation3 + $0x180] sm:$0xff] }
 0x7aa   :  { %v4592_v10 = vpop.eup %4591  ;;  %11782 = vst [vmem:[#allocation89_spill] sm:$0xff] %v9814_v15 }
 0x7ab   :  { %v4594_v16 = vpop.eup %4593  ;;  %4599 = vrcp.f32 %v3483_v13  ;;  %v3489_v43 = vadd.f32 1.0, %v4592_v10  ;;  %v9820_v10 = vld [vmem:[#allocation3 + $0x168] sm:$0xff] }
 0x7ac   :  { %v4596_v40 = vpop.eup %4595  ;;  %4601 = vtanh.f32 %v3478_v36  ;;  %v9817_v36 = vld [vmem:[#allocation3 + $0x190] sm:$0xff]  ;;  %11784 = vst [vmem:[#allocation91_spill] sm:$0xff] %v9820_v10 }
 0x7ad   :  { %4603 = vrcp.f32 %v3489_v43  ;;  %v3186_v18 = vmul.f32 %v4596_v40, %v4594_v16  ;;  %11783 = vst [vmem:[#allocation90_spill] sm:$0xff] %v9817_v36  ;;  %v4598_v13 = vpop.eup %4597  ;;  %v9823_v16 = vld [vmem:[#allocation3 + $0x178] sm:$0xff]  ;;  %v9826_v40 = vld [vmem:[#allocation3 + $0x160] sm:$0xff] }
 0x7ae   :  { %11785 = vst [vmem:[#allocation92_spill] sm:$0xff] %v9823_v16  ;;  %11786 = vst [vmem:[#allocation93_spill] sm:$0xff] %v9826_v40 }
 0x7af   :  { %3394 = vmatmul.mubr.f32.vlgmr.msra.gmra.mxu0 %v3186_v18  ;;  %3465 = vmatmul.mubr.f32.vlgmr.msra.gmra.mxu1 %v3186_v18  ;;  %v9829_v18 = vld [vmem:[#allocation3 + $0x170] sm:$0xff] }
 0x7b0   :  { %3505 = vmatpush1.msra.mxu0 %v9778_v41  ;;  %3576 = vmatpush1.msra.mxu1 %v9781_v20  ;;  %11787 = vst [vmem:[#allocation94_spill] sm:$0xff] %v9829_v18 }
 0x7b1   :  { %3506 = vmatprep.subr.mxu0 %v9784_v38  ;;  %3577 = vmatprep.subr.mxu1 %v9787_v28 }
 0x7b2   :  { %3507 = vmatpush1.msra.mxu0 %v9790_v34  ;;  %3578 = vmatpush1.msra.mxu1 %v9793_v44 }
 0x7b3   :  { %3508 = vmatprep.subr.mxu0 %v9796_v45  ;;  %3579 = vmatprep.subr.mxu1 %v9799_v21 }
 0x7b4   :  { %3509 = vmatpush1.msra.mxu0 %v9802_v12  ;;  %3580 = vmatpush1.msra.mxu1 %v9805_v17  ;;  %v9845_v12 = vld [vmem:[#allocation3 + $0x128] sm:$0xff] }
 0x7b5   :  { %3510 = vmatprep.subr.mxu0 %v9808_v14  ;;  %3581 = vmatprep.subr.mxu1 %v9811_v11  ;;  %v9835_v11 = vld [vmem:[#allocation3 + $0x158] sm:$0xff]  ;;  %v9838_v14 = vld [vmem:[#allocation3 + $0x140] sm:$0xff] }
 0x7b6   :  { %3511 = vmatpush1.msra.mxu0 %v9814_v15  ;;  %3582 = vmatpush1.msra.mxu1 %v9817_v36  ;;  %v9832_v36 = vld [vmem:[#allocation3 + $0x148] sm:$0xff]  ;;  %11789 = vst [vmem:[#allocation96_spill] sm:$0xff] %v9838_v14 }
 0x7b7   :  { %3512 = vmatprep.subr.mxu0 %v9820_v10  ;;  %3583 = vmatprep.subr.mxu1 %v9823_v16  ;;  %11788 = vst [vmem:[#allocation95_spill] sm:$0xff] %v9832_v36  ;;  %v3496_v16 = vadd.f32 1.0, %v4598_v13  ;;  %v9851_v13 = vld [vmem:[#allocation3 + $0x120] sm:$0xff] }
 0x7b8   :  { %v4600_v43 = vpop.eup %4599  ;;  %3513 = vmatpush1.msra.mxu0 %v9826_v40  ;;  %3584 = vmatpush1.msra.mxu1 %v9829_v18  ;;  %v9841_v40 = vld [vmem:[#allocation3 + $0x150] sm:$0xff] }
 0x7b9   :  { %v4602_v15 = vpop.eup %4601  ;;  %3514 = vmatprep.subr.mxu0 %v9832_v36  ;;  %3585 = vmatprep.subr.mxu1 %v9835_v11  ;;  %11790 = vst [vmem:[#allocation97_spill] sm:$0xff] %v9841_v40  ;;  %v9848_v36 = vld [vmem:[#allocation3 + $0x138] sm:$0xff]  ;;  %4605 = vrcp.f32 %v3496_v16  ;;  %v9881_v16 = vld [vmem:[#allocation3 + $0xf0] sm:$0xff] }
 0x7ba   :  { %v4604_v10 = vpop.eup %4603  ;;  %3515 = vmatpush1.msra.mxu0 %v9838_v14  ;;  %3586 = vmatpush1.msra.mxu1 %v9841_v40  ;;  %v3500_v18 = vmul.f32 %v4602_v15, %v4600_v43  ;;  %v9854_v14 = vld [vmem:[#allocation3 + $0x130] sm:$0xff]  ;;  %v9859_v15 = vld [vmem:[#allocation3 + $0x108] sm:$0xff]  ;;  %11799 = vst [vmem:[#allocation106_spill] sm:$0xff] %v9881_v16 }
 0x7bb   :  { %v3499_v17 = vmul.f32 %v4604_v10, %v8933_v61  ;;  %3516 = vmatprep.subr.mxu0 %v9845_v12  ;;  %3587 = vmatprep.subr.mxu1 %v9848_v36  ;;  %11791 = vst [vmem:[#allocation98_spill] sm:$0xff] %v9854_v14  ;;  %11792 = vst [vmem:[#allocation99_spill] sm:$0xff] %v9859_v15  ;;  %v9862_v61 = vld [vmem:[#allocation3 + $0x118] sm:$0xff]  ;;  %v9865_v10 = vld [vmem:[#allocation3 + $0x100] sm:$0xff] }
 0x7bc   :  { %3517 = vmatpush1.msra.mxu0 %v9851_v13  ;;  %3588 = vmatpush1.msra.mxu1 %v9854_v14  ;;  %11793 = vst [vmem:[#allocation100_spill] sm:$0xff] %v9862_v61  ;;  %11794 = vst [vmem:[#allocation101_spill] sm:$0xff] %v9865_v10  ;;  %v9868_v43 = vld [vmem:[#allocation3 + $0x110] sm:$0xff]  ;;  %v9871_v14 = vld [vmem:[#allocation3 + $0xe8] sm:$0xff] }
 0x7bd   :  { %v9857_v40 = vadd.f32 %v3500_v18, %v3499_v17  ;;  %3518 = vmatprep.subr.mxu0 %v9859_v15  ;;  %3589 = vmatprep.subr.mxu1 %v9862_v61  ;;  %11795 = vst [vmem:[#allocation102_spill] sm:$0xff] %v9868_v43  ;;  %11796 = vst [vmem:[#allocation103_spill] sm:$0xff] %v9871_v14  ;;  %v9874_v17 = vld [vmem:[#allocation3 + $0xf8] sm:$0xff]  ;;  %v9878_v18 = vld [vmem:[#allocation3 + $0xe0] sm:$0xff] }
 0x7be   :  { %3519 = vmatpush1.msra.mxu0 %v9865_v10  ;;  %3590 = vmatpush1.msra.mxu1 %v9868_v43  ;;  %11797 = vst [vmem:[#allocation104_spill] sm:$0xff] %v9874_v17  ;;  %11798 = vst [vmem:[#allocation105_spill] sm:$0xff] %v9878_v18  ;;  %v9884_v10 = vld [vmem:[#allocation3 + $0xc8] sm:$0xff]  ;;  %v9887_v43 = vld [vmem:[#allocation3 + $0xd8] sm:$0xff] }
 0x7bf   :  { %3520 = vmatprep.subr.mxu0 %v9871_v14  ;;  %3591 = vmatprep.subr.mxu1 %v9874_v17  ;;  %4607 = vtanh.f32 %v9857_v40  ;;  %11800 = vst [vmem:[#allocation107_spill] sm:$0xff] %v9884_v10  ;;  %11801 = vst [vmem:[#allocation108_spill] sm:$0xff] %v9887_v43  ;;  %v9890_v14 = vld [vmem:[#allocation3 + $0xc0] sm:$0xff]  ;;  %v9893_v17 = vld [vmem:[#allocation3 + $0xd0] sm:$0xff] }
 0x7c0   :  { %3521 = vmatpush1.msra.mxu0 %v9878_v18  ;;  %3592 = vmatpush1.msra.mxu1 %v9881_v16  ;;  %11802 = vst [vmem:[#allocation109_spill] sm:$0xff] %v9890_v14  ;;  %11803 = vst [vmem:[#allocation110_spill] sm:$0xff] %v9893_v17  ;;  %v9896_v18 = vld [vmem:[#allocation3 + $0xa8] sm:$0xff]  ;;  %v9899_v16 = vld [vmem:[#allocation3 + $0xb8] sm:$0xff] }
 0x7c1   :  { %3522 = vmatprep.subr.mxu0 %v9884_v10  ;;  %3593 = vmatprep.subr.mxu1 %v9887_v43  ;;  %11804 = vst [vmem:[#allocation111_spill] sm:$0xff] %v9896_v18  ;;  %11805 = vst [vmem:[#allocation112_spill] sm:$0xff] %v9899_v16  ;;  %v9902_v10 = vld [vmem:[#allocation3 + $0xa0] sm:$0xff]  ;;  %v9905_v43 = vld [vmem:[#allocation3 + $0xb0] sm:$0xff] }
 0x7c2   :  { %3523 = vmatpush1.msra.mxu0 %v9890_v14  ;;  %3594 = vmatpush1.msra.mxu1 %v9893_v17  ;;  %11806 = vst [vmem:[#allocation113_spill] sm:$0xff] %v9902_v10  ;;  %11807 = vst [vmem:[#allocation114_spill] sm:$0xff] %v9905_v43  ;;  %v9908_v14 = vld [vmem:[#allocation3 + $0x88] sm:$0xff]  ;;  %v9911_v17 = vld [vmem:[#allocation3 + $0x98] sm:$0xff] }
 0x7c3   :  { %3524 = vmatprep.subr.mxu0 %v9896_v18  ;;  %3595 = vmatprep.subr.mxu1 %v9899_v16  ;;  %11808 = vst [vmem:[#allocation115_spill] sm:$0xff] %v9908_v14  ;;  %11809 = vst [vmem:[#allocation116_spill] sm:$0xff] %v9911_v17  ;;  %v9914_v18 = vld [vmem:[#allocation3 + $0x80] sm:$0xff]  ;;  %v9917_v16 = vld [vmem:[#allocation3 + $0x90] sm:$0xff] }
 0x7c4   :  { %3525 = vmatpush1.msra.mxu0 %v9902_v10  ;;  %3596 = vmatpush1.msra.mxu1 %v9905_v43  ;;  %11810 = vst [vmem:[#allocation117_spill] sm:$0xff] %v9914_v18  ;;  %11811 = vst [vmem:[#allocation118_spill] sm:$0xff] %v9917_v16  ;;  %v9920_v10 = vld [vmem:[#allocation3 + $0x68] sm:$0xff]  ;;  %v9923_v43 = vld [vmem:[#allocation3 + $0x78] sm:$0xff] }
 0x7c5   :  { %3526 = vmatprep.subr.mxu0 %v9908_v14  ;;  %3597 = vmatprep.subr.mxu1 %v9911_v17  ;;  %11812 = vst [vmem:[#allocation119_spill] sm:$0xff] %v9920_v10  ;;  %11813 = vst [vmem:[#allocation120_spill] sm:$0xff] %v9923_v43  ;;  %v9926_v14 = vld [vmem:[#allocation3 + $0x60] sm:$0xff]  ;;  %v9929_v17 = vld [vmem:[#allocation3 + $0x70] sm:$0xff] }
 0x7c6   :  { %3527 = vmatpush1.msra.mxu0 %v9914_v18  ;;  %3598 = vmatpush1.msra.mxu1 %v9917_v16  ;;  %11814 = vst [vmem:[#allocation121_spill] sm:$0xff] %v9926_v14  ;;  %11815 = vst [vmem:[#allocation122_spill] sm:$0xff] %v9929_v17  ;;  %v9932_v18 = vld [vmem:[#allocation3 + $0x48] sm:$0xff]  ;;  %v9935_v16 = vld [vmem:[#allocation3 + $0x58] sm:$0xff] }
 0x7c7   :  { %3528 = vmatprep.subr.mxu0 %v9920_v10  ;;  %3599 = vmatprep.subr.mxu1 %v9923_v43  ;;  %11816 = vst [vmem:[#allocation123_spill] sm:$0xff] %v9932_v18  ;;  %11817 = vst [vmem:[#allocation124_spill] sm:$0xff] %v9935_v16  ;;  %v9938_v10 = vld [vmem:[#allocation3 + $0x40] sm:$0xff]  ;;  %v9941_v43 = vld [vmem:[#allocation3 + $0x50] sm:$0xff] }
 0x7c8   :  { %3529 = vmatpush1.msra.mxu0 %v9926_v14  ;;  %3600 = vmatpush1.msra.mxu1 %v9929_v17  ;;  %11818 = vst [vmem:[#allocation125_spill] sm:$0xff] %v9938_v10  ;;  %11819 = vst [vmem:[#allocation126_spill] sm:$0xff] %v9941_v43  ;;  %v4606_v14 = vpop.eup %4605  ;;  %v9944_v61 = vld [vmem:[#allocation3 + $0x28] sm:$0xff]  ;;  %v9947_v17 = vld [vmem:[#allocation3 + $0x38] sm:$0xff] }
 0x7c9   :  { %3530 = vmatprep.subr.mxu0 %v9932_v18  ;;  %3601 = vmatprep.subr.mxu1 %v9935_v16  ;;  %11820 = vst [vmem:[#allocation127_spill] sm:$0xff] %v9944_v61  ;;  %11821 = vst [vmem:[#allocation128_spill] sm:$0xff] %v9947_v17  ;;  %v9950_v15 = vld [vmem:[#allocation3 + $0x20] sm:$0xff]  ;;  %v9953_v16 = vld [vmem:[#allocation3 + $0x30] sm:$0xff] }
 0x7ca   :  { %3531 = vmatpush1.msra.mxu0 %v9938_v10  ;;  %3602 = vmatpush1.msra.mxu1 %v9941_v43  ;;  %11822 = vst [vmem:[#allocation129_spill] sm:$0xff] %v9950_v15  ;;  %v9956_v10 = vld [vmem:[#allocation3 + $0x8] sm:$0xff]  ;;  %v9959_v43 = vld [vmem:[#allocation3 + $0x18] sm:$0xff] }
 0x7cb   :  { %3532 = vmatprep.subr.mxu0 %v9944_v61  ;;  %3603 = vmatprep.subr.mxu1 %v9947_v17  ;;  %v9964_v17 = vld [vmem:[#allocation3] sm:$0xff] }
 0x7cc   :  { %v4608_v18 = vpop.eup %4607  ;;  %3533 = vmatpush1.msra.mxu0 %v9950_v15  ;;  %3604 = vmatpush1.msra.mxu1 %v9953_v16  ;;  %v9968_v15 = vld [vmem:[#allocation3 + $0x10] sm:$0xff] }
 0x7cd   :  { %3534 = vmatprep.subr.mxu0 %v9956_v10  ;;  %3605 = vmatprep.subr.mxu1 %v9959_v43  ;;  %v9962_v61 = vmul.f32 %v4608_v18, %v4606_v14  ;;  %v11860_v14 = vld [vmem:[#allocation26_spill] sm:$0xff]  ;;  %v11862_v18 = vld [vmem:[#allocation29_spill] sm:$0xff] }
 0x7ce   :  { %3535 = vmatpush1.msra.mxu0 %v9964_v17  ;;  %3568 = vmatprep.mubr.f32.mxu0 %v11003_v19 }
 0x7cf   :  { %3606 = vmatpush1.msra.mxu1 %v9968_v15  ;;  %3639 = vmatprep.mubr.f32.mxu1 %v11003_v19 }
 0x7d0   :  { %3569 = vmatmul.mubr.f32.vlgmr.msra.gmra.mxu0 %v9962_v61  ;;  %3640 = vmatmul.mubr.f32.vlgmr.msra.gmra.mxu1 %v9962_v61 }
 0x7d1   :  { %3674 = vmatprep.subr.mxu0 %v8981_v42  ;;  %3745 = vmatprep.subr.mxu1 %v8987_v54  ;;  %v11823_v42 = vld [vmem:[#allocation137_spill] sm:$0xff]  ;;  %v11824_v54 = vld [vmem:[#allocation138_spill] sm:$0xff] }
 0x7d2   :  { %3675 = vmatpush1.msra.mxu0 %v8993_v48  ;;  %3746 = vmatpush1.msra.mxu1 %v8999_v56  ;;  %v11825_v48 = vld [vmem:[#allocation139_spill] sm:$0xff]  ;;  %v11826_v56 = vld [vmem:[#allocation140_spill] sm:$0xff] }
 0x7d3   :  { %3676 = vmatprep.subr.mxu0 %v9005_v52  ;;  %3747 = vmatprep.subr.mxu1 %v9011_v63  ;;  %v11827_v52 = vld [vmem:[#allocation141_spill] sm:$0xff]  ;;  %v11828_v63 = vld [vmem:[#allocation142_spill] sm:$0xff] }
 0x7d4   :  { %3677 = vmatpush1.msra.mxu0 %v9017_v53  ;;  %3748 = vmatpush1.msra.mxu1 %v9023_v9  ;;  %v11829_v53 = vld [vmem:[#allocation143_spill] sm:$0xff]  ;;  %v11830_v9 = vld [vmem:[#allocation144_spill] sm:$0xff] }
 0x7d5   :  { %3678 = vmatprep.subr.mxu0 %v9029_v4  ;;  %3749 = vmatprep.subr.mxu1 %v9035_v6  ;;  %v11831_v4 = vld [vmem:[#allocation145_spill] sm:$0xff]  ;;  %v11832_v6 = vld [vmem:[#allocation146_spill] sm:$0xff] }
 0x7d6   :  { %3679 = vmatpush1.msra.mxu0 %v9041_v7  ;;  %3750 = vmatpush1.msra.mxu1 %v9047_v8  ;;  %v11833_v7 = vld [vmem:[#allocation147_spill] sm:$0xff]  ;;  %v11834_v8 = vld [vmem:[#allocation148_spill] sm:$0xff] }
 0x7d7   :  { %3680 = vmatprep.subr.mxu0 %v9053_v39  ;;  %3751 = vmatprep.subr.mxu1 %v9059_v3  ;;  %v11835_v39 = vld [vmem:[#allocation149_spill] sm:$0xff]  ;;  %v11836_v3 = vld [vmem:[#allocation150_spill] sm:$0xff] }
 0x7d8   :  { %3681 = vmatpush1.msra.mxu0 %v9065_v26  ;;  %3752 = vmatpush1.msra.mxu1 %v9071_v27  ;;  %v11837_v26 = vld [vmem:[#allocation11_spill] sm:$0xff]  ;;  %v11838_v27 = vld [vmem:[#allocation6_spill] sm:$0xff] }
 0x7d9   :  { %3682 = vmatprep.subr.mxu0 %v9077_v46  ;;  %3753 = vmatprep.subr.mxu1 %v9083_v49  ;;  %v11839_v46 = vld [vmem:[#allocation13_spill] sm:$0xff]  ;;  %v11840_v49 = vld [vmem:[#allocation7_spill] sm:$0xff] }
 0x7da   :  { %3683 = vmatpush1.msra.mxu0 %v9089_v51  ;;  %3754 = vmatpush1.msra.mxu1 %v9095_v55  ;;  %v11841_v51 = vld [vmem:[#allocation15_spill] sm:$0xff]  ;;  %v11842_v55 = vld [vmem:[#allocation8_spill] sm:$0xff] }
 0x7db   :  { %3684 = vmatprep.subr.mxu0 %v9101_v58  ;;  %3755 = vmatprep.subr.mxu1 %v9107_v1  ;;  %v11843_v58 = vld [vmem:[#allocation17_spill] sm:$0xff] }
 0x7dc   :  { %3685 = vmatpush1.msra.mxu0 %v9113_v62  ;;  %3756 = vmatpush1.msra.mxu1 %v9119_v59  ;;  %v11844_v1 = vld [vmem:[#allocation9_spill] sm:$0xff]  ;;  %v11845_v62 = vld [vmem:[#allocation18_spill] sm:$0xff] }
 0x7dd   :  { %3686 = vmatprep.subr.mxu0 %v9125_v2  ;;  %3757 = vmatprep.subr.mxu1 %v9131_v30  ;;  %v11846_v59 = vld [vmem:[#allocation10_spill] sm:$0xff]  ;;  %v11847_v2 = vld [vmem:[#allocation19_spill] sm:$0xff]  ;;  %v11848_v30 = vld [vmem:[#allocation12_spill] sm:$0xff] }
 0x7de   :  { %3687 = vmatpush1.msra.mxu0 %v9137_v25  ;;  %3758 = vmatpush1.msra.mxu1 %v9143_v50  ;;  %v11849_v25 = vld [vmem:[#allocation21_spill] sm:$0xff]  ;;  %v11850_v50 = vld [vmem:[#allocation14_spill] sm:$0xff] }
 0x7df   :  { %3688 = vmatprep.subr.mxu0 %v9149_v5  ;;  %3759 = vmatprep.subr.mxu1 %v9155_v0  ;;  %v11851_v5 = vld [vmem:[#allocation23_spill] sm:$0xff]  ;;  %v11852_v0 = vld [vmem:[#allocation16_spill] sm:$0xff] }
 0x7e0   :  { %3689 = vmatpush1.msra.mxu0 %v9161_v60  ;;  %3760 = vmatpush1.msra.mxu1 %v9167_v29  ;;  %v11853_v60 = vld [vmem:[#allocation25_spill] sm:$0xff]  ;;  %v11854_v29 = vld [vmem:[#allocation20_spill] sm:$0xff] }
 0x7e1   :  { %3690 = vmatprep.subr.mxu0 %v9173_v32  ;;  %3761 = vmatprep.subr.mxu1 %v9179_v31  ;;  %v11855_v32 = vld [vmem:[#allocation27_spill] sm:$0xff]  ;;  %v11856_v31 = vld [vmem:[#allocation22_spill] sm:$0xff] }
 0x7e2   :  { %3691 = vmatpush1.msra.mxu0 %v9185_v24  ;;  %3762 = vmatpush1.msra.mxu1 %v9191_v35  ;;  %v11857_v24 = vld [vmem:[#allocation28_spill] sm:$0xff] }
 0x7e3   :  { %3692 = vmatprep.subr.mxu0 %v9197_v22  ;;  %3763 = vmatprep.subr.mxu1 %v11823_v42  ;;  %v11858_v35 = vld [vmem:[#allocation24_spill] sm:$0xff]  ;;  %v11859_v22 = vld [vmem:[#allocation30_spill] sm:$0xff] }
 0x7e4   :  { %3693 = vmatpush1.msra.mxu0 %v11824_v54  ;;  %3764 = vmatpush1.msra.mxu1 %v11825_v48  ;;  %v11863_v42 = vld [vmem:[#allocation34_spill] sm:$0xff]  ;;  %v11864_v54 = vld [vmem:[#allocation31_spill] sm:$0xff]  ;;  %v11865_v48 = vld [vmem:[#allocation36_spill] sm:$0xff] }
 0x7e5   :  { %3694 = vmatprep.subr.mxu0 %v11826_v56  ;;  %3765 = vmatprep.subr.mxu1 %v11827_v52  ;;  %v11866_v56 = vld [vmem:[#allocation33_spill] sm:$0xff] }
 0x7e6   :  { %3695 = vmatpush1.msra.mxu0 %v11828_v63  ;;  %3766 = vmatpush1.msra.mxu1 %v11829_v53  ;;  %v11867_v52 = vld [vmem:[#allocation37_spill] sm:$0xff]  ;;  %v11868_v63 = vld [vmem:[#allocation35_spill] sm:$0xff]  ;;  %v11869_v53 = vld [vmem:[#allocation38_spill] sm:$0xff] }
 0x7e7   :  { %3696 = vmatprep.subr.mxu0 %v11830_v9  ;;  %3767 = vmatprep.subr.mxu1 %v11831_v4  ;;  %v11870_v9 = vld [vmem:[#allocation39_spill] sm:$0xff]  ;;  %v11871_v4 = vld [vmem:[#allocation40_spill] sm:$0xff] }
 0x7e8   :  { %3697 = vmatpush1.msra.mxu0 %v11832_v6  ;;  %3768 = vmatpush1.msra.mxu1 %v11833_v7  ;;  %v11872_v6 = vld [vmem:[#allocation41_spill] sm:$0xff]  ;;  %v11873_v7 = vld [vmem:[#allocation42_spill] sm:$0xff] }
 0x7e9   :  { %3698 = vmatprep.subr.mxu0 %v11834_v8  ;;  %3769 = vmatprep.subr.mxu1 %v11835_v39  ;;  %v11874_v8 = vld [vmem:[#allocation43_spill] sm:$0xff]  ;;  %v11875_v39 = vld [vmem:[#allocation44_spill] sm:$0xff] }
 0x7ea   :  { %3699 = vmatpush1.msra.mxu0 %v11836_v3  ;;  %3770 = vmatpush1.msra.mxu1 %v11837_v26  ;;  %v11876_v3 = vld [vmem:[#allocation45_spill] sm:$0xff]  ;;  %v11877_v26 = vld [vmem:[#allocation46_spill] sm:$0xff] }
 0x7eb   :  { %3700 = vmatprep.subr.mxu0 %v11838_v27  ;;  %3771 = vmatprep.subr.mxu1 %v11839_v46  ;;  %v11878_v27 = vld [vmem:[#allocation47_spill] sm:$0xff]  ;;  %v11879_v46 = vld [vmem:[#allocation48_spill] sm:$0xff] }
 0x7ec   :  { %3701 = vmatpush1.msra.mxu0 %v11840_v49  ;;  %3772 = vmatpush1.msra.mxu1 %v11841_v51  ;;  %v11880_v49 = vld [vmem:[#allocation49_spill] sm:$0xff]  ;;  %v11881_v51 = vld [vmem:[#allocation50_spill] sm:$0xff] }
 0x7ed   :  { %3702 = vmatprep.subr.mxu0 %v11842_v55  ;;  %3773 = vmatprep.subr.mxu1 %v11843_v58  ;;  %v11882_v55 = vld [vmem:[#allocation51_spill] sm:$0xff]  ;;  %v11883_v58 = vld [vmem:[#allocation52_spill] sm:$0xff] }
 0x7ee   :  { %3703 = vmatpush1.msra.mxu0 %v11844_v1  ;;  %3774 = vmatpush1.msra.mxu1 %v11845_v62  ;;  %v11884_v1 = vld [vmem:[#allocation53_spill] sm:$0xff]  ;;  %v11885_v62 = vld [vmem:[#allocation54_spill] sm:$0xff] }
 0x7ef   :  { %3704 = vmatprep.subr.mxu0 %v11846_v59  ;;  %3775 = vmatprep.subr.mxu1 %v11847_v2  ;;  %v11886_v59 = vld [vmem:[#allocation55_spill] sm:$0xff]  ;;  %v11887_v2 = vld [vmem:[#allocation56_spill] sm:$0xff] }
 0x7f0   :  { %3705 = vmatpush1.msra.mxu0 %v11848_v30  ;;  %3738 = vmatprep.mubr.f32.mxu0 %v11003_v19  ;;  %v11888_v30 = vld [vmem:[#allocation57_spill] sm:$0xff] }
 0x7f1   :  { %3776 = vmatpush1.msra.mxu1 %v11849_v25  ;;  %3809 = vmatprep.mubr.f32.mxu1 %v11003_v19  ;;  %v11889_v25 = vld [vmem:[#allocation58_spill] sm:$0xff] }
 0x7f2   :  { %3739 = vmatmul.mubr.f32.vlgmr.msra.gmra.mxu0 %v9962_v61  ;;  %3810 = vmatmul.mubr.f32.vlgmr.msra.gmra.mxu1 %v9962_v61  ;;  %v11861_v61 = vld [vmem:[#allocation32_spill] sm:$0xff] }
 0x7f3   :  { %3816 = vmatprep.subr.mxu0 %v11850_v50  ;;  %3887 = vmatprep.subr.mxu1 %v11851_v5  ;;  %v11890_v50 = vld [vmem:[#allocation59_spill] sm:$0xff]  ;;  %v11891_v5 = vld [vmem:[#allocation60_spill] sm:$0xff] }
 0x7f4   :  { %3817 = vmatpush1.msra.mxu0 %v11852_v0  ;;  %3888 = vmatpush1.msra.mxu1 %v11853_v60  ;;  %v11892_v0 = vld [vmem:[#allocation61_spill] sm:$0xff]  ;;  %v11893_v60 = vld [vmem:[#allocation62_spill] sm:$0xff] }
 0x7f5   :  { %3818 = vmatprep.subr.mxu0 %v11854_v29  ;;  %3889 = vmatprep.subr.mxu1 %v11855_v32  ;;  %v11894_v29 = vld [vmem:[#allocation63_spill] sm:$0xff]  ;;  %v11895_v32 = vld [vmem:[#allocation64_spill] sm:$0xff] }
 0x7f6   :  { %3819 = vmatpush1.msra.mxu0 %v11856_v31  ;;  %3890 = vmatpush1.msra.mxu1 %v11857_v24  ;;  %v11896_v31 = vld [vmem:[#allocation65_spill] sm:$0xff]  ;;  %v11897_v24 = vld [vmem:[#allocation66_spill] sm:$0xff] }
 0x7f7   :  { %3820 = vmatprep.subr.mxu0 %v11858_v35  ;;  %3891 = vmatprep.subr.mxu1 %v11859_v22  ;;  %v11898_v35 = vld [vmem:[#allocation67_spill] sm:$0xff]  ;;  %v11899_v22 = vld [vmem:[#allocation68_spill] sm:$0xff] }
 0x7f8   :  { %3821 = vmatpush1.msra.mxu0 %v11860_v14  ;;  %3892 = vmatpush1.msra.mxu1 %v11861_v61  ;;  %v11900_v14 = vld [vmem:[#allocation69_spill] sm:$0xff]  ;;  %v11901_v61 = vld [vmem:[#allocation70_spill] sm:$0xff] }
 0x7f9   :  { %3822 = vmatprep.subr.mxu0 %v11862_v18  ;;  %3893 = vmatprep.subr.mxu1 %v11863_v42  ;;  %v11902_v18 = vld [vmem:[#allocation71_spill] sm:$0xff]  ;;  %v11903_v42 = vld [vmem:[#allocation72_spill] sm:$0xff] }
 0x7fa   :  { %3823 = vmatpush1.msra.mxu0 %v11864_v54  ;;  %3894 = vmatpush1.msra.mxu1 %v11865_v48  ;;  %v11904_v54 = vld [vmem:[#allocation73_spill] sm:$0xff]  ;;  %v11905_v48 = vld [vmem:[#allocation74_spill] sm:$0xff] }
 0x7fb   :  { %3824 = vmatprep.subr.mxu0 %v11866_v56  ;;  %3895 = vmatprep.subr.mxu1 %v11867_v52  ;;  %v11906_v56 = vld [vmem:[#allocation75_spill] sm:$0xff]  ;;  %v11907_v52 = vld [vmem:[#allocation76_spill] sm:$0xff] }
 0x7fc   :  { %3825 = vmatpush1.msra.mxu0 %v11868_v63  ;;  %3896 = vmatpush1.msra.mxu1 %v11869_v53  ;;  %v11908_v63 = vld [vmem:[#allocation77_spill] sm:$0xff]  ;;  %v11909_v53 = vld [vmem:[#allocation78_spill] sm:$0xff] }
 0x7fd   :  { %3826 = vmatprep.subr.mxu0 %v11870_v9  ;;  %3897 = vmatprep.subr.mxu1 %v11871_v4  ;;  %v11910_v9 = vld [vmem:[#allocation79_spill] sm:$0xff]  ;;  %v11911_v4 = vld [vmem:[#allocation80_spill] sm:$0xff] }
 0x7fe   :  { %3827 = vmatpush1.msra.mxu0 %v11872_v6  ;;  %3898 = vmatpush1.msra.mxu1 %v11873_v7  ;;  %v11912_v6 = vld [vmem:[#allocation81_spill] sm:$0xff]  ;;  %v11913_v7 = vld [vmem:[#allocation82_spill] sm:$0xff] }
 0x7ff   :  { %3828 = vmatprep.subr.mxu0 %v11874_v8  ;;  %3899 = vmatprep.subr.mxu1 %v11875_v39  ;;  %v11914_v8 = vld [vmem:[#allocation83_spill] sm:$0xff]  ;;  %v11915_v39 = vld [vmem:[#allocation84_spill] sm:$0xff] }
 0x800   :  { %3829 = vmatpush1.msra.mxu0 %v11876_v3  ;;  %3900 = vmatpush1.msra.mxu1 %v11877_v26 }
 0x801   :  { %3830 = vmatprep.subr.mxu0 %v11878_v27  ;;  %3901 = vmatprep.subr.mxu1 %v11879_v46 }
 0x802   :  { %3831 = vmatpush1.msra.mxu0 %v11880_v49  ;;  %3902 = vmatpush1.msra.mxu1 %v11881_v51 }
 0x803   :  { %3832 = vmatprep.subr.mxu0 %v11882_v55  ;;  %3903 = vmatprep.subr.mxu1 %v11883_v58 }
 0x804   :  { %3833 = vmatpush1.msra.mxu0 %v11884_v1  ;;  %3904 = vmatpush1.msra.mxu1 %v11885_v62 }
 0x805   :  { %3834 = vmatprep.subr.mxu0 %v11886_v59  ;;  %3905 = vmatprep.subr.mxu1 %v11887_v2 }
 0x806   :  { %3835 = vmatpush1.msra.mxu0 %v11888_v30  ;;  %3906 = vmatpush1.msra.mxu1 %v11889_v25 }
 0x807   :  { %3836 = vmatprep.subr.mxu0 %v11890_v50  ;;  %3907 = vmatprep.subr.mxu1 %v11891_v5 }
 0x808   :  { %3837 = vmatpush1.msra.mxu0 %v11892_v0  ;;  %3908 = vmatpush1.msra.mxu1 %v11893_v60 }
 0x809   :  { %3838 = vmatprep.subr.mxu0 %v11894_v29  ;;  %3909 = vmatprep.subr.mxu1 %v11895_v32 }
 0x80a   :  { %3839 = vmatpush1.msra.mxu0 %v11896_v31  ;;  %3910 = vmatpush1.msra.mxu1 %v11897_v24 }
 0x80b   :  { %3840 = vmatprep.subr.mxu0 %v11898_v35  ;;  %3911 = vmatprep.subr.mxu1 %v11899_v22  ;;  %v4333_v22 = vld [vmem:[%s10271_s0 + $0xe0] sm:$0xff] }
 0x80c   :  { %3841 = vmatpush1.msra.mxu0 %v11900_v14  ;;  %3912 = vmatpush1.msra.mxu1 %v11901_v61  ;;  %v4334_v61 = vld [vmem:[%s10271_s0 + $0xe8] sm:$0xff] }
 0x80d   :  { %3842 = vmatprep.subr.mxu0 %v11902_v18  ;;  %3913 = vmatprep.subr.mxu1 %v11903_v42 }
 0x80e   :  { %3843 = vmatpush1.msra.mxu0 %v11904_v54  ;;  %3914 = vmatpush1.msra.mxu1 %v11905_v48 }
 0x80f   :  { %3844 = vmatprep.subr.mxu0 %v11906_v56  ;;  %3915 = vmatprep.subr.mxu1 %v11907_v52 }
 0x810   :  { %3845 = vmatpush1.msra.mxu0 %v11908_v63  ;;  %3916 = vmatpush1.msra.mxu1 %v11909_v53 }
 0x811   :  { %3846 = vmatprep.subr.mxu0 %v11910_v9  ;;  %3917 = vmatprep.subr.mxu1 %v11911_v4 }
 0x812   :  { %3847 = vmatpush1.msra.mxu0 %v11912_v6  ;;  %3918 = vmatpush1.msra.mxu1 %v11913_v7 }
 0x813   :  { %3880 = vmatprep.mubr.f32.mxu0 %v11003_v19  ;;  %3951 = vmatprep.mubr.f32.mxu1 %v11003_v19 }
 0x814   :  { %3991 = vmatprep.subr.mxu0 %v11914_v8  ;;  %4062 = vmatprep.subr.mxu1 %v11915_v39 }
 0x86f   :  { %v3395_v3 = vpop.f32.mrf.mxu0  ;;  %v3466_v26 = vpop.f32.mrf.mxu1 }
 0x871   :  { %v3397_v27 = vpop.f32.mrf.mxu0  ;;  %v3468_v49 = vpop.f32.mrf.mxu1 }
 0x890   :  { %v3570_v46 = vpop.f32.mrf.mxu0  ;;  %v3641_v1 = vpop.f32.mrf.mxu1 }
 0x891   :  { %v3571_v51 = vadd.f32 %v3570_v46, %v3395_v3  ;;  %v3642_v0 = vadd.f32 %v3641_v1, %v3466_v26  ;;  %v4336_v26 = vld [vmem:[%s10271_s0 + $0xf8] sm:$0xff]  ;;  %v4335_v46 = vld [vmem:[%s10271_s0 + $0xf0] sm:$0xff] }
 0x892   :  { %v3572_v55 = vpop.f32.mrf.mxu0  ;;  %v3643_v25 = vpop.f32.mrf.mxu1 }
 0x893   :  { %v3646_v58 = vadd.f32 %v3571_v51, %v6431_v33  ;;  %v3573_v62 = vadd.f32 %v3572_v55, %v3397_v27  ;;  %v3644_v50 = vadd.f32 %v3643_v25, %v3468_v49  ;;  %v3648_v32 = vadd.f32 %v3642_v0, %v6440_v57  ;;  %v11917_v25 = vld [vmem:[#allocation86_spill] sm:$0xff] }
 0x895   :  { %v4330_v59 = vmul.f32 -1.442695, %v3646_v58  ;;  %v3647_v2 = vadd.f32 %v3573_v62, %v6433_v37  ;;  %v3649_v5 = vadd.f32 %v3644_v50, %v6437_v47  ;;  %v11918_v50 = vld [vmem:[#allocation87_spill] sm:$0xff] }
 0x897   :  { %4609 = vpow2.f32 %v4330_v59  ;;  %v4331_v30 = vmul.f32 -1.442695, %v3647_v2  ;;  %v4332_v60 = vmul.f32 -1.442695, %v3649_v5  ;;  %v11924_v5 = vld [vmem:[#allocation93_spill] sm:$0xff] }
 0x899   :  { %4611 = vpow2.f32 %v4331_v30  ;;  %v11916_v30 = vld [vmem:[#allocation85_spill] sm:$0xff] }
 0x89a   :  { %4613 = vpow2.f32 %v4332_v60  ;;  %v11926_v60 = vld [vmem:[#allocation95_spill] sm:$0xff] }
 0x8a4   :  { %v4610_v29 = vpop.eup %4609 }
 0x8a5   :  { %v3653_v31 = vadd.f32 1.0, %v4610_v29 }
 0x8a6   :  { %v4612_v24 = vpop.eup %4611 }
 0x8a7   :  { %4615 = vrcp.f32 %v3653_v31  ;;  %v3659_v35 = vadd.f32 1.0, %v4612_v24  ;;  %v4614_v18 = vpop.eup %4613  ;;  %v11927_v31 = vld [vmem:[#allocation96_spill] sm:$0xff]  ;;  %v11928_v24 = vld [vmem:[#allocation97_spill] sm:$0xff] }
 0x8a8   :  { %4617 = vtanh.f32 %v3648_v32  ;;  %v3666_v9 = vadd.f32 1.0, %v4614_v18  ;;  %v11930_v18 = vld [vmem:[#allocation99_spill] sm:$0xff] }
 0x8a9   :  { %4619 = vrcp.f32 %v3659_v35 }
 0x8b2   :  { %v3740_v14 = vpop.f32.mrf.mxu0  ;;  %v3811_v7 = vpop.f32.mrf.mxu1 }
 0x8b3   :  { %v3963_v42 = vadd.f32 %v4333_v22, %v3740_v14  ;;  %v3965_v51 = vadd.f32 %v4335_v46, %v3811_v7  ;;  %v11929_v14 = vld [vmem:[#allocation98_spill] sm:$0xff]  ;;  %v11946_v7 = vld [vmem:[#allocation115_spill] sm:$0xff]  ;;  %v11951_v46 = vld [vmem:[#allocation120_spill] sm:$0xff] }
 0x8b4   :  { %v4616_v54 = vpop.eup %4615  ;;  %v3742_v48 = vpop.f32.mrf.mxu0 }
 0x8b5   :  { %v4618_v56 = vpop.eup %4617  ;;  %v4337_v52 = vmul.f32 -1.442695, %v3963_v42  ;;  %v3964_v63 = vadd.f32 %v4334_v61, %v3742_v48  ;;  %v3813_v3 = vpop.f32.mrf.mxu1  ;;  %v11932_v42 = vld [vmem:[#allocation101_spill] sm:$0xff]  ;;  %v11934_v48 = vld [vmem:[#allocation103_spill] sm:$0xff] }
 0x8b6   :  { %v4620_v53 = vpop.eup %4619  ;;  %v3670_v4 = vmul.f32 %v4618_v56, %v4616_v54  ;;  %v3966_v27 = vadd.f32 %v4336_v26, %v3813_v3  ;;  %v11933_v54 = vld [vmem:[#allocation102_spill] sm:$0xff]  ;;  %v11939_v56 = vld [vmem:[#allocation108_spill] sm:$0xff]  ;;  %v11948_v3 = vld [vmem:[#allocation117_spill] sm:$0xff] }
 0x8b7   :  { %v3669_v6 = vmul.f32 %v4620_v53, %v9769_v23  ;;  %4621 = vpow2.f32 %v4337_v52  ;;  %v4338_v8 = vmul.f32 -1.442695, %v3964_v63  ;;  %v11940_v52 = vld [vmem:[#allocation109_spill] sm:$0xff]  ;;  %v11941_v63 = vld [vmem:[#allocation110_spill] sm:$0xff]  ;;  %v11942_v53 = vld [vmem:[#allocation111_spill] sm:$0xff] }
 0x8b8   :  { %v4339_v23 = vmul.f32 -1.442695, %v3966_v27  ;;  %v11949_v26 = vld [vmem:[#allocation118_spill] sm:$0xff]  ;;  %v11950_v27 = vld [vmem:[#allocation119_spill] sm:$0xff] }
 0x8b9   :  { %4623 = vpow2.f32 %v4338_v8  ;;  %v10121_v39 = vadd.f32 %v3670_v4, %v3669_v6  ;;  %v11944_v4 = vld [vmem:[#allocation113_spill] sm:$0xff]  ;;  %v11945_v6 = vld [vmem:[#allocation114_spill] sm:$0xff]  ;;  %v11947_v8 = vld [vmem:[#allocation116_spill] sm:$0xff] }
 0x8ba   :  { %4625 = vrcp.f32 %v3666_v9  ;;  %v11943_v9 = vld [vmem:[#allocation112_spill] sm:$0xff] }
 0x8bb   :  { %4627 = vtanh.f32 %v10121_v39 }
 0x8bc   :  { %4629 = vpow2.f32 %v4339_v23  ;;  %v11952_v23 = vld [vmem:[#allocation121_spill] sm:$0xff] }
 0x8c4   :  { %v4622_v49 = vpop.eup %4621 }
 0x8c5   :  { %v3970_v55 = vadd.f32 1.0, %v4622_v49  ;;  %v11953_v49 = vld [vmem:[#allocation122_spill] sm:$0xff] }
 0x8c6   :  { %v4624_v58 = vpop.eup %4623 }
 0x8c7   :  { %v4626_v1 = vpop.eup %4625  ;;  %4631 = vrcp.f32 %v3970_v55  ;;  %v3976_v62 = vadd.f32 1.0, %v4624_v58  ;;  %v11955_v55 = vld [vmem:[#allocation124_spill] sm:$0xff]  ;;  %v11956_v58 = vld [vmem:[#allocation125_spill] sm:$0xff] }
 0x8c8   :  { %v4628_v59 = vpop.eup %4627  ;;  %4633 = vtanh.f32 %v3965_v51  ;;  %v11954_v51 = vld [vmem:[#allocation123_spill] sm:$0xff] }
 0x8c9   :  { %4635 = vrcp.f32 %v3976_v62  ;;  %v3673_v2 = vmul.f32 %v4628_v59, %v4626_v1  ;;  %v11957_v1 = vld [vmem:[#allocation126_spill] sm:$0xff]  ;;  %v11958_v59 = vld [vmem:[#allocation127_spill] sm:$0xff] }
 0x8cb   :  { %3881 = vmatmul.mubr.f32.vlgmr.msra.gmra.mxu0 %v3673_v2  ;;  %3952 = vmatmul.mubr.f32.vlgmr.msra.gmra.mxu1 %v3673_v2  ;;  %v11959_v2 = vld [vmem:[#allocation128_spill] sm:$0xff] }
 0x8cc   :  { %3992 = vmatpush1.msra.mxu0 %v9778_v41  ;;  %4063 = vmatpush1.msra.mxu1 %v9781_v20  ;;  %v11919_v41 = vld [vmem:[#allocation88_spill] sm:$0xff]  ;;  %v11920_v20 = vld [vmem:[#allocation89_spill] sm:$0xff] }
 0x8cd   :  { %3993 = vmatprep.subr.mxu0 %v9784_v38  ;;  %4064 = vmatprep.subr.mxu1 %v9787_v28  ;;  %v11921_v38 = vld [vmem:[#allocation90_spill] sm:$0xff]  ;;  %v4630_v28 = vpop.eup %4629 }
 0x8ce   :  { %3994 = vmatpush1.msra.mxu0 %v9790_v34  ;;  %4065 = vmatpush1.msra.mxu1 %v9793_v44  ;;  %v11922_v34 = vld [vmem:[#allocation91_spill] sm:$0xff]  ;;  %v11923_v44 = vld [vmem:[#allocation92_spill] sm:$0xff]  ;;  %v3983_v32 = vadd.f32 1.0, %v4630_v28  ;;  %v4175_v28 = vld [vmem:[%s10276_s5 + $0x38] sm:$0xff] }
 0x8cf   :  { %3995 = vmatprep.subr.mxu0 %v9796_v45  ;;  %4066 = vmatprep.subr.mxu1 %v9799_v21  ;;  %v11925_v21 = vld [vmem:[#allocation94_spill] sm:$0xff] }
 0x8d0   :  { %3996 = vmatpush1.msra.mxu0 %v11916_v30  ;;  %4067 = vmatpush1.msra.mxu1 %v11917_v25  ;;  %4637 = vrcp.f32 %v3983_v32  ;;  %v11960_v25 = vld [vmem:[#allocation129_spill] sm:$0xff] }
 0x8d1   :  { %3997 = vmatprep.subr.mxu0 %v11918_v50  ;;  %4068 = vmatprep.subr.mxu1 %v11919_v41  ;;  %v4178_v41 = vld [vmem:[%s10276_s5 + $0x50] sm:$0xff] }
 0x8d2   :  { %3998 = vmatpush1.msra.mxu0 %v11920_v20  ;;  %4069 = vmatpush1.msra.mxu1 %v11921_v38  ;;  %v4177_v20 = vld [vmem:[%s10276_s5 + $0x48] sm:$0xff]  ;;  %v4176_v38 = vld [vmem:[%s10276_s5 + $0x40] sm:$0xff] }
 0x8d3   :  { %3999 = vmatprep.subr.mxu0 %v11922_v34  ;;  %4070 = vmatprep.subr.mxu1 %v11923_v44  ;;  %v4174_v34 = vld [vmem:[%s10276_s5 + $0x30] sm:$0xff]  ;;  %v4173_v44 = vld [vmem:[%s10276_s5 + $0x28] sm:$0xff] }
 0x8d4   :  { %v4632_v45 = vpop.eup %4631  ;;  %4000 = vmatpush1.msra.mxu0 %v11924_v5  ;;  %4071 = vmatpush1.msra.mxu1 %v11925_v21  ;;  %v4171_v5 = vld [vmem:[%s10276_s5 + $0x18] sm:$0xff]  ;;  %v4170_v21 = vld [vmem:[%s10276_s5 + $0x10] sm:$0xff] }
 0x8d5   :  { %v4634_v0 = vpop.eup %4633  ;;  %4001 = vmatprep.subr.mxu0 %v11926_v60  ;;  %4072 = vmatprep.subr.mxu1 %v9835_v11  ;;  %v11931_v11 = vld [vmem:[#allocation100_spill] sm:$0xff]  ;;  %v4168_v60 = vld [vmem:[%s10276_s5] sm:$0xff] }
 0x8d6   :  { %v4636_v29 = vpop.eup %4635  ;;  %4002 = vmatpush1.msra.mxu0 %v11927_v31  ;;  %4073 = vmatpush1.msra.mxu1 %v11928_v24  ;;  %v3987_v35 = vmul.f32 %v4634_v0, %v4632_v45  ;;  %v4172_v45 = vld [vmem:[%s10276_s5 + $0x20] sm:$0xff]  ;;  %v4169_v0 = vld [vmem:[%s10276_s5 + $0x8] sm:$0xff] }
 0x8d7   :  { %v3986_v22 = vmul.f32 %v4636_v29, %v9857_v40  ;;  %4003 = vmatprep.subr.mxu0 %v9845_v12  ;;  %4074 = vmatprep.subr.mxu1 %v9848_v36  ;;  %v11935_v40 = vld [vmem:[#allocation104_spill] sm:$0xff]  ;;  %v11936_v12 = vld [vmem:[#allocation105_spill] sm:$0xff]  ;;  %v11937_v36 = vld [vmem:[#allocation106_spill] sm:$0xff] }
 0x8d8   :  { %4004 = vmatpush1.msra.mxu0 %v9851_v13  ;;  %4075 = vmatpush1.msra.mxu1 %v11929_v14  ;;  %v11938_v13 = vld [vmem:[#allocation107_spill] sm:$0xff] }
 0x8d9   :  { %v3988_v61 = vadd.f32 %v3987_v35, %v3986_v22  ;;  %4005 = vmatprep.subr.mxu0 %v11930_v18  ;;  %4076 = vmatprep.subr.mxu1 %v11931_v11 }
 0x8da   :  { %4006 = vmatpush1.msra.mxu0 %v11932_v42  ;;  %4077 = vmatpush1.msra.mxu1 %v11933_v54 }
 0x8db   :  { %4007 = vmatprep.subr.mxu0 %v11934_v48  ;;  %4078 = vmatprep.subr.mxu1 %v11935_v40  ;;  %4639 = vtanh.f32 %v3988_v61 }
 0x8dc   :  { %4008 = vmatpush1.msra.mxu0 %v11936_v12  ;;  %4079 = vmatpush1.msra.mxu1 %v11937_v36 }
 0x8dd   :  { %4009 = vmatprep.subr.mxu0 %v11938_v13  ;;  %4080 = vmatprep.subr.mxu1 %v11939_v56  ;;  %v4638_v62 = vpop.eup %4637 }
 0x8de   :  { %4010 = vmatpush1.msra.mxu0 %v11940_v52  ;;  %4081 = vmatpush1.msra.mxu1 %v11941_v63 }
 0x8df   :  { %4011 = vmatprep.subr.mxu0 %v11942_v53  ;;  %4082 = vmatprep.subr.mxu1 %v11943_v9 }
 0x8e0   :  { %4012 = vmatpush1.msra.mxu0 %v11944_v4  ;;  %4083 = vmatpush1.msra.mxu1 %v11945_v6 }
 0x8e1   :  { %4013 = vmatprep.subr.mxu0 %v11946_v7  ;;  %4084 = vmatprep.subr.mxu1 %v11947_v8 }
 0x8e2   :  { %4014 = vmatpush1.msra.mxu0 %v11948_v3  ;;  %4085 = vmatpush1.msra.mxu1 %v11949_v26 }
 0x8e3   :  { %4015 = vmatprep.subr.mxu0 %v11950_v27  ;;  %4086 = vmatprep.subr.mxu1 %v11951_v46  ;;  %v4343_v46 = vld [vmem:[%s10277_s6] ss:$0 sm:$0xff] }
 0x8e4   :  { %4016 = vmatpush1.msra.mxu0 %v11952_v23  ;;  %4087 = vmatpush1.msra.mxu1 %v11953_v49 }
 0x8e5   :  { %4017 = vmatprep.subr.mxu0 %v11954_v51  ;;  %4088 = vmatprep.subr.mxu1 %v11955_v55 }
 0x8e6   :  { %4018 = vmatpush1.msra.mxu0 %v11956_v58  ;;  %4089 = vmatpush1.msra.mxu1 %v11957_v1 }
 0x8e7   :  { %4019 = vmatprep.subr.mxu0 %v11958_v59  ;;  %4090 = vmatprep.subr.mxu1 %v11959_v2 }
 0x8e8   :  { %v4640_v30 = vpop.eup %4639  ;;  %4020 = vmatpush1.msra.mxu0 %v11960_v25  ;;  %4091 = vmatpush1.msra.mxu1 %v9953_v16  ;;  %v4183_v16 = vld [vmem:[%s10276_s5 + $0x78] sm:$0xff] }
 0x8e9   :  { %4021 = vmatprep.subr.mxu0 %v9956_v10  ;;  %4092 = vmatprep.subr.mxu1 %v9959_v43  ;;  %v3990_v50 = vmul.f32 %v4640_v30, %v4638_v62  ;;  %v4182_v10 = vld [vmem:[%s10276_s5 + $0x70] sm:$0xff]  ;;  %v4180_v43 = vld [vmem:[%s10276_s5 + $0x60] sm:$0xff] }
 0x8ea   :  { %4022 = vmatpush1.msra.mxu0 %v9964_v17  ;;  %4055 = vmatprep.mubr.f32.mxu0 %v11003_v19  ;;  %v4179_v17 = vld [vmem:[%s10276_s5 + $0x58] sm:$0xff] }
 0x8eb   :  { %4093 = vmatpush1.msra.mxu1 %v9968_v15  ;;  %4126 = vmatprep.mubr.f32.mxu1 %v11003_v19  ;;  %v4181_v15 = vld [vmem:[%s10276_s5 + $0x68] sm:$0xff] }
 0x8ec   :  { %4056 = vmatmul.mubr.f32.vlgmr.msra.gmra.mxu0 %v3990_v50  ;;  %4127 = vmatmul.mubr.f32.vlgmr.msra.gmra.mxu1 %v3990_v50 }
 0x8ed   :  { %4361 = vmatprep.subr.mxu0 %v11003_v19  ;;  %4393 = vmatprep.mubr.msk.f32.mxu0 %vm5259_vm0, %v11003_v19 }
 0x8ee   :  { %4362 = vmatpush3.msra.mxu0 %v4183_v16 }
 0x8ef   :  { %4363 = vmatprep.subr.mxu0 %v11003_v19 }
 0x8f0   :  { %4364 = vmatpush3.msra.mxu0 %v4182_v10 }
 0x8f1   :  { %4365 = vmatprep.subr.mxu0 %v11003_v19 }
 0x8f2   :  { %4366 = vmatpush3.msra.mxu0 %v4181_v15 }
 0x8f3   :  { %4367 = vmatprep.subr.mxu0 %v11003_v19 }
 0x8f4   :  { %4368 = vmatpush3.msra.mxu0 %v4180_v43 }
 0x8f5   :  { %4369 = vmatprep.subr.mxu0 %v11003_v19 }
 0x8f6   :  { %4370 = vmatpush3.msra.mxu0 %v4179_v17 }
 0x8f7   :  { %4371 = vmatprep.subr.mxu0 %v11003_v19 }
 0x8f8   :  { %4372 = vmatpush3.msra.mxu0 %v4178_v41 }
 0x8f9   :  { %4373 = vmatprep.subr.mxu0 %v11003_v19 }
 0x8fa   :  { %4374 = vmatpush3.msra.mxu0 %v4177_v20 }
 0x8fb   :  { %4375 = vmatprep.subr.mxu0 %v11003_v19 }
 0x8fc   :  { %4376 = vmatpush3.msra.mxu0 %v4176_v38 }
 0x8fd   :  { %4377 = vmatprep.subr.mxu0 %v11003_v19 }
 0x8fe   :  { %4378 = vmatpush3.msra.mxu0 %v4175_v28 }
 0x8ff   :  { %4379 = vmatprep.subr.mxu0 %v11003_v19 }
 0x900   :  { %4380 = vmatpush3.msra.mxu0 %v4174_v34 }
 0x901   :  { %4381 = vmatprep.subr.mxu0 %v11003_v19 }
 0x902   :  { %4382 = vmatpush3.msra.mxu0 %v4173_v44 }
 0x903   :  { %4383 = vmatprep.subr.mxu0 %v11003_v19 }
 0x904   :  { %4384 = vmatpush3.msra.mxu0 %v4172_v45 }
 0x905   :  { %4385 = vmatprep.subr.mxu0 %v11003_v19 }
 0x906   :  { %4386 = vmatpush3.msra.mxu0 %v4171_v5 }
 0x907   :  { %4387 = vmatprep.subr.mxu0 %v11003_v19 }
 0x908   :  { %4388 = vmatpush3.msra.mxu0 %v4170_v21 }
 0x909   :  { %4389 = vmatprep.subr.mxu0 %v11003_v19 }
 0x90a   :  { %4390 = vmatpush3.msra.mxu0 %v4169_v0 }
 0x90b   :  { %4391 = vmatprep.subr.mxu0 %v11003_v19 }
 0x90c   :  { %4392 = vmatpush3.msra.mxu0 %v4168_v60 }
 0x98b   :  { %v3882_v29 = vpop.f32.mrf.mxu0  ;;  %v3953_v32 = vpop.f32.mrf.mxu1 }
 0x98d   :  { %v3884_v31 = vpop.f32.mrf.mxu0  ;;  %v3955_v35 = vpop.f32.mrf.mxu1 }
 0x9ac   :  { %v4057_v24 = vpop.f32.mrf.mxu0  ;;  %v4128_v18 = vpop.f32.mrf.mxu1 }
 0x9ad   :  { %v4058_v22 = vadd.f32 %v4057_v24, %v3882_v29  ;;  %v4129_v36 = vadd.f32 %v4128_v18, %v3953_v32 }
 0x9ae   :  { %v4059_v14 = vpop.f32.mrf.mxu0  ;;  %v4130_v40 = vpop.f32.mrf.mxu1 }
 0x9af   :  { %v4133_v61 = vadd.f32 %v4058_v22, %v6431_v33  ;;  %v4060_v11 = vadd.f32 %v4059_v14, %v3884_v31  ;;  %v4131_v19 = vadd.f32 %v4130_v40, %v3955_v35  ;;  %v4135_v52 = vadd.f32 %v4129_v36, %v6440_v57 }
 0x9b1   :  { %v4340_v42 = vmul.f32 -1.442695, %v4133_v61  ;;  %v4134_v54 = vadd.f32 %v4060_v11, %v6433_v37  ;;  %v4136_v12 = vadd.f32 %v4131_v19, %v6437_v47 }
 0x9b3   :  { %4641 = vpow2.f32 %v4340_v42  ;;  %v4341_v48 = vmul.f32 -1.442695, %v4134_v54  ;;  %v4342_v13 = vmul.f32 -1.442695, %v4136_v12 }
 0x9b5   :  { %4643 = vpow2.f32 %v4341_v48 }
 0x9b6   :  { %4645 = vpow2.f32 %v4342_v13 }
 0x9c0   :  { %v4642_v56 = vpop.eup %4641 }
 0x9c1   :  { %v4140_v63 = vadd.f32 1.0, %v4642_v56 }
 0x9c2   :  { %v4644_v53 = vpop.eup %4643 }
 0x9c3   :  { %4647 = vrcp.f32 %v4140_v63  ;;  %v4146_v33 = vadd.f32 1.0, %v4644_v53  ;;  %v4646_v37 = vpop.eup %4645 }
 0x9c4   :  { %4649 = vtanh.f32 %v4135_v52  ;;  %v4153_v7 = vadd.f32 1.0, %v4646_v37 }
 0x9c5   :  { %4651 = vrcp.f32 %v4146_v33 }
 0x9c6   :  { %4653 = vrcp.f32 %v4153_v7 }
 0x9d0   :  { %v4648_v9 = vpop.eup %4647 }
 0x9d1   :  { %v4650_v4 = vpop.eup %4649 }
 0x9d2   :  { %v4652_v6 = vpop.eup %4651  ;;  %v4157_v8 = vmul.f32 %v4650_v4, %v4648_v9 }
 0x9d3   :  { %v4156_v47 = vmul.f32 %v4652_v6, %v10121_v39  ;;  %v4654_v26 = vpop.eup %4653 }
 0x9d5   :  { %v4158_v3 = vadd.f32 %v4157_v8, %v4156_v47 }
 0x9d7   :  { %4655 = vtanh.f32 %v4158_v3 }
 0x9e4   :  { %v4656_v57 = vpop.eup %4655 }
 0x9e5   :  { %v4160_v27 = vmul.f32 %v4656_v57, %v4654_v26 }
 0x9e7   :  { %4394 = vmatmul.mubr.f32.vlgmr.msra.gmra.mxu0 %v4160_v27 }
 0xaa7   :  { %v4257_v23 = vpop.f32.mrf.mxu0 }
 0xaa8   :  { %v4258_v49 = vadd.f32 %v4343_v46, %v4257_v23 }
 0xaa9   :  { %v4395_v51 = vpop.f32.mrf.mxu0 }
 0xaaa   :  { %4261 = vst [vmem:[%s10278_s7] sm:$0xff] %v4258_v49 }
 0xaab   :  { %4266 = vsyncpa [#allocation4], 1 }

</bundles_post_ra>
